<compile_context>
chip_gen: v5e
topology: v5e:2x2
jax: 0.10.0
libtpu: 0.0.40
codegen_flags: <defaults>
</compile_context>

<pallas_src>
import math

import jax
import jax.numpy as jnp
from jax.experimental import pallas as pl
from jax.experimental.pallas import tpu as pltpu


_PAD_LEFT = 8   # data columns start here in the padded scratch (sublane aligned)


def _round_up(n, m):
    return ((n + m - 1) // m) * m


# ----------------------------- fused Pallas kernel ---------------------------

def policy_fused_kernel(p1_ref, w1_ref, b1_ref, w2_ref, b2_ref, w3_ref, b3_ref,
                        w4_ref, b4_ref, wft_ref, bft_ref,
                        meant_ref,
                        pad_ref, col_ref, featt_ref):
    """Whole Policy forward in one kernel; all intermediates stay in VMEM.

    p1_ref   : (B*H*W, 9*Cin)  im2col patches of the NHWC input (conv1)
    w1_ref   : (9*Cin, 128)    conv1 weights, (dy,dx,cin) flattened
    w2_ref   : (128, 128)      conv2 (1x1) weights
    w3_ref   : (9*128, 128)    conv3 weights, (dy,dx,cin) flattened
    w4_ref   : (128, 1)        conv4 (1x1) weights
    wft_ref  : (A, H*W)        fc weight, transposed
    bft_ref  : (A, 1)          fc bias, transposed
    meant_ref: (A, B)          output: action_mean^T
    pad_ref  : (B, H+2, Wp, 128)  zero-padded conv3 input scratch (VMEM)
    col_ref  : (B*H*W, 9*128)  conv3 im2col scratch (VMEM)
    featt_ref: (H*W, B)        conv4 features, transposed (VMEM)
    """
    B, Hp, Wp, C = pad_ref.shape
    H = Hp - 2
    HW = featt_ref.shape[0]
    W = HW // H
    M = B * HW

    # conv1: 3x3 (Cin->128) + ReLU as one MXU dot (batch folded into M, K=9*Cin)
    h = jnp.dot(p1_ref[...], w1_ref[...], preferred_element_type=jnp.float32)
    h = jnp.maximum(h + b1_ref[...], 0.0)                           # (M, 128)

    # conv2: 1x1 (128->128) + ReLU
    h = jnp.dot(h, w2_ref[...], preferred_element_type=jnp.float32)
    h = jnp.maximum(h + b2_ref[...], 0.0)                           # (M, 128)

    # conv3: 3x3 (128->128) + ReLU -- pad in VMEM, im2col, single dot with K=9*128
    pad_ref[...] = jnp.zeros_like(pad_ref)
    pad_ref[:, 1:H + 1, _PAD_LEFT:_PAD_LEFT + W, :] = h.reshape(B, H, W, C)
    for dy in range(3):
        for dx in range(3):
            k = dy * 3 + dx
            c0 = _PAD_LEFT - 1 + dx
            win = pad_ref[:, dy:dy + H, c0:c0 + W, :]               # (B,H,W,C)
            col_ref[:, k * C:(k + 1) * C] = win.reshape(M, C)
    h = jnp.dot(col_ref[...], w3_ref[...], preferred_element_type=jnp.float32)
    h = jnp.maximum(h + b3_ref[...], 0.0)                           # (M, 128)

    # conv4: 1x1 (128->1) + ReLU; result never leaves VMEM
    h = jnp.dot(h, w4_ref[...], preferred_element_type=jnp.float32)
    h = jnp.maximum(h + b4_ref[...], 0.0)                           # (M, 1)

    # relayout (B*H*W, 1) -> (H*W, B) so the FC head is a plain MXU dot
    for b in range(B):
        featt_ref[:, b:b + 1] = h[b * HW:(b + 1) * HW, :]

    # fc head: mean^T = wf^T @ feat^T + bf^T
    mt = jnp.dot(wft_ref[...], featt_ref[...], preferred_element_type=jnp.float32)
    meant_ref[...] = mt + bft_ref[...]


# ----------------------------- wrapper ---------------------------------------

def _im2col_3x3(x_nhwc):
    """(B,H,W,C) -> (B*H*W, 9*C) patches, (dy,dx,c) ordering, 'SAME' zero padding."""
    B, H, W, C = x_nhwc.shape
    xp = jnp.pad(x_nhwc, ((0, 0), (1, 1), (1, 1), (0, 0)))
    cols = [xp[:, dy:dy + H, dx:dx + W, :] for dy in range(3) for dx in range(3)]
    return jnp.concatenate(cols, axis=-1).reshape(B * H * W, 9 * C)


def policy_forward(params, x_nchw, in_size):
    bs = x_nchw.shape[0]
    x = x_nchw.reshape(bs, -1, in_size, in_size)              # matches torch reshape
    x = jnp.transpose(x, (0, 2, 3, 1)).astype(jnp.float32)    # NCHW -> NHWC
    B, H, W, Cin = x.shape
    C = 128
    HW = H * W
    A = params["wf"].shape[1]
    Hp = H + 2
    Wp = _round_up(_PAD_LEFT + W + 1, 8)

    p1 = _im2col_3x3(x)                                       # (B*H*W, 9*Cin), ~72 KB
    w1f = params["w1"].reshape(9 * Cin, C)
    w3f = params["w3"].reshape(9 * C, C)
    wft = params["wf"].T                                      # (A, HW)
    bft = params["bf"].reshape(A, 1)

    def full(shape):
        return pl.BlockSpec(shape, lambda i: (0,) * len(shape))

    mean_t = pl.pallas_call(
        policy_fused_kernel,
        out_shape=jax.ShapeDtypeStruct((A, B), jnp.float32),
        grid=(1,),
        in_specs=[
            full((B * HW, 9 * Cin)),
            full((9 * Cin, C)), full((1, C)),
            full((C, C)), full((1, C)),
            full((9 * C, C)), full((1, C)),
            full((C, 1)), full((1, 1)),
            full((A, HW)), full((A, 1)),
        ],
        out_specs=full((A, B)),
        scratch_shapes=[
            pltpu.VMEM((B, Hp, Wp, C), jnp.float32),      # conv3 padded input
            pltpu.VMEM((B * HW, 9 * C), jnp.float32),     # conv3 im2col patches
            pltpu.VMEM((HW, B), jnp.float32),             # conv4 features^T
        ],
        compiler_params=pltpu.CompilerParams(
            dimension_semantics=("arbitrary",),
            vmem_limit_bytes=32 * 1024 * 1024),
    )(p1, w1f, params["b1"].reshape(1, C), params["w2"], params["b2"].reshape(1, C),
      w3f, params["b3"].reshape(1, C), params["w4"], params["b4"].reshape(1, 1),
      wft, bft)

    mean = mean_t.T                                           # (B, A)
    # action_log_std / action_std are x-independent: trivial epilogue outside Pallas.
    log_std = jnp.broadcast_to(params["log_std"], mean.shape)
    std = jnp.exp(log_std)
    return mean, log_std, std


# ----------------------------- params / reference ----------------------------

def init_params(key, in_channel, in_size, action_dim, log_std_val=0.0):
    ks = jax.random.split(key, 10)

    def uni(k, shape, fan_in):
        bound = 1.0 / math.sqrt(fan_in)
        return jax.random.uniform(k, shape, jnp.float32, -bound, bound)

    params = {
        # conv1: 3x3, in_channel -> 128, HWIO
        "w1": uni(ks[0], (3, 3, in_channel, 128), in_channel * 9),
        "b1": uni(ks[1], (128,), in_channel * 9),
        # conv2: 1x1, 128 -> 128 (stored as matmul weight (Cin, Cout))
        "w2": uni(ks[2], (128, 128), 128),
        "b2": uni(ks[3], (128,), 128),
        # conv3: 3x3, 128 -> 128
        "w3": uni(ks[4], (3, 3, 128, 128), 128 * 9),
        "b3": uni(ks[5], (128,), 128 * 9),
        # conv4: 1x1, 128 -> 1
        "w4": uni(ks[6], (128, 1), 128),
        "b4": uni(ks[7], (1,), 128),
        # fc: (H*W) -> action_dim
        "wf": uni(ks[8], (in_size * in_size, action_dim), in_size * in_size),
        "bf": uni(ks[9], (action_dim,), in_size * in_size),
        # action_log_std parameter
        "log_std": jnp.full((1, action_dim), log_std_val, jnp.float32),
    }
    return params


def ref_forward(params, x_nchw, in_size):
    """Pure-JAX reference (lax.conv) to sanity-check the Pallas path."""
    B = x_nchw.shape[0]
    x = x_nchw.reshape(B, -1, in_size, in_size)
    x = jnp.transpose(x, (0, 2, 3, 1)).astype(jnp.float32)

    def conv(h, w_hwio, b, same):
        y = jax.lax.conv_general_dilated(
            h, w_hwio, (1, 1), "SAME" if same else "VALID",
            dimension_numbers=("NHWC", "HWIO", "NHWC"))
        return jax.nn.relu(y + b)

    h = conv(x, params["w1"], params["b1"], True)
    h = conv(h, params["w2"].reshape(1, 1, 128, 128), params["b2"], False)
    h = conv(h, params["w3"], params["b3"], True)
    h = conv(h, params["w4"].reshape(1, 1, 128, 1), params["b4"], False)
    feat = h.reshape(B, -1)
    mean = feat @ params["wf"] + params["bf"]
    log_std = jnp.broadcast_to(params["log_std"], mean.shape)
    return mean, log_std, jnp.exp(log_std)


# ----------------------------------- main ------------------------------------

if __name__ == "__main__":
    B, C, S, A = 2, 4, 16, 8   # batch, in_channel, in_size, action_dim

    key = jax.random.PRNGKey(0)
    k_x, k_p = jax.random.split(key)
    x = jax.random.normal(k_x, (B, C, S, S), jnp.float32)   # PyTorch-style NCHW input
    params = init_params(k_p, C, S, A)

    fwd = jax.jit(lambda p, xx: policy_forward(p, xx, S))
    mean, log_std, std = fwd(params, x)
    jax.block_until_ready((mean, log_std, std))

    # sanity check against pure-JAX reference
    r_mean, r_log_std, r_std = ref_forward(params, x, S)
    assert mean.shape == (B, A) and log_std.shape == (B, A) and std.shape == (B, A)
    assert jnp.allclose(mean, r_mean, atol=1e-2, rtol=1e-2)
    assert jnp.allclose(log_std, r_log_std, atol=1e-6)
    assert jnp.allclose(std, r_std, atol=1e-6)

    print("KERNEL_OK")
</pallas_src>

<mosaic_0001>
module attributes {stable_mosaic.version = 11 : i64} {
  func.func @policy_fused_kernel(%arg0: i32, %arg1: memref<512x36xf32, #tpu.memory_space<vmem>>, %arg2: memref<36x128xf32, #tpu.memory_space<vmem>>, %arg3: memref<1x128xf32, #tpu.memory_space<vmem>>, %arg4: memref<128x128xf32, #tpu.memory_space<vmem>>, %arg5: memref<1x128xf32, #tpu.memory_space<vmem>>, %arg6: memref<1152x128xf32, #tpu.memory_space<vmem>>, %arg7: memref<1x128xf32, #tpu.memory_space<vmem>>, %arg8: memref<128x1xf32, #tpu.memory_space<vmem>>, %arg9: memref<1x1xf32, #tpu.memory_space<vmem>>, %arg10: memref<8x256xf32, #tpu.memory_space<vmem>>, %arg11: memref<8x1xf32, #tpu.memory_space<vmem>>, %arg12: memref<8x2xf32, #tpu.memory_space<vmem>>, %arg13: memref<2x18x32x128xf32, #tpu.memory_space<vmem>>, %arg14: memref<512x1152xf32, #tpu.memory_space<vmem>>, %arg15: memref<256x2xf32, #tpu.memory_space<vmem>>) attributes {dimension_semantics = [#tpu.dimension_semantics<arbitrary>], iteration_bounds = array<i64: 1>, scalar_prefetch = 0 : i64, scratch_operands = 3 : i64, tpu.core_type = #tpu.core_type<tc>, window_params = [{pipeline_mode = #tpu.pipeline_mode<synchronous>, transform_indices = @transform_0, window_bounds = array<i64: 512, 36>}, {pipeline_mode = #tpu.pipeline_mode<synchronous>, transform_indices = @transform_1, window_bounds = array<i64: 36, 128>}, {pipeline_mode = #tpu.pipeline_mode<synchronous>, transform_indices = @transform_2, window_bounds = array<i64: 1, 128>}, {pipeline_mode = #tpu.pipeline_mode<synchronous>, transform_indices = @transform_3, window_bounds = array<i64: 128, 128>}, {pipeline_mode = #tpu.pipeline_mode<synchronous>, transform_indices = @transform_4, window_bounds = array<i64: 1, 128>}, {pipeline_mode = #tpu.pipeline_mode<synchronous>, transform_indices = @transform_5, window_bounds = array<i64: 1152, 128>}, {pipeline_mode = #tpu.pipeline_mode<synchronous>, transform_indices = @transform_6, window_bounds = array<i64: 1, 128>}, {pipeline_mode = #tpu.pipeline_mode<synchronous>, transform_indices = @transform_7, window_bounds = array<i64: 128, 1>}, {pipeline_mode = #tpu.pipeline_mode<synchronous>, transform_indices = @transform_8, window_bounds = array<i64: 1, 1>}, {pipeline_mode = #tpu.pipeline_mode<synchronous>, transform_indices = @transform_9, window_bounds = array<i64: 8, 256>}, {pipeline_mode = #tpu.pipeline_mode<synchronous>, transform_indices = @transform_10, window_bounds = array<i64: 8, 1>}, {pipeline_mode = #tpu.pipeline_mode<synchronous>, transform_indices = @transform_11, window_bounds = array<i64: 8, 2>}]} {
    %c0 = arith.constant 0 : index
    %c0_0 = arith.constant 0 : index
    %0 = vector.load %arg1[%c0, %c0_0] : memref<512x36xf32, #tpu.memory_space<vmem>>, vector<512x36xf32>
    %c0_1 = arith.constant 0 : index
    %c0_2 = arith.constant 0 : index
    %1 = vector.load %arg2[%c0_1, %c0_2] : memref<36x128xf32, #tpu.memory_space<vmem>>, vector<36x128xf32>
    %cst = arith.constant dense<0.000000e+00> : vector<512x128xf32>
    %2 = tpu.matmul %0, %1, %cst {dimension_numbers = #tpu.dot_dimension_numbers<[1], [0], [0], [1], [0, 0, 1, 1], [], []>} : vector<512x36xf32>, vector<36x128xf32>, vector<512x128xf32> -> vector<512x128xf32>
    %c0_3 = arith.constant 0 : index
    %c0_4 = arith.constant 0 : index
    %3 = vector.load %arg3[%c0_3, %c0_4] : memref<1x128xf32, #tpu.memory_space<vmem>>, vector<1x128xf32>
    %4 = vector.broadcast %3 : vector<1x128xf32> to vector<512x128xf32>
    %5 = arith.addf %2, %4 : vector<512x128xf32>
    %cst_5 = arith.constant 0.000000e+00 : f32
    %6 = vector.broadcast %cst_5 : f32 to vector<512x128xf32>
    %7 = arith.maximumf %5, %6 : vector<512x128xf32>
    %c0_6 = arith.constant 0 : index
    %c0_7 = arith.constant 0 : index
    %8 = vector.load %arg4[%c0_6, %c0_7] : memref<128x128xf32, #tpu.memory_space<vmem>>, vector<128x128xf32>
    %cst_8 = arith.constant dense<0.000000e+00> : vector<512x128xf32>
    %9 = tpu.matmul %7, %8, %cst_8 {dimension_numbers = #tpu.dot_dimension_numbers<[1], [0], [0], [1], [0, 0, 1, 1], [], []>} : vector<512x128xf32>, vector<128x128xf32>, vector<512x128xf32> -> vector<512x128xf32>
    %c0_9 = arith.constant 0 : index
    %c0_10 = arith.constant 0 : index
    %10 = vector.load %arg5[%c0_9, %c0_10] : memref<1x128xf32, #tpu.memory_space<vmem>>, vector<1x128xf32>
    %11 = vector.broadcast %10 : vector<1x128xf32> to vector<512x128xf32>
    %12 = arith.addf %9, %11 : vector<512x128xf32>
    %cst_11 = arith.constant 0.000000e+00 : f32
    %13 = vector.broadcast %cst_11 : f32 to vector<512x128xf32>
    %14 = arith.maximumf %12, %13 : vector<512x128xf32>
    %cst_12 = arith.constant 0.000000e+00 : f32
    %15 = vector.broadcast %cst_12 : f32 to vector<2x18x32x128xf32>
    %c0_13 = arith.constant 0 : index
    %c0_14 = arith.constant 0 : index
    %c0_15 = arith.constant 0 : index
    %c0_16 = arith.constant 0 : index
    %16 = vector.load %arg13[%c0_13, %c0_14, %c0_15, %c0_16] : memref<2x18x32x128xf32, #tpu.memory_space<vmem>>, vector<2x18x32x128xf32>
    tpu.vector_store %arg13[%c0_13, %c0_14, %c0_15, %c0_16], %15 {strides = array<i32>} : memref<2x18x32x128xf32, #tpu.memory_space<vmem>>, vector<2x18x32x128xf32>,
    %17 = vector.shape_cast %14 : vector<512x128xf32> to vector<2x16x16x128xf32>
    %c0_17 = arith.constant 0 : index
    %c1 = arith.constant 1 : index
    %c8 = arith.constant 8 : index
    %c0_18 = arith.constant 0 : index
    %18 = vector.load %arg13[%c0_17, %c1, %c8, %c0_18] : memref<2x18x32x128xf32, #tpu.memory_space<vmem>>, vector<2x16x16x128xf32>
    tpu.vector_store %arg13[%c0_17, %c1, %c8, %c0_18], %17 {strides = array<i32>} : memref<2x18x32x128xf32, #tpu.memory_space<vmem>>, vector<2x16x16x128xf32>,
    %c0_19 = arith.constant 0 : index
    %c0_20 = arith.constant 0 : index
    %c7 = arith.constant 7 : index
    %c0_21 = arith.constant 0 : index
    %19 = vector.load %arg13[%c0_19, %c0_20, %c7, %c0_21] : memref<2x18x32x128xf32, #tpu.memory_space<vmem>>, vector<2x16x16x128xf32>
    %20 = vector.shape_cast %19 : vector<2x16x16x128xf32> to vector<512x128xf32>
    %c0_22 = arith.constant 0 : index
    %c0_23 = arith.constant 0 : index
    %21 = vector.load %arg14[%c0_22, %c0_23] : memref<512x1152xf32, #tpu.memory_space<vmem>>, vector<512x128xf32>
    tpu.vector_store %arg14[%c0_22, %c0_23], %20 {strides = array<i32>} : memref<512x1152xf32, #tpu.memory_space<vmem>>, vector<512x128xf32>,
    %c0_24 = arith.constant 0 : index
    %c0_25 = arith.constant 0 : index
    %c8_26 = arith.constant 8 : index
    %c0_27 = arith.constant 0 : index
    %22 = vector.load %arg13[%c0_24, %c0_25, %c8_26, %c0_27] : memref<2x18x32x128xf32, #tpu.memory_space<vmem>>, vector<2x16x16x128xf32>
    %23 = vector.shape_cast %22 : vector<2x16x16x128xf32> to vector<512x128xf32>
    %c0_28 = arith.constant 0 : index
    %c128 = arith.constant 128 : index
    %24 = vector.load %arg14[%c0_28, %c128] : memref<512x1152xf32, #tpu.memory_space<vmem>>, vector<512x128xf32>
    tpu.vector_store %arg14[%c0_28, %c128], %23 {strides = array<i32>} : memref<512x1152xf32, #tpu.memory_space<vmem>>, vector<512x128xf32>,
    %c0_29 = arith.constant 0 : index
    %c0_30 = arith.constant 0 : index
    %c9 = arith.constant 9 : index
    %c0_31 = arith.constant 0 : index
    %25 = vector.load %arg13[%c0_29, %c0_30, %c9, %c0_31] : memref<2x18x32x128xf32, #tpu.memory_space<vmem>>, vector<2x16x16x128xf32>
    %26 = vector.shape_cast %25 : vector<2x16x16x128xf32> to vector<512x128xf32>
    %c0_32 = arith.constant 0 : index
    %c256 = arith.constant 256 : index
    %27 = vector.load %arg14[%c0_32, %c256] : memref<512x1152xf32, #tpu.memory_space<vmem>>, vector<512x128xf32>
    tpu.vector_store %arg14[%c0_32, %c256], %26 {strides = array<i32>} : memref<512x1152xf32, #tpu.memory_space<vmem>>, vector<512x128xf32>,
    %c0_33 = arith.constant 0 : index
    %c1_34 = arith.constant 1 : index
    %c7_35 = arith.constant 7 : index
    %c0_36 = arith.constant 0 : index
    %28 = vector.load %arg13[%c0_33, %c1_34, %c7_35, %c0_36] : memref<2x18x32x128xf32, #tpu.memory_space<vmem>>, vector<2x16x16x128xf32>
    %29 = vector.shape_cast %28 : vector<2x16x16x128xf32> to vector<512x128xf32>
    %c0_37 = arith.constant 0 : index
    %c384 = arith.constant 384 : index
    %30 = vector.load %arg14[%c0_37, %c384] : memref<512x1152xf32, #tpu.memory_space<vmem>>, vector<512x128xf32>
    tpu.vector_store %arg14[%c0_37, %c384], %29 {strides = array<i32>} : memref<512x1152xf32, #tpu.memory_space<vmem>>, vector<512x128xf32>,
    %c0_38 = arith.constant 0 : index
    %c1_39 = arith.constant 1 : index
    %c8_40 = arith.constant 8 : index
    %c0_41 = arith.constant 0 : index
    %31 = vector.load %arg13[%c0_38, %c1_39, %c8_40, %c0_41] : memref<2x18x32x128xf32, #tpu.memory_space<vmem>>, vector<2x16x16x128xf32>
    %32 = vector.shape_cast %31 : vector<2x16x16x128xf32> to vector<512x128xf32>
    %c0_42 = arith.constant 0 : index
    %c512 = arith.constant 512 : index
    %33 = vector.load %arg14[%c0_42, %c512] : memref<512x1152xf32, #tpu.memory_space<vmem>>, vector<512x128xf32>
    tpu.vector_store %arg14[%c0_42, %c512], %32 {strides = array<i32>} : memref<512x1152xf32, #tpu.memory_space<vmem>>, vector<512x128xf32>,
    %c0_43 = arith.constant 0 : index
    %c1_44 = arith.constant 1 : index
    %c9_45 = arith.constant 9 : index
    %c0_46 = arith.constant 0 : index
    %34 = vector.load %arg13[%c0_43, %c1_44, %c9_45, %c0_46] : memref<2x18x32x128xf32, #tpu.memory_space<vmem>>, vector<2x16x16x128xf32>
    %35 = vector.shape_cast %34 : vector<2x16x16x128xf32> to vector<512x128xf32>
    %c0_47 = arith.constant 0 : index
    %c640 = arith.constant 640 : index
    %36 = vector.load %arg14[%c0_47, %c640] : memref<512x1152xf32, #tpu.memory_space<vmem>>, vector<512x128xf32>
    tpu.vector_store %arg14[%c0_47, %c640], %35 {strides = array<i32>} : memref<512x1152xf32, #tpu.memory_space<vmem>>, vector<512x128xf32>,
    %c0_48 = arith.constant 0 : index
    %c2 = arith.constant 2 : index
    %c7_49 = arith.constant 7 : index
    %c0_50 = arith.constant 0 : index
    %37 = vector.load %arg13[%c0_48, %c2, %c7_49, %c0_50] : memref<2x18x32x128xf32, #tpu.memory_space<vmem>>, vector<2x16x16x128xf32>
    %38 = vector.shape_cast %37 : vector<2x16x16x128xf32> to vector<512x128xf32>
    %c0_51 = arith.constant 0 : index
    %c768 = arith.constant 768 : index
    %39 = vector.load %arg14[%c0_51, %c768] : memref<512x1152xf32, #tpu.memory_space<vmem>>, vector<512x128xf32>
    tpu.vector_store %arg14[%c0_51, %c768], %38 {strides = array<i32>} : memref<512x1152xf32, #tpu.memory_space<vmem>>, vector<512x128xf32>,
    %c0_52 = arith.constant 0 : index
    %c2_53 = arith.constant 2 : index
    %c8_54 = arith.constant 8 : index
    %c0_55 = arith.constant 0 : index
    %40 = vector.load %arg13[%c0_52, %c2_53, %c8_54, %c0_55] : memref<2x18x32x128xf32, #tpu.memory_space<vmem>>, vector<2x16x16x128xf32>
    %41 = vector.shape_cast %40 : vector<2x16x16x128xf32> to vector<512x128xf32>
    %c0_56 = arith.constant 0 : index
    %c896 = arith.constant 896 : index
    %42 = vector.load %arg14[%c0_56, %c896] : memref<512x1152xf32, #tpu.memory_space<vmem>>, vector<512x128xf32>
    tpu.vector_store %arg14[%c0_56, %c896], %41 {strides = array<i32>} : memref<512x1152xf32, #tpu.memory_space<vmem>>, vector<512x128xf32>,
    %c0_57 = arith.constant 0 : index
    %c2_58 = arith.constant 2 : index
    %c9_59 = arith.constant 9 : index
    %c0_60 = arith.constant 0 : index
    %43 = vector.load %arg13[%c0_57, %c2_58, %c9_59, %c0_60] : memref<2x18x32x128xf32, #tpu.memory_space<vmem>>, vector<2x16x16x128xf32>
    %44 = vector.shape_cast %43 : vector<2x16x16x128xf32> to vector<512x128xf32>
    %c0_61 = arith.constant 0 : index
    %c1024 = arith.constant 1024 : index
    %45 = vector.load %arg14[%c0_61, %c1024] : memref<512x1152xf32, #tpu.memory_space<vmem>>, vector<512x128xf32>
    tpu.vector_store %arg14[%c0_61, %c1024], %44 {strides = array<i32>} : memref<512x1152xf32, #tpu.memory_space<vmem>>, vector<512x128xf32>,
    %c0_62 = arith.constant 0 : index
    %c0_63 = arith.constant 0 : index
    %46 = vector.load %arg14[%c0_62, %c0_63] : memref<512x1152xf32, #tpu.memory_space<vmem>>, vector<512x1152xf32>
    %c0_64 = arith.constant 0 : index
    %c0_65 = arith.constant 0 : index
    %47 = vector.load %arg6[%c0_64, %c0_65] : memref<1152x128xf32, #tpu.memory_space<vmem>>, vector<1152x128xf32>
    %cst_66 = arith.constant dense<0.000000e+00> : vector<512x128xf32>
    %48 = tpu.matmul %46, %47, %cst_66 {dimension_numbers = #tpu.dot_dimension_numbers<[1], [0], [0], [1], [0, 0, 1, 1], [], []>} : vector<512x1152xf32>, vector<1152x128xf32>, vector<512x128xf32> -> vector<512x128xf32>
    %c0_67 = arith.constant 0 : index
    %c0_68 = arith.constant 0 : index
    %49 = vector.load %arg7[%c0_67, %c0_68] : memref<1x128xf32, #tpu.memory_space<vmem>>, vector<1x128xf32>
    %50 = vector.broadcast %49 : vector<1x128xf32> to vector<512x128xf32>
    %51 = arith.addf %48, %50 : vector<512x128xf32>
    %cst_69 = arith.constant 0.000000e+00 : f32
    %52 = vector.broadcast %cst_69 : f32 to vector<512x128xf32>
    %53 = arith.maximumf %51, %52 : vector<512x128xf32>
    %c0_70 = arith.constant 0 : index
    %c0_71 = arith.constant 0 : index
    %54 = vector.load %arg8[%c0_70, %c0_71] : memref<128x1xf32, #tpu.memory_space<vmem>>, vector<128x1xf32>
    %cst_72 = arith.constant dense<0.000000e+00> : vector<512x1xf32>
    %55 = tpu.matmul %53, %54, %cst_72 {dimension_numbers = #tpu.dot_dimension_numbers<[1], [0], [0], [1], [0, 0, 1, 1], [], []>} : vector<512x128xf32>, vector<128x1xf32>, vector<512x1xf32> -> vector<512x1xf32>
    %c0_73 = arith.constant 0 : index
    %c0_74 = arith.constant 0 : index
    %56 = vector.load %arg9[%c0_73, %c0_74] : memref<1x1xf32, #tpu.memory_space<vmem>>, vector<1x1xf32>
    %57 = vector.broadcast %56 : vector<1x1xf32> to vector<512x1xf32>
    %58 = arith.addf %55, %57 : vector<512x1xf32>
    %cst_75 = arith.constant 0.000000e+00 : f32
    %59 = vector.broadcast %cst_75 : f32 to vector<512x1xf32>
    %60 = arith.maximumf %58, %59 : vector<512x1xf32>
    %61 = vector.extract_strided_slice %60 {offsets = [0, 0], sizes = [256, 1], strides = [1, 1]} : vector<512x1xf32> to vector<256x1xf32>
    %c0_76 = arith.constant 0 : index
    %c0_77 = arith.constant 0 : index
    %62 = vector.load %arg15[%c0_76, %c0_77] : memref<256x2xf32, #tpu.memory_space<vmem>>, vector<256x1xf32>
    tpu.vector_store %arg15[%c0_76, %c0_77], %61 {strides = array<i32>} : memref<256x2xf32, #tpu.memory_space<vmem>>, vector<256x1xf32>,
    %63 = vector.extract_strided_slice %60 {offsets = [256, 0], sizes = [256, 1], strides = [1, 1]} : vector<512x1xf32> to vector<256x1xf32>
    %c0_78 = arith.constant 0 : index
    %c1_79 = arith.constant 1 : index
    %64 = vector.load %arg15[%c0_78, %c1_79] : memref<256x2xf32, #tpu.memory_space<vmem>>, vector<256x1xf32>
    tpu.vector_store %arg15[%c0_78, %c1_79], %63 {strides = array<i32>} : memref<256x2xf32, #tpu.memory_space<vmem>>, vector<256x1xf32>,
    %c0_80 = arith.constant 0 : index
    %c0_81 = arith.constant 0 : index
    %65 = vector.load %arg10[%c0_80, %c0_81] : memref<8x256xf32, #tpu.memory_space<vmem>>, vector<8x256xf32>
    %c0_82 = arith.constant 0 : index
    %c0_83 = arith.constant 0 : index
    %66 = vector.load %arg15[%c0_82, %c0_83] : memref<256x2xf32, #tpu.memory_space<vmem>>, vector<256x2xf32>
    %cst_84 = arith.constant dense<0.000000e+00> : vector<8x2xf32>
    %67 = tpu.matmul %65, %66, %cst_84 {dimension_numbers = #tpu.dot_dimension_numbers<[1], [0], [0], [1], [0, 0, 1, 1], [], []>} : vector<8x256xf32>, vector<256x2xf32>, vector<8x2xf32> -> vector<8x2xf32>
    %c0_85 = arith.constant 0 : index
    %c0_86 = arith.constant 0 : index
    %68 = vector.load %arg11[%c0_85, %c0_86] : memref<8x1xf32, #tpu.memory_space<vmem>>, vector<8x1xf32>
    %69 = vector.broadcast %68 : vector<8x1xf32> to vector<8x2xf32>
    %70 = arith.addf %67, %69 : vector<8x2xf32>
    %c0_87 = arith.constant 0 : index
    %c0_88 = arith.constant 0 : index
    %71 = vector.load %arg12[%c0_87, %c0_88] : memref<8x2xf32, #tpu.memory_space<vmem>>, vector<8x2xf32>
    tpu.vector_store %arg12[%c0_87, %c0_88], %70 {strides = array<i32>} : memref<8x2xf32, #tpu.memory_space<vmem>>, vector<8x2xf32>,
    return
  }
  func.func @transform_0(%arg0: i32) -> (i32, i32) {
    %c0_i32 = arith.constant 0 : i32
    %c0_i32_0 = arith.constant 0 : i32
    %c0_i32_1 = arith.constant 0 : i32
    return %c0_i32, %c0_i32_0 : i32, i32
  }
  func.func @transform_1(%arg0: i32) -> (i32, i32) {
    %c0_i32 = arith.constant 0 : i32
    %c0_i32_0 = arith.constant 0 : i32
    %c0_i32_1 = arith.constant 0 : i32
    return %c0_i32, %c0_i32_0 : i32, i32
  }
  func.func @transform_2(%arg0: i32) -> (i32, i32) {
    %c0_i32 = arith.constant 0 : i32
    %c0_i32_0 = arith.constant 0 : i32
    %c0_i32_1 = arith.constant 0 : i32
    return %c0_i32, %c0_i32_0 : i32, i32
  }
  func.func @transform_3(%arg0: i32) -> (i32, i32) {
    %c0_i32 = arith.constant 0 : i32
    %c0_i32_0 = arith.constant 0 : i32
    %c0_i32_1 = arith.constant 0 : i32
    return %c0_i32, %c0_i32_0 : i32, i32
  }
  func.func @transform_4(%arg0: i32) -> (i32, i32) {
    %c0_i32 = arith.constant 0 : i32
    %c0_i32_0 = arith.constant 0 : i32
    %c0_i32_1 = arith.constant 0 : i32
    return %c0_i32, %c0_i32_0 : i32, i32
  }
  func.func @transform_5(%arg0: i32) -> (i32, i32) {
    %c0_i32 = arith.constant 0 : i32
    %c0_i32_0 = arith.constant 0 : i32
    %c0_i32_1 = arith.constant 0 : i32
    return %c0_i32, %c0_i32_0 : i32, i32
  }
  func.func @transform_6(%arg0: i32) -> (i32, i32) {
    %c0_i32 = arith.constant 0 : i32
    %c0_i32_0 = arith.constant 0 : i32
    %c0_i32_1 = arith.constant 0 : i32
    return %c0_i32, %c0_i32_0 : i32, i32
  }
  func.func @transform_7(%arg0: i32) -> (i32, i32) {
    %c0_i32 = arith.constant 0 : i32
    %c0_i32_0 = arith.constant 0 : i32
    %c0_i32_1 = arith.constant 0 : i32
    return %c0_i32, %c0_i32_0 : i32, i32
  }
  func.func @transform_8(%arg0: i32) -> (i32, i32) {
    %c0_i32 = arith.constant 0 : i32
    %c0_i32_0 = arith.constant 0 : i32
    %c0_i32_1 = arith.constant 0 : i32
    return %c0_i32, %c0_i32_0 : i32, i32
  }
  func.func @transform_9(%arg0: i32) -> (i32, i32) {
    %c0_i32 = arith.constant 0 : i32
    %c0_i32_0 = arith.constant 0 : i32
    %c0_i32_1 = arith.constant 0 : i32
    return %c0_i32, %c0_i32_0 : i32, i32
  }
  func.func @transform_10(%arg0: i32) -> (i32, i32) {
    %c0_i32 = arith.constant 0 : i32
    %c0_i32_0 = arith.constant 0 : i32
    %c0_i32_1 = arith.constant 0 : i32
    return %c0_i32, %c0_i32_0 : i32, i32
  }
  func.func @transform_11(%arg0: i32) -> (i32, i32) {
    %c0_i32 = arith.constant 0 : i32
    %c0_i32_0 = arith.constant 0 : i32
    %c0_i32_1 = arith.constant 0 : i32
    return %c0_i32, %c0_i32_0 : i32, i32
  }
}

</mosaic_0001>

<bundles_post_ra>
// kernel: _lambda_.1
= control target key start
LH: loop header
LB: loop body
LE: loop exit
PB: predicated region body
PF: predicated region fallthrough
CT: control target
= control target key end

     0   :  { %vm306_vm0 = vcmask 1043456   ;;  %vm113_vm1 = vcmask 293888   ;;  %vm5200_vm2 = vcmask 7168   ;;  %vm5361_vm3 = vcmask 15368   ;;  %s8429_s1 = inlined_call_operand.vmem [shape: f32[36,128], index: 1, kind: input, shape index: {}]   ;;  %s8430_s2 = inlined_call_operand.vmem [shape: f32[1,128], index: 2, kind: input, shape index: {}]   ;;  %s8431_s0 = inlined_call_operand.vmem [shape: f32[512,36], index: 0, kind: input, shape index: {}]   ;;  %s8432_s3 = inlined_call_operand.vmem [shape: f32[128,128], index: 3, kind: input, shape index: {}]   ;;  %s8433_s4 = inlined_call_operand.vmem [shape: f32[1,128], index: 4, kind: input, shape index: {}]   ;;  %s8434_s5 = inlined_call_operand.vmem [shape: f32[1152,128], index: 5, kind: input, shape index: {}]   ;;  %s8435_s6 = inlined_call_operand.vmem [shape: f32[1,128], index: 6, kind: input, shape index: {}]   ;;  %s8436_s7 = inlined_call_operand.vmem [shape: f32[128,1], index: 7, kind: input, shape index: {}]   ;;  %s8437_s8 = inlined_call_operand.<no memory space> [shape: f32[1,1], index: 8, kind: input, shape index: {}]   ;;  %s8438_s10 = inlined_call_operand.vmem [shape: f32[8,1], index: 10, kind: input, shape index: {}]   ;;  %s8439_s9 = inlined_call_operand.vmem [shape: f32[8,256], index: 9, kind: input, shape index: {}]   ;;  %s8440_s11 = inlined_call_operand.vmem [shape: f32[8,2], index: 11, kind: output, shape index: {}]  }
   0x1   :  { %v108_v0 = vld [vmem:[%s8429_s1 + $0x20] sm:$0xf]  ;;  %v107_v1 = vld [vmem:[%s8429_s1 + $0x18] sm:$0xff]  ;;  %v106_v2 = vld [vmem:[%s8429_s1 + $0x10] sm:$0xff]  ;;  %vm5474_vm4 = vcmask 15360  }
   0x2   :  { %5480 = vmatpush.msk.msra.mxu0 %vm306_vm0, %v108_v0  ;;  %v105_v3 = vld [vmem:[%s8429_s1 + $0x8] sm:$0xff]  ;;  %v104_v4 = vld [vmem:[%s8429_s1] sm:$0xff]  ;;  %v42_v7 = vld [vmem:[%s8431_s0 + $0x10] sm:$0xff] }
   0x3   :  { %v40_v5 = vld [vmem:[%s8431_s0] sm:$0xff]  ;;  %v41_v6 = vld [vmem:[%s8431_s0 + $0x8] sm:$0xff]  ;;  %v43_v8 = vld [vmem:[%s8431_s0 + $0x18] sm:$0xff] }
   0x4   :  { %322 = vmatpush.msra.mxu0 %v107_v1  ;;  %v44_v9 = vld [vmem:[%s8431_s0 + $0x20] sm:$0xff]  ;;  %v45_v10 = vld [vmem:[%s8431_s0 + $0x28] sm:$0xff]  ;;  %v46_v11 = vld [vmem:[%s8431_s0 + $0x30] sm:$0xff] }
   0x5   :  { %v47_v12 = vld [vmem:[%s8431_s0 + $0x38] sm:$0xff]  ;;  %v48_v13 = vld [vmem:[%s8431_s0 + $0x40] sm:$0xff]  ;;  %v597_v15 = vld [vmem:[%s8432_s3 + $0x70] sm:$0xff] }
   0x6   :  { %323 = vmatpush.msra.mxu0 %v106_v2  ;;  %v598_v14 = vld [vmem:[%s8432_s3 + $0x78] sm:$0xff]  ;;  %v596_v16 = vld [vmem:[%s8432_s3 + $0x68] sm:$0xff]  ;;  %v595_v18 = vld [vmem:[%s8432_s3 + $0x60] sm:$0xff] }
   0x7   :  { %603 = vmatpush.msra.mxu1 %v598_v14  ;;  %v49_v17 = vld [vmem:[%s8431_s0 + $0x48] sm:$0xff]  ;;  %v594_v19 = vld [vmem:[%s8432_s3 + $0x58] sm:$0xff]  ;;  %v593_v20 = vld [vmem:[%s8432_s3 + $0x50] sm:$0xff] }
   0x8   :  { %324 = vmatpush.msra.mxu0 %v105_v3  ;;  %v592_v21 = vld [vmem:[%s8432_s3 + $0x48] sm:$0xff]  ;;  %v50_v22 = vld [vmem:[%s8431_s0 + $0x50] sm:$0xff]  ;;  %v591_v23 = vld [vmem:[%s8432_s3 + $0x40] sm:$0xff] }
   0x9   :  { %604 = vmatpush.msra.mxu1 %v597_v15  ;;  %v590_v24 = vld [vmem:[%s8432_s3 + $0x38] sm:$0xff]  ;;  %v589_v25 = vld [vmem:[%s8432_s3 + $0x30] sm:$0xff]  ;;  %v588_v26 = vld [vmem:[%s8432_s3 + $0x28] sm:$0xff] }
   0xa   :  { %325 = vmatpush.msra.mxu0 %v104_v4  ;;  %v51_v27 = vld [vmem:[%s8431_s0 + $0x58] sm:$0xff]  ;;  %v587_v28 = vld [vmem:[%s8432_s3 + $0x20] sm:$0xff]  ;;  %v585_v30 = vld [vmem:[%s8432_s3 + $0x10] sm:$0xff] }
   0xb   :  { %5481 = vmatmul.msk.f32.vlgmr.msra.gmra.mxu0 %vm113_vm1, %v40_v5  ;;  %605 = vmatpush.msra.mxu1 %v596_v16  ;;  %v586_v29 = vld [vmem:[%s8432_s3 + $0x18] sm:$0xff]  ;;  %v52_v31 = vld [vmem:[%s8431_s0 + $0x60] sm:$0xff]  ;;  %v584_v32 = vld [vmem:[%s8432_s3 + $0x8] sm:$0xff] }
   0xc   :  { %v583_v33 = vld [vmem:[%s8432_s3] sm:$0xff]  ;;  %v53_v34 = vld [vmem:[%s8431_s0 + $0x68] sm:$0xff]  ;;  %v54_v35 = vld [vmem:[%s8431_s0 + $0x70] sm:$0xff] }
   0xd   :  { %606 = vmatpush.msra.mxu1 %v595_v18  ;;  %v55_v36 = vld [vmem:[%s8431_s0 + $0x78] sm:$0xff]  ;;  %v5755_v37 = vld [vmem:[%s8430_s2] ss:$0 sm:$0xff]  ;;  %v57_v43 = vld [vmem:[%s8431_s0 + $0x88] sm:$0xff] }
   0xe   :  { %v56_v39 = vld [vmem:[%s8431_s0 + $0x80] sm:$0xff]  ;;  %v58_v47 = vld [vmem:[%s8431_s0 + $0x90] sm:$0xff]  ;;  %v59_v51 = vld [vmem:[%s8431_s0 + $0x98] sm:$0xff] }
   0xf   :  { %607 = vmatpush.msra.mxu1 %v594_v19  ;;  %v60_v55 = vld [vmem:[%s8431_s0 + $0xa0] sm:$0xff]  ;;  %v61_v59 = vld [vmem:[%s8431_s0 + $0xa8] sm:$0xff]  ;;  %v62_v63 = vld [vmem:[%s8431_s0 + $0xb0] sm:$0xff] }
  0x10   :  { %v2845_v2 = vld [vmem:[%s8434_s5 + $0xf8] sm:$0xff]  ;;  %v2828_v15 = vld [vmem:[%s8434_s5 + $0x70] sm:$0xff]  ;;  %v2827_v18 = vld [vmem:[%s8434_s5 + $0x68] sm:$0xff] }
  0x11   :  { %608 = vmatpush.msra.mxu1 %v593_v20  ;;  %v63_v4 = vld [vmem:[%s8431_s0 + $0xb8] sm:$0xff]  ;;  %3171 = vmatpush.msra.mxu3 %v2845_v2  ;;  %v2840_v16 = vld [vmem:[%s8434_s5 + $0xd0] sm:$0xff]  ;;  %v2839_v19 = vld [vmem:[%s8434_s5 + $0xc8] sm:$0xff] }
  0x12   :  { %v2826_v20 = vld [vmem:[%s8434_s5 + $0x60] sm:$0xff]  ;;  %v70_v2 = vld [vmem:[%s8431_s0 + $0xf0] sm:$0xff] }
  0x13   :  { %5482 = vmatmul.msk.f32.gmra.mxu0 %vm113_vm1, %v41_v6  ;;  %609 = vmatpush.msra.mxu1 %v592_v21  ;;  %v2844_v6 = vld [vmem:[%s8434_s5 + $0xf0] sm:$0xff]  ;;  %v2838_v21 = vld [vmem:[%s8434_s5 + $0xc0] sm:$0xff] }
  0x14   :  { %3172 = vmatpush.msra.mxu3 %v2844_v6  ;;  %v71_v6 = vld [vmem:[%s8431_s0 + $0xf8] sm:$0xff] }
  0x15   :  { %610 = vmatpush.msra.mxu1 %v591_v23  ;;  %v2837_v23 = vld [vmem:[%s8434_s5 + $0xb8] sm:$0xff] }
  0x17   :  { %611 = vmatpush.msra.mxu1 %v590_v24 }
  0x19   :  { %612 = vmatpush.msra.mxu1 %v589_v25  ;;  %v65_v25 = vld [vmem:[%s8431_s0 + $0xc8] sm:$0xff] }
  0x1b   :  { %5483 = vmatmul.msk.f32.gmra.mxu0 %vm113_vm1, %v42_v7  ;;  %613 = vmatpush.msra.mxu1 %v588_v26 }
  0x1d   :  { %614 = vmatpush.msra.mxu1 %v587_v28  ;;  %v2836_v28 = vld [vmem:[%s8434_s5 + $0xb0] sm:$0xff] }
  0x1f   :  { %615 = vmatpush.msra.mxu1 %v586_v29 }
  0x21   :  { %616 = vmatpush.msra.mxu1 %v585_v30  ;;  %v2823_v30 = vld [vmem:[%s8434_s5 + $0x48] sm:$0xff] }
  0x23   :  { %5484 = vmatmul.msk.f32.gmra.mxu0 %vm113_vm1, %v43_v8  ;;  %617 = vmatpush.msra.mxu1 %v584_v32  ;;  %v2843_v8 = vld [vmem:[%s8434_s5 + $0xe8] sm:$0xff]  ;;  %v2822_v32 = vld [vmem:[%s8434_s5 + $0x40] sm:$0xff] }
  0x24   :  { %3173 = vmatpush.msra.mxu3 %v2843_v8 }
  0x25   :  { %618 = vmatpush.msra.mxu1 %v583_v33  ;;  %v2834_v33 = vld [vmem:[%s8434_s5 + $0xa0] sm:$0xff] }
  0x2b   :  { %5485 = vmatmul.msk.f32.gmra.mxu0 %vm113_vm1, %v44_v9  ;;  %v2842_v9 = vld [vmem:[%s8434_s5 + $0xe0] sm:$0xff] }
  0x2c   :  { %3174 = vmatpush.msra.mxu3 %v2842_v9  ;;  %v5979_v9 = vld [vmem:[%s8433_s4] ss:$0 sm:$0xff] }
  0x33   :  { %5486 = vmatmul.msk.f32.gmra.mxu0 %vm113_vm1, %v45_v10  ;;  %v2829_v10 = vld [vmem:[%s8434_s5 + $0x78] sm:$0xff] }
  0x34   :  { %2962 = vmatpush.msra.mxu2 %v2829_v10 }
  0x36   :  { %2963 = vmatpush.msra.mxu2 %v2828_v15 }
  0x38   :  { %2964 = vmatpush.msra.mxu2 %v2827_v18 }
  0x3a   :  { %2965 = vmatpush.msra.mxu2 %v2826_v20 }
  0x3b   :  { %5487 = vmatmul.msk.f32.gmra.mxu0 %vm113_vm1, %v46_v11  ;;  %v2841_v11 = vld [vmem:[%s8434_s5 + $0xd8] sm:$0xff] }
  0x3c   :  { %3175 = vmatpush.msra.mxu3 %v2841_v11 }
  0x3e   :  { %3176 = vmatpush.msra.mxu3 %v2840_v16 }
  0x40   :  { %3177 = vmatpush.msra.mxu3 %v2839_v19  ;;  %v73_v19 = vld [vmem:[%s8431_s0 + $0x108] sm:$0xff] }
  0x42   :  { %3178 = vmatpush.msra.mxu3 %v2838_v21 }
  0x43   :  { %5488 = vmatmul.msk.f32.gmra.mxu0 %vm113_vm1, %v47_v12 }
  0x44   :  { %3179 = vmatpush.msra.mxu3 %v2837_v23 }
  0x46   :  { %3180 = vmatpush.msra.mxu3 %v2836_v28 }
  0x4b   :  { %5489 = vmatmul.msk.f32.gmra.mxu0 %vm113_vm1, %v48_v13  ;;  %v64_v13 = vld [vmem:[%s8431_s0 + $0xc0] sm:$0xff] }
  0x53   :  { %5490 = vmatmul.msk.f32.gmra.mxu0 %vm113_vm1, %v49_v17 }
  0x5b   :  { %5491 = vmatmul.msk.f32.gmra.mxu0 %vm113_vm1, %v50_v22  ;;  %v2825_v22 = vld [vmem:[%s8434_s5 + $0x58] sm:$0xff] }
  0x5c   :  { %2966 = vmatpush.msra.mxu2 %v2825_v22 }
  0x63   :  { %5492 = vmatmul.msk.f32.gmra.mxu0 %vm113_vm1, %v51_v27  ;;  %v2824_v27 = vld [vmem:[%s8434_s5 + $0x50] sm:$0xff] }
  0x64   :  { %2967 = vmatpush.msra.mxu2 %v2824_v27 }
  0x66   :  { %2968 = vmatpush.msra.mxu2 %v2823_v30 }
  0x68   :  { %2969 = vmatpush.msra.mxu2 %v2822_v32 }
  0x6b   :  { %5493 = vmatmul.msk.f32.gmra.mxu0 %vm113_vm1, %v52_v31  ;;  %v2835_v31 = vld [vmem:[%s8434_s5 + $0xa8] sm:$0xff] }
  0x6c   :  { %3181 = vmatpush.msra.mxu3 %v2835_v31 }
  0x6e   :  { %3182 = vmatpush.msra.mxu3 %v2834_v33  ;;  %v75_v33 = vld [vmem:[%s8431_s0 + $0x118] sm:$0xff] }
  0x73   :  { %5494 = vmatmul.msk.f32.gmra.mxu0 %vm113_vm1, %v53_v34  ;;  %v2821_v34 = vld [vmem:[%s8434_s5 + $0x38] sm:$0xff] }
  0x74   :  { %2970 = vmatpush.msra.mxu2 %v2821_v34 }
  0x7b   :  { %5495 = vmatmul.msk.f32.gmra.mxu0 %vm113_vm1, %v54_v35  ;;  %v2833_v35 = vld [vmem:[%s8434_s5 + $0x98] sm:$0xff] }
  0x7c   :  { %3183 = vmatpush.msra.mxu3 %v2833_v35 }
  0x83   :  { %5496 = vmatmul.msk.f32.gmra.mxu0 %vm113_vm1, %v55_v36 }
  0x88   :  { %v327_v38 = vpop.f32.mrf.mxu0 }
  0x89   :  { %v328_v40 = vadd.f32 %v5755_v37, %v327_v38  ;;  %v66_v38 = vld [vmem:[%s8431_s0 + $0xd0] sm:$0xff] }
  0x8b   :  { %5497 = vmatmul.msk.f32.gmra.mxu0 %vm113_vm1, %v56_v39  ;;  %v519_v41 = vmax.f32 %v328_v40, 0.0  ;;  %v2820_v40 = vld [vmem:[%s8434_s5 + $0x30] sm:$0xff] }
  0x8c   :  { %2971 = vmatpush.msra.mxu2 %v2820_v40 }
  0x8d   :  { %619 = vmatmul.f32.vlgmr.msra.gmra.mxu1 %v519_v41  ;;  %v2832_v41 = vld [vmem:[%s8434_s5 + $0x90] sm:$0xff] }
  0x8e   :  { %3184 = vmatpush.msra.mxu3 %v2832_v41  ;;  %v76_v41 = vld [vmem:[%s8431_s0 + $0x120] sm:$0xff] }
  0x90   :  { %v330_v42 = vpop.f32.mrf.mxu0 }
  0x91   :  { %v331_v44 = vadd.f32 %v5755_v37, %v330_v42 }
  0x93   :  { %5498 = vmatmul.msk.f32.gmra.mxu0 %vm113_vm1, %v57_v43  ;;  %v520_v45 = vmax.f32 %v331_v44, 0.0  ;;  %v2819_v43 = vld [vmem:[%s8434_s5 + $0x28] sm:$0xff] }
  0x94   :  { %v2831_v44 = vld [vmem:[%s8434_s5 + $0x88] sm:$0xff]  ;;  %2972 = vmatpush.msra.mxu2 %v2819_v43 }
  0x95   :  { %622 = vmatmul.f32.gmra.mxu1 %v520_v45  ;;  %3185 = vmatpush.msra.mxu3 %v2831_v44  ;;  %v2818_v45 = vld [vmem:[%s8434_s5 + $0x20] sm:$0xff] }
  0x96   :  { %2973 = vmatpush.msra.mxu2 %v2818_v45 }
  0x98   :  { %v333_v46 = vpop.f32.mrf.mxu0 }
  0x99   :  { %v334_v48 = vadd.f32 %v5755_v37, %v333_v46  ;;  %v2830_v46 = vld [vmem:[%s8434_s5 + $0x80] sm:$0xff] }
  0x9a   :  { %3186 = vmatpush.msra.mxu3 %v2830_v46 }
  0x9b   :  { %5499 = vmatmul.msk.f32.gmra.mxu0 %vm113_vm1, %v58_v47  ;;  %v521_v49 = vmax.f32 %v334_v48, 0.0  ;;  %v2817_v47 = vld [vmem:[%s8434_s5 + $0x18] sm:$0xff]  ;;  %v5562_v48 = vmov 0.0  }
  0x9c   :  { %876 = vst [vmem:[#allocation2] sm:$0xff] %v5562_v48  ;;  %3187 = vmatmul.f32.vlgmr.msra.gmra.mxu3 %v5562_v48  ;;  %2974 = vmatpush.msra.mxu2 %v2817_v47 }
  0x9d   :  { %625 = vmatmul.f32.gmra.mxu1 %v521_v49  ;;  %877 = vst [vmem:[#allocation2 + $0x8] sm:$0xff] %v5562_v48 }
  0x9e   :  { %878 = vst [vmem:[#allocation2 + $0x10] sm:$0xff] %v5562_v48 }
  0x9f   :  { %879 = vst [vmem:[#allocation2 + $0x18] sm:$0xff] %v5562_v48 }
  0xa0   :  { %v336_v50 = vpop.f32.mrf.mxu0  ;;  %880 = vst [vmem:[#allocation2 + $0x20] sm:$0xff] %v5562_v48 }
  0xa1   :  { %v337_v52 = vadd.f32 %v5755_v37, %v336_v50  ;;  %v67_v50 = vld [vmem:[%s8431_s0 + $0xd8] sm:$0xff]  ;;  %883 = vst [vmem:[#allocation2 + $0x38] sm:$0xff] %v5562_v48 }
  0xa2   :  { %884 = vst [vmem:[#allocation2 + $0x40] sm:$0xff] %v5562_v48 }
  0xa3   :  { %5500 = vmatmul.msk.f32.gmra.mxu0 %vm113_vm1, %v59_v51  ;;  %v522_v53 = vmax.f32 %v337_v52, 0.0  ;;  %v2816_v52 = vld [vmem:[%s8434_s5 + $0x10] sm:$0xff]  ;;  %887 = vst [vmem:[#allocation2 + $0x58] sm:$0xff] %v5562_v48 }
  0xa4   :  { %2975 = vmatpush.msra.mxu2 %v2816_v52  ;;  %888 = vst [vmem:[#allocation2 + $0x60] sm:$0xff] %v5562_v48  ;;  %3190 = vmatmul.f32.gmra.mxu3 %v5562_v48 }
  0xa5   :  { %628 = vmatmul.f32.gmra.mxu1 %v522_v53  ;;  %891 = vst [vmem:[#allocation2 + $0x78] sm:$0xff] %v5562_v48 }
  0xa6   :  { %892 = vst [vmem:[#allocation2 + $0x80] sm:$0xff] %v5562_v48 }
  0xa7   :  { %895 = vst [vmem:[#allocation2 + $0x98] sm:$0xff] %v5562_v48 }
  0xa8   :  { %v339_v54 = vpop.f32.mrf.mxu0  ;;  %896 = vst [vmem:[#allocation2 + $0xa0] sm:$0xff] %v5562_v48 }
  0xa9   :  { %v340_v56 = vadd.f32 %v5755_v37, %v339_v54  ;;  %v2815_v54 = vld [vmem:[%s8434_s5 + $0x8] sm:$0xff]  ;;  %899 = vst [vmem:[#allocation2 + $0xb8] sm:$0xff] %v5562_v48 }
  0xaa   :  { %2976 = vmatpush.msra.mxu2 %v2815_v54  ;;  %900 = vst [vmem:[#allocation2 + $0xc0] sm:$0xff] %v5562_v48 }
  0xab   :  { %5501 = vmatmul.msk.f32.gmra.mxu0 %vm113_vm1, %v60_v55  ;;  %v523_v57 = vmax.f32 %v340_v56, 0.0  ;;  %v2814_v55 = vld [vmem:[%s8434_s5] sm:$0xff]  ;;  %903 = vst [vmem:[#allocation2 + $0xd8] sm:$0xff] %v5562_v48 }
  0xac   :  { %2977 = vmatpush.msra.mxu2 %v2814_v55  ;;  %v1085_v56 = vld [vmem:[#allocation2 + $0x7] sm:$0xff]  ;;  %904 = vst [vmem:[#allocation2 + $0xe0] sm:$0xff] %v5562_v48 }
  0xad   :  { %631 = vmatmul.f32.gmra.mxu1 %v523_v57  ;;  %2978 = vmatmul.f32.vlgmr.msra.gmra.mxu2 %v1085_v56  ;;  %907 = vst [vmem:[#allocation2 + $0xf8] sm:$0xff] %v5562_v48  ;;  %v78_v56 = vld [vmem:[%s8431_s0 + $0x130] sm:$0xff] }
  0xae   :  { %908 = vst [vmem:[#allocation2 + $0x100] sm:$0xff] %v5562_v48 }
  0xaf   :  { %911 = vst [vmem:[#allocation2 + $0x118] sm:$0xff] %v5562_v48 }
  0xb0   :  { %v342_v58 = vpop.f32.mrf.mxu0  ;;  %912 = vst [vmem:[#allocation2 + $0x120] sm:$0xff] %v5562_v48 }
  0xb1   :  { %v343_v60 = vadd.f32 %v5755_v37, %v342_v58  ;;  %v68_v58 = vld [vmem:[%s8431_s0 + $0xe0] sm:$0xff]  ;;  %915 = vst [vmem:[#allocation2 + $0x138] sm:$0xff] %v5562_v48 }
  0xb2   :  { %916 = vst [vmem:[#allocation2 + $0x140] sm:$0xff] %v5562_v48 }
  0xb3   :  { %5502 = vmatmul.msk.f32.gmra.mxu0 %vm113_vm1, %v61_v59  ;;  %v524_v61 = vmax.f32 %v343_v60, 0.0  ;;  %919 = vst [vmem:[#allocation2 + $0x158] sm:$0xff] %v5562_v48 }
  0xb4   :  { %920 = vst [vmem:[#allocation2 + $0x160] sm:$0xff] %v5562_v48 }
  0xb5   :  { %634 = vmatmul.f32.gmra.mxu1 %v524_v61  ;;  %923 = vst [vmem:[#allocation2 + $0x178] sm:$0xff] %v5562_v48 }
  0xb6   :  { %924 = vst [vmem:[#allocation2 + $0x180] sm:$0xff] %v5562_v48 }
  0xb7   :  { %927 = vst [vmem:[#allocation2 + $0x198] sm:$0xff] %v5562_v48 }
  0xb8   :  { %v345_v62 = vpop.f32.mrf.mxu0  ;;  %928 = vst [vmem:[#allocation2 + $0x1a0] sm:$0xff] %v5562_v48 }
  0xb9   :  { %v346_v0 = vadd.f32 %v5755_v37, %v345_v62  ;;  %v69_v62 = vld [vmem:[%s8431_s0 + $0xe8] sm:$0xff]  ;;  %931 = vst [vmem:[#allocation2 + $0x1b8] sm:$0xff] %v5562_v48 }
  0xba   :  { %932 = vst [vmem:[#allocation2 + $0x1c0] sm:$0xff] %v5562_v48 }
  0xbb   :  { %5503 = vmatmul.msk.f32.gmra.mxu0 %vm113_vm1, %v62_v63  ;;  %v525_v1 = vmax.f32 %v346_v0, 0.0  ;;  %935 = vst [vmem:[#allocation2 + $0x1d8] sm:$0xff] %v5562_v48 }
  0xbc   :  { %936 = vst [vmem:[#allocation2 + $0x1e0] sm:$0xff] %v5562_v48 }
  0xbd   :  { %637 = vmatmul.f32.gmra.mxu1 %v525_v1  ;;  %939 = vst [vmem:[#allocation2 + $0x1f8] sm:$0xff] %v5562_v48 }
  0xbe   :  { %940 = vst [vmem:[#allocation2 + $0x200] sm:$0xff] %v5562_v48 }
  0xbf   :  { %943 = vst [vmem:[#allocation2 + $0x218] sm:$0xff] %v5562_v48 }
  0xc0   :  { %v348_v3 = vpop.f32.mrf.mxu0  ;;  %944 = vst [vmem:[#allocation2 + $0x220] sm:$0xff] %v5562_v48 }
  0xc1   :  { %v349_v5 = vadd.f32 %v5755_v37, %v348_v3  ;;  %945 = vst [vmem:[#allocation2 + $0x228] sm:$0xff] %v5562_v48 }
  0xc2   :  { %946 = vst [vmem:[#allocation2 + $0x230] sm:$0xff] %v5562_v48 }
  0xc3   :  { %5504 = vmatmul.msk.f32.gmra.mxu0 %vm113_vm1, %v63_v4  ;;  %v526_v7 = vmax.f32 %v349_v5, 0.0  ;;  %947 = vst [vmem:[#allocation2 + $0x238] sm:$0xff] %v5562_v48 }
  0xc4   :  { %948 = vst [vmem:[#allocation2 + $0x240] sm:$0xff] %v5562_v48 }
  0xc5   :  { %640 = vmatmul.f32.gmra.mxu1 %v526_v7  ;;  %949 = vst [vmem:[#allocation2 + $0x248] sm:$0xff] %v5562_v48 }
  0xc6   :  { %950 = vst [vmem:[#allocation2 + $0x250] sm:$0xff] %v5562_v48 }
  0xc7   :  { %951 = vst [vmem:[#allocation2 + $0x258] sm:$0xff] %v5562_v48 }
  0xc8   :  { %v351_v12 = vpop.f32.mrf.mxu0  ;;  %952 = vst [vmem:[#allocation2 + $0x260] sm:$0xff] %v5562_v48 }
  0xc9   :  { %v352_v14 = vadd.f32 %v5755_v37, %v351_v12  ;;  %955 = vst [vmem:[#allocation2 + $0x278] sm:$0xff] %v5562_v48 }
  0xca   :  { %956 = vst [vmem:[#allocation2 + $0x280] sm:$0xff] %v5562_v48 }
  0xcb   :  { %5505 = vmatmul.msk.f32.gmra.mxu0 %vm113_vm1, %v64_v13  ;;  %v527_v17 = vmax.f32 %v352_v14, 0.0  ;;  %v72_v13 = vld [vmem:[%s8431_s0 + $0x100] sm:$0xff]  ;;  %959 = vst [vmem:[#allocation2 + $0x298] sm:$0xff] %v5562_v48 }
  0xcc   :  { %960 = vst [vmem:[#allocation2 + $0x2a0] sm:$0xff] %v5562_v48 }
  0xcd   :  { %643 = vmatmul.f32.gmra.mxu1 %v527_v17  ;;  %v1086_v17 = vld [vmem:[#allocation2 + $0xf] sm:$0xff]  ;;  %963 = vst [vmem:[#allocation2 + $0x2b8] sm:$0xff] %v5562_v48 }
  0xce   :  { %2981 = vmatmul.f32.gmra.mxu2 %v1086_v17  ;;  %964 = vst [vmem:[#allocation2 + $0x2c0] sm:$0xff] %v5562_v48  ;;  %v81_v17 = vld [vmem:[%s8431_s0 + $0x148] sm:$0xff] }
  0xcf   :  { %967 = vst [vmem:[#allocation2 + $0x2d8] sm:$0xff] %v5562_v48 }
  0xd0   :  { %v354_v24 = vpop.f32.mrf.mxu0  ;;  %968 = vst [vmem:[#allocation2 + $0x2e0] sm:$0xff] %v5562_v48 }
  0xd1   :  { %v355_v26 = vadd.f32 %v5755_v37, %v354_v24  ;;  %971 = vst [vmem:[#allocation2 + $0x2f8] sm:$0xff] %v5562_v48 }
  0xd2   :  { %972 = vst [vmem:[#allocation2 + $0x300] sm:$0xff] %v5562_v48 }
  0xd3   :  { %5506 = vmatmul.msk.f32.gmra.mxu0 %vm113_vm1, %v65_v25  ;;  %v528_v29 = vmax.f32 %v355_v26, 0.0  ;;  %975 = vst [vmem:[#allocation2 + $0x318] sm:$0xff] %v5562_v48  ;;  %v74_v26 = vld [vmem:[%s8431_s0 + $0x110] sm:$0xff] }
  0xd4   :  { %976 = vst [vmem:[#allocation2 + $0x320] sm:$0xff] %v5562_v48 }
  0xd5   :  { %646 = vmatmul.f32.gmra.mxu1 %v528_v29  ;;  %979 = vst [vmem:[#allocation2 + $0x338] sm:$0xff] %v5562_v48 }
  0xd6   :  { %980 = vst [vmem:[#allocation2 + $0x340] sm:$0xff] %v5562_v48 }
  0xd7   :  { %983 = vst [vmem:[#allocation2 + $0x358] sm:$0xff] %v5562_v48 }
  0xd8   :  { %v357_v36 = vpop.f32.mrf.mxu0  ;;  %984 = vst [vmem:[#allocation2 + $0x360] sm:$0xff] %v5562_v48 }
  0xd9   :  { %v358_v39 = vadd.f32 %v5755_v37, %v357_v36  ;;  %987 = vst [vmem:[#allocation2 + $0x378] sm:$0xff] %v5562_v48 }
  0xda   :  { %988 = vst [vmem:[#allocation2 + $0x380] sm:$0xff] %v5562_v48 }
  0xdb   :  { %5507 = vmatmul.msk.f32.gmra.mxu0 %vm113_vm1, %v66_v38  ;;  %v529_v42 = vmax.f32 %v358_v39, 0.0  ;;  %991 = vst [vmem:[#allocation2 + $0x398] sm:$0xff] %v5562_v48 }
  0xdc   :  { %992 = vst [vmem:[#allocation2 + $0x3a0] sm:$0xff] %v5562_v48 }
  0xdd   :  { %649 = vmatmul.f32.gmra.mxu1 %v529_v42  ;;  %995 = vst [vmem:[#allocation2 + $0x3b8] sm:$0xff] %v5562_v48 }
  0xde   :  { %996 = vst [vmem:[#allocation2 + $0x3c0] sm:$0xff] %v5562_v48 }
  0xdf   :  { %999 = vst [vmem:[#allocation2 + $0x3d8] sm:$0xff] %v5562_v48 }
  0xe0   :  { %v360_v49 = vpop.f32.mrf.mxu0  ;;  %1000 = vst [vmem:[#allocation2 + $0x3e0] sm:$0xff] %v5562_v48 }
  0xe1   :  { %v361_v51 = vadd.f32 %v5755_v37, %v360_v49  ;;  %1003 = vst [vmem:[#allocation2 + $0x3f8] sm:$0xff] %v5562_v48  ;;  %v77_v49 = vld [vmem:[%s8431_s0 + $0x128] sm:$0xff] }
  0xe2   :  { %1004 = vst [vmem:[#allocation2 + $0x400] sm:$0xff] %v5562_v48 }
  0xe3   :  { %5508 = vmatmul.msk.f32.gmra.mxu0 %vm113_vm1, %v67_v50  ;;  %v530_v53 = vmax.f32 %v361_v51, 0.0  ;;  %1007 = vst [vmem:[#allocation2 + $0x418] sm:$0xff] %v5562_v48 }
  0xe4   :  { %1008 = vst [vmem:[#allocation2 + $0x420] sm:$0xff] %v5562_v48 }
  0xe5   :  { %652 = vmatmul.f32.gmra.mxu1 %v530_v53  ;;  %1011 = vst [vmem:[#allocation2 + $0x438] sm:$0xff] %v5562_v48 }
  0xe6   :  { %1012 = vst [vmem:[#allocation2 + $0x440] sm:$0xff] %v5562_v48 }
  0xe7   :  { %1015 = vst [vmem:[#allocation2 + $0x458] sm:$0xff] %v5562_v48 }
  0xe8   :  { %v363_v57 = vpop.f32.mrf.mxu0  ;;  %1016 = vst [vmem:[#allocation2 + $0x460] sm:$0xff] %v5562_v48 }
  0xe9   :  { %v364_v59 = vadd.f32 %v5755_v37, %v363_v57  ;;  %1017 = vst [vmem:[#allocation2 + $0x468] sm:$0xff] %v5562_v48 }
  0xea   :  { %1018 = vst [vmem:[#allocation2 + $0x470] sm:$0xff] %v5562_v48 }
  0xeb   :  { %5509 = vmatmul.msk.f32.gmra.mxu0 %vm113_vm1, %v68_v58  ;;  %v531_v60 = vmax.f32 %v364_v59, 0.0  ;;  %1019 = vst [vmem:[#allocation2 + $0x478] sm:$0xff] %v5562_v48 }
  0xed   :  { %655 = vmatmul.f32.gmra.mxu1 %v531_v60 }
  0xf0   :  { %v366_v61 = vpop.f32.mrf.mxu0 }
  0xf1   :  { %v367_v63 = vadd.f32 %v5755_v37, %v366_v61 }
  0xf3   :  { %5510 = vmatmul.msk.f32.gmra.mxu0 %vm113_vm1, %v69_v62  ;;  %v532_v0 = vmax.f32 %v367_v63, 0.0 }
  0xf5   :  { %658 = vmatmul.f32.gmra.mxu1 %v532_v0  ;;  %v79_v0 = vld [vmem:[%s8431_s0 + $0x138] sm:$0xff] }
  0xf8   :  { %v369_v1 = vpop.f32.mrf.mxu0 }
  0xf9   :  { %v370_v3 = vadd.f32 %v5755_v37, %v369_v1 }
  0xfb   :  { %5511 = vmatmul.msk.f32.gmra.mxu0 %vm113_vm1, %v70_v2  ;;  %v533_v4 = vmax.f32 %v370_v3, 0.0 }
  0xfd   :  { %661 = vmatmul.f32.gmra.mxu1 %v533_v4 }
 0x100   :  { %v372_v5 = vpop.f32.mrf.mxu0 }
 0x101   :  { %v373_v7 = vadd.f32 %v5755_v37, %v372_v5 }
 0x103   :  { %5512 = vmatmul.msk.f32.gmra.mxu0 %vm113_vm1, %v71_v6  ;;  %v534_v8 = vmax.f32 %v373_v7, 0.0 }
 0x105   :  { %664 = vmatmul.f32.gmra.mxu1 %v534_v8  ;;  %v80_v8 = vld [vmem:[%s8431_s0 + $0x140] sm:$0xff] }
 0x108   :  { %v375_v10 = vpop.f32.mrf.mxu0 }
 0x109   :  { %v376_v11 = vadd.f32 %v5755_v37, %v375_v10 }
 0x10a   :  { %v620_v12 = vpop.f32.mrf.mxu1 }
 0x10b   :  { %v5990_v14 = vadd.f32 %v5979_v9, %v620_v12  ;;  %5513 = vmatmul.msk.f32.gmra.mxu0 %vm113_vm1, %v72_v13  ;;  %v535_v15 = vmax.f32 %v376_v11, 0.0 }
 0x10d   :  { %v812_v16 = vmax.f32 %v5990_v14, 0.0  ;;  %667 = vmatmul.f32.gmra.mxu1 %v535_v15 }
 0x10f   :  { %3193 = vmatmul.f32.gmra.mxu3 %v812_v16  ;;  %1021 = vst [vmem:[#allocation2 + $0x28] sm:$0xff] %v812_v16 }
 0x110   :  { %v378_v18 = vpop.f32.mrf.mxu0 }
 0x111   :  { %v379_v20 = vadd.f32 %v5755_v37, %v378_v18 }
 0x112   :  { %v623_v21 = vpop.f32.mrf.mxu1 }
 0x113   :  { %v6009_v22 = vadd.f32 %v5979_v9, %v623_v21  ;;  %5514 = vmatmul.msk.f32.gmra.mxu0 %vm113_vm1, %v73_v19  ;;  %v536_v23 = vmax.f32 %v379_v20, 0.0 }
 0x115   :  { %v813_v24 = vmax.f32 %v6009_v22, 0.0  ;;  %670 = vmatmul.f32.gmra.mxu1 %v536_v23 }
 0x116   :  { %v1087_v54 = vld [vmem:[#allocation2 + $0x27] sm:$0xff] }
 0x117   :  { %3196 = vmatmul.f32.gmra.mxu3 %v813_v24  ;;  %1022 = vst [vmem:[#allocation2 + $0x30] sm:$0xff] %v813_v24  ;;  %2984 = vmatmul.f32.gmra.mxu2 %v1087_v54 }
 0x118   :  { %v381_v25 = vpop.f32.mrf.mxu0 }
 0x119   :  { %v382_v27 = vadd.f32 %v5755_v37, %v381_v25  ;;  %v82_v25 = vld [vmem:[%s8431_s0 + $0x150] sm:$0xff] }
 0x11a   :  { %v626_v28 = vpop.f32.mrf.mxu1 }
 0x11b   :  { %v627_v29 = vadd.f32 %v5979_v9, %v626_v28  ;;  %5515 = vmatmul.msk.f32.gmra.mxu0 %vm113_vm1, %v74_v26  ;;  %v537_v30 = vmax.f32 %v382_v27, 0.0 }
 0x11d   :  { %v814_v31 = vmax.f32 %v627_v29, 0.0  ;;  %673 = vmatmul.f32.gmra.mxu1 %v537_v30 }
 0x11e   :  { %v1088_v61 = vld [vmem:[#allocation2 + $0x2f] sm:$0xff] }
 0x11f   :  { %3199 = vmatmul.f32.gmra.mxu3 %v814_v31  ;;  %1023 = vst [vmem:[#allocation2 + $0x48] sm:$0xff] %v814_v31  ;;  %2987 = vmatmul.f32.gmra.mxu2 %v1088_v61 }
 0x120   :  { %v384_v32 = vpop.f32.mrf.mxu0 }
 0x121   :  { %v385_v34 = vadd.f32 %v5755_v37, %v384_v32 }
 0x122   :  { %v629_v35 = vpop.f32.mrf.mxu1 }
 0x123   :  { %v630_v36 = vadd.f32 %v5979_v9, %v629_v35  ;;  %5516 = vmatmul.msk.f32.gmra.mxu0 %vm113_vm1, %v75_v33  ;;  %v538_v38 = vmax.f32 %v385_v34, 0.0  ;;  %v83_v33 = vld [vmem:[%s8431_s0 + $0x158] sm:$0xff] }
 0x125   :  { %v815_v39 = vmax.f32 %v630_v36, 0.0  ;;  %676 = vmatmul.f32.gmra.mxu1 %v538_v38 }
 0x126   :  { %v1089_v5 = vld [vmem:[#allocation2 + $0x47] sm:$0xff] }
 0x127   :  { %3202 = vmatmul.f32.gmra.mxu3 %v815_v39  ;;  %1024 = vst [vmem:[#allocation2 + $0x50] sm:$0xff] %v815_v39  ;;  %2990 = vmatmul.f32.gmra.mxu2 %v1089_v5  ;;  %v6124_v5 = vpop.f32.mrf.mxu3 }
 0x128   :  { %v387_v40 = vpop.f32.mrf.mxu0 }
 0x129   :  { %v388_v42 = vadd.f32 %v5755_v37, %v387_v40 }
 0x12a   :  { %v632_v43 = vpop.f32.mrf.mxu1 }
 0x12b   :  { %v633_v44 = vadd.f32 %v5979_v9, %v632_v43  ;;  %5517 = vmatmul.msk.f32.gmra.mxu0 %vm113_vm1, %v76_v41  ;;  %v539_v45 = vmax.f32 %v388_v42, 0.0  ;;  %v84_v42 = vld [vmem:[%s8431_s0 + $0x160] sm:$0xff] }
 0x12d   :  { %v816_v46 = vmax.f32 %v633_v44, 0.0  ;;  %679 = vmatmul.f32.gmra.mxu1 %v539_v45 }
 0x12e   :  { %v1090_v14 = vld [vmem:[#allocation2 + $0x4f] sm:$0xff] }
 0x12f   :  { %3205 = vmatmul.f32.gmra.mxu3 %v816_v46  ;;  %1025 = vst [vmem:[#allocation2 + $0x68] sm:$0xff] %v816_v46  ;;  %2993 = vmatmul.f32.gmra.mxu2 %v1090_v14 }
 0x130   :  { %v390_v47 = vpop.f32.mrf.mxu0 }
 0x131   :  { %v391_v50 = vadd.f32 %v5755_v37, %v390_v47 }
 0x132   :  { %v635_v51 = vpop.f32.mrf.mxu1 }
 0x133   :  { %v636_v52 = vadd.f32 %v5979_v9, %v635_v51  ;;  %5518 = vmatmul.msk.f32.gmra.mxu0 %vm113_vm1, %v77_v49  ;;  %v540_v48 = vmax.f32 %v391_v50, 0.0  ;;  %v85_v51 = vld [vmem:[%s8431_s0 + $0x168] sm:$0xff] }
 0x135   :  { %v817_v53 = vmax.f32 %v636_v52, 0.0  ;;  %682 = vmatmul.f32.gmra.mxu1 %v540_v48 }
 0x136   :  { %v1091_v22 = vld [vmem:[#allocation2 + $0x67] sm:$0xff] }
 0x137   :  { %1026 = vst [vmem:[#allocation2 + $0x70] sm:$0xff] %v817_v53  ;;  %3208 = vmatmul.f32.gmra.mxu3 %v817_v53  ;;  %2996 = vmatmul.f32.gmra.mxu2 %v1091_v22 }
 0x138   :  { %v393_v55 = vpop.f32.mrf.mxu0 }
 0x139   :  { %v394_v57 = vadd.f32 %v5755_v37, %v393_v55 }
 0x13a   :  { %v638_v58 = vpop.f32.mrf.mxu1 }
 0x13b   :  { %v639_v59 = vadd.f32 %v5979_v9, %v638_v58  ;;  %5519 = vmatmul.msk.f32.gmra.mxu0 %vm113_vm1, %v78_v56  ;;  %v541_v60 = vmax.f32 %v394_v57, 0.0  ;;  %v86_v58 = vld [vmem:[%s8431_s0 + $0x170] sm:$0xff] }
 0x13d   :  { %v818_v62 = vmax.f32 %v639_v59, 0.0  ;;  %685 = vmatmul.f32.gmra.mxu1 %v541_v60 }
 0x13e   :  { %v1092_v30 = vld [vmem:[#allocation2 + $0x6f] sm:$0xff] }
 0x13f   :  { %1027 = vst [vmem:[#allocation2 + $0x88] sm:$0xff] %v818_v62  ;;  %3211 = vmatmul.f32.gmra.mxu3 %v818_v62  ;;  %2999 = vmatmul.f32.gmra.mxu2 %v1092_v30 }
 0x140   :  { %v396_v63 = vpop.f32.mrf.mxu0 }
 0x141   :  { %v397_v1 = vadd.f32 %v5755_v37, %v396_v63 }
 0x142   :  { %v641_v2 = vpop.f32.mrf.mxu1 }
 0x143   :  { %v642_v3 = vadd.f32 %v5979_v9, %v641_v2  ;;  %5520 = vmatmul.msk.f32.gmra.mxu0 %vm113_vm1, %v79_v0  ;;  %v542_v4 = vmax.f32 %v397_v1, 0.0  ;;  %v87_v2 = vld [vmem:[%s8431_s0 + $0x178] sm:$0xff] }
 0x145   :  { %v819_v6 = vmax.f32 %v642_v3, 0.0  ;;  %688 = vmatmul.f32.gmra.mxu1 %v542_v4 }
 0x146   :  { %v1093_v39 = vld [vmem:[#allocation2 + $0x87] sm:$0xff] }
 0x147   :  { %1028 = vst [vmem:[#allocation2 + $0x90] sm:$0xff] %v819_v6  ;;  %3214 = vmatmul.f32.gmra.mxu3 %v819_v6  ;;  %3002 = vmatmul.f32.gmra.mxu2 %v1093_v39 }
 0x148   :  { %v399_v7 = vpop.f32.mrf.mxu0 }
 0x149   :  { %v400_v10 = vadd.f32 %v5755_v37, %v399_v7 }
 0x14a   :  { %v644_v11 = vpop.f32.mrf.mxu1 }
 0x14b   :  { %v543_v12 = vmax.f32 %v400_v10, 0.0  ;;  %v645_v13 = vadd.f32 %v5979_v9, %v644_v11  ;;  %5521 = vmatmul.msk.f32.gmra.mxu0 %vm113_vm1, %v80_v8 }
 0x14d   :  { %v820_v15 = vmax.f32 %v645_v13, 0.0  ;;  %691 = vmatmul.f32.gmra.mxu1 %v543_v12  ;;  %v88_v12 = vld [vmem:[%s8431_s0 + $0x180] sm:$0xff] }
 0x14e   :  { %v1094_v47 = vld [vmem:[#allocation2 + $0x8f] sm:$0xff] }
 0x14f   :  { %1029 = vst [vmem:[#allocation2 + $0xa8] sm:$0xff] %v820_v15  ;;  %3217 = vmatmul.f32.gmra.mxu3 %v820_v15  ;;  %3005 = vmatmul.f32.gmra.mxu2 %v1094_v47  ;;  %v6132_v15 = vpop.f32.mrf.mxu3 }
 0x150   :  { %v402_v16 = vpop.f32.mrf.mxu0 }
 0x151   :  { %v403_v18 = vadd.f32 %v5755_v37, %v402_v16 }
 0x152   :  { %v647_v19 = vpop.f32.mrf.mxu1 }
 0x153   :  { %v544_v20 = vmax.f32 %v403_v18, 0.0  ;;  %v648_v21 = vadd.f32 %v5979_v9, %v647_v19  ;;  %5522 = vmatmul.msk.f32.gmra.mxu0 %vm113_vm1, %v81_v17 }
 0x155   :  { %v821_v23 = vmax.f32 %v648_v21, 0.0  ;;  %694 = vmatmul.f32.gmra.mxu1 %v544_v20  ;;  %v89_v21 = vld [vmem:[%s8431_s0 + $0x188] sm:$0xff] }
 0x156   :  { %v1095_v55 = vld [vmem:[#allocation2 + $0xa7] sm:$0xff] }
 0x157   :  { %1030 = vst [vmem:[#allocation2 + $0xb0] sm:$0xff] %v821_v23  ;;  %3220 = vmatmul.f32.gmra.mxu3 %v821_v23  ;;  %3008 = vmatmul.f32.gmra.mxu2 %v1095_v55 }
 0x158   :  { %v405_v24 = vpop.f32.mrf.mxu0 }
 0x159   :  { %v406_v26 = vadd.f32 %v5755_v37, %v405_v24 }
 0x15a   :  { %v650_v27 = vpop.f32.mrf.mxu1 }
 0x15b   :  { %v545_v28 = vmax.f32 %v406_v26, 0.0  ;;  %v651_v29 = vadd.f32 %v5979_v9, %v650_v27  ;;  %5523 = vmatmul.msk.f32.gmra.mxu0 %vm113_vm1, %v82_v25 }
 0x15d   :  { %v822_v31 = vmax.f32 %v651_v29, 0.0  ;;  %697 = vmatmul.f32.gmra.mxu1 %v545_v28 }
 0x15e   :  { %v1096_v63 = vld [vmem:[#allocation2 + $0xaf] sm:$0xff] }
 0x15f   :  { %1031 = vst [vmem:[#allocation2 + $0xc8] sm:$0xff] %v822_v31  ;;  %3223 = vmatmul.f32.gmra.mxu3 %v822_v31  ;;  %3011 = vmatmul.f32.gmra.mxu2 %v1096_v63 }
 0x160   :  { %v408_v32 = vpop.f32.mrf.mxu0 }
 0x161   :  { %v409_v34 = vadd.f32 %v5755_v37, %v408_v32  ;;  %v90_v32 = vld [vmem:[%s8431_s0 + $0x190] sm:$0xff] }
 0x162   :  { %v653_v35 = vpop.f32.mrf.mxu1 }
 0x163   :  { %v546_v36 = vmax.f32 %v409_v34, 0.0  ;;  %v654_v38 = vadd.f32 %v5979_v9, %v653_v35  ;;  %5524 = vmatmul.msk.f32.gmra.mxu0 %vm113_vm1, %v83_v33 }
 0x165   :  { %v823_v40 = vmax.f32 %v654_v38, 0.0  ;;  %700 = vmatmul.f32.gmra.mxu1 %v546_v36 }
 0x166   :  { %v1097_v8 = vld [vmem:[#allocation2 + $0xc7] sm:$0xff] }
 0x167   :  { %1032 = vst [vmem:[#allocation2 + $0xd0] sm:$0xff] %v823_v40  ;;  %3226 = vmatmul.f32.gmra.mxu3 %v823_v40  ;;  %3014 = vmatmul.f32.gmra.mxu2 %v1097_v8 }
 0x168   :  { %v411_v41 = vpop.f32.mrf.mxu0 }
 0x169   :  { %v412_v43 = vadd.f32 %v5755_v37, %v411_v41 }
 0x16a   :  { %v656_v44 = vpop.f32.mrf.mxu1 }
 0x16b   :  { %v547_v45 = vmax.f32 %v412_v43, 0.0  ;;  %v657_v46 = vadd.f32 %v5979_v9, %v656_v44  ;;  %5525 = vmatmul.msk.f32.gmra.mxu0 %vm113_vm1, %v84_v42  ;;  %v91_v42 = vld [vmem:[%s8431_s0 + $0x198] sm:$0xff] }
 0x16d   :  { %v824_v49 = vmax.f32 %v657_v46, 0.0  ;;  %703 = vmatmul.f32.gmra.mxu1 %v547_v45 }
 0x16e   :  { %v1098_v18 = vld [vmem:[#allocation2 + $0xcf] sm:$0xff] }
 0x16f   :  { %1033 = vst [vmem:[#allocation2 + $0xe8] sm:$0xff] %v824_v49  ;;  %3229 = vmatmul.f32.gmra.mxu3 %v824_v49  ;;  %3017 = vmatmul.f32.gmra.mxu2 %v1098_v18  ;;  %v6160_v49 = vpop.f32.mrf.mxu2 }
 0x170   :  { %v414_v50 = vpop.f32.mrf.mxu0 }
 0x171   :  { %v415_v52 = vadd.f32 %v5755_v37, %v414_v50 }
 0x172   :  { %v659_v48 = vpop.f32.mrf.mxu1 }
 0x173   :  { %v548_v53 = vmax.f32 %v415_v52, 0.0  ;;  %v660_v54 = vadd.f32 %v5979_v9, %v659_v48  ;;  %5526 = vmatmul.msk.f32.gmra.mxu0 %vm113_vm1, %v85_v51  ;;  %v92_v48 = vld [vmem:[%s8431_s0 + $0x1a0] sm:$0xff] }
 0x175   :  { %v825_v56 = vmax.f32 %v660_v54, 0.0  ;;  %706 = vmatmul.f32.gmra.mxu1 %v548_v53 }
 0x176   :  { %v1099_v27 = vld [vmem:[#allocation2 + $0xe7] sm:$0xff] }
 0x177   :  { %1034 = vst [vmem:[#allocation2 + $0xf0] sm:$0xff] %v825_v56  ;;  %3232 = vmatmul.f32.gmra.mxu3 %v825_v56  ;;  %3020 = vmatmul.f32.gmra.mxu2 %v1099_v27 }
 0x178   :  { %v417_v57 = vpop.f32.mrf.mxu0 }
 0x179   :  { %v418_v59 = vadd.f32 %v5755_v37, %v417_v57 }
 0x17a   :  { %v662_v60 = vpop.f32.mrf.mxu1 }
 0x17b   :  { %v549_v61 = vmax.f32 %v418_v59, 0.0  ;;  %v663_v62 = vadd.f32 %v5979_v9, %v662_v60  ;;  %5527 = vmatmul.msk.f32.gmra.mxu0 %vm113_vm1, %v86_v58  ;;  %v6170_v58 = vpop.f32.mrf.mxu2  ;;  %v6175_v59 = vld [vmem:[%s8430_s2] ss:$0 sm:$0xff] }
 0x17d   :  { %v826_v0 = vmax.f32 %v663_v62, 0.0  ;;  %709 = vmatmul.f32.gmra.mxu1 %v549_v61  ;;  %v93_v62 = vld [vmem:[%s8431_s0 + $0x1a8] sm:$0xff] }
 0x17e   :  { %v1100_v36 = vld [vmem:[#allocation2 + $0xef] sm:$0xff] }
 0x17f   :  { %1035 = vst [vmem:[#allocation2 + $0x108] sm:$0xff] %v826_v0  ;;  %3235 = vmatmul.f32.gmra.mxu3 %v826_v0  ;;  %3023 = vmatmul.f32.gmra.mxu2 %v1100_v36 }
 0x180   :  { %v420_v1 = vpop.f32.mrf.mxu0 }
 0x181   :  { %v421_v3 = vadd.f32 %v5755_v37, %v420_v1 }
 0x182   :  { %v665_v4 = vpop.f32.mrf.mxu1 }
 0x183   :  { %v550_v6 = vmax.f32 %v421_v3, 0.0  ;;  %v666_v7 = vadd.f32 %v5979_v9, %v665_v4  ;;  %5528 = vmatmul.msk.f32.gmra.mxu0 %vm113_vm1, %v87_v2 }
 0x185   :  { %v827_v10 = vmax.f32 %v666_v7, 0.0  ;;  %712 = vmatmul.f32.gmra.mxu1 %v550_v6  ;;  %v6188_v6 = vld [vmem:[%s8435_s6] ss:$0 sm:$0xff] }
 0x186   :  { %v1101_v46 = vld [vmem:[#allocation2 + $0x107] sm:$0xff] }
 0x187   :  { %1036 = vst [vmem:[#allocation2 + $0x110] sm:$0xff] %v827_v10  ;;  %3238 = vmatmul.f32.gmra.mxu3 %v827_v10  ;;  %3026 = vmatmul.f32.gmra.mxu2 %v1101_v46 }
 0x188   :  { %v423_v11 = vpop.f32.mrf.mxu0 }
 0x189   :  { %v424_v13 = vadd.f32 %v5755_v37, %v423_v11  ;;  %v94_v11 = vld [vmem:[%s8431_s0 + $0x1b0] sm:$0xff] }
 0x18a   :  { %v668_v14 = vpop.f32.mrf.mxu1 }
 0x18b   :  { %v551_v16 = vmax.f32 %v424_v13, 0.0  ;;  %v669_v17 = vadd.f32 %v5979_v9, %v668_v14  ;;  %5529 = vmatmul.msk.f32.gmra.mxu0 %vm113_vm1, %v88_v12 }
 0x18d   :  { %v828_v19 = vmax.f32 %v669_v17, 0.0  ;;  %715 = vmatmul.f32.gmra.mxu1 %v551_v16 }
 0x18e   :  { %v1102_v56 = vld [vmem:[#allocation2 + $0x10f] sm:$0xff] }
 0x18f   :  { %1037 = vst [vmem:[#allocation2 + $0x128] sm:$0xff] %v828_v19  ;;  %3241 = vmatmul.f32.gmra.mxu3 %v828_v19  ;;  %3029 = vmatmul.f32.gmra.mxu2 %v1102_v56 }
 0x190   :  { %v426_v20 = vpop.f32.mrf.mxu0 }
 0x191   :  { %v427_v22 = vadd.f32 %v5755_v37, %v426_v20 }
 0x192   :  { %v671_v23 = vpop.f32.mrf.mxu1  ;;  %v6142_v26 = vpop.f32.mrf.mxu3 }
 0x193   :  { %v552_v24 = vmax.f32 %v427_v22, 0.0  ;;  %v672_v25 = vadd.f32 %v5979_v9, %v671_v23  ;;  %5530 = vmatmul.msk.f32.gmra.mxu0 %vm113_vm1, %v89_v21 }
 0x195   :  { %v829_v28 = vmax.f32 %v672_v25, 0.0  ;;  %718 = vmatmul.f32.gmra.mxu1 %v552_v24  ;;  %v95_v24 = vld [vmem:[%s8431_s0 + $0x1b8] sm:$0xff] }
 0x196   :  { %v1103_v2 = vld [vmem:[#allocation2 + $0x127] sm:$0xff] }
 0x197   :  { %1038 = vst [vmem:[#allocation2 + $0x130] sm:$0xff] %v829_v28  ;;  %3244 = vmatmul.f32.gmra.mxu3 %v829_v28  ;;  %3032 = vmatmul.f32.gmra.mxu2 %v1103_v2 }
 0x198   :  { %v429_v29 = vpop.f32.mrf.mxu0 }
 0x199   :  { %v430_v30 = vadd.f32 %v5755_v37, %v429_v29 }
 0x19a   :  { %v674_v31 = vpop.f32.mrf.mxu1  ;;  %v6150_v35 = vpop.f32.mrf.mxu3 }
 0x19b   :  { %v553_v33 = vmax.f32 %v430_v30, 0.0  ;;  %v675_v34 = vadd.f32 %v5979_v9, %v674_v31  ;;  %5531 = vmatmul.msk.f32.gmra.mxu0 %vm113_vm1, %v90_v32  ;;  %v2985_v8 = vpop.f32.mrf.mxu2 }
 0x19c   :  { %v2986_v12 = vadd.f32 %v6188_v6, %v2985_v8 }
 0x19d   :  { %v830_v38 = vmax.f32 %v675_v34, 0.0  ;;  %721 = vmatmul.f32.gmra.mxu1 %v553_v33 }
 0x19e   :  { %v1104_v17 = vld [vmem:[#allocation2 + $0x12f] sm:$0xff]  ;;  %v6200_v18 = vadd.f32 %v6142_v26, %v2986_v12 }
 0x19f   :  { %1039 = vst [vmem:[#allocation2 + $0x148] sm:$0xff] %v830_v38  ;;  %3247 = vmatmul.f32.gmra.mxu3 %v830_v38  ;;  %3035 = vmatmul.f32.gmra.mxu2 %v1104_v17  ;;  %v96_v38 = vld [vmem:[%s8431_s0 + $0x1c0] sm:$0xff]  ;;  %v99_v17 = vld [vmem:[%s8431_s0 + $0x1d8] sm:$0xff] }
 0x1a0   :  { %v432_v39 = vpop.f32.mrf.mxu0 }
 0x1a1   :  { %v433_v40 = vadd.f32 %v5755_v37, %v432_v39 }
 0x1a2   :  { %v677_v41 = vpop.f32.mrf.mxu1  ;;  %v6158_v45 = vpop.f32.mrf.mxu3 }
 0x1a3   :  { %v554_v43 = vmax.f32 %v433_v40, 0.0  ;;  %v678_v44 = vadd.f32 %v5979_v9, %v677_v41  ;;  %5532 = vmatmul.msk.f32.gmra.mxu0 %vm113_vm1, %v91_v42  ;;  %v2988_v22 = vpop.f32.mrf.mxu2 }
 0x1a4   :  { %v2989_v25 = vadd.f32 %v6188_v6, %v2988_v22 }
 0x1a5   :  { %v831_v47 = vmax.f32 %v678_v44, 0.0  ;;  %724 = vmatmul.f32.gmra.mxu1 %v554_v43 }
 0x1a6   :  { %v1105_v29 = vld [vmem:[#allocation2 + $0x147] sm:$0xff]  ;;  %v6212_v30 = vadd.f32 %v6150_v35, %v2989_v25 }
 0x1a7   :  { %1040 = vst [vmem:[#allocation2 + $0x150] sm:$0xff] %v831_v47  ;;  %3250 = vmatmul.f32.gmra.mxu3 %v831_v47  ;;  %3038 = vmatmul.f32.gmra.mxu2 %v1105_v29 }
 0x1a8   :  { %v435_v50 = vpop.f32.mrf.mxu0 }
 0x1a9   :  { %v436_v51 = vadd.f32 %v5755_v37, %v435_v50 }
 0x1aa   :  { %v680_v52 = vpop.f32.mrf.mxu1  ;;  %v6168_v55 = vpop.f32.mrf.mxu3 }
 0x1ab   :  { %v555_v53 = vmax.f32 %v436_v51, 0.0  ;;  %v681_v54 = vadd.f32 %v5979_v9, %v680_v52  ;;  %5533 = vmatmul.msk.f32.gmra.mxu0 %vm113_vm1, %v92_v48  ;;  %v2991_v34 = vpop.f32.mrf.mxu2  ;;  %v97_v52 = vld [vmem:[%s8431_s0 + $0x1c8] sm:$0xff] }
 0x1ac   :  { %v2992_v39 = vadd.f32 %v6188_v6, %v2991_v34  ;;  %v2861_v34 = vld [vmem:[%s8434_s5 + $0x178] sm:$0xff] }
 0x1ad   :  { %v832_v57 = vmax.f32 %v681_v54, 0.0  ;;  %727 = vmatmul.f32.gmra.mxu1 %v555_v53  ;;  %3380 = vmatpush.msrb.mxu0 %v2861_v34  ;;  %v2849_v34 = vld [vmem:[%s8434_s5 + $0x118] sm:$0xff] }
 0x1ae   :  { %v1106_v42 = vld [vmem:[#allocation2 + $0x14f] sm:$0xff]  ;;  %v6224_v43 = vadd.f32 %v6158_v45, %v2992_v39 }
 0x1af   :  { %1041 = vst [vmem:[#allocation2 + $0x168] sm:$0xff] %v832_v57  ;;  %3253 = vmatmul.f32.gmra.mxu3 %v832_v57  ;;  %3041 = vmatmul.f32.gmra.mxu2 %v1106_v42  ;;  %v2859_v42 = vld [vmem:[%s8434_s5 + $0x168] sm:$0xff] }
 0x1b0   :  { %v438_v37 = vpop.f32.mrf.mxu0 }
 0x1b1   :  { %v439_v60 = vadd.f32 %v6175_v59, %v438_v37 }
 0x1b2   :  { %v683_v61 = vpop.f32.mrf.mxu1  ;;  %v6183_v1 = vpop.f32.mrf.mxu3 }
 0x1b3   :  { %v556_v63 = vmax.f32 %v439_v60, 0.0  ;;  %v684_v0 = vadd.f32 %v5979_v9, %v683_v61  ;;  %5534 = vmatmul.msk.f32.gmra.mxu0 %vm113_vm1, %v93_v62  ;;  %v2994_v50 = vpop.f32.mrf.mxu2 }
 0x1b4   :  { %v2995_v48 = vadd.f32 %v6188_v6, %v2994_v50 }
 0x1b5   :  { %v833_v3 = vmax.f32 %v684_v0, 0.0  ;;  %730 = vmatmul.f32.gmra.mxu1 %v556_v63  ;;  %v98_v0 = vld [vmem:[%s8431_s0 + $0x1d0] sm:$0xff] }
 0x1b6   :  { %v1107_v56 = vld [vmem:[#allocation2 + $0x167] sm:$0xff]  ;;  %v6236_v57 = vadd.f32 %v6168_v55, %v2995_v48 }
 0x1b7   :  { %1042 = vst [vmem:[#allocation2 + $0x170] sm:$0xff] %v833_v3  ;;  %3256 = vmatmul.f32.gmra.mxu3 %v833_v3  ;;  %3044 = vmatmul.f32.gmra.mxu2 %v1107_v56 }
 0x1b8   :  { %v441_v4 = vpop.f32.mrf.mxu0 }
 0x1b9   :  { %v442_v7 = vadd.f32 %v6175_v59, %v441_v4 }
 0x1ba   :  { %v686_v10 = vpop.f32.mrf.mxu1  ;;  %v6197_v16 = vpop.f32.mrf.mxu3 }
 0x1bb   :  { %v557_v13 = vmax.f32 %v442_v7, 0.0  ;;  %v687_v14 = vadd.f32 %v5979_v9, %v686_v10  ;;  %5535 = vmatmul.msk.f32.gmra.mxu0 %vm113_vm1, %v94_v11  ;;  %v2997_v62 = vpop.f32.mrf.mxu2 }
 0x1bc   :  { %v2998_v2 = vadd.f32 %v6188_v6, %v2997_v62  ;;  %v2856_v62 = vld [vmem:[%s8434_s5 + $0x150] sm:$0xff] }
 0x1bd   :  { %v834_v19 = vmax.f32 %v687_v14, 0.0  ;;  %733 = vmatmul.f32.gmra.mxu1 %v557_v13 }
 0x1be   :  { %v1108_v7 = vld [vmem:[#allocation2 + $0x16f] sm:$0xff]  ;;  %v6248_v8 = vadd.f32 %v6183_v1, %v2998_v2 }
 0x1bf   :  { %1043 = vst [vmem:[#allocation2 + $0x188] sm:$0xff] %v834_v19  ;;  %3259 = vmatmul.f32.gmra.mxu3 %v834_v19  ;;  %3047 = vmatmul.f32.gmra.mxu2 %v1108_v7  ;;  %v102_v7 = vld [vmem:[%s8431_s0 + $0x1f0] sm:$0xff] }
 0x1c0   :  { %v444_v20 = vpop.f32.mrf.mxu0 }
 0x1c1   :  { %v445_v21 = vadd.f32 %v6175_v59, %v444_v20 }
 0x1c2   :  { %v689_v23 = vpop.f32.mrf.mxu1  ;;  %v6209_v28 = vpop.f32.mrf.mxu3 }
 0x1c3   :  { %v558_v27 = vmax.f32 %v445_v21, 0.0  ;;  %v690_v26 = vadd.f32 %v5979_v9, %v689_v23  ;;  %5536 = vmatmul.msk.f32.gmra.mxu0 %vm113_vm1, %v95_v24  ;;  %v3000_v13 = vpop.f32.mrf.mxu2 }
 0x1c4   :  { %v3001_v19 = vadd.f32 %v6188_v6, %v3000_v13  ;;  %v2853_v13 = vld [vmem:[%s8434_s5 + $0x138] sm:$0xff] }
 0x1c5   :  { %v835_v31 = vmax.f32 %v690_v26, 0.0  ;;  %736 = vmatmul.f32.gmra.mxu1 %v558_v27 }
 0x1c6   :  { %v1109_v22 = vld [vmem:[#allocation2 + $0x187] sm:$0xff]  ;;  %v6260_v23 = vadd.f32 %v6197_v16, %v3001_v19 }
 0x1c7   :  { %1044 = vst [vmem:[#allocation2 + $0x190] sm:$0xff] %v835_v31  ;;  %3262 = vmatmul.f32.gmra.mxu3 %v835_v31  ;;  %3050 = vmatmul.f32.gmra.mxu2 %v1109_v22  ;;  %v100_v31 = vld [vmem:[%s8431_s0 + $0x1e0] sm:$0xff] }
 0x1c8   :  { %v447_v32 = vpop.f32.mrf.mxu0  ;;  %v5555_v22 = vld [vmem:[#allocation2] sm:$0xff] }
 0x1c9   :  { %v448_v33 = vadd.f32 %v6175_v59, %v447_v32 }
 0x1ca   :  { %v692_v36 = vpop.f32.mrf.mxu1  ;;  %v6221_v41 = vpop.f32.mrf.mxu3 }
 0x1cb   :  { %v559_v40 = vmax.f32 %v448_v33, 0.0  ;;  %v693_v35 = vadd.f32 %v5979_v9, %v692_v36  ;;  %5537 = vmatmul.msk.f32.gmra.mxu0 %vm113_vm1, %v96_v38  ;;  %v3003_v26 = vpop.f32.mrf.mxu2 }
 0x1cc   :  { %v3004_v32 = vadd.f32 %v6188_v6, %v3003_v26 }
 0x1cd   :  { %v836_v44 = vmax.f32 %v693_v35, 0.0  ;;  %739 = vmatmul.f32.gmra.mxu1 %v559_v40  ;;  %v2860_v35 = vld [vmem:[%s8434_s5 + $0x170] sm:$0xff] }
 0x1ce   :  { %v1110_v38 = vld [vmem:[#allocation2 + $0x18f] sm:$0xff]  ;;  %v6275_v39 = vadd.f32 %v6209_v28, %v3004_v32  ;;  %3381 = vmatpush.msrb.mxu0 %v2860_v35  ;;  %v2858_v28 = vld [vmem:[%s8434_s5 + $0x160] sm:$0xff] }
 0x1cf   :  { %1045 = vst [vmem:[#allocation2 + $0x1a8] sm:$0xff] %v836_v44  ;;  %3265 = vmatmul.f32.gmra.mxu3 %v836_v44  ;;  %3053 = vmatmul.f32.gmra.mxu2 %v1110_v38 }
 0x1d0   :  { %v450_v46 = vpop.f32.mrf.mxu0  ;;  %3382 = vmatpush.msrb.mxu0 %v2859_v42 }
 0x1d1   :  { %v451_v47 = vadd.f32 %v6175_v59, %v450_v46 }
 0x1d2   :  { %v695_v51 = vpop.f32.mrf.mxu1  ;;  %v6233_v54 = vpop.f32.mrf.mxu3  ;;  %3383 = vmatpush.msrb.mxu0 %v2858_v28 }
 0x1d3   :  { %v560_v53 = vmax.f32 %v451_v47, 0.0  ;;  %v696_v45 = vadd.f32 %v5979_v9, %v695_v51  ;;  %5538 = vmatmul.msk.f32.gmra.mxu0 %vm113_vm1, %v97_v52  ;;  %v3006_v47 = vpop.f32.mrf.mxu2  ;;  %v101_v51 = vld [vmem:[%s8431_s0 + $0x1e8] sm:$0xff] }
 0x1d4   :  { %v3007_v52 = vadd.f32 %v6188_v6, %v3006_v47 }
 0x1d5   :  { %v837_v37 = vmax.f32 %v696_v45, 0.0  ;;  %742 = vmatmul.f32.gmra.mxu1 %v560_v53  ;;  %v2857_v45 = vld [vmem:[%s8434_s5 + $0x158] sm:$0xff] }
 0x1d6   :  { %3384 = vmatpush.msrb.mxu0 %v2857_v45 }
 0x1d7   :  { %1046 = vst [vmem:[#allocation2 + $0x1b0] sm:$0xff] %v837_v37  ;;  %3268 = vmatmul.f32.gmra.mxu3 %v837_v37  ;;  %v1111_v37 = vld [vmem:[#allocation2 + $0x1a7] sm:$0xff] }
 0x1d8   :  { %v453_v60 = vpop.f32.mrf.mxu0  ;;  %3385 = vmatpush.msrb.mxu0 %v2856_v62  ;;  %3056 = vmatmul.f32.gmra.mxu2 %v1111_v37 }
 0x1d9   :  { %v454_v61 = vadd.f32 %v6175_v59, %v453_v60  ;;  %v6299_v60 = vadd.f32 %v6221_v41, %v3007_v52  ;;  %v2854_v41 = vld [vmem:[%s8434_s5 + $0x140] sm:$0xff]  ;;  %v1341_v52 = vld [vmem:[#allocation2 + $0x9] sm:$0xff] }
 0x1da   :  { %v698_v63 = vpop.f32.mrf.mxu1  ;;  %v6245_v4 = vpop.f32.mrf.mxu3 }
 0x1db   :  { %v561_v3 = vmax.f32 %v454_v61, 0.0  ;;  %v699_v55 = vadd.f32 %v5979_v9, %v698_v63  ;;  %5539 = vmatmul.msk.f32.gmra.mxu0 %vm113_vm1, %v98_v0  ;;  %v2855_v63 = vld [vmem:[%s8434_s5 + $0x148] sm:$0xff] }
 0x1dc   :  { %3386 = vmatpush.msrb.mxu0 %v2855_v63 }
 0x1dd   :  { %v838_v10 = vmax.f32 %v699_v55, 0.0  ;;  %745 = vmatmul.f32.gmra.mxu1 %v561_v3  ;;  %v3009_v3 = vpop.f32.mrf.mxu2 }
 0x1de   :  { %3387 = vmatpush.msrb.mxu0 %v2854_v41 }
 0x1df   :  { %1047 = vst [vmem:[#allocation2 + $0x1c8] sm:$0xff] %v838_v10  ;;  %3271 = vmatmul.f32.gmra.mxu3 %v838_v10  ;;  %v3010_v10 = vadd.f32 %v6188_v6, %v3009_v3 }
 0x1e0   :  { %v456_v11 = vpop.f32.mrf.mxu0  ;;  %3388 = vmatpush.msrb.mxu0 %v2853_v13 }
 0x1e1   :  { %v457_v12 = vadd.f32 %v6175_v59, %v456_v11  ;;  %v6323_v19 = vadd.f32 %v6233_v54, %v3010_v10 }
 0x1e2   :  { %v701_v14 = vpop.f32.mrf.mxu1  ;;  %v6257_v21 = vpop.f32.mrf.mxu3 }
 0x1e3   :  { %v562_v20 = vmax.f32 %v457_v12, 0.0  ;;  %v702_v1 = vadd.f32 %v5979_v9, %v701_v14  ;;  %5540 = vmatmul.msk.f32.gmra.mxu0 %vm113_vm1, %v99_v17  ;;  %v1112_v17 = vld [vmem:[#allocation2 + $0x1af] sm:$0xff] }
 0x1e4   :  { %3059 = vmatmul.f32.gmra.mxu2 %v1112_v17 }
 0x1e5   :  { %v839_v24 = vmax.f32 %v702_v1, 0.0  ;;  %748 = vmatmul.f32.gmra.mxu1 %v562_v20  ;;  %v2852_v1 = vld [vmem:[%s8434_s5 + $0x130] sm:$0xff] }
 0x1e6   :  { %3389 = vmatpush.msrb.mxu0 %v2852_v1 }
 0x1e7   :  { %1048 = vst [vmem:[#allocation2 + $0x1d0] sm:$0xff] %v839_v24  ;;  %3274 = vmatmul.f32.gmra.mxu3 %v839_v24 }
 0x1e8   :  { %v459_v25 = vpop.f32.mrf.mxu0 }
 0x1e9   :  { %v460_v27 = vadd.f32 %v6175_v59, %v459_v25  ;;  %v2850_v25 = vld [vmem:[%s8434_s5 + $0x120] sm:$0xff] }
 0x1ea   :  { %v704_v29 = vpop.f32.mrf.mxu1  ;;  %v6272_v36 = vpop.f32.mrf.mxu3 }
 0x1eb   :  { %v563_v33 = vmax.f32 %v460_v27, 0.0  ;;  %v705_v16 = vadd.f32 %v5979_v9, %v704_v29  ;;  %5541 = vmatmul.msk.f32.gmra.mxu0 %vm113_vm1, %v100_v31  ;;  %v3012_v27 = vpop.f32.mrf.mxu2  ;;  %v103_v29 = vld [vmem:[%s8431_s0 + $0x1f8] sm:$0xff] }
 0x1ec   :  { %v3013_v31 = vadd.f32 %v6188_v6, %v3012_v27 }
 0x1ed   :  { %v840_v40 = vmax.f32 %v705_v16, 0.0  ;;  %751 = vmatmul.f32.gmra.mxu1 %v563_v33  ;;  %v6342_v33 = vld [vmem:[%s8433_s4] ss:$0 sm:$0xff] }
 0x1ee   :  { %v6352_v35 = vadd.f32 %v6245_v4, %v3013_v31  ;;  %v2846_v4 = vld [vmem:[%s8434_s5 + $0x100] sm:$0xff] }
 0x1ef   :  { %1049 = vst [vmem:[#allocation2 + $0x1e8] sm:$0xff] %v840_v40  ;;  %3277 = vmatmul.f32.gmra.mxu3 %v840_v40  ;;  %v1113_v40 = vld [vmem:[#allocation2 + $0x1c7] sm:$0xff] }
 0x1f0   :  { %v462_v44 = vpop.f32.mrf.mxu0  ;;  %3062 = vmatmul.f32.gmra.mxu2 %v1113_v40 }
 0x1f1   :  { %v463_v46 = vadd.f32 %v6175_v59, %v462_v44  ;;  %v2848_v44 = vld [vmem:[%s8434_s5 + $0x110] sm:$0xff] }
 0x1f2   :  { %v707_v50 = vpop.f32.mrf.mxu1  ;;  %v6296_v56 = vpop.f32.mrf.mxu3 }
 0x1f3   :  { %v564_v48 = vmax.f32 %v463_v46, 0.0  ;;  %v708_v53 = vadd.f32 %v5979_v9, %v707_v50  ;;  %5542 = vmatmul.msk.f32.gmra.mxu0 %vm113_vm1, %v101_v51  ;;  %v2847_v46 = vld [vmem:[%s8434_s5 + $0x108] sm:$0xff]  ;;  %v3015_v50 = vpop.f32.mrf.mxu2 }
 0x1f5   :  { %v841_v61 = vmax.f32 %v708_v53, 0.0  ;;  %754 = vmatmul.f32.gmra.mxu1 %v564_v48  ;;  %v3016_v48 = vadd.f32 %v6188_v6, %v3015_v50 }
 0x1f7   :  { %1050 = vst [vmem:[#allocation2 + $0x1f0] sm:$0xff] %v841_v61  ;;  %3280 = vmatmul.f32.gmra.mxu3 %v841_v61  ;;  %v1114_v61 = vld [vmem:[#allocation2 + $0x1cf] sm:$0xff]  ;;  %v6369_v62 = vadd.f32 %v6257_v21, %v3016_v48  ;;  %v1115_v21 = vld [vmem:[#allocation2 + $0x1e7] sm:$0xff] }
 0x1f8   :  { %v465_v0 = vpop.f32.mrf.mxu0  ;;  %3065 = vmatmul.f32.gmra.mxu2 %v1114_v61 }
 0x1f9   :  { %v466_v2 = vadd.f32 %v6175_v59, %v465_v0 }
 0x1fa   :  { %v710_v55 = vpop.f32.mrf.mxu1  ;;  %v6320_v14 = vpop.f32.mrf.mxu3 }
 0x1fb   :  { %v565_v11 = vmax.f32 %v466_v2, 0.0  ;;  %v711_v12 = vadd.f32 %v5979_v9, %v710_v55  ;;  %5543 = vmatmul.msk.f32.gmra.mxu0 %vm113_vm1, %v102_v7  ;;  %v2851_v9 = vld [vmem:[%s8434_s5 + $0x128] sm:$0xff]  ;;  %v3018_v41 = vpop.f32.mrf.mxu2  ;;  %v1342_v55 = vld [vmem:[#allocation2 + $0x11] sm:$0xff] }
 0x1fc   :  { %3390 = vmatpush.msrb.mxu0 %v2851_v9  ;;  %v3019_v7 = vadd.f32 %v6188_v6, %v3018_v41 }
 0x1fd   :  { %v842_v20 = vmax.f32 %v711_v12, 0.0  ;;  %757 = vmatmul.f32.gmra.mxu1 %v565_v11 }
 0x1fe   :  { %3391 = vmatpush.msrb.mxu0 %v2850_v25  ;;  %v6377_v13 = vadd.f32 %v6272_v36, %v3019_v7  ;;  %v1116_v36 = vld [vmem:[#allocation2 + $0x1ef] sm:$0xff] }
 0x1ff   :  { %1051 = vst [vmem:[#allocation2 + $0x208] sm:$0xff] %v842_v20  ;;  %3283 = vmatmul.f32.gmra.mxu3 %v5555_v22 }
 0x200   :  { %v468_v24 = vpop.f32.mrf.mxu0  ;;  %3392 = vmatpush.msrb.mxu0 %v2849_v34  ;;  %8454 = vst [vmem:[#allocation6_spill] sm:$0xff] %v6377_v13  ;;  %3068 = vmatmul.f32.gmra.mxu2 %v1115_v21  ;;  %v1346_v21 = vld [vmem:[#allocation2 + $0x51] sm:$0xff] }
 0x201   :  { %v469_v54 = vadd.f32 %v6175_v59, %v468_v24  ;;  %v1343_v24 = vld [vmem:[#allocation2 + $0x29] sm:$0xff] }
 0x202   :  { %v713_v26 = vpop.f32.mrf.mxu1  ;;  %v6349_v38 = vpop.f32.mrf.mxu3  ;;  %3393 = vmatpush.msrb.mxu0 %v2848_v44 }
 0x203   :  { %v566_v32 = vmax.f32 %v469_v54, 0.0  ;;  %v714_v16 = vadd.f32 %v6342_v33, %v713_v26  ;;  %5544 = vmatmul.msk.f32.gmra.mxu0 %vm113_vm1, %v103_v29  ;;  %v3021_v9 = vpop.f32.mrf.mxu2 }
 0x204   :  { %3394 = vmatpush.msrb.mxu0 %v2847_v46  ;;  %v3022_v54 = vadd.f32 %v6188_v6, %v3021_v9 }
 0x205   :  { %v843_v42 = vmax.f32 %v714_v16, 0.0  ;;  %760 = vmatmul.f32.gmra.mxu1 %v566_v32 }
 0x206   :  { %3395 = vmatpush.msrb.mxu0 %v2846_v4  ;;  %v6385_v29 = vadd.f32 %v6296_v56, %v3022_v54  ;;  %v1117_v56 = vld [vmem:[#allocation2 + $0x247] sm:$0xff] }
 0x207   :  { %1052 = vst [vmem:[#allocation2 + $0x210] sm:$0xff] %v843_v42  ;;  %3286 = vmatmul.f32.gmra.mxu3 %v5555_v22  ;;  %v1344_v42 = vld [vmem:[#allocation2 + $0x31] sm:$0xff] }
 0x208   :  { %v471_v28 = vpop.f32.mrf.mxu0  ;;  %8455 = vst [vmem:[#allocation7_spill] sm:$0xff] %v6385_v29  ;;  %3071 = vmatmul.f32.gmra.mxu2 %v1116_v36 }
 0x209   :  { %v472_v47 = vadd.f32 %v6175_v59, %v471_v28 }
 0x20a   :  { %v716_v51 = vpop.f32.mrf.mxu1  ;;  %v6366_v37 = vpop.f32.mrf.mxu3 }
 0x20b   :  { %v567_v53 = vmax.f32 %v472_v47, 0.0  ;;  %v717_v45 = vadd.f32 %v6342_v33, %v716_v51  ;;  %3396 = vmatmul.f32.vlgmr.msrb.gmra.mxu0 %v1341_v52  ;;  %v3024_v34 = vpop.f32.mrf.mxu2 }
 0x20c   :  { %v3025_v44 = vadd.f32 %v6188_v6, %v3024_v34 }
 0x20d   :  { %v844_v63 = vmax.f32 %v717_v45, 0.0  ;;  %763 = vmatmul.f32.gmra.mxu1 %v567_v53  ;;  %v1345_v45 = vld [vmem:[#allocation2 + $0x49] sm:$0xff] }
 0x20e   :  { %v6393_v4 = vadd.f32 %v6320_v14, %v3025_v44  ;;  %v1118_v14 = vld [vmem:[#allocation2 + $0x24f] sm:$0xff] }
 0x20f   :  { %1053 = vst [vmem:[#allocation2 + $0x268] sm:$0xff] %v844_v63  ;;  %3289 = vmatmul.f32.gmra.mxu3 %v844_v63 }
 0x210   :  { %v474_v0 = vpop.f32.mrf.mxu0  ;;  %8456 = vst [vmem:[#allocation8_spill] sm:$0xff] %v6393_v4  ;;  %3074 = vmatmul.f32.gmra.mxu2 %v1117_v56 }
 0x211   :  { %v475_v2 = vadd.f32 %v6175_v59, %v474_v0 }
 0x212   :  { %v719_v3 = vpop.f32.mrf.mxu1  ;;  %v6374_v12 = vpop.f32.mrf.mxu3 }
 0x213   :  { %v568_v10 = vmax.f32 %v475_v2, 0.0  ;;  %v720_v11 = vadd.f32 %v6342_v33, %v719_v3  ;;  %3399 = vmatmul.f32.gmra.mxu0 %v1342_v55  ;;  %v3027_v48 = vpop.f32.mrf.mxu2 }
 0x214   :  { %v3028_v61 = vadd.f32 %v6188_v6, %v3027_v48 }
 0x215   :  { %v845_v17 = vmax.f32 %v720_v11, 0.0  ;;  %766 = vmatmul.f32.gmra.mxu1 %v568_v10 }
 0x216   :  { %v6401_v41 = vadd.f32 %v6349_v38, %v3028_v61  ;;  %v1119_v38 = vld [vmem:[#allocation2 + $0x267] sm:$0xff] }
 0x217   :  { %1054 = vst [vmem:[#allocation2 + $0x270] sm:$0xff] %v845_v17  ;;  %3292 = vmatmul.f32.gmra.mxu3 %v845_v17 }
 0x218   :  { %v477_v20 = vpop.f32.mrf.mxu0  ;;  %8457 = vst [vmem:[#allocation9_spill] sm:$0xff] %v6401_v41  ;;  %3077 = vmatmul.f32.gmra.mxu2 %v1118_v14 }
 0x219   :  { %v478_v1 = vadd.f32 %v6175_v59, %v477_v20 }
 0x21a   :  { %v722_v22 = vpop.f32.mrf.mxu1  ;;  %v6382_v26 = vpop.f32.mrf.mxu3 }
 0x21b   :  { %v569_v25 = vmax.f32 %v478_v1, 0.0  ;;  %v723_v27 = vadd.f32 %v6342_v33, %v722_v22  ;;  %3402 = vmatmul.f32.gmra.mxu0 %v1343_v24  ;;  %v3030_v10 = vpop.f32.mrf.mxu2 }
 0x21c   :  { %v3031_v17 = vadd.f32 %v6188_v6, %v3030_v10 }
 0x21d   :  { %v846_v31 = vmax.f32 %v723_v27, 0.0  ;;  %769 = vmatmul.f32.gmra.mxu1 %v569_v25 }
 0x21e   :  { %v6409_v22 = vadd.f32 %v6366_v37, %v3031_v17  ;;  %v1120_v37 = vld [vmem:[#allocation2 + $0x26f] sm:$0xff] }
 0x21f   :  { %1055 = vst [vmem:[#allocation2 + $0x288] sm:$0xff] %v846_v31  ;;  %3295 = vmatmul.f32.gmra.mxu3 %v846_v31  ;;  %v1347_v31 = vld [vmem:[#allocation2 + $0x69] sm:$0xff] }
 0x220   :  { %v480_v32 = vpop.f32.mrf.mxu0  ;;  %8458 = vst [vmem:[#allocation10_spill] sm:$0xff] %v6409_v22  ;;  %3080 = vmatmul.f32.gmra.mxu2 %v1119_v38  ;;  %v1502_v13 = vld [vmem:[#allocation2 + $0x26f] sm:$0xff] }
 0x221   :  { %v481_v16 = vadd.f32 %v6175_v59, %v480_v32 }
 0x222   :  { %v725_v40 = vpop.f32.mrf.mxu1  ;;  %v6390_v47 = vpop.f32.mrf.mxu3 }
 0x223   :  { %v570_v46 = vmax.f32 %v481_v16, 0.0  ;;  %v726_v28 = vadd.f32 %v6342_v33, %v725_v40  ;;  %3405 = vmatmul.f32.gmra.mxu0 %v1344_v42  ;;  %v3033_v27 = vpop.f32.mrf.mxu2 }
 0x224   :  { %v3034_v32 = vadd.f32 %v6188_v6, %v3033_v27  ;;  %v1350_v27 = vld [vmem:[#allocation2 + $0x91] sm:$0xff] }
 0x225   :  { %v847_v50 = vmax.f32 %v726_v28, 0.0  ;;  %772 = vmatmul.f32.gmra.mxu1 %v570_v46 }
 0x226   :  { %v6417_v42 = vadd.f32 %v6374_v12, %v3034_v32  ;;  %v1121_v12 = vld [vmem:[#allocation2 + $0x287] sm:$0xff] }
 0x227   :  { %1056 = vst [vmem:[#allocation2 + $0x290] sm:$0xff] %v847_v50  ;;  %3298 = vmatmul.f32.gmra.mxu3 %v847_v50 }
 0x228   :  { %v483_v51 = vpop.f32.mrf.mxu0  ;;  %8459 = vst [vmem:[#allocation11_spill] sm:$0xff] %v6417_v42  ;;  %3083 = vmatmul.f32.gmra.mxu2 %v1120_v37 }
 0x229   :  { %v484_v52 = vadd.f32 %v6175_v59, %v483_v51  ;;  %v1348_v51 = vld [vmem:[#allocation2 + $0x71] sm:$0xff] }
 0x22a   :  { %v728_v53 = vpop.f32.mrf.mxu1  ;;  %v6398_v2 = vpop.f32.mrf.mxu3 }
 0x22b   :  { %v571_v63 = vmax.f32 %v484_v52, 0.0  ;;  %v729_v0 = vadd.f32 %v6342_v33, %v728_v53  ;;  %3408 = vmatmul.f32.gmra.mxu0 %v1345_v45  ;;  %v3036_v56 = vpop.f32.mrf.mxu2 }
 0x22c   :  { %v3037_v52 = vadd.f32 %v6188_v6, %v3036_v56 }
 0x22d   :  { %v848_v3 = vmax.f32 %v729_v0, 0.0  ;;  %775 = vmatmul.f32.gmra.mxu1 %v571_v63 }
 0x22e   :  { %v6425_v61 = vadd.f32 %v6382_v26, %v3037_v52  ;;  %v1122_v26 = vld [vmem:[#allocation2 + $0x28f] sm:$0xff] }
 0x22f   :  { %1057 = vst [vmem:[#allocation2 + $0x2a8] sm:$0xff] %v848_v3  ;;  %3301 = vmatmul.f32.gmra.mxu3 %v848_v3 }
 0x230   :  { %v486_v55 = vpop.f32.mrf.mxu0  ;;  %8460 = vst [vmem:[#allocation12_spill] sm:$0xff] %v6425_v61  ;;  %3086 = vmatmul.f32.gmra.mxu2 %v1121_v12 }
 0x231   :  { %v487_v7 = vadd.f32 %v6175_v59, %v486_v55 }
 0x232   :  { %v731_v11 = vpop.f32.mrf.mxu1  ;;  %v6406_v9 = vpop.f32.mrf.mxu3 }
 0x233   :  { %v572_v20 = vmax.f32 %v487_v7, 0.0  ;;  %v732_v1 = vadd.f32 %v6342_v33, %v731_v11  ;;  %3411 = vmatmul.f32.gmra.mxu0 %v1346_v21  ;;  %v3039_v3 = vpop.f32.mrf.mxu2  ;;  %v1349_v7 = vld [vmem:[#allocation2 + $0x89] sm:$0xff] }
 0x234   :  { %v3040_v10 = vadd.f32 %v6188_v6, %v3039_v3 }
 0x235   :  { %v849_v24 = vmax.f32 %v732_v1, 0.0  ;;  %778 = vmatmul.f32.gmra.mxu1 %v572_v20 }
 0x236   :  { %v6433_v20 = vadd.f32 %v6390_v47, %v3040_v10  ;;  %v1123_v47 = vld [vmem:[#allocation2 + $0x2a7] sm:$0xff] }
 0x237   :  { %1058 = vst [vmem:[#allocation2 + $0x2b0] sm:$0xff] %v849_v24  ;;  %3304 = vmatmul.f32.gmra.mxu3 %v849_v24 }
 0x238   :  { %v489_v54 = vpop.f32.mrf.mxu0  ;;  %8461 = vst [vmem:[#allocation13_spill] sm:$0xff] %v6433_v20  ;;  %3089 = vmatmul.f32.gmra.mxu2 %v1122_v26  ;;  %v6832_v20 = vld [vmem:[#allocation2 + $0x271] sm:$0xff] }
 0x239   :  { %v490_v25 = vadd.f32 %v6175_v59, %v489_v54 }
 0x23a   :  { %v734_v36 = vpop.f32.mrf.mxu1  ;;  %v6414_v40 = vpop.f32.mrf.mxu3 }
 0x23b   :  { %v573_v16 = vmax.f32 %v490_v25, 0.0  ;;  %v735_v34 = vadd.f32 %v6342_v33, %v734_v36  ;;  %3414 = vmatmul.f32.gmra.mxu0 %v1347_v31  ;;  %v3042_v54 = vpop.f32.mrf.mxu2 }
 0x23c   :  { %v3043_v36 = vadd.f32 %v6188_v6, %v3042_v54 }
 0x23d   :  { %v850_v44 = vmax.f32 %v735_v34, 0.0  ;;  %781 = vmatmul.f32.gmra.mxu1 %v573_v16 }
 0x23e   :  { %v6441_v34 = vadd.f32 %v6398_v2, %v3043_v36  ;;  %v1124_v2 = vld [vmem:[#allocation2 + $0x2af] sm:$0xff] }
 0x23f   :  { %1059 = vst [vmem:[#allocation2 + $0x2c8] sm:$0xff] %v850_v44  ;;  %3307 = vmatmul.f32.gmra.mxu3 %v850_v44  ;;  %v1353_v36 = vld [vmem:[#allocation2 + $0xc9] sm:$0xff] }
 0x240   :  { %v492_v46 = vpop.f32.mrf.mxu0  ;;  %8462 = vst [vmem:[#allocation14_spill] sm:$0xff] %v6441_v34  ;;  %3092 = vmatmul.f32.gmra.mxu2 %v1123_v47 }
 0x241   :  { %v493_v28 = vadd.f32 %v6175_v59, %v492_v46 }
 0x242   :  { %v737_v50 = vpop.f32.mrf.mxu1  ;;  %v6422_v45 = vpop.f32.mrf.mxu3 }
 0x243   :  { %v574_v48 = vmax.f32 %v493_v28, 0.0  ;;  %v738_v53 = vadd.f32 %v6342_v33, %v737_v50  ;;  %3417 = vmatmul.f32.gmra.mxu0 %v1348_v51  ;;  %v3045_v28 = vpop.f32.mrf.mxu2  ;;  %v1351_v50 = vld [vmem:[#allocation2 + $0xa9] sm:$0xff] }
 0x244   :  { %v3046_v51 = vadd.f32 %v6188_v6, %v3045_v28  ;;  %v2877_v28 = vld [vmem:[%s8434_s5 + $0x1f8] sm:$0xff] }
 0x245   :  { %v851_v63 = vmax.f32 %v738_v53, 0.0  ;;  %784 = vmatmul.f32.gmra.mxu1 %v574_v48 }
 0x246   :  { %v6449_v12 = vadd.f32 %v6406_v9, %v3046_v51  ;;  %v1125_v9 = vld [vmem:[#allocation2 + $0x2c7] sm:$0xff]  ;;  %3589 = vmatpush.msrb.mxu1 %v2877_v28 }
 0x247   :  { %1060 = vst [vmem:[#allocation2 + $0x2d0] sm:$0xff] %v851_v63  ;;  %3310 = vmatmul.f32.gmra.mxu3 %v851_v63 }
 0x248   :  { %v495_v0 = vpop.f32.mrf.mxu0  ;;  %8463 = vst [vmem:[#allocation15_spill] sm:$0xff] %v6449_v12  ;;  %3095 = vmatmul.f32.gmra.mxu2 %v1124_v2  ;;  %v1354_v2 = vld [vmem:[#allocation2 + $0xd1] sm:$0xff] }
 0x249   :  { %v496_v14 = vadd.f32 %v6175_v59, %v495_v0  ;;  %v1486_v12 = vld [vmem:[#allocation2 + $0x12f] sm:$0xff] }
 0x24a   :  { %v740_v55 = vpop.f32.mrf.mxu1  ;;  %v6430_v17 = vpop.f32.mrf.mxu3 }
 0x24b   :  { %v575_v11 = vmax.f32 %v496_v14, 0.0  ;;  %v741_v21 = vadd.f32 %v6342_v33, %v740_v55  ;;  %3420 = vmatmul.f32.gmra.mxu0 %v1349_v7  ;;  %v3048_v3 = vpop.f32.mrf.mxu2  ;;  %v1352_v7 = vld [vmem:[#allocation2 + $0xb1] sm:$0xff] }
 0x24c   :  { %v3049_v10 = vadd.f32 %v6188_v6, %v3048_v3  ;;  %v2874_v3 = vld [vmem:[%s8434_s5 + $0x1e0] sm:$0xff] }
 0x24d   :  { %v852_v1 = vmax.f32 %v741_v21, 0.0  ;;  %787 = vmatmul.f32.gmra.mxu1 %v575_v11 }
 0x24e   :  { %v6897_v4 = vld [vmem:[#allocation2 + $0x2c9] sm:$0xff] }
 0x24f   :  { %1061 = vst [vmem:[#allocation2 + $0x2e8] sm:$0xff] %v852_v1  ;;  %3313 = vmatmul.f32.gmra.mxu3 %v852_v1  ;;  %v6457_v1 = vadd.f32 %v6414_v40, %v3049_v10  ;;  %v1126_v40 = vld [vmem:[#allocation2 + $0x2cf] sm:$0xff] }
 0x250   :  { %v498_v38 = vpop.f32.mrf.mxu0  ;;  %3098 = vmatmul.f32.gmra.mxu2 %v1125_v9  ;;  %v2872_v9 = vld [vmem:[%s8434_s5 + $0x1d0] sm:$0xff]  ;;  %8509 = vst [vmem:[#allocation61_spill] sm:$0xff] %v6897_v4 }
 0x251   :  { %v499_v24 = vadd.f32 %v6175_v59, %v498_v38  ;;  %8464 = vst [vmem:[#allocation16_spill] sm:$0xff] %v6457_v1 }
 0x252   :  { %v743_v25 = vpop.f32.mrf.mxu1  ;;  %v6438_v16 = vpop.f32.mrf.mxu3 }
 0x253   :  { %v576_v31 = vmax.f32 %v499_v24, 0.0  ;;  %v744_v32 = vadd.f32 %v6342_v33, %v743_v25  ;;  %3423 = vmatmul.f32.gmra.mxu0 %v1350_v27  ;;  %v3051_v25 = vpop.f32.mrf.mxu2 }
 0x255   :  { %v853_v37 = vmax.f32 %v744_v32, 0.0  ;;  %790 = vmatmul.f32.gmra.mxu1 %v576_v31  ;;  %v3052_v31 = vadd.f32 %v6188_v6, %v3051_v25 }
 0x257   :  { %1062 = vst [vmem:[#allocation2 + $0x2f0] sm:$0xff] %v853_v37  ;;  %3316 = vmatmul.f32.gmra.mxu3 %v853_v37 }
 0x258   :  { %v501_v44 = vpop.f32.mrf.mxu0  ;;  %3101 = vmatmul.f32.gmra.mxu2 %v1126_v40 }
 0x259   :  { %v502_v46 = vadd.f32 %v6175_v59, %v501_v44  ;;  %v6465_v44 = vadd.f32 %v6422_v45, %v3052_v31  ;;  %v2875_v45 = vld [vmem:[%s8434_s5 + $0x1e8] sm:$0xff] }
 0x25a   :  { %v746_v56 = vpop.f32.mrf.mxu1  ;;  %v6446_v53 = vpop.f32.mrf.mxu3 }
 0x25b   :  { %v577_v52 = vmax.f32 %v502_v46, 0.0  ;;  %v747_v48 = vadd.f32 %v6342_v33, %v746_v56  ;;  %3426 = vmatmul.f32.gmra.mxu0 %v1351_v50  ;;  %8465 = vst [vmem:[#allocation17_spill] sm:$0xff] %v6465_v44  ;;  %v2876_v56 = vld [vmem:[%s8434_s5 + $0x1f0] sm:$0xff] }
 0x25c   :  { %3590 = vmatpush.msrb.mxu1 %v2876_v56  ;;  %v1374_v44 = vld [vmem:[#allocation2 + $0x251] sm:$0xff] }
 0x25d   :  { %v854_v63 = vmax.f32 %v747_v48, 0.0  ;;  %793 = vmatmul.f32.gmra.mxu1 %v577_v52  ;;  %v3054_v52 = vpop.f32.mrf.mxu2 }
 0x25e   :  { %3591 = vmatpush.msrb.mxu1 %v2875_v45  ;;  %v6936_v29 = vld [vmem:[#allocation2 + $0x2f1] sm:$0xff] }
 0x25f   :  { %1063 = vst [vmem:[#allocation2 + $0x308] sm:$0xff] %v854_v63  ;;  %3319 = vmatmul.f32.gmra.mxu3 %v854_v63  ;;  %v3055_v63 = vadd.f32 %v6188_v6, %v3054_v52 }
 0x260   :  { %v504_v0 = vpop.f32.mrf.mxu0  ;;  %3592 = vmatpush.msrb.mxu1 %v2874_v3  ;;  %8518 = vst [vmem:[#allocation70_spill] sm:$0xff] %v6936_v29 }
 0x261   :  { %v505_v14 = vadd.f32 %v6175_v59, %v504_v0  ;;  %v6485_v10 = vadd.f32 %v6430_v17, %v3055_v63  ;;  %v2871_v17 = vld [vmem:[%s8434_s5 + $0x1c8] sm:$0xff]  ;;  %v1356_v63 = vld [vmem:[#allocation2 + $0xf1] sm:$0xff] }
 0x262   :  { %v749_v55 = vpop.f32.mrf.mxu1  ;;  %v6454_v26 = vpop.f32.mrf.mxu3 }
 0x263   :  { %v578_v11 = vmax.f32 %v505_v14, 0.0  ;;  %v750_v21 = vadd.f32 %v6342_v33, %v749_v55  ;;  %3429 = vmatmul.f32.gmra.mxu0 %v1352_v7  ;;  %v1127_v7 = vld [vmem:[#allocation2 + $0x2e7] sm:$0xff]  ;;  %8466 = vst [vmem:[#allocation18_spill] sm:$0xff] %v6485_v10 }
 0x264   :  { %3104 = vmatmul.f32.gmra.mxu2 %v1127_v7  ;;  %v2866_v7 = vld [vmem:[%s8434_s5 + $0x1a0] sm:$0xff] }
 0x265   :  { %v855_v38 = vmax.f32 %v750_v21, 0.0  ;;  %796 = vmatmul.f32.gmra.mxu1 %v578_v11  ;;  %v2873_v21 = vld [vmem:[%s8434_s5 + $0x1d8] sm:$0xff] }
 0x266   :  { %3593 = vmatpush.msrb.mxu1 %v2873_v21 }
 0x267   :  { %1064 = vst [vmem:[#allocation2 + $0x310] sm:$0xff] %v855_v38  ;;  %3322 = vmatmul.f32.gmra.mxu3 %v855_v38 }
 0x268   :  { %v507_v24 = vpop.f32.mrf.mxu0  ;;  %3594 = vmatpush.msrb.mxu1 %v2872_v9 }
 0x269   :  { %v508_v54 = vadd.f32 %v6175_v59, %v507_v24 }
 0x26a   :  { %v752_v27 = vpop.f32.mrf.mxu1  ;;  %v6462_v37 = vpop.f32.mrf.mxu3  ;;  %3595 = vmatpush.msrb.mxu1 %v2871_v17 }
 0x26b   :  { %v579_v32 = vmax.f32 %v508_v54, 0.0  ;;  %v753_v47 = vadd.f32 %v6342_v33, %v752_v27  ;;  %3432 = vmatmul.f32.gmra.mxu0 %v1353_v36  ;;  %v3057_v54 = vpop.f32.mrf.mxu2  ;;  %v1355_v27 = vld [vmem:[#allocation2 + $0xe9] sm:$0xff] }
 0x26c   :  { %v3058_v36 = vadd.f32 %v6188_v6, %v3057_v54 }
 0x26d   :  { %v856_v46 = vmax.f32 %v753_v47, 0.0  ;;  %799 = vmatmul.f32.gmra.mxu1 %v579_v32  ;;  %v2870_v47 = vld [vmem:[%s8434_s5 + $0x1c0] sm:$0xff] }
 0x26e   :  { %3596 = vmatpush.msrb.mxu1 %v2870_v47  ;;  %v6505_v28 = vadd.f32 %v6438_v16, %v3058_v36  ;;  %v2867_v16 = vld [vmem:[%s8434_s5 + $0x1a8] sm:$0xff] }
 0x26f   :  { %1065 = vst [vmem:[#allocation2 + $0x328] sm:$0xff] %v856_v46  ;;  %3325 = vmatmul.f32.gmra.mxu3 %v856_v46  ;;  %v1128_v46 = vld [vmem:[#allocation2 + $0x2ef] sm:$0xff] }
 0x270   :  { %v510_v50 = vpop.f32.mrf.mxu0  ;;  %8467 = vst [vmem:[#allocation19_spill] sm:$0xff] %v6505_v28  ;;  %3107 = vmatmul.f32.gmra.mxu2 %v1128_v46  ;;  %v1130_v46 = vld [vmem:[#allocation2 + $0x30f] sm:$0xff] }
 0x271   :  { %v511_v51 = vadd.f32 %v6175_v59, %v510_v50  ;;  %v2869_v50 = vld [vmem:[%s8434_s5 + $0x1b8] sm:$0xff] }
 0x272   :  { %v755_v48 = vpop.f32.mrf.mxu1  ;;  %v6482_v55 = vpop.f32.mrf.mxu3  ;;  %3597 = vmatpush.msrb.mxu1 %v2869_v50 }
 0x273   :  { %v580_v0 = vmax.f32 %v511_v51, 0.0  ;;  %v756_v14 = vadd.f32 %v6342_v33, %v755_v48  ;;  %3435 = vmatmul.f32.gmra.mxu0 %v1354_v2  ;;  %v2868_v51 = vld [vmem:[%s8434_s5 + $0x1b0] sm:$0xff]  ;;  %v3060_v48 = vpop.f32.mrf.mxu2 }
 0x274   :  { %3598 = vmatpush.msrb.mxu1 %v2868_v51 }
 0x275   :  { %v857_v11 = vmax.f32 %v756_v14, 0.0  ;;  %802 = vmatmul.f32.gmra.mxu1 %v580_v0  ;;  %v3061_v0 = vadd.f32 %v6188_v6, %v3060_v48  ;;  %v6553_v48 = vld [vmem:[%s8435_s6] ss:$0 sm:$0xff] }
 0x276   :  { %3599 = vmatpush.msrb.mxu1 %v2867_v16  ;;  %v1358_v16 = vld [vmem:[#allocation2 + $0x111] sm:$0xff] }
 0x277   :  { %1066 = vst [vmem:[#allocation2 + $0x330] sm:$0xff] %v857_v11  ;;  %3328 = vmatmul.f32.gmra.mxu3 %v857_v11  ;;  %v6525_v21 = vadd.f32 %v6446_v53, %v3061_v0  ;;  %v2863_v53 = vld [vmem:[%s8434_s5 + $0x188] sm:$0xff] }
 0x278   :  { %v513_v38 = vpop.f32.mrf.mxu0  ;;  %3600 = vmatpush.msrb.mxu1 %v2866_v7  ;;  %v1131_v0 = vld [vmem:[#allocation2 + $0x327] sm:$0xff] }
 0x279   :  { %v514_v24 = vadd.f32 %v6175_v59, %v513_v38  ;;  %8468 = vst [vmem:[#allocation20_spill] sm:$0xff] %v6525_v21  ;;  %v2865_v38 = vld [vmem:[%s8434_s5 + $0x198] sm:$0xff]  ;;  %v1725_v21 = vld [vmem:[#allocation2 + $0x29] sm:$0xff] }
 0x27a   :  { %v758_v25 = vpop.f32.mrf.mxu1  ;;  %v6502_v40 = vpop.f32.mrf.mxu3  ;;  %3601 = vmatpush.msrb.mxu1 %v2865_v38 }
 0x27b   :  { %v581_v31 = vmax.f32 %v514_v24, 0.0  ;;  %v759_v32 = vadd.f32 %v6342_v33, %v758_v25  ;;  %3438 = vmatmul.f32.gmra.mxu0 %v1355_v27  ;;  %v2864_v24 = vld [vmem:[%s8434_s5 + $0x190] sm:$0xff]  ;;  %v3063_v54 = vpop.f32.mrf.mxu2 }
 0x27c   :  { %3602 = vmatpush.msrb.mxu1 %v2864_v24  ;;  %v1357_v27 = vld [vmem:[#allocation2 + $0x109] sm:$0xff]  ;;  %v3064_v36 = vadd.f32 %v6188_v6, %v3063_v54 }
 0x27d   :  { %v858_v56 = vmax.f32 %v759_v32, 0.0  ;;  %805 = vmatmul.f32.gmra.mxu1 %v581_v31  ;;  %v2862_v32 = vld [vmem:[%s8434_s5 + $0x180] sm:$0xff]  ;;  %v1359_v24 = vld [vmem:[#allocation2 + $0x129] sm:$0xff] }
 0x27e   :  { %3603 = vmatpush.msrb.mxu1 %v2863_v53  ;;  %v6546_v50 = vadd.f32 %v6454_v26, %v3064_v36 }
 0x27f   :  { %1067 = vst [vmem:[#allocation2 + $0x348] sm:$0xff] %v858_v56  ;;  %3331 = vmatmul.f32.gmra.mxu3 %v858_v56  ;;  %v1469_v56 = vld [vmem:[#allocation2 + $0x27] sm:$0xff] }
 0x280   :  { %v516_v45 = vpop.f32.mrf.mxu0  ;;  %3604 = vmatpush.msrb.mxu1 %v2862_v32  ;;  %8469 = vst [vmem:[#allocation21_spill] sm:$0xff] %v6546_v50  ;;  %v2894_v50 = vld [vmem:[%s8434_s5 + $0x280] sm:$0xff] }
 0x281   :  { %v517_v52 = vadd.f32 %v6175_v59, %v516_v45  ;;  %v1129_v59 = vld [vmem:[#allocation2 + $0x307] sm:$0xff] }
 0x282   :  { %v761_v2 = vpop.f32.mrf.mxu1  ;;  %v6522_v11 = vpop.f32.mrf.mxu3  ;;  %3110 = vmatmul.f32.gmra.mxu2 %v1129_v59 }
 0x283   :  { %v582_v14 = vmax.f32 %v517_v52, 0.0  ;;  %v762_v3 = vadd.f32 %v6342_v33, %v761_v2  ;;  %3441 = vmatmul.f32.gmra.mxu0 %v1356_v63  ;;  %v3066_v45 = vpop.f32.mrf.mxu2 }
 0x284   :  { %v3067_v2 = vadd.f32 %v6553_v48, %v3066_v45 }
 0x285   :  { %v859_v9 = vmax.f32 %v762_v3, 0.0  ;;  %808 = vmatmul.f32.gmra.mxu1 %v582_v14  ;;  %v1470_v14 = vld [vmem:[#allocation2 + $0x2f] sm:$0xff] }
 0x286   :  { %v6560_v3 = vadd.f32 %v6462_v37, %v3067_v2  ;;  %v1471_v37 = vld [vmem:[#allocation2 + $0x47] sm:$0xff] }
 0x287   :  { %1068 = vst [vmem:[#allocation2 + $0x350] sm:$0xff] %v859_v9  ;;  %3334 = vmatmul.f32.gmra.mxu3 %v859_v9  ;;  %v1133_v2 = vld [vmem:[#allocation2 + $0x347] sm:$0xff] }
 0x288   :  { %v6533_v17 = vpop.f32.mrf.mxu0  ;;  %8470 = vst [vmem:[#allocation22_spill] sm:$0xff] %v6560_v3  ;;  %v1483_v3 = vld [vmem:[#allocation2 + $0x107] sm:$0xff] }
 0x28a   :  { %v764_v25 = vpop.f32.mrf.mxu1  ;;  %v6543_v47 = vpop.f32.mrf.mxu3  ;;  %3113 = vmatmul.f32.gmra.mxu2 %v1130_v46 }
 0x28b   :  { %v765_v31 = vadd.f32 %v6342_v33, %v764_v25  ;;  %3444 = vmatmul.f32.gmra.mxu0 %v1357_v27  ;;  %v3069_v9 = vpop.f32.mrf.mxu2  ;;  %v1132_v27 = vld [vmem:[#allocation2 + $0x32f] sm:$0xff] }
 0x28c   :  { %v3070_v53 = vadd.f32 %v6553_v48, %v3069_v9 }
 0x28d   :  { %v860_v51 = vmax.f32 %v765_v31, 0.0  ;;  %3605 = vmatmul.f32.vlgmr.msrb.gmra.mxu1 %v1469_v56 }
 0x28e   :  { %v6569_v36 = vadd.f32 %v6482_v55, %v3070_v53  ;;  %v1472_v55 = vld [vmem:[#allocation2 + $0x4f] sm:$0xff] }
 0x28f   :  { %1069 = vst [vmem:[#allocation2 + $0x368] sm:$0xff] %v860_v51  ;;  %3337 = vmatmul.f32.gmra.mxu3 %v860_v51  ;;  %v1360_v51 = vld [vmem:[#allocation2 + $0x131] sm:$0xff] }
 0x290   :  { %v6548_v6 = vpop.f32.mrf.mxu0  ;;  %8471 = vst [vmem:[#allocation23_spill] sm:$0xff] %v6569_v36 }
 0x292   :  { %v767_v52 = vpop.f32.mrf.mxu1  ;;  %v6557_v63 = vpop.f32.mrf.mxu3  ;;  %3116 = vmatmul.f32.gmra.mxu2 %v1131_v0 }
 0x293   :  { %v768_v26 = vadd.f32 %v6342_v33, %v767_v52  ;;  %3447 = vmatmul.f32.gmra.mxu0 %v1358_v16  ;;  %v3072_v46 = vpop.f32.mrf.mxu2 }
 0x294   :  { %v3073_v45 = vadd.f32 %v6553_v48, %v3072_v46 }
 0x295   :  { %v861_v7 = vmax.f32 %v768_v26, 0.0  ;;  %3608 = vmatmul.f32.gmra.mxu1 %v1470_v14 }
 0x296   :  { %v6578_v26 = vadd.f32 %v6502_v40, %v3073_v45  ;;  %v1473_v40 = vld [vmem:[#allocation2 + $0x67] sm:$0xff]  ;;  %v1362_v45 = vld [vmem:[#allocation2 + $0x151] sm:$0xff] }
 0x297   :  { %1070 = vst [vmem:[#allocation2 + $0x370] sm:$0xff] %v861_v7  ;;  %3340 = vmatmul.f32.gmra.mxu3 %v861_v7 }
 0x298   :  { %v6562_v59 = vpop.f32.mrf.mxu0  ;;  %8472 = vst [vmem:[#allocation24_spill] sm:$0xff] %v6578_v26 }
 0x29a   :  { %v770_v38 = vpop.f32.mrf.mxu1  ;;  %v6566_v25 = vpop.f32.mrf.mxu3  ;;  %3119 = vmatmul.f32.gmra.mxu2 %v1132_v27  ;;  %v1134_v27 = vld [vmem:[#allocation2 + $0x34f] sm:$0xff] }
 0x29b   :  { %v771_v54 = vadd.f32 %v6342_v33, %v770_v38  ;;  %3450 = vmatmul.f32.gmra.mxu0 %v1359_v24  ;;  %v3075_v7 = vpop.f32.mrf.mxu2  ;;  %v1361_v38 = vld [vmem:[#allocation2 + $0x149] sm:$0xff] }
 0x29c   :  { %v3076_v24 = vadd.f32 %v6553_v48, %v3075_v7 }
 0x29d   :  { %v862_v31 = vmax.f32 %v771_v54, 0.0  ;;  %3611 = vmatmul.f32.gmra.mxu1 %v1471_v37 }
 0x29e   :  { %v6587_v37 = vadd.f32 %v6522_v11, %v3076_v24  ;;  %v1474_v11 = vld [vmem:[#allocation2 + $0x6f] sm:$0xff] }
 0x29f   :  { %1071 = vst [vmem:[#allocation2 + $0x388] sm:$0xff] %v862_v31  ;;  %3343 = vmatmul.f32.gmra.mxu3 %v862_v31 }
 0x2a0   :  { %v6571_v32 = vpop.f32.mrf.mxu0  ;;  %8473 = vst [vmem:[#allocation25_spill] sm:$0xff] %v6587_v37 }
 0x2a2   :  { %v773_v56 = vpop.f32.mrf.mxu1  ;;  %v6575_v16 = vpop.f32.mrf.mxu3  ;;  %3122 = vmatmul.f32.gmra.mxu2 %v1133_v2 }
 0x2a3   :  { %v774_v52 = vadd.f32 %v6342_v33, %v773_v56  ;;  %3453 = vmatmul.f32.gmra.mxu0 %v1360_v51  ;;  %v3078_v56 = vpop.f32.mrf.mxu2 }
 0x2a5   :  { %v863_v0 = vmax.f32 %v774_v52, 0.0  ;;  %3614 = vmatmul.f32.gmra.mxu1 %v1472_v55  ;;  %v3079_v52 = vadd.f32 %v6553_v48, %v3078_v56 }
 0x2a7   :  { %1072 = vst [vmem:[#allocation2 + $0x390] sm:$0xff] %v863_v0  ;;  %3346 = vmatmul.f32.gmra.mxu3 %v863_v0  ;;  %v1135_v0 = vld [vmem:[#allocation2 + $0x367] sm:$0xff]  ;;  %v6596_v7 = vadd.f32 %v6543_v47, %v3079_v52 }
 0x2a8   :  { %v6580_v14 = vpop.f32.mrf.mxu0  ;;  %v1475_v47 = vld [vmem:[#allocation2 + $0x87] sm:$0xff] }
 0x2a9   :  { %8474 = vst [vmem:[#allocation26_spill] sm:$0xff] %v6596_v7  ;;  %v1137_v7 = vld [vmem:[#allocation2 + $0x387] sm:$0xff] }
 0x2aa   :  { %v776_v9 = vpop.f32.mrf.mxu1  ;;  %v6584_v54 = vpop.f32.mrf.mxu3  ;;  %3125 = vmatmul.f32.gmra.mxu2 %v1134_v27  ;;  %v1363_v27 = vld [vmem:[#allocation2 + $0x169] sm:$0xff] }
 0x2ab   :  { %v777_v53 = vadd.f32 %v6342_v33, %v776_v9  ;;  %3456 = vmatmul.f32.gmra.mxu0 %v1361_v38  ;;  %v3081_v24 = vpop.f32.mrf.mxu2 }
 0x2ad   :  { %v864_v31 = vmax.f32 %v777_v53, 0.0  ;;  %3617 = vmatmul.f32.gmra.mxu1 %v1473_v40  ;;  %v3082_v40 = vadd.f32 %v6553_v48, %v3081_v24 }
 0x2ae   :  { %v1138_v37 = vld [vmem:[#allocation2 + $0x38f] sm:$0xff] }
 0x2af   :  { %1073 = vst [vmem:[#allocation2 + $0x3a8] sm:$0xff] %v864_v31  ;;  %3349 = vmatmul.f32.gmra.mxu3 %v864_v31 }
 0x2b0   :  { %v6589_v46 = vpop.f32.mrf.mxu0 }
 0x2b2   :  { %v779_v51 = vpop.f32.mrf.mxu1  ;;  %v6593_v55 = vpop.f32.mrf.mxu3  ;;  %3128 = vmatmul.f32.gmra.mxu2 %v1135_v0 }
 0x2b3   :  { %v780_v2 = vadd.f32 %v6342_v33, %v779_v51  ;;  %3459 = vmatmul.f32.gmra.mxu0 %v1362_v45  ;;  %v1136_v51 = vld [vmem:[#allocation2 + $0x36f] sm:$0xff]  ;;  %v6605_v45 = vadd.f32 %v6557_v63, %v3082_v40  ;;  %v3084_v0 = vpop.f32.mrf.mxu2 }
 0x2b4   :  { %v3085_v24 = vadd.f32 %v6553_v48, %v3084_v0  ;;  %v1476_v63 = vld [vmem:[#allocation2 + $0x8f] sm:$0xff] }
 0x2b5   :  { %v865_v9 = vmax.f32 %v780_v2, 0.0  ;;  %3620 = vmatmul.f32.gmra.mxu1 %v1474_v11  ;;  %8475 = vst [vmem:[#allocation27_spill] sm:$0xff] %v6605_v45  ;;  %v1365_v0 = vld [vmem:[#allocation2 + $0x189] sm:$0xff] }
 0x2b6   :  { %v6614_v40 = vadd.f32 %v6566_v25, %v3085_v24  ;;  %v1477_v25 = vld [vmem:[#allocation2 + $0xa7] sm:$0xff] }
 0x2b7   :  { %1074 = vst [vmem:[#allocation2 + $0x3b0] sm:$0xff] %v865_v9  ;;  %3352 = vmatmul.f32.gmra.mxu3 %v865_v9  ;;  %v1364_v9 = vld [vmem:[#allocation2 + $0x171] sm:$0xff]  ;;  %v1139_v26 = vld [vmem:[#allocation2 + $0x3a7] sm:$0xff] }
 0x2b8   :  { %v6598_v38 = vpop.f32.mrf.mxu0  ;;  %8476 = vst [vmem:[#allocation28_spill] sm:$0xff] %v6614_v40 }
 0x2ba   :  { %v782_v53 = vpop.f32.mrf.mxu1  ;;  %v6602_v56 = vpop.f32.mrf.mxu3  ;;  %3131 = vmatmul.f32.gmra.mxu2 %v1136_v51 }
 0x2bb   :  { %v783_v31 = vadd.f32 %v6342_v33, %v782_v53  ;;  %3462 = vmatmul.f32.gmra.mxu0 %v1363_v27 }
 0x2bd   :  { %v866_v52 = vmax.f32 %v783_v31, 0.0  ;;  %3623 = vmatmul.f32.gmra.mxu1 %v1475_v47  ;;  %v3087_v47 = vpop.f32.mrf.mxu2 }
 0x2be   :  { %v1140_v36 = vld [vmem:[#allocation2 + $0x3af] sm:$0xff] }
 0x2bf   :  { %1075 = vst [vmem:[#allocation2 + $0x3c8] sm:$0xff] %v866_v52  ;;  %3355 = vmatmul.f32.gmra.mxu3 %v866_v52 }
 0x2c0   :  { %v6607_v2 = vpop.f32.mrf.mxu0 }
 0x2c2   :  { %v785_v11 = vpop.f32.mrf.mxu1  ;;  %v6611_v27 = vpop.f32.mrf.mxu3  ;;  %3134 = vmatmul.f32.gmra.mxu2 %v1137_v7 }
 0x2c3   :  { %v786_v53 = vadd.f32 %v6342_v33, %v785_v11  ;;  %3465 = vmatmul.f32.gmra.mxu0 %v1364_v9  ;;  %v3088_v11 = vadd.f32 %v6553_v48, %v3087_v47  ;;  %v1366_v47 = vld [vmem:[#allocation2 + $0x191] sm:$0xff] }
 0x2c5   :  { %v867_v31 = vmax.f32 %v786_v53, 0.0  ;;  %3626 = vmatmul.f32.gmra.mxu1 %v1476_v63  ;;  %v6623_v24 = vadd.f32 %v6575_v16, %v3088_v11  ;;  %v3090_v63 = vpop.f32.mrf.mxu2  ;;  %v1478_v16 = vld [vmem:[#allocation2 + $0xaf] sm:$0xff] }
 0x2c7   :  { %1076 = vst [vmem:[#allocation2 + $0x3d0] sm:$0xff] %v867_v31  ;;  %3358 = vmatmul.f32.gmra.mxu3 %v867_v31 }
 0x2c8   :  { %v6616_v51 = vpop.f32.mrf.mxu0  ;;  %8477 = vst [vmem:[#allocation29_spill] sm:$0xff] %v6623_v24 }
 0x2ca   :  { %v788_v52 = vpop.f32.mrf.mxu1  ;;  %v6620_v45 = vpop.f32.mrf.mxu3  ;;  %3137 = vmatmul.f32.gmra.mxu2 %v1138_v37 }
 0x2cb   :  { %v789_v9 = vadd.f32 %v6342_v33, %v788_v52  ;;  %3468 = vmatmul.f32.gmra.mxu0 %v1365_v0  ;;  %v3091_v52 = vadd.f32 %v6553_v48, %v3090_v63  ;;  %v1367_v63 = vld [vmem:[#allocation2 + $0x1a9] sm:$0xff] }
 0x2cd   :  { %v868_v7 = vmax.f32 %v789_v9, 0.0  ;;  %3629 = vmatmul.f32.gmra.mxu1 %v1477_v25  ;;  %v6632_v11 = vadd.f32 %v6584_v54, %v3091_v52  ;;  %v3093_v25 = vpop.f32.mrf.mxu2  ;;  %v1479_v54 = vld [vmem:[#allocation2 + $0xc7] sm:$0xff] }
 0x2cf   :  { %1077 = vst [vmem:[#allocation2 + $0x3e8] sm:$0xff] %v868_v7  ;;  %3361 = vmatmul.f32.gmra.mxu3 %v868_v7 }
 0x2d0   :  { %v6625_v53 = vpop.f32.mrf.mxu0  ;;  %8478 = vst [vmem:[#allocation30_spill] sm:$0xff] %v6632_v11 }
 0x2d2   :  { %v791_v31 = vpop.f32.mrf.mxu1  ;;  %v6629_v40 = vpop.f32.mrf.mxu3  ;;  %3140 = vmatmul.f32.gmra.mxu2 %v1139_v26 }
 0x2d3   :  { %v792_v0 = vadd.f32 %v6342_v33, %v791_v31  ;;  %3471 = vmatmul.f32.gmra.mxu0 %v1366_v47  ;;  %v3094_v31 = vadd.f32 %v6553_v48, %v3093_v25 }
 0x2d5   :  { %v869_v37 = vmax.f32 %v792_v0, 0.0  ;;  %3632 = vmatmul.f32.gmra.mxu1 %v1478_v16  ;;  %v6641_v52 = vadd.f32 %v6593_v55, %v3094_v31  ;;  %v2909_v0 = vld [vmem:[%s8434_s5 + $0x2f8] sm:$0xff]  ;;  %v3096_v25 = vpop.f32.mrf.mxu2 }
 0x2d6   :  { %4007 = vmatpush.msrb.mxu3 %v2909_v0  ;;  %v1368_v55 = vld [vmem:[#allocation2 + $0x1b1] sm:$0xff]  ;;  %v1143_v11 = vld [vmem:[#allocation2 + $0x3e7] sm:$0xff] }
 0x2d7   :  { %1078 = vst [vmem:[#allocation2 + $0x3f0] sm:$0xff] %v869_v37  ;;  %3364 = vmatmul.f32.gmra.mxu3 %v869_v37  ;;  %v2908_v37 = vld [vmem:[%s8434_s5 + $0x2f0] sm:$0xff] }
 0x2d8   :  { %v6634_v9 = vpop.f32.mrf.mxu0  ;;  %8479 = vst [vmem:[#allocation31_spill] sm:$0xff] %v6641_v52  ;;  %4008 = vmatpush.msrb.mxu3 %v2908_v37  ;;  %v2893_v37 = vld [vmem:[%s8434_s5 + $0x278] sm:$0xff] }
 0x2d9   :  { %3798 = vmatpush.msrb.mxu2 %v2893_v37  ;;  %v2891_v37 = vld [vmem:[%s8434_s5 + $0x268] sm:$0xff] }
 0x2da   :  { %v794_v7 = vpop.f32.mrf.mxu1  ;;  %v6638_v24 = vpop.f32.mrf.mxu3  ;;  %3143 = vmatmul.f32.gmra.mxu2 %v1140_v36 }
 0x2db   :  { %v795_v47 = vadd.f32 %v6342_v33, %v794_v7  ;;  %3474 = vmatmul.f32.gmra.mxu0 %v1367_v63  ;;  %v3097_v63 = vadd.f32 %v6553_v48, %v3096_v25 }
 0x2dd   :  { %v870_v26 = vmax.f32 %v795_v47, 0.0  ;;  %3635 = vmatmul.f32.gmra.mxu1 %v1479_v54  ;;  %v2907_v47 = vld [vmem:[%s8434_s5 + $0x2e8] sm:$0xff]  ;;  %v6659_v0 = vadd.f32 %v6602_v56, %v3097_v63  ;;  %v2905_v56 = vld [vmem:[%s8434_s5 + $0x2d8] sm:$0xff]  ;;  %v3099_v63 = vpop.f32.mrf.mxu2 }
 0x2de   :  { %v1141_v54 = vld [vmem:[#allocation2 + $0x3c7] sm:$0xff]  ;;  %4009 = vmatpush.msrb.mxu3 %v2907_v47 }
 0x2df   :  { %1079 = vst [vmem:[#allocation2 + $0x408] sm:$0xff] %v870_v26  ;;  %3367 = vmatmul.f32.gmra.mxu3 %v870_v26  ;;  %v1480_v26 = vld [vmem:[#allocation2 + $0xcf] sm:$0xff] }
 0x2e0   :  { %v6646_v16 = vpop.f32.mrf.mxu0  ;;  %8480 = vst [vmem:[#allocation32_spill] sm:$0xff] %v6659_v0  ;;  %v1369_v47 = vld [vmem:[#allocation2 + $0x1c9] sm:$0xff] }
 0x2e2   :  { %v797_v7 = vpop.f32.mrf.mxu1  ;;  %v6653_v31 = vpop.f32.mrf.mxu3  ;;  %3146 = vmatmul.f32.gmra.mxu2 %v1141_v54  ;;  %v6682_v54 = vld [vmem:[%s8433_s4] ss:$0 sm:$0xff] }
 0x2e3   :  { %v798_v36 = vadd.f32 %v6342_v33, %v797_v7  ;;  %3477 = vmatmul.f32.gmra.mxu0 %v1368_v55  ;;  %v2906_v33 = vld [vmem:[%s8434_s5 + $0x2e0] sm:$0xff]  ;;  %v2892_v7 = vld [vmem:[%s8434_s5 + $0x270] sm:$0xff] }
 0x2e4   :  { %4010 = vmatpush.msrb.mxu3 %v2906_v33  ;;  %v2904_v55 = vld [vmem:[%s8434_s5 + $0x2d0] sm:$0xff]  ;;  %3799 = vmatpush.msrb.mxu2 %v2892_v7 }
 0x2e5   :  { %v871_v52 = vmax.f32 %v798_v36, 0.0  ;;  %3638 = vmatmul.f32.gmra.mxu1 %v1480_v26  ;;  %v1142_v7 = vld [vmem:[#allocation2 + $0x3cf] sm:$0xff] }
 0x2e6   :  { %4011 = vmatpush.msrb.mxu3 %v2905_v56  ;;  %v2903_v56 = vld [vmem:[%s8434_s5 + $0x2c8] sm:$0xff]  ;;  %3800 = vmatpush.msrb.mxu2 %v2891_v37  ;;  %v2889_v37 = vld [vmem:[%s8434_s5 + $0x258] sm:$0xff] }
 0x2e7   :  { %1080 = vst [vmem:[#allocation2 + $0x410] sm:$0xff] %v871_v52  ;;  %3370 = vmatmul.f32.gmra.mxu3 %v871_v52  ;;  %v3100_v52 = vadd.f32 %v6553_v48, %v3099_v63 }
 0x2e8   :  { %v6670_v25 = vpop.f32.mrf.mxu0  ;;  %4012 = vmatpush.msrb.mxu3 %v2904_v55  ;;  %v1481_v55 = vld [vmem:[#allocation2 + $0xe7] sm:$0xff] }
 0x2e9   :  { %v6694_v63 = vadd.f32 %v6611_v27, %v3100_v52  ;;  %v2901_v27 = vld [vmem:[%s8434_s5 + $0x2b8] sm:$0xff] }
 0x2ea   :  { %v800_v36 = vpop.f32.mrf.mxu1  ;;  %v6688_v33 = vpop.f32.mrf.mxu3  ;;  %4013 = vmatpush.msrb.mxu3 %v2903_v56  ;;  %3149 = vmatmul.f32.gmra.mxu2 %v1142_v7  ;;  %v2900_v56 = vld [vmem:[%s8434_s5 + $0x2b0] sm:$0xff] }
 0x2eb   :  { %v801_v26 = vadd.f32 %v6682_v54, %v800_v36  ;;  %3480 = vmatmul.f32.gmra.mxu0 %v1369_v47  ;;  %8481 = vst [vmem:[#allocation33_spill] sm:$0xff] %v6694_v63  ;;  %v2890_v36 = vld [vmem:[%s8434_s5 + $0x260] sm:$0xff]  ;;  %v3102_v7 = vpop.f32.mrf.mxu2  ;;  %v2899_v63 = vld [vmem:[%s8434_s5 + $0x2a8] sm:$0xff] }
 0x2ec   :  { %v2902_v47 = vld [vmem:[%s8434_s5 + $0x2c0] sm:$0xff]  ;;  %3801 = vmatpush.msrb.mxu2 %v2890_v36  ;;  %v3103_v36 = vadd.f32 %v6553_v48, %v3102_v7 }
 0x2ed   :  { %v872_v0 = vmax.f32 %v801_v26, 0.0  ;;  %3641 = vmatmul.f32.gmra.mxu1 %v1481_v55  ;;  %4014 = vmatpush.msrb.mxu3 %v2902_v47  ;;  %v2888_v26 = vld [vmem:[%s8434_s5 + $0x250] sm:$0xff] }
 0x2ee   :  { %3802 = vmatpush.msrb.mxu2 %v2889_v37  ;;  %v2887_v37 = vld [vmem:[%s8434_s5 + $0x248] sm:$0xff] }
 0x2ef   :  { %1081 = vst [vmem:[#allocation2 + $0x428] sm:$0xff] %v872_v0  ;;  %3373 = vmatmul.f32.gmra.mxu3 %v872_v0  ;;  %v1370_v0 = vld [vmem:[#allocation2 + $0x1d1] sm:$0xff] }
 0x2f0   :  { %v6708_v52 = vpop.f32.mrf.mxu0  ;;  %4015 = vmatpush.msrb.mxu3 %v2901_v27  ;;  %3803 = vmatpush.msrb.mxu2 %v2888_v26  ;;  %v1482_v26 = vld [vmem:[#allocation2 + $0xef] sm:$0xff] }
 0x2f1   :  { %8482 = vst [vmem:[#allocation34_spill] sm:$0xff] %v6708_v52  ;;  %v6962_v52 = vld [vmem:[#allocation2 + $0x311] sm:$0xff] }
 0x2f2   :  { %v803_v55 = vpop.f32.mrf.mxu1  ;;  %4016 = vmatpush.msrb.mxu3 %v2900_v56  ;;  %v6721_v27 = vpop.f32.mrf.mxu3  ;;  %3804 = vmatpush.msrb.mxu2 %v2887_v37  ;;  %v6727_v56 = vadd.f32 %v6620_v45, %v3103_v36  ;;  %v2897_v45 = vld [vmem:[%s8434_s5 + $0x298] sm:$0xff]  ;;  %8525 = vst [vmem:[#allocation77_spill] sm:$0xff] %v6962_v52 }
 0x2f3   :  { %v804_v47 = vadd.f32 %v6682_v54, %v803_v55  ;;  %3483 = vmatmul.f32.gmra.mxu0 %v1370_v0  ;;  %v2886_v55 = vld [vmem:[%s8434_s5 + $0x240] sm:$0xff]  ;;  %3152 = vmatmul.f32.gmra.mxu2 %v1143_v11  ;;  %v2896_v11 = vld [vmem:[%s8434_s5 + $0x290] sm:$0xff]  ;;  %v3105_v37 = vpop.f32.mrf.mxu2 }
 0x2f4   :  { %4017 = vmatpush.msrb.mxu3 %v2899_v63  ;;  %8483 = vst [vmem:[#allocation35_spill] sm:$0xff] %v6727_v56  ;;  %v2898_v0 = vld [vmem:[%s8434_s5 + $0x2a0] sm:$0xff]  ;;  %3805 = vmatpush.msrb.mxu2 %v2886_v55  ;;  %v2885_v63 = vld [vmem:[%s8434_s5 + $0x238] sm:$0xff]  ;;  %v3106_v55 = vadd.f32 %v6553_v48, %v3105_v37  ;;  %v2895_v56 = vld [vmem:[%s8434_s5 + $0x288] sm:$0xff] }
 0x2f5   :  { %v873_v7 = vmax.f32 %v804_v47, 0.0  ;;  %3644 = vmatmul.f32.gmra.mxu1 %v1482_v26  ;;  %v2884_v47 = vld [vmem:[%s8434_s5 + $0x230] sm:$0xff] }
 0x2f6   :  { %4018 = vmatpush.msrb.mxu3 %v2898_v0  ;;  %3806 = vmatpush.msrb.mxu2 %v2885_v63  ;;  %v2883_v63 = vld [vmem:[%s8434_s5 + $0x228] sm:$0xff] }
 0x2f7   :  { %1082 = vst [vmem:[#allocation2 + $0x430] sm:$0xff] %v873_v7  ;;  %3376 = vmatmul.f32.gmra.mxu3 %v873_v7  ;;  %v6749_v7 = vld [vmem:[#allocation2 + $0x1e9] sm:$0xff] }
 0x2f8   :  { %v6741_v36 = vpop.f32.mrf.mxu0  ;;  %4019 = vmatpush.msrb.mxu3 %v2897_v45  ;;  %3807 = vmatpush.msrb.mxu2 %v2884_v47  ;;  %v1144_v47 = vld [vmem:[#allocation2 + $0x3ef] sm:$0xff]  ;;  %v1147_v1 = vld [vmem:[#allocation2 + $0x427] sm:$0xff] }
 0x2f9   :  { %8484 = vst [vmem:[#allocation36_spill] sm:$0xff] %v6741_v36  ;;  %v6923_v36 = vld [vmem:[#allocation2 + $0x2e9] sm:$0xff] }
 0x2fa   :  { %v806_v26 = vpop.f32.mrf.mxu1  ;;  %4020 = vmatpush.msrb.mxu3 %v2896_v11  ;;  %v6757_v45 = vpop.f32.mrf.mxu3  ;;  %3808 = vmatpush.msrb.mxu2 %v2883_v63  ;;  %v6763_v11 = vadd.f32 %v6629_v40, %v3106_v55  ;;  %v2881_v40 = vld [vmem:[%s8434_s5 + $0x218] sm:$0xff]  ;;  %8515 = vst [vmem:[#allocation67_spill] sm:$0xff] %v6923_v36 }
 0x2fb   :  { %v807_v0 = vadd.f32 %v6682_v54, %v806_v26  ;;  %3486 = vmatmul.f32.gmra.mxu0 %v6749_v7  ;;  %v2882_v26 = vld [vmem:[%s8434_s5 + $0x220] sm:$0xff]  ;;  %3155 = vmatmul.f32.gmra.mxu2 %v1144_v47  ;;  %v3108_v55 = vpop.f32.mrf.mxu2  ;;  %v6779_v63 = vld [vmem:[#allocation2 + $0x1f1] sm:$0xff] }
 0x2fc   :  { %4021 = vmatpush.msrb.mxu3 %v2895_v56  ;;  %8485 = vst [vmem:[#allocation37_spill] sm:$0xff] %v6763_v11  ;;  %3809 = vmatpush.msrb.mxu2 %v2882_v26  ;;  %v1145_v26 = vld [vmem:[#allocation2 + $0x407] sm:$0xff] }
 0x2fd   :  { %v874_v37 = vmax.f32 %v807_v0, 0.0  ;;  %3647 = vmatmul.f32.gmra.mxu1 %v1483_v3  ;;  %v2880_v3 = vld [vmem:[%s8434_s5 + $0x210] sm:$0xff] }
 0x2fe   :  { %4022 = vmatpush.msrb.mxu3 %v2894_v50  ;;  %3810 = vmatpush.msrb.mxu2 %v2881_v40  ;;  %v3109_v50 = vadd.f32 %v6553_v48, %v3108_v55  ;;  %v1484_v40 = vld [vmem:[#allocation2 + $0x10f] sm:$0xff] }
 0x2ff   :  { %1083 = vst [vmem:[#allocation2 + $0x448] sm:$0xff] %v874_v37  ;;  %4023 = vmatmul.f32.vlgmr.msrb.gmra.mxu3 %v1725_v21  ;;  %v2879_v21 = vld [vmem:[%s8434_s5 + $0x208] sm:$0xff]  ;;  %v1726_v55 = vld [vmem:[#allocation2 + $0x31] sm:$0xff] }
 0x300   :  { %v6774_v56 = vpop.f32.mrf.mxu0  ;;  %3811 = vmatpush.msrb.mxu2 %v2880_v3  ;;  %v6790_v11 = vadd.f32 %v6638_v24, %v3109_v50  ;;  %v1148_v34 = vld [vmem:[#allocation2 + $0x42f] sm:$0xff] }
 0x301   :  { %8486 = vst [vmem:[#allocation38_spill] sm:$0xff] %v6774_v56  ;;  %v6884_v56 = vld [vmem:[#allocation2 + $0x2b1] sm:$0xff] }
 0x302   :  { %v809_v0 = vpop.f32.mrf.mxu1  ;;  %v6787_v37 = vpop.f32.mrf.mxu3  ;;  %3812 = vmatpush.msrb.mxu2 %v2879_v21  ;;  %8487 = vst [vmem:[#allocation39_spill] sm:$0xff] %v6790_v11  ;;  %v1373_v21 = vld [vmem:[#allocation2 + $0x249] sm:$0xff] }
 0x303   :  { %v810_v47 = vadd.f32 %v6682_v54, %v809_v0  ;;  %3489 = vmatmul.f32.gmra.mxu0 %v6779_v63  ;;  %v2878_v54 = vld [vmem:[%s8434_s5 + $0x200] sm:$0xff]  ;;  %3158 = vmatmul.f32.gmra.mxu2 %v1145_v26  ;;  %v1727_v26 = vld [vmem:[#allocation2 + $0x49] sm:$0xff]  ;;  %8506 = vst [vmem:[#allocation58_spill] sm:$0xff] %v6884_v56 }
 0x304   :  { %3813 = vmatpush.msrb.mxu2 %v2878_v54 }
 0x305   :  { %v875_v3 = vmax.f32 %v810_v47, 0.0  ;;  %3650 = vmatmul.f32.gmra.mxu1 %v1484_v40  ;;  %v3111_v28 = vpop.f32.mrf.mxu2  ;;  %v1146_v47 = vld [vmem:[#allocation2 + $0x40f] sm:$0xff]  ;;  %v1485_v40 = vld [vmem:[#allocation2 + $0x127] sm:$0xff] }
 0x306   :  { %v3112_v24 = vadd.f32 %v6553_v48, %v3111_v28 }
 0x307   :  { %1084 = vst [vmem:[#allocation2 + $0x450] sm:$0xff] %v875_v3  ;;  %4026 = vmatmul.f32.gmra.mxu3 %v1726_v55 }
 0x308   :  { %v6795_v0 = vpop.f32.mrf.mxu0  ;;  %v6803_v11 = vadd.f32 %v6653_v31, %v3112_v24  ;;  %v1728_v24 = vld [vmem:[#allocation2 + $0x51] sm:$0xff] }
 0x309   :  { %8488 = vst [vmem:[#allocation40_spill] sm:$0xff] %v6795_v0  ;;  %v6871_v0 = vld [vmem:[#allocation2 + $0x2a9] sm:$0xff] }
 0x30a   :  { %v6797_v10 = vpop.f32.mrf.mxu1  ;;  %v6800_v50 = vpop.f32.mrf.mxu3  ;;  %8489 = vst [vmem:[#allocation41_spill] sm:$0xff] %v6803_v11  ;;  %v6819_v11 = vld [vmem:[#allocation2 + $0x269] sm:$0xff] }
 0x30b   :  { %3492 = vmatmul.f32.gmra.mxu0 %v1373_v21  ;;  %3161 = vmatmul.f32.gmra.mxu2 %v1146_v47  ;;  %8503 = vst [vmem:[#allocation55_spill] sm:$0xff] %v6871_v0 }
 0x30d   :  { %3653 = vmatmul.f32.gmra.mxu1 %v1485_v40  ;;  %v3114_v54 = vpop.f32.mrf.mxu2 }
 0x30e   :  { %v3115_v28 = vadd.f32 %v6553_v48, %v3114_v54 }
 0x30f   :  { %4029 = vmatmul.f32.gmra.mxu3 %v1727_v26 }
 0x310   :  { %v6805_v3 = vpop.f32.mrf.mxu0  ;;  %v6813_v31 = vadd.f32 %v6688_v33, %v3115_v28  ;;  %v1487_v33 = vld [vmem:[#allocation2 + $0x147] sm:$0xff] }
 0x311   :  { %8490 = vst [vmem:[#allocation42_spill] sm:$0xff] %v6805_v3  ;;  %v6858_v3 = vld [vmem:[#allocation2 + $0x291] sm:$0xff] }
 0x312   :  { %v6807_v55 = vpop.f32.mrf.mxu1  ;;  %v6810_v21 = vpop.f32.mrf.mxu3  ;;  %8491 = vst [vmem:[#allocation43_spill] sm:$0xff] %v6813_v31 }
 0x313   :  { %3495 = vmatmul.f32.gmra.mxu0 %v1374_v44  ;;  %3164 = vmatmul.f32.gmra.mxu2 %v1147_v1  ;;  %v1729_v1 = vld [vmem:[#allocation2 + $0x69] sm:$0xff]  ;;  %8500 = vst [vmem:[#allocation52_spill] sm:$0xff] %v6858_v3 }
 0x315   :  { %3656 = vmatmul.f32.gmra.mxu1 %v1486_v12  ;;  %v3117_v40 = vpop.f32.mrf.mxu2 }
 0x316   :  { %v3118_v44 = vadd.f32 %v6553_v48, %v3117_v40 }
 0x317   :  { %4032 = vmatmul.f32.gmra.mxu3 %v1728_v24 }
 0x318   :  { %v6815_v47 = vpop.f32.mrf.mxu0  ;;  %v6826_v12 = vadd.f32 %v6721_v27, %v3118_v44  ;;  %v1730_v44 = vld [vmem:[#allocation2 + $0x71] sm:$0xff] }
 0x319   :  { %8492 = vst [vmem:[#allocation44_spill] sm:$0xff] %v6815_v47  ;;  %v1488_v47 = vld [vmem:[#allocation2 + $0x14f] sm:$0xff] }
 0x31a   :  { %v6817_v26 = vpop.f32.mrf.mxu1  ;;  %v6823_v54 = vpop.f32.mrf.mxu3  ;;  %8493 = vst [vmem:[#allocation45_spill] sm:$0xff] %v6826_v12 }
 0x31b   :  { %3498 = vmatmul.f32.gmra.mxu0 %v6819_v11  ;;  %3167 = vmatmul.f32.gmra.mxu2 %v1148_v34  ;;  %v1597_v34 = vld [vmem:[#allocation2 + $0x28] sm:$0xff] }
 0x31d   :  { %3659 = vmatmul.f32.gmra.mxu1 %v1487_v33  ;;  %v3120_v24 = vpop.f32.mrf.mxu2 }
 0x31e   :  { %v3121_v40 = vadd.f32 %v6553_v48, %v3120_v24 }
 0x31f   :  { %4035 = vmatmul.f32.gmra.mxu3 %v1729_v1 }
 0x320   :  { %v6828_v28 = vpop.f32.mrf.mxu0  ;;  %v6839_v27 = vadd.f32 %v6757_v45, %v3121_v40  ;;  %v1489_v45 = vld [vmem:[#allocation2 + $0x167] sm:$0xff]  ;;  %v1598_v40 = vld [vmem:[#allocation2 + $0x30] sm:$0xff] }
 0x321   :  { %8494 = vst [vmem:[#allocation46_spill] sm:$0xff] %v6828_v28  ;;  %v6845_v28 = vld [vmem:[#allocation2 + $0x289] sm:$0xff] }
 0x322   :  { %v6830_v31 = vpop.f32.mrf.mxu1  ;;  %v6836_v61 = vpop.f32.mrf.mxu3  ;;  %8495 = vst [vmem:[#allocation47_spill] sm:$0xff] %v6839_v27 }
 0x323   :  { %3501 = vmatmul.f32.gmra.mxu0 %v6832_v20  ;;  %3814 = vmatmul.f32.vlgmr.msrb.gmra.mxu2 %v1597_v34  ;;  %8497 = vst [vmem:[#allocation49_spill] sm:$0xff] %v6845_v28  ;;  %v1731_v34 = vld [vmem:[#allocation2 + $0x89] sm:$0xff] }
 0x325   :  { %3662 = vmatmul.f32.gmra.mxu1 %v1488_v47  ;;  %v3123_v1 = vpop.f32.mrf.mxu2 }
 0x326   :  { %v3124_v24 = vadd.f32 %v6553_v48, %v3123_v1 }
 0x327   :  { %4038 = vmatmul.f32.gmra.mxu3 %v1730_v44 }
 0x328   :  { %v6841_v33 = vpop.f32.mrf.mxu0  ;;  %v6852_v47 = vadd.f32 %v6787_v37, %v3124_v24  ;;  %v1490_v37 = vld [vmem:[#allocation2 + $0x16f] sm:$0xff] }
 0x329   :  { %8496 = vst [vmem:[#allocation48_spill] sm:$0xff] %v6841_v33 }
 0x32a   :  { %v6843_v12 = vpop.f32.mrf.mxu1  ;;  %v6849_v42 = vpop.f32.mrf.mxu3  ;;  %8498 = vst [vmem:[#allocation50_spill] sm:$0xff] %v6852_v47 }
 0x32b   :  { %3504 = vmatmul.f32.gmra.mxu0 %v6845_v28  ;;  %3817 = vmatmul.f32.gmra.mxu2 %v1598_v40  ;;  %v1732_v40 = vld [vmem:[#allocation2 + $0x91] sm:$0xff]  ;;  %v6949_v28 = vld [vmem:[#allocation2 + $0x309] sm:$0xff] }
 0x32c   :  { %8521 = vst [vmem:[#allocation73_spill] sm:$0xff] %v6949_v28 }
 0x32d   :  { %3665 = vmatmul.f32.gmra.mxu1 %v1489_v45  ;;  %v3126_v27 = vpop.f32.mrf.mxu2  ;;  %v1599_v45 = vld [vmem:[#allocation2 + $0x48] sm:$0xff] }
 0x32e   :  { %v3127_v1 = vadd.f32 %v6553_v48, %v3126_v27 }
 0x32f   :  { %4041 = vmatmul.f32.gmra.mxu3 %v1731_v34 }
 0x330   :  { %v6854_v44 = vpop.f32.mrf.mxu0  ;;  %v6865_v24 = vadd.f32 %v6800_v50, %v3127_v1  ;;  %v1491_v50 = vld [vmem:[#allocation2 + $0x187] sm:$0xff] }
 0x331   :  { %8499 = vst [vmem:[#allocation51_spill] sm:$0xff] %v6854_v44 }
 0x332   :  { %v6856_v33 = vpop.f32.mrf.mxu1  ;;  %v6862_v22 = vpop.f32.mrf.mxu3  ;;  %8501 = vst [vmem:[#allocation53_spill] sm:$0xff] %v6865_v24 }
 0x333   :  { %3507 = vmatmul.f32.gmra.mxu0 %v6858_v3  ;;  %3820 = vmatmul.f32.gmra.mxu2 %v1599_v45  ;;  %v1733_v45 = vld [vmem:[#allocation2 + $0xa9] sm:$0xff]  ;;  %v6910_v3 = vld [vmem:[#allocation2 + $0x2d1] sm:$0xff] }
 0x334   :  { %8512 = vst [vmem:[#allocation64_spill] sm:$0xff] %v6910_v3 }
 0x335   :  { %3668 = vmatmul.f32.gmra.mxu1 %v1490_v37  ;;  %v3129_v47 = vpop.f32.mrf.mxu2  ;;  %v1600_v37 = vld [vmem:[#allocation2 + $0x50] sm:$0xff] }
 0x336   :  { %v3130_v27 = vadd.f32 %v6553_v48, %v3129_v47 }
 0x337   :  { %4044 = vmatmul.f32.gmra.mxu3 %v1732_v40 }
 0x338   :  { %v6867_v34 = vpop.f32.mrf.mxu0  ;;  %v6878_v1 = vadd.f32 %v6810_v21, %v3130_v27  ;;  %v1492_v21 = vld [vmem:[#allocation2 + $0x18f] sm:$0xff] }
 0x339   :  { %8502 = vst [vmem:[#allocation54_spill] sm:$0xff] %v6867_v34 }
 0x33a   :  { %v6869_v44 = vpop.f32.mrf.mxu1  ;;  %v6875_v41 = vpop.f32.mrf.mxu3  ;;  %8504 = vst [vmem:[#allocation56_spill] sm:$0xff] %v6878_v1 }
 0x33b   :  { %3510 = vmatmul.f32.gmra.mxu0 %v6871_v0  ;;  %3823 = vmatmul.f32.gmra.mxu2 %v1600_v37  ;;  %v1734_v37 = vld [vmem:[#allocation2 + $0xb1] sm:$0xff] }
 0x33d   :  { %3671 = vmatmul.f32.gmra.mxu1 %v1491_v50  ;;  %v3132_v24 = vpop.f32.mrf.mxu2  ;;  %v1601_v50 = vld [vmem:[#allocation2 + $0x68] sm:$0xff] }
 0x33e   :  { %v3133_v47 = vadd.f32 %v6553_v48, %v3132_v24 }
 0x33f   :  { %4047 = vmatmul.f32.gmra.mxu3 %v1733_v45 }
 0x340   :  { %v6880_v40 = vpop.f32.mrf.mxu0  ;;  %v6891_v27 = vadd.f32 %v6823_v54, %v3133_v47  ;;  %v1493_v54 = vld [vmem:[#allocation2 + $0x1a7] sm:$0xff] }
 0x341   :  { %8505 = vst [vmem:[#allocation57_spill] sm:$0xff] %v6880_v40 }
 0x342   :  { %v6882_v34 = vpop.f32.mrf.mxu1  ;;  %v6888_v0 = vpop.f32.mrf.mxu3  ;;  %8507 = vst [vmem:[#allocation59_spill] sm:$0xff] %v6891_v27 }
 0x343   :  { %3513 = vmatmul.f32.gmra.mxu0 %v6884_v56  ;;  %3826 = vmatmul.f32.gmra.mxu2 %v1601_v50  ;;  %v1735_v50 = vld [vmem:[#allocation2 + $0xc9] sm:$0xff] }
 0x345   :  { %3674 = vmatmul.f32.gmra.mxu1 %v1492_v21  ;;  %v3135_v1 = vpop.f32.mrf.mxu2  ;;  %v1602_v21 = vld [vmem:[#allocation2 + $0x70] sm:$0xff] }
 0x346   :  { %v3136_v24 = vadd.f32 %v6553_v48, %v3135_v1 }
 0x347   :  { %4050 = vmatmul.f32.gmra.mxu3 %v1734_v37 }
 0x348   :  { %v6893_v45 = vpop.f32.mrf.mxu0  ;;  %v6904_v47 = vadd.f32 %v6836_v61, %v3136_v24  ;;  %v1494_v61 = vld [vmem:[#allocation2 + $0x1af] sm:$0xff] }
 0x349   :  { %8508 = vst [vmem:[#allocation60_spill] sm:$0xff] %v6893_v45 }
 0x34a   :  { %v6895_v40 = vpop.f32.mrf.mxu1  ;;  %v6901_v56 = vpop.f32.mrf.mxu3  ;;  %8510 = vst [vmem:[#allocation62_spill] sm:$0xff] %v6904_v47 }
 0x34b   :  { %3516 = vmatmul.f32.gmra.mxu0 %v6897_v4  ;;  %3829 = vmatmul.f32.gmra.mxu2 %v1602_v21  ;;  %v1736_v21 = vld [vmem:[#allocation2 + $0xd1] sm:$0xff] }
 0x34d   :  { %3677 = vmatmul.f32.gmra.mxu1 %v1493_v54  ;;  %v3138_v27 = vpop.f32.mrf.mxu2  ;;  %v1603_v54 = vld [vmem:[#allocation2 + $0x88] sm:$0xff] }
 0x34e   :  { %v3139_v1 = vadd.f32 %v6553_v48, %v3138_v27 }
 0x34f   :  { %4053 = vmatmul.f32.gmra.mxu3 %v1735_v50 }
 0x350   :  { %v6906_v37 = vpop.f32.mrf.mxu0  ;;  %v6917_v24 = vadd.f32 %v6849_v42, %v3139_v1  ;;  %v1495_v42 = vld [vmem:[#allocation2 + $0x1c7] sm:$0xff] }
 0x351   :  { %8511 = vst [vmem:[#allocation63_spill] sm:$0xff] %v6906_v37 }
 0x352   :  { %v6908_v45 = vpop.f32.mrf.mxu1  ;;  %v6914_v4 = vpop.f32.mrf.mxu3  ;;  %8513 = vst [vmem:[#allocation65_spill] sm:$0xff] %v6917_v24 }
 0x353   :  { %3519 = vmatmul.f32.gmra.mxu0 %v6910_v3  ;;  %3832 = vmatmul.f32.gmra.mxu2 %v1603_v54  ;;  %v1737_v54 = vld [vmem:[#allocation2 + $0xe9] sm:$0xff] }
 0x355   :  { %3680 = vmatmul.f32.gmra.mxu1 %v1494_v61  ;;  %v3141_v47 = vpop.f32.mrf.mxu2  ;;  %v1604_v61 = vld [vmem:[#allocation2 + $0x90] sm:$0xff] }
 0x356   :  { %v3142_v27 = vadd.f32 %v6553_v48, %v3141_v47 }
 0x357   :  { %4056 = vmatmul.f32.gmra.mxu3 %v1736_v21 }
 0x358   :  { %v6919_v50 = vpop.f32.mrf.mxu0  ;;  %v6930_v1 = vadd.f32 %v6862_v22, %v3142_v27  ;;  %v1496_v22 = vld [vmem:[#allocation2 + $0x1cf] sm:$0xff] }
 0x359   :  { %8514 = vst [vmem:[#allocation66_spill] sm:$0xff] %v6919_v50 }
 0x35a   :  { %v6921_v37 = vpop.f32.mrf.mxu1  ;;  %v6927_v3 = vpop.f32.mrf.mxu3  ;;  %8516 = vst [vmem:[#allocation68_spill] sm:$0xff] %v6930_v1 }
 0x35b   :  { %3522 = vmatmul.f32.gmra.mxu0 %v6923_v36  ;;  %3835 = vmatmul.f32.gmra.mxu2 %v1604_v61  ;;  %v1738_v61 = vld [vmem:[#allocation2 + $0xf1] sm:$0xff] }
 0x35d   :  { %3683 = vmatmul.f32.gmra.mxu1 %v1495_v42  ;;  %v3144_v24 = vpop.f32.mrf.mxu2  ;;  %v1605_v42 = vld [vmem:[#allocation2 + $0xa8] sm:$0xff] }
 0x35e   :  { %v3145_v47 = vadd.f32 %v6553_v48, %v3144_v24 }
 0x35f   :  { %4059 = vmatmul.f32.gmra.mxu3 %v1737_v54 }
 0x360   :  { %v6932_v21 = vpop.f32.mrf.mxu0  ;;  %v6943_v27 = vadd.f32 %v6875_v41, %v3145_v47  ;;  %v1497_v41 = vld [vmem:[#allocation2 + $0x1e7] sm:$0xff] }
 0x361   :  { %8517 = vst [vmem:[#allocation69_spill] sm:$0xff] %v6932_v21 }
 0x362   :  { %v6934_v50 = vpop.f32.mrf.mxu1  ;;  %v6940_v36 = vpop.f32.mrf.mxu3  ;;  %8519 = vst [vmem:[#allocation71_spill] sm:$0xff] %v6943_v27 }
 0x363   :  { %3525 = vmatmul.f32.gmra.mxu0 %v6936_v29  ;;  %3838 = vmatmul.f32.gmra.mxu2 %v1605_v42  ;;  %v1739_v42 = vld [vmem:[#allocation2 + $0x109] sm:$0xff] }
 0x365   :  { %3686 = vmatmul.f32.gmra.mxu1 %v1496_v22  ;;  %v3147_v1 = vpop.f32.mrf.mxu2  ;;  %v1606_v22 = vld [vmem:[#allocation2 + $0xb0] sm:$0xff] }
 0x366   :  { %v3148_v24 = vadd.f32 %v6553_v48, %v3147_v1 }
 0x367   :  { %4062 = vmatmul.f32.gmra.mxu3 %v1738_v61 }
 0x368   :  { %v6945_v54 = vpop.f32.mrf.mxu0  ;;  %v6956_v47 = vadd.f32 %v6888_v0, %v3148_v24  ;;  %v1498_v0 = vld [vmem:[#allocation2 + $0x1ef] sm:$0xff] }
 0x369   :  { %8520 = vst [vmem:[#allocation72_spill] sm:$0xff] %v6945_v54 }
 0x36a   :  { %v6947_v21 = vpop.f32.mrf.mxu1  ;;  %v6953_v29 = vpop.f32.mrf.mxu3  ;;  %8522 = vst [vmem:[#allocation74_spill] sm:$0xff] %v6956_v47 }
 0x36b   :  { %3528 = vmatmul.f32.gmra.mxu0 %v6949_v28  ;;  %3841 = vmatmul.f32.gmra.mxu2 %v1606_v22  ;;  %v1740_v22 = vld [vmem:[#allocation2 + $0x111] sm:$0xff] }
 0x36d   :  { %3689 = vmatmul.f32.gmra.mxu1 %v1497_v41  ;;  %v3150_v27 = vpop.f32.mrf.mxu2  ;;  %v1607_v41 = vld [vmem:[#allocation2 + $0xc8] sm:$0xff] }
 0x36e   :  { %v3151_v1 = vadd.f32 %v6553_v48, %v3150_v27 }
 0x36f   :  { %4065 = vmatmul.f32.gmra.mxu3 %v1739_v42 }
 0x370   :  { %v6958_v61 = vpop.f32.mrf.mxu0  ;;  %v6969_v24 = vadd.f32 %v6901_v56, %v3151_v1  ;;  %v1499_v56 = vld [vmem:[#allocation2 + $0x207] sm:$0xff] }
 0x371   :  { %8523 = vst [vmem:[#allocation75_spill] sm:$0xff] %v6958_v61 }
 0x372   :  { %v6960_v54 = vpop.f32.mrf.mxu1  ;;  %v6966_v28 = vpop.f32.mrf.mxu3  ;;  %8526 = vst [vmem:[#allocation78_spill] sm:$0xff] %v6969_v24 }
 0x373   :  { %8524 = vst [vmem:[#allocation76_spill] sm:$0xff] %v6960_v54  ;;  %3531 = vmatmul.f32.gmra.mxu0 %v6962_v52  ;;  %3844 = vmatmul.f32.gmra.mxu2 %v1607_v41  ;;  %v6975_v54 = vld [vmem:[#allocation2 + $0x329] sm:$0xff] }
 0x374   :  { %8529 = vst [vmem:[#allocation81_spill] sm:$0xff] %v6975_v54  ;;  %v1741_v41 = vld [vmem:[#allocation2 + $0x129] sm:$0xff] }
 0x375   :  { %3692 = vmatmul.f32.gmra.mxu1 %v1498_v0  ;;  %v1608_v0 = vld [vmem:[#allocation2 + $0xd0] sm:$0xff] }
 0x376   :  { %v3153_v47 = vpop.f32.mrf.mxu2 }
 0x377   :  { %4068 = vmatmul.f32.gmra.mxu3 %v1740_v22  ;;  %v3154_v27 = vadd.f32 %v6553_v48, %v3153_v47  ;;  %v6993_v48 = vld [vmem:[%s8435_s6] ss:$0 sm:$0xff] }
 0x378   :  { %v6971_v42 = vpop.f32.mrf.mxu0 }
 0x379   :  { %8527 = vst [vmem:[#allocation79_spill] sm:$0xff] %v6971_v42  ;;  %v6982_v1 = vadd.f32 %v6914_v4, %v3154_v27  ;;  %v1500_v27 = vld [vmem:[#allocation2 + $0x20f] sm:$0xff] }
 0x37a   :  { %v6973_v61 = vpop.f32.mrf.mxu1  ;;  %v6979_v52 = vpop.f32.mrf.mxu3 }
 0x37b   :  { %8528 = vst [vmem:[#allocation80_spill] sm:$0xff] %v6973_v61  ;;  %3534 = vmatmul.f32.gmra.mxu0 %v6975_v54  ;;  %3847 = vmatmul.f32.gmra.mxu2 %v1608_v0  ;;  %v6988_v61 = vld [vmem:[#allocation2 + $0x331] sm:$0xff]  ;;  %v1609_v0 = vld [vmem:[#allocation2 + $0xe8] sm:$0xff] }
 0x37c   :  { %8530 = vst [vmem:[#allocation82_spill] sm:$0xff] %v6982_v1 }
 0x37d   :  { %3695 = vmatmul.f32.gmra.mxu1 %v1499_v56  ;;  %8533 = vst [vmem:[#allocation85_spill] sm:$0xff] %v6988_v61 }
 0x37e   :  { %v3156_v24 = vpop.f32.mrf.mxu2 }
 0x37f   :  { %4071 = vmatmul.f32.gmra.mxu3 %v1741_v41  ;;  %v3157_v4 = vadd.f32 %v6993_v48, %v3156_v24  ;;  %v1742_v41 = vld [vmem:[#allocation2 + $0x131] sm:$0xff] }
 0x380   :  { %v6984_v22 = vpop.f32.mrf.mxu0 }
 0x381   :  { %8531 = vst [vmem:[#allocation83_spill] sm:$0xff] %v6984_v22  ;;  %v7000_v56 = vadd.f32 %v6927_v3, %v3157_v4  ;;  %v1501_v3 = vld [vmem:[#allocation2 + $0x267] sm:$0xff] }
 0x382   :  { %v6986_v42 = vpop.f32.mrf.mxu1  ;;  %v6997_v47 = vpop.f32.mrf.mxu3 }
 0x383   :  { %8532 = vst [vmem:[#allocation84_spill] sm:$0xff] %v6986_v42  ;;  %3537 = vmatmul.f32.gmra.mxu0 %v6988_v61  ;;  %3850 = vmatmul.f32.gmra.mxu2 %v1609_v0  ;;  %v7006_v42 = vld [vmem:[#allocation2 + $0x349] sm:$0xff] }
 0x384   :  { %8534 = vst [vmem:[#allocation86_spill] sm:$0xff] %v7000_v56  ;;  %v1743_v0 = vld [vmem:[#allocation2 + $0x149] sm:$0xff] }
 0x385   :  { %3698 = vmatmul.f32.gmra.mxu1 %v1500_v27  ;;  %8537 = vst [vmem:[#allocation89_spill] sm:$0xff] %v7006_v42  ;;  %v1610_v27 = vld [vmem:[#allocation2 + $0xf0] sm:$0xff] }
 0x386   :  { %v3159_v22 = vpop.f32.mrf.mxu2 }
 0x387   :  { %4074 = vmatmul.f32.gmra.mxu3 %v1742_v41  ;;  %v3160_v24 = vadd.f32 %v6993_v48, %v3159_v22 }
 0x388   :  { %v7002_v1 = vpop.f32.mrf.mxu0 }
 0x389   :  { %8535 = vst [vmem:[#allocation87_spill] sm:$0xff] %v7002_v1  ;;  %v7013_v4 = vadd.f32 %v6940_v36, %v3160_v24  ;;  %v1611_v24 = vld [vmem:[#allocation2 + $0x108] sm:$0xff] }
 0x38a   :  { %v7004_v54 = vpop.f32.mrf.mxu1  ;;  %v7010_v61 = vpop.f32.mrf.mxu3 }
 0x38b   :  { %8536 = vst [vmem:[#allocation88_spill] sm:$0xff] %v7004_v54  ;;  %3540 = vmatmul.f32.gmra.mxu0 %v7006_v42  ;;  %3853 = vmatmul.f32.gmra.mxu2 %v1610_v27  ;;  %v1390_v54 = vld [vmem:[#allocation2 + $0x351] sm:$0xff] }
 0x38c   :  { %8538 = vst [vmem:[#allocation90_spill] sm:$0xff] %v7013_v4 }
 0x38d   :  { %3701 = vmatmul.f32.gmra.mxu1 %v1501_v3  ;;  %v1744_v3 = vld [vmem:[#allocation2 + $0x151] sm:$0xff] }
 0x38e   :  { %v3162_v56 = vpop.f32.mrf.mxu2 }
 0x38f   :  { %4077 = vmatmul.f32.gmra.mxu3 %v1743_v0  ;;  %v3163_v22 = vadd.f32 %v6993_v48, %v3162_v56 }
 0x390   :  { %v7015_v41 = vpop.f32.mrf.mxu0 }
 0x391   :  { %8539 = vst [vmem:[#allocation91_spill] sm:$0xff] %v7015_v41  ;;  %v7023_v36 = vadd.f32 %v6953_v29, %v3163_v22  ;;  %v1391_v41 = vld [vmem:[#allocation2 + $0x369] sm:$0xff] }
 0x392   :  { %v7017_v1 = vpop.f32.mrf.mxu1  ;;  %v7020_v42 = vpop.f32.mrf.mxu3  ;;  %v1745_v22 = vld [vmem:[#allocation2 + $0x169] sm:$0xff] }
 0x393   :  { %8540 = vst [vmem:[#allocation92_spill] sm:$0xff] %v7017_v1  ;;  %3543 = vmatmul.f32.gmra.mxu0 %v1390_v54  ;;  %3856 = vmatmul.f32.gmra.mxu2 %v1611_v24  ;;  %v1503_v1 = vld [vmem:[#allocation2 + $0x287] sm:$0xff] }
 0x394   :  { %8541 = vst [vmem:[#allocation93_spill] sm:$0xff] %v7023_v36 }
 0x395   :  { %3704 = vmatmul.f32.gmra.mxu1 %v1502_v13  ;;  %v1612_v13 = vld [vmem:[#allocation2 + $0x110] sm:$0xff] }
 0x396   :  { %v3165_v0 = vpop.f32.mrf.mxu2 }
 0x397   :  { %4080 = vmatmul.f32.gmra.mxu3 %v1744_v3  ;;  %v3166_v56 = vadd.f32 %v6993_v48, %v3165_v0  ;;  %v2980_v3 = vadd.f32 %v6993_v48, %v6160_v49 }
 0x398   :  { %v7025_v27 = vpop.f32.mrf.mxu0 }
 0x399   :  { %8542 = vst [vmem:[#allocation94_spill] sm:$0xff] %v7025_v27  ;;  %v7033_v29 = vadd.f32 %v6966_v28, %v3166_v56  ;;  %v1504_v28 = vld [vmem:[#allocation2 + $0x28f] sm:$0xff] }
 0x39a   :  { %v7027_v4 = vpop.f32.mrf.mxu1  ;;  %v7030_v54 = vpop.f32.mrf.mxu3 }
 0x39b   :  { %8543 = vst [vmem:[#allocation95_spill] sm:$0xff] %v7027_v4  ;;  %3546 = vmatmul.f32.gmra.mxu0 %v1391_v41  ;;  %3859 = vmatmul.f32.gmra.mxu2 %v1612_v13  ;;  %v1392_v41 = vld [vmem:[#allocation2 + $0x371] sm:$0xff]  ;;  %v1613_v13 = vld [vmem:[#allocation2 + $0x128] sm:$0xff] }
 0x39c   :  { %8544 = vst [vmem:[#allocation96_spill] sm:$0xff] %v7033_v29 }
 0x39d   :  { %3707 = vmatmul.f32.gmra.mxu1 %v1503_v1  ;;  %v3189_v1 = vadd.f32 %v6124_v5, %v2980_v3  ;;  %v1393_v5 = vld [vmem:[#allocation2 + $0x389] sm:$0xff] }
 0x39e   :  { %v3168_v36 = vpop.f32.mrf.mxu2 }
 0x39f   :  { %4083 = vmatmul.f32.gmra.mxu3 %v1745_v22  ;;  %v3169_v0 = vadd.f32 %v6993_v48, %v3168_v36  ;;  %v1746_v22 = vld [vmem:[#allocation2 + $0x171] sm:$0xff]  ;;  %v3398_v49 = vadd.f32 %v6533_v17, %v3189_v1  ;;  %v2983_v36 = vadd.f32 %v6993_v48, %v6170_v58 }
 0x3a0   :  { %v7035_v24 = vpop.f32.mrf.mxu0  ;;  %v1614_v1 = vld [vmem:[#allocation2 + $0x130] sm:$0xff] }
 0x3a1   :  { %8545 = vst [vmem:[#allocation97_spill] sm:$0xff] %v7035_v24  ;;  %v7046_v56 = vadd.f32 %v6979_v52, %v3169_v0  ;;  %v1505_v0 = vld [vmem:[#allocation2 + $0x2a7] sm:$0xff]  ;;  %v3192_v17 = vadd.f32 %v6132_v15, %v2983_v36 }
 0x3a2   :  { %v7039_v27 = vpop.f32.mrf.mxu1  ;;  %v7042_v4 = vpop.f32.mrf.mxu3 }
 0x3a3   :  { %8546 = vst [vmem:[#allocation98_spill] sm:$0xff] %v7039_v27  ;;  %3549 = vmatmul.f32.gmra.mxu0 %v1392_v41  ;;  %3862 = vmatmul.f32.gmra.mxu2 %v1613_v13  ;;  %v3607_v41 = vadd.f32 %v6797_v10, %v3398_v49  ;;  %v1747_v13 = vld [vmem:[#allocation2 + $0x189] sm:$0xff]  ;;  %v3401_v58 = vadd.f32 %v6548_v6, %v3192_v17  ;;  %v1394_v49 = vld [vmem:[#allocation2 + $0x391] sm:$0xff] }
 0x3a4   :  { %8547 = vst [vmem:[#allocation99_spill] sm:$0xff] %v7046_v56  ;;  %v1615_v6 = vld [vmem:[#allocation2 + $0x148] sm:$0xff] }
 0x3a5   :  { %3710 = vmatmul.f32.gmra.mxu1 %v1504_v28  ;;  %v3610_v48 = vadd.f32 %v6807_v55, %v3401_v58 }
 0x3a6   :  { %v3815_v24 = vpop.f32.mrf.mxu2 }
 0x3a7   :  { %4086 = vmatmul.f32.gmra.mxu3 %v1746_v22  ;;  %v3816_v52 = vadd.f32 %v3815_v24, %v3607_v41 }
 0x3a8   :  { %v7049_v29 = vpop.f32.mrf.mxu0 }
 0x3a9   :  { %v7060_v28 = vadd.f32 %v6997_v47, %v3816_v52  ;;  %v1506_v47 = vld [vmem:[#allocation2 + $0x2af] sm:$0xff]  ;;  %v3404_v52 = vadd.f32 %v6562_v59, %v6200_v18 }
 0x3aa   :  { %v7054_v27 = vpop.f32.mrf.mxu1  ;;  %v7056_v3 = vpop.f32.mrf.mxu3  ;;  %v1616_v18 = vld [vmem:[#allocation2 + $0x150] sm:$0xff] }
 0x3ab   :  { %3552 = vmatmul.f32.gmra.mxu0 %v1393_v5  ;;  %8548 = vst [vmem:[#allocation100_spill] sm:$0xff] %v7060_v28  ;;  %3865 = vmatmul.f32.gmra.mxu2 %v1614_v1  ;;  %v1748_v5 = vld [vmem:[#allocation2 + $0x191] sm:$0xff]  ;;  %v1749_v59 = vld [vmem:[#allocation2 + $0x1a9] sm:$0xff] }
 0x3ad   :  { %3713 = vmatmul.f32.gmra.mxu1 %v1505_v0  ;;  %v3613_v0 = vadd.f32 %v6817_v26, %v3404_v52 }
 0x3ae   :  { %v3818_v24 = vpop.f32.mrf.mxu2 }
 0x3af   :  { %4089 = vmatmul.f32.gmra.mxu3 %v1747_v13  ;;  %v3819_v41 = vadd.f32 %v3818_v24, %v3610_v48  ;;  %v1395_v13 = vld [vmem:[#allocation2 + $0x3a9] sm:$0xff] }
 0x3b0   :  { %v7063_v10 = vpop.f32.mrf.mxu0  ;;  %v1507_v48 = vld [vmem:[#allocation2 + $0x2c7] sm:$0xff] }
 0x3b1   :  { %v7071_v36 = vadd.f32 %v7010_v61, %v3819_v41 }
 0x3b2   :  { %v7066_v22 = vpop.f32.mrf.mxu1  ;;  %v7068_v15 = vpop.f32.mrf.mxu3 }
 0x3b3   :  { %3555 = vmatmul.f32.gmra.mxu0 %v1394_v49  ;;  %8549 = vst [vmem:[#allocation101_spill] sm:$0xff] %v7071_v36  ;;  %3868 = vmatmul.f32.gmra.mxu2 %v1615_v6  ;;  %v3407_v49 = vadd.f32 %v6571_v32, %v6212_v30  ;;  %v1617_v30 = vld [vmem:[#allocation2 + $0x168] sm:$0xff]  ;;  %v1750_v32 = vld [vmem:[#allocation2 + $0x1b1] sm:$0xff] }
 0x3b5   :  { %3716 = vmatmul.f32.gmra.mxu1 %v1506_v47  ;;  %v3616_v41 = vadd.f32 %v6830_v31, %v3407_v49 }
 0x3b6   :  { %v3821_v17 = vpop.f32.mrf.mxu2 }
 0x3b7   :  { %4092 = vmatmul.f32.gmra.mxu3 %v1748_v5  ;;  %v3822_v58 = vadd.f32 %v3821_v17, %v3613_v0  ;;  %v1396_v5 = vld [vmem:[#allocation2 + $0x3b1] sm:$0xff] }
 0x3b8   :  { %v7075_v55 = vpop.f32.mrf.mxu0  ;;  %v1508_v0 = vld [vmem:[#allocation2 + $0x2cf] sm:$0xff] }
 0x3b9   :  { %v7083_v24 = vadd.f32 %v7020_v42, %v3822_v58 }
 0x3ba   :  { %v7078_v1 = vpop.f32.mrf.mxu1  ;;  %v7080_v61 = vpop.f32.mrf.mxu3 }
 0x3bb   :  { %3558 = vmatmul.f32.gmra.mxu0 %v1395_v13  ;;  %8550 = vst [vmem:[#allocation102_spill] sm:$0xff] %v7083_v24  ;;  %3871 = vmatmul.f32.gmra.mxu2 %v1616_v18  ;;  %v3410_v13 = vadd.f32 %v6580_v14, %v6224_v43  ;;  %v1618_v43 = vld [vmem:[#allocation2 + $0x170] sm:$0xff] }
 0x3bc   :  { %v1751_v14 = vld [vmem:[#allocation2 + $0x1c9] sm:$0xff] }
 0x3bd   :  { %3719 = vmatmul.f32.gmra.mxu1 %v1507_v48  ;;  %v3619_v58 = vadd.f32 %v6843_v12, %v3410_v13 }
 0x3be   :  { %v3824_v47 = vpop.f32.mrf.mxu2 }
 0x3bf   :  { %4095 = vmatmul.f32.gmra.mxu3 %v1749_v59  ;;  %v3825_v52 = vadd.f32 %v3824_v47, %v3616_v41  ;;  %v1397_v59 = vld [vmem:[#allocation2 + $0x3c9] sm:$0xff] }
 0x3c0   :  { %v7087_v26 = vpop.f32.mrf.mxu0  ;;  %v1509_v41 = vld [vmem:[#allocation2 + $0x2e7] sm:$0xff] }
 0x3c1   :  { %v7095_v17 = vadd.f32 %v7030_v54, %v3825_v52 }
 0x3c2   :  { %v7090_v6 = vpop.f32.mrf.mxu1  ;;  %v7092_v42 = vpop.f32.mrf.mxu3 }
 0x3c3   :  { %3561 = vmatmul.f32.gmra.mxu0 %v1396_v5  ;;  %8551 = vst [vmem:[#allocation103_spill] sm:$0xff] %v7095_v17  ;;  %3874 = vmatmul.f32.gmra.mxu2 %v1617_v30  ;;  %v3413_v5 = vadd.f32 %v6589_v46, %v6236_v57  ;;  %v1619_v57 = vld [vmem:[#allocation2 + $0x188] sm:$0xff]  ;;  %v1752_v46 = vld [vmem:[#allocation2 + $0x1d1] sm:$0xff] }
 0x3c5   :  { %3722 = vmatmul.f32.gmra.mxu1 %v1508_v0  ;;  %v3622_v52 = vadd.f32 %v6856_v33, %v3413_v5 }
 0x3c6   :  { %v3827_v48 = vpop.f32.mrf.mxu2 }
 0x3c7   :  { %4098 = vmatmul.f32.gmra.mxu3 %v1750_v32  ;;  %v3828_v49 = vadd.f32 %v3827_v48, %v3619_v58  ;;  %v1398_v32 = vld [vmem:[#allocation2 + $0x3d1] sm:$0xff] }
 0x3c8   :  { %v7099_v31 = vpop.f32.mrf.mxu0  ;;  %v1510_v58 = vld [vmem:[#allocation2 + $0x2ef] sm:$0xff] }
 0x3c9   :  { %v7107_v47 = vadd.f32 %v7042_v4, %v3828_v49 }
 0x3ca   :  { %v7102_v18 = vpop.f32.mrf.mxu1  ;;  %v7104_v54 = vpop.f32.mrf.mxu3 }
 0x3cb   :  { %3564 = vmatmul.f32.gmra.mxu0 %v1397_v59  ;;  %8552 = vst [vmem:[#allocation104_spill] sm:$0xff] %v7107_v47  ;;  %3877 = vmatmul.f32.gmra.mxu2 %v1618_v43  ;;  %v3416_v59 = vadd.f32 %v6598_v38, %v6248_v8  ;;  %v1620_v8 = vld [vmem:[#allocation2 + $0x190] sm:$0xff]  ;;  %v3419_v38 = vadd.f32 %v6607_v2, %v6260_v23  ;;  %v1621_v23 = vld [vmem:[#allocation2 + $0x1a8] sm:$0xff] }
 0x3cc   :  { %v3422_v2 = vadd.f32 %v6616_v51, %v6275_v39  ;;  %v1513_v39 = vld [vmem:[#allocation2 + $0x327] sm:$0xff] }
 0x3cd   :  { %3725 = vmatmul.f32.gmra.mxu1 %v1509_v41  ;;  %v3625_v49 = vadd.f32 %v6869_v44, %v3416_v59  ;;  %v1512_v59 = vld [vmem:[#allocation2 + $0x30f] sm:$0xff] }
 0x3ce   :  { %v3830_v0 = vpop.f32.mrf.mxu2 }
 0x3cf   :  { %4101 = vmatmul.f32.gmra.mxu3 %v1751_v14  ;;  %v3831_v13 = vadd.f32 %v3830_v0, %v3622_v52  ;;  %v1399_v14 = vld [vmem:[#allocation2 + $0x3e9] sm:$0xff] }
 0x3d0   :  { %v7111_v12 = vpop.f32.mrf.mxu0  ;;  %v1511_v52 = vld [vmem:[#allocation2 + $0x307] sm:$0xff] }
 0x3d1   :  { %v7119_v48 = vadd.f32 %v7056_v3, %v3831_v13 }
 0x3d2   :  { %v7114_v30 = vpop.f32.mrf.mxu1  ;;  %v7116_v4 = vpop.f32.mrf.mxu3 }
 0x3d3   :  { %3567 = vmatmul.f32.gmra.mxu0 %v1398_v32  ;;  %8553 = vst [vmem:[#allocation105_spill] sm:$0xff] %v7119_v48  ;;  %3880 = vmatmul.f32.gmra.mxu2 %v1619_v57  ;;  %v3628_v32 = vadd.f32 %v6882_v34, %v3419_v38  ;;  %v1400_v57 = vld [vmem:[#allocation2 + $0x3f1] sm:$0xff]  ;;  %v3631_v34 = vadd.f32 %v6895_v40, %v3422_v2  ;;  %v1755_v38 = vld [vmem:[#allocation2 + $0x209] sm:$0xff] }
 0x3d4   :  { %v1622_v40 = vld [vmem:[#allocation2 + $0x1b0] sm:$0xff]  ;;  %v2921_v2 = vld [vmem:[%s8434_s5 + $0x358] sm:$0xff] }
 0x3d5   :  { %3728 = vmatmul.f32.gmra.mxu1 %v1510_v58 }
 0x3d6   :  { %v3833_v41 = vpop.f32.mrf.mxu2 }
 0x3d7   :  { %4104 = vmatmul.f32.gmra.mxu3 %v1752_v46  ;;  %v3834_v5 = vadd.f32 %v3833_v41, %v3625_v49 }
 0x3d8   :  { %v7123_v33 = vpop.f32.mrf.mxu0 }
 0x3d9   :  { %v7131_v0 = vadd.f32 %v7068_v15, %v3834_v5  ;;  %v1401_v5 = vld [vmem:[#allocation2 + $0x409] sm:$0xff] }
 0x3da   :  { %v7126_v43 = vpop.f32.mrf.mxu1  ;;  %v7128_v3 = vpop.f32.mrf.mxu3 }
 0x3db   :  { %3570 = vmatmul.f32.gmra.mxu0 %v1399_v14  ;;  %8554 = vst [vmem:[#allocation106_spill] sm:$0xff] %v7131_v0  ;;  %3883 = vmatmul.f32.gmra.mxu2 %v1620_v8 }
 0x3dd   :  { %3731 = vmatmul.f32.gmra.mxu1 %v1511_v52 }
 0x3de   :  { %v3836_v13 = vpop.f32.mrf.mxu2 }
 0x3df   :  { %4107 = vmatmul.f32.gmra.mxu3 %v6749_v7  ;;  %v3837_v46 = vadd.f32 %v3836_v13, %v3628_v32  ;;  %v3425_v32 = vadd.f32 %v6625_v53, %v6299_v60  ;;  %v2923_v13 = vld [vmem:[%s8434_s5 + $0x368] sm:$0xff]  ;;  %v1402_v60 = vld [vmem:[#allocation2 + $0x411] sm:$0xff] }
 0x3e0   :  { %v7136_v44 = vpop.f32.mrf.mxu0 }
 0x3e1   :  { %v7144_v49 = vadd.f32 %v7080_v61, %v3837_v46  ;;  %v2925_v61 = vld [vmem:[%s8434_s5 + $0x378] sm:$0xff]  ;;  %v2922_v46 = vld [vmem:[%s8434_s5 + $0x360] sm:$0xff] }
 0x3e2   :  { %v7139_v58 = vpop.f32.mrf.mxu1  ;;  %v7141_v15 = vpop.f32.mrf.mxu3  ;;  %4216 = vmatpush.msra.mxu0 %v2925_v61  ;;  %v1756_v61 = vld [vmem:[#allocation2 + $0x211] sm:$0xff] }
 0x3e3   :  { %3573 = vmatmul.f32.gmra.mxu0 %v1400_v57  ;;  %8555 = vst [vmem:[#allocation107_spill] sm:$0xff] %v7144_v49  ;;  %3886 = vmatmul.f32.gmra.mxu2 %v1621_v23 }
 0x3e5   :  { %3734 = vmatmul.f32.gmra.mxu1 %v1512_v59 }
 0x3e6   :  { %v3839_v41 = vpop.f32.mrf.mxu2 }
 0x3e7   :  { %4110 = vmatmul.f32.gmra.mxu3 %v6779_v63  ;;  %v3840_v52 = vadd.f32 %v3839_v41, %v3631_v34  ;;  %v2924_v63 = vld [vmem:[%s8434_s5 + $0x370] sm:$0xff] }
 0x3e8   :  { %v7149_v7 = vpop.f32.mrf.mxu0  ;;  %4217 = vmatpush.msra.mxu0 %v2924_v63  ;;  %v1514_v41 = vld [vmem:[#allocation2 + $0x32f] sm:$0xff] }
 0x3e9   :  { %v7160_v51 = vadd.f32 %v7092_v42, %v3840_v52  ;;  %v3634_v42 = vadd.f32 %v6908_v45, %v3425_v32  ;;  %v1623_v52 = vld [vmem:[#allocation2 + $0x1c8] sm:$0xff] }
 0x3ea   :  { %v7152_v14 = vpop.f32.mrf.mxu1  ;;  %v7157_v8 = vpop.f32.mrf.mxu3  ;;  %4218 = vmatpush.msra.mxu0 %v2923_v13  ;;  %v2919_v63 = vld [vmem:[%s8434_s5 + $0x348] sm:$0xff] }
 0x3eb   :  { %3576 = vmatmul.f32.gmra.mxu0 %v1401_v5  ;;  %8556 = vst [vmem:[#allocation108_spill] sm:$0xff] %v7160_v51  ;;  %3889 = vmatmul.f32.gmra.mxu2 %v1622_v40  ;;  %v2920_v5 = vld [vmem:[%s8434_s5 + $0x350] sm:$0xff] }
 0x3ec   :  { %4219 = vmatpush.msra.mxu0 %v2922_v46 }
 0x3ed   :  { %3737 = vmatmul.f32.gmra.mxu1 %v1513_v39  ;;  %v3428_v39 = vadd.f32 %v6634_v9, %v6323_v19  ;;  %v1403_v19 = vld [vmem:[#allocation2 + $0x429] sm:$0xff] }
 0x3ee   :  { %v3842_v59 = vpop.f32.mrf.mxu2  ;;  %4220 = vmatpush.msra.mxu0 %v2921_v2  ;;  %v3431_v2 = vadd.f32 %v6646_v16, %v6352_v35  ;;  %v1404_v35 = vld [vmem:[#allocation2 + $0x431] sm:$0xff] }
 0x3ef   :  { %4113 = vmatmul.f32.gmra.mxu3 %v1755_v38  ;;  %v3843_v53 = vadd.f32 %v3842_v59, %v3634_v42  ;;  %v2918_v38 = vld [vmem:[%s8434_s5 + $0x340] sm:$0xff]  ;;  %v2917_v42 = vld [vmem:[%s8434_s5 + $0x338] sm:$0xff] }
 0x3f0   :  { %v7170_v57 = vpop.f32.mrf.mxu0  ;;  %4221 = vmatpush.msra.mxu0 %v2920_v5  ;;  %v1515_v59 = vld [vmem:[#allocation2 + $0x347] sm:$0xff] }
 0x3f1   :  { %v7184_v45 = vadd.f32 %v7104_v54, %v3843_v53  ;;  %v3637_v54 = vadd.f32 %v6921_v37, %v3428_v39  ;;  %v1624_v53 = vld [vmem:[#allocation2 + $0x1d0] sm:$0xff] }
 0x3f2   :  { %v7176_v23 = vpop.f32.mrf.mxu1  ;;  %v7181_v34 = vpop.f32.mrf.mxu3  ;;  %4222 = vmatpush.msra.mxu0 %v2919_v63 }
 0x3f3   :  { %3579 = vmatmul.f32.gmra.mxu0 %v1402_v60  ;;  %8557 = vst [vmem:[#allocation109_spill] sm:$0xff] %v7184_v45  ;;  %3892 = vmatmul.f32.gmra.mxu2 %v1623_v52  ;;  %v2916_v60 = vld [vmem:[%s8434_s5 + $0x330] sm:$0xff]  ;;  %v2914_v52 = vld [vmem:[%s8434_s5 + $0x320] sm:$0xff] }
 0x3f4   :  { %4223 = vmatpush.msra.mxu0 %v2918_v38  ;;  %v2912_v38 = vld [vmem:[%s8434_s5 + $0x310] sm:$0xff] }
 0x3f5   :  { %3740 = vmatmul.f32.gmra.mxu1 %v1514_v41  ;;  %v2915_v41 = vld [vmem:[%s8434_s5 + $0x328] sm:$0xff] }
 0x3f6   :  { %v3845_v32 = vpop.f32.mrf.mxu2  ;;  %4224 = vmatpush.msra.mxu0 %v2917_v42 }
 0x3f7   :  { %4116 = vmatmul.f32.gmra.mxu3 %v1756_v61  ;;  %v3846_v9 = vadd.f32 %v3845_v32, %v3637_v54  ;;  %v1516_v54 = vld [vmem:[#allocation2 + $0x34f] sm:$0xff] }
 0x3f8   :  { %v7194_v40 = vpop.f32.mrf.mxu0  ;;  %4225 = vmatpush.msra.mxu0 %v2916_v60  ;;  %v1625_v32 = vld [vmem:[#allocation2 + $0x1e8] sm:$0xff] }
 0x3f9   :  { %v7208_v37 = vadd.f32 %v7116_v4, %v3846_v9  ;;  %v3640_v4 = vadd.f32 %v6934_v50, %v3431_v2  ;;  %v2911_v9 = vld [vmem:[%s8434_s5 + $0x308] sm:$0xff] }
 0x3fa   :  { %v7200_v13 = vpop.f32.mrf.mxu1  ;;  %v7205_v46 = vpop.f32.mrf.mxu3  ;;  %4226 = vmatpush.msra.mxu0 %v2915_v41  ;;  %v1517_v41 = vld [vmem:[#allocation2 + $0x367] sm:$0xff] }
 0x3fb   :  { %3582 = vmatmul.f32.gmra.mxu0 %v1403_v19  ;;  %8558 = vst [vmem:[#allocation110_spill] sm:$0xff] %v7208_v37  ;;  %3895 = vmatmul.f32.gmra.mxu2 %v1624_v53  ;;  %v3434_v19 = vadd.f32 %v6670_v25, %v6369_v62  ;;  %v1854_v62 = vld [vmem:[#allocation2 + $0x47] sm:$0xff]  ;;  %v8583_v37 = vld [vmem:[#allocation61_spill] sm:$0xff] }
 0x3fc   :  { %4227 = vmatpush.msra.mxu0 %v2914_v52  ;;  %v8562_v52 = vld [vmem:[#allocation34_spill] sm:$0xff] }
 0x3fd   :  { %3743 = vmatmul.f32.gmra.mxu1 %v1515_v59  ;;  %v2910_v59 = vld [vmem:[%s8434_s5 + $0x300] sm:$0xff] }
 0x3fe   :  { %v3848_v61 = vpop.f32.mrf.mxu2 }
 0x3ff   :  { %4119 = vmatmul.f32.gmra.mxu3 %v6819_v11  ;;  %v3849_v16 = vadd.f32 %v3848_v61, %v3640_v4  ;;  %v2913_v11 = vld [vmem:[%s8434_s5 + $0x318] sm:$0xff]  ;;  %v1626_v4 = vld [vmem:[#allocation2 + $0x1f0] sm:$0xff] }
 0x400   :  { %v7219_v5 = vpop.f32.mrf.mxu0  ;;  %4228 = vmatpush.msra.mxu0 %v2913_v11  ;;  %v8564_v11 = vld [vmem:[#allocation76_spill] sm:$0xff] }
 0x401   :  { %v7233_v50 = vadd.f32 %v7128_v3, %v3849_v16  ;;  %v3643_v3 = vadd.f32 %v6947_v21, %v3434_v19  ;;  %v8561_v21 = vld [vmem:[#allocation6_spill] sm:$0xff]  ;;  %v1855_v19 = vld [vmem:[#allocation2 + $0x4f] sm:$0xff] }
 0x402   :  { %v7225_v39 = vpop.f32.mrf.mxu1  ;;  %v7230_v63 = vpop.f32.mrf.mxu3  ;;  %4229 = vmatpush.msra.mxu0 %v2912_v38  ;;  %v3437_v61 = vadd.f32 %v8562_v52, %v8561_v21  ;;  %v8569_v52 = vld [vmem:[#allocation80_spill] sm:$0xff] }
 0x403   :  { %3585 = vmatmul.f32.gmra.mxu0 %v1404_v35  ;;  %8559 = vst [vmem:[#allocation111_spill] sm:$0xff] %v7233_v50  ;;  %3898 = vmatmul.f32.gmra.mxu2 %v1625_v32  ;;  %v8563_v35 = vld [vmem:[#allocation49_spill] sm:$0xff] }
 0x404   :  { %4230 = vmatpush.msra.mxu0 %v2911_v9 }
 0x405   :  { %3746 = vmatmul.f32.gmra.mxu1 %v1516_v54  ;;  %v3646_v54 = vadd.f32 %v8564_v11, %v3437_v61 }
 0x406   :  { %v3851_v60 = vpop.f32.mrf.mxu2  ;;  %4231 = vmatpush.msra.mxu0 %v2910_v59 }
 0x407   :  { %4122 = vmatmul.f32.gmra.mxu3 %v6832_v20  ;;  %v3852_v25 = vadd.f32 %v3851_v60, %v3643_v3  ;;  %v1518_v3 = vld [vmem:[#allocation2 + $0x36f] sm:$0xff] }
 0x408   :  { %v7244_v42 = vpop.f32.mrf.mxu0  ;;  %v1627_v60 = vld [vmem:[#allocation2 + $0x208] sm:$0xff] }
 0x409   :  { %v7255_v20 = vadd.f32 %v7141_v15, %v3852_v25  ;;  %v8567_v25 = vld [vmem:[#allocation36_spill] sm:$0xff] }
 0x40a   :  { %v7250_v53 = vpop.f32.mrf.mxu1  ;;  %v7252_v2 = vpop.f32.mrf.mxu3 }
 0x40b   :  { %4232 = vmatmul.f32.vlgmr.msra.gmra.mxu0 %v1854_v62  ;;  %8560 = vst [vmem:[#allocation112_spill] sm:$0xff] %v7255_v20  ;;  %3901 = vmatmul.f32.gmra.mxu2 %v1626_v4  ;;  %v8566_v62 = vld [vmem:[#allocation7_spill] sm:$0xff]  ;;  %v8568_v4 = vld [vmem:[#allocation52_spill] sm:$0xff] }
 0x40d   :  { %3749 = vmatmul.f32.gmra.mxu1 %v1517_v41  ;;  %v3440_v41 = vadd.f32 %v8567_v25, %v8566_v62  ;;  %v8572_v62 = vld [vmem:[#allocation38_spill] sm:$0xff] }
 0x40e   :  { %v3854_v38 = vpop.f32.mrf.mxu2 }
 0x40f   :  { %4125 = vmatmul.f32.gmra.mxu3 %v8563_v35  ;;  %v3855_v9 = vadd.f32 %v3854_v38, %v3646_v54  ;;  %v3649_v61 = vadd.f32 %v8569_v52, %v3440_v41  ;;  %v1856_v54 = vld [vmem:[#allocation2 + $0x67] sm:$0xff]  ;;  %v8574_v52 = vld [vmem:[#allocation84_spill] sm:$0xff] }
 0x410   :  { %v7260_v16 = vpop.f32.mrf.mxu0 }
 0x411   :  { %v7268_v59 = vadd.f32 %v7157_v8, %v3855_v9 }
 0x412   :  { %v7263_v32 = vpop.f32.mrf.mxu1  ;;  %v7265_v15 = vpop.f32.mrf.mxu3 }
 0x413   :  { %4235 = vmatmul.f32.gmra.mxu0 %v1855_v19  ;;  %8565 = vst [vmem:[#allocation6_spill] sm:$0xff] %v7268_v59  ;;  %3904 = vmatmul.f32.gmra.mxu2 %v1627_v60  ;;  %v1519_v19 = vld [vmem:[#allocation2 + $0x387] sm:$0xff]  ;;  %v8571_v60 = vld [vmem:[#allocation8_spill] sm:$0xff] }
 0x414   :  { %v3443_v25 = vadd.f32 %v8572_v62, %v8571_v60  ;;  %v8576_v60 = vld [vmem:[#allocation9_spill] sm:$0xff]  ;;  %v8577_v62 = vld [vmem:[#allocation40_spill] sm:$0xff] }
 0x415   :  { %3752 = vmatmul.f32.gmra.mxu1 %v1518_v3  ;;  %v1628_v3 = vld [vmem:[#allocation2 + $0x210] sm:$0xff] }
 0x416   :  { %v3857_v35 = vpop.f32.mrf.mxu2  ;;  %v3652_v59 = vadd.f32 %v8574_v52, %v3443_v25  ;;  %v8579_v52 = vld [vmem:[#allocation88_spill] sm:$0xff] }
 0x417   :  { %4128 = vmatmul.f32.gmra.mxu3 %v8568_v4  ;;  %v3858_v38 = vadd.f32 %v3857_v35, %v3649_v61  ;;  %v8573_v4 = vld [vmem:[#allocation55_spill] sm:$0xff] }
 0x418   :  { %v7273_v21 = vpop.f32.mrf.mxu0 }
 0x419   :  { %v7281_v9 = vadd.f32 %v7181_v34, %v3858_v38  ;;  %v1520_v34 = vld [vmem:[#allocation2 + $0x38f] sm:$0xff] }
 0x41a   :  { %v7276_v11 = vpop.f32.mrf.mxu1  ;;  %v7278_v8 = vpop.f32.mrf.mxu3 }
 0x41b   :  { %4238 = vmatmul.f32.gmra.mxu0 %v1856_v54  ;;  %8570 = vst [vmem:[#allocation34_spill] sm:$0xff] %v7281_v9  ;;  %3907 = vmatmul.f32.gmra.mxu2 %v1628_v3  ;;  %v1857_v54 = vld [vmem:[#allocation2 + $0x6f] sm:$0xff]  ;;  %v8578_v9 = vld [vmem:[#allocation58_spill] sm:$0xff] }
 0x41c   :  { %v1629_v3 = vld [vmem:[#allocation2 + $0x268] sm:$0xff] }
 0x41d   :  { %3755 = vmatmul.f32.gmra.mxu1 %v1519_v19 }
 0x41e   :  { %v3860_v61 = vpop.f32.mrf.mxu2 }
 0x41f   :  { %4131 = vmatmul.f32.gmra.mxu3 %v8573_v4  ;;  %v3861_v20 = vadd.f32 %v3860_v61, %v3652_v59  ;;  %v3446_v4 = vadd.f32 %v8577_v62, %v8576_v60  ;;  %v8581_v60 = vld [vmem:[#allocation10_spill] sm:$0xff] }
 0x420   :  { %v7286_v41 = vpop.f32.mrf.mxu0 }
 0x421   :  { %v7292_v38 = vadd.f32 %v7205_v46, %v3861_v20  ;;  %v3655_v50 = vadd.f32 %v8579_v52, %v3446_v4  ;;  %v1521_v20 = vld [vmem:[#allocation2 + $0x3a7] sm:$0xff]  ;;  %v8584_v52 = vld [vmem:[#allocation92_spill] sm:$0xff] }
 0x422   :  { %v7289_v35 = vpop.f32.mrf.mxu1  ;;  %v7294_v19 = vpop.f32.mrf.mxu3 }
 0x423   :  { %4241 = vmatmul.f32.gmra.mxu0 %v1857_v54  ;;  %8575 = vst [vmem:[#allocation49_spill] sm:$0xff] %v7292_v38  ;;  %3910 = vmatmul.f32.gmra.mxu2 %v1629_v3  ;;  %v1858_v54 = vld [vmem:[#allocation2 + $0x87] sm:$0xff]  ;;  %v1630_v38 = vld [vmem:[#allocation2 + $0x270] sm:$0xff] }
 0x424   :  { %v8582_v3 = vld [vmem:[#allocation42_spill] sm:$0xff] }
 0x425   :  { %3758 = vmatmul.f32.gmra.mxu1 %v1520_v34  ;;  %v3449_v62 = vadd.f32 %v8582_v3, %v8581_v60  ;;  %v8586_v60 = vld [vmem:[#allocation11_spill] sm:$0xff]  ;;  %v8587_v3 = vld [vmem:[#allocation44_spill] sm:$0xff] }
 0x426   :  { %v3863_v59 = vpop.f32.mrf.mxu2 }
 0x427   :  { %4134 = vmatmul.f32.gmra.mxu3 %v8578_v9  ;;  %v3864_v46 = vadd.f32 %v3863_v59, %v3655_v50  ;;  %v3658_v45 = vadd.f32 %v8584_v52, %v3449_v62  ;;  %v8589_v62 = vld [vmem:[#allocation95_spill] sm:$0xff] }
 0x428   :  { %v7299_v25 = vpop.f32.mrf.mxu0 }
 0x429   :  { %v7305_v34 = vadd.f32 %v7230_v63, %v3864_v46  ;;  %v1522_v46 = vld [vmem:[#allocation2 + $0x3af] sm:$0xff] }
 0x42a   :  { %v7302_v61 = vpop.f32.mrf.mxu1  ;;  %v7309_v9 = vpop.f32.mrf.mxu3 }
 0x42b   :  { %4244 = vmatmul.f32.gmra.mxu0 %v1858_v54  ;;  %8580 = vst [vmem:[#allocation76_spill] sm:$0xff] %v7305_v34  ;;  %3913 = vmatmul.f32.gmra.mxu2 %v1630_v38  ;;  %v1859_v54 = vld [vmem:[#allocation2 + $0x8f] sm:$0xff]  ;;  %v3452_v34 = vadd.f32 %v8587_v3, %v8586_v60  ;;  %v8592_v3 = vld [vmem:[#allocation46_spill] sm:$0xff] }
 0x42c   :  { %v1631_v38 = vld [vmem:[#allocation2 + $0x288] sm:$0xff]  ;;  %v8591_v60 = vld [vmem:[#allocation12_spill] sm:$0xff] }
 0x42d   :  { %3761 = vmatmul.f32.gmra.mxu1 %v1521_v20  ;;  %v3661_v52 = vadd.f32 %v8589_v62, %v3452_v34  ;;  %v8594_v62 = vld [vmem:[#allocation98_spill] sm:$0xff] }
 0x42e   :  { %v3866_v50 = vpop.f32.mrf.mxu2 }
 0x42f   :  { %4137 = vmatmul.f32.gmra.mxu3 %v8583_v37  ;;  %v3867_v63 = vadd.f32 %v3866_v50, %v3658_v45  ;;  %v8588_v37 = vld [vmem:[#allocation64_spill] sm:$0xff] }
 0x430   :  { %v7312_v4 = vpop.f32.mrf.mxu0 }
 0x431   :  { %v7318_v20 = vadd.f32 %v7252_v2, %v3867_v63  ;;  %v1523_v63 = vld [vmem:[#allocation2 + $0x3c7] sm:$0xff] }
 0x432   :  { %v7315_v59 = vpop.f32.mrf.mxu1  ;;  %v7326_v49 = vpop.f32.mrf.mxu3 }
 0x433   :  { %4247 = vmatmul.f32.gmra.mxu0 %v1859_v54  ;;  %8585 = vst [vmem:[#allocation7_spill] sm:$0xff] %v7318_v20  ;;  %3916 = vmatmul.f32.gmra.mxu2 %v1631_v38  ;;  %v1860_v54 = vld [vmem:[#allocation2 + $0xa7] sm:$0xff]  ;;  %v1632_v38 = vld [vmem:[#allocation2 + $0x290] sm:$0xff] }
 0x434   :  { %v8593_v20 = vld [vmem:[#allocation67_spill] sm:$0xff] }
 0x435   :  { %3764 = vmatmul.f32.gmra.mxu1 %v1522_v46 }
 0x436   :  { %v3869_v45 = vpop.f32.mrf.mxu2 }
 0x437   :  { %4140 = vmatmul.f32.gmra.mxu3 %v8588_v37  ;;  %v3870_v2 = vadd.f32 %v3869_v45, %v3661_v52  ;;  %v3455_v37 = vadd.f32 %v8592_v3, %v8591_v60  ;;  %v1861_v52 = vld [vmem:[#allocation2 + $0xaf] sm:$0xff]  ;;  %v8598_v3 = vld [vmem:[#allocation70_spill] sm:$0xff] }
 0x438   :  { %v7323_v51 = vpop.f32.mrf.mxu0  ;;  %v8597_v60 = vld [vmem:[#allocation48_spill] sm:$0xff] }
 0x439   :  { %v7331_v46 = vadd.f32 %v7265_v15, %v3870_v2  ;;  %v3664_v0 = vadd.f32 %v8594_v62, %v3455_v37  ;;  %v1524_v15 = vld [vmem:[#allocation2 + $0x3cf] sm:$0xff] }
 0x43a   :  { %v7328_v50 = vpop.f32.mrf.mxu1 }
 0x43b   :  { %4250 = vmatmul.f32.gmra.mxu0 %v1860_v54  ;;  %8590 = vst [vmem:[#allocation36_spill] sm:$0xff] %v7331_v46  ;;  %3919 = vmatmul.f32.gmra.mxu2 %v1632_v38  ;;  %v4093_v54 = vpop.f32.mrf.mxu3  ;;  %v8596_v38 = vld [vmem:[#allocation13_spill] sm:$0xff] }
 0x43d   :  { %3767 = vmatmul.f32.gmra.mxu1 %v1523_v63  ;;  %v1633_v63 = vld [vmem:[#allocation2 + $0x2a8] sm:$0xff] }
 0x43e   :  { %v3872_v48 = vpop.f32.mrf.mxu2 }
 0x43f   :  { %4143 = vmatmul.f32.gmra.mxu3 %v8593_v20  ;;  %v3873_v45 = vadd.f32 %v3872_v48, %v3664_v0  ;;  %v3458_v20 = vadd.f32 %v8597_v60, %v8596_v38  ;;  %v1862_v0 = vld [vmem:[#allocation2 + $0xc7] sm:$0xff]  ;;  %v1634_v38 = vld [vmem:[#allocation2 + $0x2b0] sm:$0xff] }
 0x440   :  { %v7336_v34 = vpop.f32.mrf.mxu0  ;;  %v8601_v60 = vld [vmem:[#allocation51_spill] sm:$0xff] }
 0x441   :  { %v7342_v2 = vadd.f32 %v7278_v8, %v3873_v45  ;;  %v3667_v62 = vadd.f32 %v7054_v27, %v3458_v20  ;;  %v1525_v8 = vld [vmem:[#allocation2 + $0x3e7] sm:$0xff] }
 0x442   :  { %v7339_v47 = vpop.f32.mrf.mxu1 }
 0x443   :  { %4253 = vmatmul.f32.gmra.mxu0 %v1861_v52  ;;  %8595 = vst [vmem:[#allocation52_spill] sm:$0xff] %v7342_v2  ;;  %3922 = vmatmul.f32.gmra.mxu2 %v1633_v63  ;;  %v8600_v63 = vld [vmem:[#allocation14_spill] sm:$0xff]  ;;  %v8602_v2 = vld [vmem:[#allocation73_spill] sm:$0xff] }
 0x445   :  { %3770 = vmatmul.f32.gmra.mxu1 %v1524_v15  ;;  %v4096_v15 = vpop.f32.mrf.mxu3 }
 0x446   :  { %v3875_v46 = vpop.f32.mrf.mxu2 }
 0x447   :  { %4146 = vmatmul.f32.gmra.mxu3 %v8598_v3  ;;  %v3876_v52 = vadd.f32 %v3875_v46, %v3667_v62  ;;  %v3461_v3 = vadd.f32 %v8601_v60, %v8600_v63  ;;  %v1863_v62 = vld [vmem:[#allocation2 + $0xcf] sm:$0xff] }
 0x448   :  { %v7347_v37 = vpop.f32.mrf.mxu0  ;;  %v8604_v63 = vld [vmem:[#allocation15_spill] sm:$0xff] }
 0x449   :  { %v7353_v45 = vadd.f32 %v7294_v19, %v3876_v52  ;;  %v3670_v20 = vadd.f32 %v7066_v22, %v3461_v3  ;;  %v1526_v19 = vld [vmem:[#allocation2 + $0x3ef] sm:$0xff] }
 0x44a   :  { %v7350_v48 = vpop.f32.mrf.mxu1 }
 0x44b   :  { %4256 = vmatmul.f32.gmra.mxu0 %v1862_v0  ;;  %8599 = vst [vmem:[#allocation80_spill] sm:$0xff] %v7353_v45  ;;  %3925 = vmatmul.f32.gmra.mxu2 %v1634_v38  ;;  %v8605_v38 = vld [vmem:[#allocation54_spill] sm:$0xff]  ;;  %v8606_v45 = vld [vmem:[#allocation77_spill] sm:$0xff] }
 0x44c   :  { %v3464_v60 = vadd.f32 %v8605_v38, %v8604_v63  ;;  %v8609_v63 = vld [vmem:[#allocation57_spill] sm:$0xff] }
 0x44d   :  { %3773 = vmatmul.f32.gmra.mxu1 %v1525_v8  ;;  %v1635_v8 = vld [vmem:[#allocation2 + $0x2c8] sm:$0xff] }
 0x44e   :  { %v3878_v17 = vpop.f32.mrf.mxu2  ;;  %v3673_v3 = vadd.f32 %v7078_v1, %v3464_v60 }
 0x44f   :  { %4149 = vmatmul.f32.gmra.mxu3 %v8602_v2  ;;  %v3879_v0 = vadd.f32 %v3878_v17, %v3670_v20  ;;  %v4099_v2 = vpop.f32.mrf.mxu3  ;;  %v1864_v20 = vld [vmem:[#allocation2 + $0xe7] sm:$0xff] }
 0x450   :  { %v7358_v27 = vpop.f32.mrf.mxu0 }
 0x451   :  { %v7364_v52 = vadd.f32 %v7309_v9, %v3879_v0  ;;  %v1527_v9 = vld [vmem:[#allocation2 + $0x407] sm:$0xff] }
 0x452   :  { %v7361_v46 = vpop.f32.mrf.mxu1 }
 0x453   :  { %4259 = vmatmul.f32.gmra.mxu0 %v1863_v62  ;;  %8603 = vst [vmem:[#allocation8_spill] sm:$0xff] %v7364_v52  ;;  %3928 = vmatmul.f32.gmra.mxu2 %v1635_v8  ;;  %v8608_v8 = vld [vmem:[#allocation16_spill] sm:$0xff] }
 0x454   :  { %v3467_v38 = vadd.f32 %v8609_v63, %v8608_v8  ;;  %v1637_v8 = vld [vmem:[#allocation2 + $0x2e8] sm:$0xff]  ;;  %v8613_v63 = vld [vmem:[#allocation60_spill] sm:$0xff] }
 0x455   :  { %3776 = vmatmul.f32.gmra.mxu1 %v1526_v19  ;;  %v1636_v19 = vld [vmem:[#allocation2 + $0x2d0] sm:$0xff] }
 0x456   :  { %v3881_v24 = vpop.f32.mrf.mxu2  ;;  %v3676_v1 = vadd.f32 %v7090_v6, %v3467_v38 }
 0x457   :  { %4152 = vmatmul.f32.gmra.mxu3 %v8606_v45  ;;  %v3882_v62 = vadd.f32 %v3881_v24, %v3673_v3  ;;  %v8610_v45 = vld [vmem:[#allocation81_spill] sm:$0xff]  ;;  %v7383_v60 = vpop.f32.mrf.mxu3 }
 0x458   :  { %v7369_v22 = vpop.f32.mrf.mxu0 }
 0x459   :  { %v7375_v0 = vadd.f32 %v7326_v49, %v3882_v62  ;;  %v1528_v62 = vld [vmem:[#allocation2 + $0x40f] sm:$0xff] }
 0x45a   :  { %v7372_v17 = vpop.f32.mrf.mxu1 }
 0x45b   :  { %4262 = vmatmul.f32.gmra.mxu0 %v1864_v20  ;;  %8607 = vst [vmem:[#allocation38_spill] sm:$0xff] %v7375_v0  ;;  %3931 = vmatmul.f32.gmra.mxu2 %v1636_v19  ;;  %v1865_v20 = vld [vmem:[#allocation2 + $0xef] sm:$0xff]  ;;  %v8612_v19 = vld [vmem:[#allocation17_spill] sm:$0xff] }
 0x45c   :  { %v8614_v0 = vld [vmem:[#allocation85_spill] sm:$0xff] }
 0x45d   :  { %3779 = vmatmul.f32.gmra.mxu1 %v1527_v9 }
 0x45e   :  { %v3884_v24 = vpop.f32.mrf.mxu2 }
 0x45f   :  { %4155 = vmatmul.f32.gmra.mxu3 %v8610_v45  ;;  %v3885_v49 = vadd.f32 %v3884_v24, %v3676_v1  ;;  %v3470_v45 = vadd.f32 %v8613_v63, %v8612_v19  ;;  %v1866_v1 = vld [vmem:[#allocation2 + $0x107] sm:$0xff]  ;;  %v8618_v63 = vld [vmem:[#allocation89_spill] sm:$0xff] }
 0x460   :  { %v7380_v52 = vpop.f32.mrf.mxu0 }
 0x461   :  { %v7387_v9 = vadd.f32 %v4093_v54, %v3885_v49  ;;  %v3679_v38 = vadd.f32 %v7102_v18, %v3470_v45  ;;  %v1529_v54 = vld [vmem:[#allocation2 + $0x427] sm:$0xff] }
 0x462   :  { %v7385_v3 = vpop.f32.mrf.mxu1  ;;  %v8617_v18 = vld [vmem:[#allocation63_spill] sm:$0xff] }
 0x463   :  { %4265 = vmatmul.f32.gmra.mxu0 %v1865_v20  ;;  %8611 = vst [vmem:[#allocation55_spill] sm:$0xff] %v7387_v9  ;;  %3934 = vmatmul.f32.gmra.mxu2 %v1637_v8  ;;  %v7397_v20 = vpop.f32.mrf.mxu3  ;;  %v8616_v8 = vld [vmem:[#allocation18_spill] sm:$0xff] }
 0x464   :  { %v3473_v19 = vadd.f32 %v8617_v18, %v8616_v8  ;;  %v1530_v8 = vld [vmem:[#allocation2 + $0x42f] sm:$0xff]  ;;  %v8632_v9 = vld [vmem:[#allocation22_spill] sm:$0xff] }
 0x465   :  { %3782 = vmatmul.f32.gmra.mxu1 %v1528_v62  ;;  %v1638_v62 = vld [vmem:[#allocation2 + $0x2f0] sm:$0xff] }
 0x466   :  { %v3887_v36 = vpop.f32.mrf.mxu2 }
 0x467   :  { %4158 = vmatmul.f32.gmra.mxu3 %v8614_v0  ;;  %v3888_v24 = vadd.f32 %v3887_v36, %v3679_v38  ;;  %v2941_v0 = vld [vmem:[%s8434_s5 + $0x3f8] sm:$0xff]  ;;  %v2940_v36 = vld [vmem:[%s8434_s5 + $0x3f0] sm:$0xff]  ;;  %v2939_v38 = vld [vmem:[%s8434_s5 + $0x3e8] sm:$0xff] }
 0x468   :  { %v7392_v6 = vpop.f32.mrf.mxu0  ;;  %4425 = vmatpush.msra.mxu1 %v2941_v0 }
 0x469   :  { %v7399_v49 = vadd.f32 %v4096_v15, %v3888_v24  ;;  %v3682_v15 = vadd.f32 %v7114_v30, %v3473_v19  ;;  %v2937_v19 = vld [vmem:[%s8434_s5 + $0x3d8] sm:$0xff] }
 0x46a   :  { %v7395_v28 = vpop.f32.mrf.mxu1  ;;  %4426 = vmatpush.msra.mxu1 %v2940_v36  ;;  %v1639_v36 = vld [vmem:[#allocation2 + $0x308] sm:$0xff] }
 0x46b   :  { %4268 = vmatmul.f32.gmra.mxu0 %v1866_v1  ;;  %8615 = vst [vmem:[#allocation84_spill] sm:$0xff] %v7399_v49  ;;  %3937 = vmatmul.f32.gmra.mxu2 %v1638_v62  ;;  %v2938_v62 = vld [vmem:[%s8434_s5 + $0x3e0] sm:$0xff]  ;;  %v7423_v30 = vpop.f32.mrf.mxu3 }
 0x46c   :  { %4427 = vmatpush.msra.mxu1 %v2939_v38  ;;  %v8621_v38 = vld [vmem:[#allocation66_spill] sm:$0xff]  ;;  %v8628_v49 = vld [vmem:[#allocation21_spill] sm:$0xff] }
 0x46d   :  { %3785 = vmatmul.f32.gmra.mxu1 %v1529_v54  ;;  %v1867_v54 = vld [vmem:[#allocation2 + $0x10f] sm:$0xff] }
 0x46e   :  { %v3890_v1 = vpop.f32.mrf.mxu2  ;;  %4428 = vmatpush.msra.mxu1 %v2938_v62  ;;  %v2935_v62 = vld [vmem:[%s8434_s5 + $0x3c8] sm:$0xff] }
 0x46f   :  { %4161 = vmatmul.f32.gmra.mxu3 %v8618_v63  ;;  %v3891_v0 = vadd.f32 %v3890_v1, %v3682_v15  ;;  %v1772_v63 = vld [vmem:[#allocation2 + $0x351] sm:$0xff]  ;;  %v8620_v15 = vld [vmem:[#allocation19_spill] sm:$0xff] }
 0x470   :  { %v7410_v45 = vpop.f32.mrf.mxu0  ;;  %4429 = vmatpush.msra.mxu1 %v2937_v19  ;;  %v3476_v1 = vadd.f32 %v8621_v38, %v8620_v15  ;;  %v1868_v15 = vld [vmem:[#allocation2 + $0x127] sm:$0xff] }
 0x471   :  { %v7421_v18 = vadd.f32 %v4099_v2, %v3891_v0  ;;  %v1531_v38 = vld [vmem:[#allocation2 + $0x447] sm:$0xff] }
 0x472   :  { %v7416_v24 = vpop.f32.mrf.mxu1  ;;  %v3685_v0 = vadd.f32 %v7126_v43, %v3476_v1  ;;  %v2933_v43 = vld [vmem:[%s8434_s5 + $0x3b8] sm:$0xff]  ;;  %v1640_v1 = vld [vmem:[#allocation2 + $0x310] sm:$0xff] }
 0x473   :  { %4271 = vmatmul.f32.gmra.mxu0 %v1867_v54  ;;  %8619 = vst [vmem:[#allocation9_spill] sm:$0xff] %v7421_v18  ;;  %3940 = vmatmul.f32.gmra.mxu2 %v1639_v36  ;;  %v2936_v54 = vld [vmem:[%s8434_s5 + $0x3d0] sm:$0xff] }
 0x474   :  { %4430 = vmatpush.msra.mxu1 %v2936_v54  ;;  %v8624_v18 = vld [vmem:[#allocation20_spill] sm:$0xff] }
 0x475   :  { %3788 = vmatmul.f32.gmra.mxu1 %v1530_v8 }
 0x476   :  { %v3893_v8 = vpop.f32.mrf.mxu2  ;;  %4431 = vmatpush.msra.mxu1 %v2935_v62  ;;  %v1773_v62 = vld [vmem:[#allocation2 + $0x369] sm:$0xff] }
 0x477   :  { %4164 = vmatmul.f32.gmra.mxu3 %v1772_v63  ;;  %v3894_v36 = vadd.f32 %v3893_v8, %v3685_v0  ;;  %v2934_v63 = vld [vmem:[%s8434_s5 + $0x3c0] sm:$0xff] }
 0x478   :  { %v7433_v2 = vpop.f32.mrf.mxu0  ;;  %4432 = vmatpush.msra.mxu1 %v2934_v63  ;;  %v8625_v0 = vld [vmem:[#allocation69_spill] sm:$0xff]  ;;  %v2932_v63 = vld [vmem:[%s8434_s5 + $0x3b0] sm:$0xff] }
 0x479   :  { %8622 = vst [vmem:[#allocation40_spill] sm:$0xff] %v7433_v2  ;;  %v7445_v54 = vadd.f32 %v7383_v60, %v3894_v36  ;;  %v3479_v8 = vadd.f32 %v8625_v0, %v8624_v18  ;;  %v1869_v18 = vld [vmem:[#allocation2 + $0x12f] sm:$0xff] }
 0x47a   :  { %v7439_v19 = vpop.f32.mrf.mxu1  ;;  %4433 = vmatpush.msra.mxu1 %v2933_v43  ;;  %v1532_v0 = vld [vmem:[#allocation2 + $0x44f] sm:$0xff] }
 0x47b   :  { %4274 = vmatmul.f32.gmra.mxu0 %v1868_v15  ;;  %8623 = vst [vmem:[#allocation58_spill] sm:$0xff] %v7445_v54  ;;  %3943 = vmatmul.f32.gmra.mxu2 %v1640_v1  ;;  %v4111_v15 = vpop.f32.mrf.mxu3  ;;  %v3688_v36 = vadd.f32 %v7139_v58, %v3479_v8  ;;  %v2929_v58 = vld [vmem:[%s8434_s5 + $0x398] sm:$0xff]  ;;  %v1641_v8 = vld [vmem:[#allocation2 + $0x328] sm:$0xff] }
 0x47c   :  { %4434 = vmatpush.msra.mxu1 %v2932_v63 }
 0x47d   :  { %3791 = vmatmul.f32.gmra.mxu1 %v1531_v38  ;;  %v2931_v38 = vld [vmem:[%s8434_s5 + $0x3a8] sm:$0xff] }
 0x47e   :  { %v3896_v43 = vpop.f32.mrf.mxu2  ;;  %4435 = vmatpush.msra.mxu1 %v2931_v38  ;;  %v1774_v38 = vld [vmem:[#allocation2 + $0x371] sm:$0xff] }
 0x47f   :  { %4167 = vmatmul.f32.gmra.mxu3 %v1773_v62  ;;  %v3897_v1 = vadd.f32 %v3896_v43, %v3688_v36  ;;  %v2930_v62 = vld [vmem:[%s8434_s5 + $0x3a0] sm:$0xff]  ;;  %v8629_v36 = vld [vmem:[#allocation72_spill] sm:$0xff] }
 0x480   :  { %v7455_v60 = vpop.f32.mrf.mxu0  ;;  %4436 = vmatpush.msra.mxu1 %v2930_v62  ;;  %v3482_v43 = vadd.f32 %v8629_v36, %v8628_v49  ;;  %v1870_v49 = vld [vmem:[#allocation2 + $0x147] sm:$0xff] }
 0x481   :  { %8626 = vst [vmem:[#allocation88_spill] sm:$0xff] %v7455_v60  ;;  %v7467_v63 = vadd.f32 %v7397_v20, %v3897_v1  ;;  %v1982_v36 = vld [vmem:[#allocation2 + $0x48] sm:$0xff] }
 0x482   :  { %v7461_v54 = vpop.f32.mrf.mxu1  ;;  %4437 = vmatpush.msra.mxu1 %v2929_v58  ;;  %v3691_v20 = vadd.f32 %v7152_v14, %v3482_v43  ;;  %v1642_v43 = vld [vmem:[#allocation2 + $0x330] sm:$0xff] }
 0x483   :  { %4277 = vmatmul.f32.gmra.mxu0 %v1869_v18  ;;  %8627 = vst [vmem:[#allocation10_spill] sm:$0xff] %v7467_v63  ;;  %3946 = vmatmul.f32.gmra.mxu2 %v1641_v8  ;;  %v2928_v18 = vld [vmem:[%s8434_s5 + $0x390] sm:$0xff]  ;;  %v4114_v1 = vpop.f32.mrf.mxu3 }
 0x484   :  { %4438 = vmatpush.msra.mxu1 %v2928_v18  ;;  %v1775_v18 = vld [vmem:[#allocation2 + $0x389] sm:$0xff] }
 0x485   :  { %3794 = vmatmul.f32.gmra.mxu1 %v1532_v0  ;;  %v2927_v0 = vld [vmem:[%s8434_s5 + $0x388] sm:$0xff] }
 0x486   :  { %v3899_v58 = vpop.f32.mrf.mxu2  ;;  %4439 = vmatpush.msra.mxu1 %v2927_v0 }
 0x487   :  { %4170 = vmatmul.f32.gmra.mxu3 %v1774_v38  ;;  %v3900_v8 = vadd.f32 %v3899_v58, %v3691_v20  ;;  %v2926_v38 = vld [vmem:[%s8434_s5 + $0x380] sm:$0xff] }
 0x488   :  { %v7477_v62 = vpop.f32.mrf.mxu0  ;;  %4440 = vmatpush.msra.mxu1 %v2926_v38  ;;  %v1871_v38 = vld [vmem:[#allocation2 + $0x14f] sm:$0xff] }
 0x489   :  { %8630 = vst [vmem:[#allocation42_spill] sm:$0xff] %v7477_v62  ;;  %v7489_v14 = vadd.f32 %v7423_v30, %v3900_v8  ;;  %v8633_v62 = vld [vmem:[#allocation75_spill] sm:$0xff] }
 0x48a   :  { %v7483_v63 = vpop.f32.mrf.mxu1  ;;  %v3485_v60 = vadd.f32 %v8633_v62, %v8632_v9  ;;  %v1983_v30 = vld [vmem:[#allocation2 + $0x50] sm:$0xff] }
 0x48b   :  { %4280 = vmatmul.f32.gmra.mxu0 %v1870_v49  ;;  %8631 = vst [vmem:[#allocation61_spill] sm:$0xff] %v7489_v14  ;;  %3949 = vmatmul.f32.gmra.mxu2 %v1642_v43  ;;  %v4117_v2 = vpop.f32.mrf.mxu3  ;;  %v1776_v14 = vld [vmem:[#allocation2 + $0x391] sm:$0xff]  ;;  %v8636_v9 = vld [vmem:[#allocation23_spill] sm:$0xff] }
 0x48c   :  { %v3694_v20 = vadd.f32 %v7176_v23, %v3485_v60  ;;  %v8637_v62 = vld [vmem:[#allocation79_spill] sm:$0xff] }
 0x48d   :  { %4441 = vmatmul.f32.vlgmr.msra.gmra.mxu1 %v1982_v36  ;;  %v1643_v36 = vld [vmem:[#allocation2 + $0x348] sm:$0xff]  ;;  %v3488_v43 = vadd.f32 %v8637_v62, %v8636_v9  ;;  %v8640_v9 = vld [vmem:[#allocation24_spill] sm:$0xff] }
 0x48e   :  { %v3902_v58 = vpop.f32.mrf.mxu2 }
 0x48f   :  { %4173 = vmatmul.f32.gmra.mxu3 %v1775_v18  ;;  %v3903_v56 = vadd.f32 %v3902_v58, %v3694_v20  ;;  %v3697_v23 = vadd.f32 %v7200_v13, %v3488_v43  ;;  %v1872_v20 = vld [vmem:[#allocation2 + $0x167] sm:$0xff] }
 0x490   :  { %v7493_v0 = vpop.f32.mrf.mxu0 }
 0x491   :  { %8634 = vst [vmem:[#allocation92_spill] sm:$0xff] %v7493_v0  ;;  %v7498_v8 = vadd.f32 %v4111_v15, %v3903_v56  ;;  %v1984_v56 = vld [vmem:[#allocation2 + $0x68] sm:$0xff] }
 0x492   :  { %v7496_v49 = vpop.f32.mrf.mxu1 }
 0x493   :  { %4283 = vmatmul.f32.gmra.mxu0 %v1871_v38  ;;  %8635 = vst [vmem:[#allocation11_spill] sm:$0xff] %v7498_v8  ;;  %3952 = vmatmul.f32.gmra.mxu2 %v1643_v36  ;;  %v4120_v38 = vpop.f32.mrf.mxu3  ;;  %v1777_v8 = vld [vmem:[#allocation2 + $0x3a9] sm:$0xff] }
 0x494   :  { %v8641_v36 = vld [vmem:[#allocation83_spill] sm:$0xff] }
 0x495   :  { %4444 = vmatmul.f32.gmra.mxu1 %v1983_v30  ;;  %v1644_v30 = vld [vmem:[#allocation2 + $0x350] sm:$0xff] }
 0x496   :  { %v3905_v60 = vpop.f32.mrf.mxu2 }
 0x497   :  { %4176 = vmatmul.f32.gmra.mxu3 %v1776_v14  ;;  %v3906_v58 = vadd.f32 %v3905_v60, %v3697_v23  ;;  %v3491_v14 = vadd.f32 %v8641_v36, %v8640_v9  ;;  %v1873_v23 = vld [vmem:[#allocation2 + $0x16f] sm:$0xff] }
 0x498   :  { %v7502_v18 = vpop.f32.mrf.mxu0  ;;  %v8645_v9 = vld [vmem:[#allocation87_spill] sm:$0xff] }
 0x499   :  { %8638 = vst [vmem:[#allocation44_spill] sm:$0xff] %v7502_v18  ;;  %v7507_v15 = vadd.f32 %v4114_v1, %v3906_v58  ;;  %v3700_v13 = vadd.f32 %v7225_v39, %v3491_v14  ;;  %v1985_v1 = vld [vmem:[#allocation2 + $0x70] sm:$0xff]  ;;  %v1645_v58 = vld [vmem:[#allocation2 + $0x368] sm:$0xff] }
 0x49a   :  { %v7505_v0 = vpop.f32.mrf.mxu1 }
 0x49b   :  { %4286 = vmatmul.f32.gmra.mxu0 %v1872_v20  ;;  %8639 = vst [vmem:[#allocation64_spill] sm:$0xff] %v7507_v15  ;;  %3955 = vmatmul.f32.gmra.mxu2 %v1644_v30  ;;  %v8644_v15 = vld [vmem:[#allocation25_spill] sm:$0xff] }
 0x49c   :  { %v3494_v30 = vadd.f32 %v8645_v9, %v8644_v15  ;;  %v8648_v15 = vld [vmem:[#allocation26_spill] sm:$0xff] }
 0x49d   :  { %4447 = vmatmul.f32.gmra.mxu1 %v1984_v56  ;;  %v1778_v56 = vld [vmem:[#allocation2 + $0x3b1] sm:$0xff] }
 0x49e   :  { %v3908_v43 = vpop.f32.mrf.mxu2  ;;  %v3703_v39 = vadd.f32 %v7250_v53, %v3494_v30 }
 0x49f   :  { %4179 = vmatmul.f32.gmra.mxu3 %v1777_v8  ;;  %v3909_v60 = vadd.f32 %v3908_v43, %v3700_v13  ;;  %v4123_v8 = vpop.f32.mrf.mxu3  ;;  %v1874_v13 = vld [vmem:[#allocation2 + $0x187] sm:$0xff] }
 0x4a0   :  { %v7511_v62 = vpop.f32.mrf.mxu0 }
 0x4a1   :  { %8642 = vst [vmem:[#allocation95_spill] sm:$0xff] %v7511_v62  ;;  %v7516_v20 = vadd.f32 %v4117_v2, %v3909_v60  ;;  %v1986_v2 = vld [vmem:[#allocation2 + $0x88] sm:$0xff]  ;;  %v1646_v60 = vld [vmem:[#allocation2 + $0x370] sm:$0xff] }
 0x4a2   :  { %v7514_v18 = vpop.f32.mrf.mxu1 }
 0x4a3   :  { %4289 = vmatmul.f32.gmra.mxu0 %v1873_v23  ;;  %8643 = vst [vmem:[#allocation12_spill] sm:$0xff] %v7516_v20  ;;  %3958 = vmatmul.f32.gmra.mxu2 %v1645_v58  ;;  %v8649_v58 = vld [vmem:[#allocation91_spill] sm:$0xff] }
 0x4a4   :  { %v3497_v9 = vadd.f32 %v8649_v58, %v8648_v15  ;;  %v8651_v15 = vld [vmem:[#allocation27_spill] sm:$0xff] }
 0x4a5   :  { %4450 = vmatmul.f32.gmra.mxu1 %v1985_v1  ;;  %v1779_v1 = vld [vmem:[#allocation2 + $0x3c9] sm:$0xff] }
 0x4a6   :  { %v3911_v14 = vpop.f32.mrf.mxu2  ;;  %v3706_v53 = vadd.f32 %v7263_v32, %v3497_v9 }
 0x4a7   :  { %4182 = vmatmul.f32.gmra.mxu3 %v1778_v56  ;;  %v3912_v43 = vadd.f32 %v3911_v14, %v3703_v39  ;;  %v4126_v30 = vpop.f32.mrf.mxu3  ;;  %v1875_v39 = vld [vmem:[#allocation2 + $0x18f] sm:$0xff] }
 0x4a8   :  { %v7520_v36 = vpop.f32.mrf.mxu0 }
 0x4a9   :  { %8646 = vst [vmem:[#allocation46_spill] sm:$0xff] %v7520_v36  ;;  %v7525_v23 = vadd.f32 %v4120_v38, %v3912_v43  ;;  %v1987_v38 = vld [vmem:[#allocation2 + $0x90] sm:$0xff]  ;;  %v1647_v43 = vld [vmem:[#allocation2 + $0x388] sm:$0xff] }
 0x4aa   :  { %v7523_v62 = vpop.f32.mrf.mxu1 }
 0x4ab   :  { %4292 = vmatmul.f32.gmra.mxu0 %v1874_v13  ;;  %8647 = vst [vmem:[#allocation67_spill] sm:$0xff] %v7525_v23  ;;  %3961 = vmatmul.f32.gmra.mxu2 %v1646_v60  ;;  %v8652_v60 = vld [vmem:[#allocation94_spill] sm:$0xff] }
 0x4ad   :  { %4453 = vmatmul.f32.gmra.mxu1 %v1986_v2  ;;  %v1780_v2 = vld [vmem:[#allocation2 + $0x3d1] sm:$0xff] }
 0x4ae   :  { %v3914_v20 = vpop.f32.mrf.mxu2 }
 0x4af   :  { %4185 = vmatmul.f32.gmra.mxu3 %v1779_v1  ;;  %v3915_v14 = vadd.f32 %v3914_v20, %v3706_v53  ;;  %v3500_v1 = vadd.f32 %v8652_v60, %v8651_v15  ;;  %v1876_v20 = vld [vmem:[#allocation2 + $0x1a7] sm:$0xff]  ;;  %v8655_v15 = vld [vmem:[#allocation28_spill] sm:$0xff] }
 0x4b0   :  { %v7529_v56 = vpop.f32.mrf.mxu0 }
 0x4b1   :  { %v7534_v13 = vadd.f32 %v4123_v8, %v3915_v14  ;;  %v3709_v32 = vadd.f32 %v7276_v11, %v3500_v1  ;;  %v1988_v8 = vld [vmem:[#allocation2 + $0xa8] sm:$0xff] }
 0x4b2   :  { %v7532_v36 = vpop.f32.mrf.mxu1 }
 0x4b3   :  { %4295 = vmatmul.f32.gmra.mxu0 %v1875_v39  ;;  %8650 = vst [vmem:[#allocation98_spill] sm:$0xff] %v7534_v13  ;;  %3964 = vmatmul.f32.gmra.mxu2 %v1647_v43  ;;  %v4129_v39 = vpop.f32.mrf.mxu3  ;;  %v1781_v13 = vld [vmem:[#allocation2 + $0x3e9] sm:$0xff]  ;;  %v8656_v43 = vld [vmem:[#allocation97_spill] sm:$0xff] }
 0x4b5   :  { %4456 = vmatmul.f32.gmra.mxu1 %v1987_v38  ;;  %v1648_v38 = vld [vmem:[#allocation2 + $0x390] sm:$0xff] }
 0x4b6   :  { %v3917_v9 = vpop.f32.mrf.mxu2 }
 0x4b7   :  { %4188 = vmatmul.f32.gmra.mxu3 %v1780_v2  ;;  %v3918_v53 = vadd.f32 %v3917_v9, %v3709_v32  ;;  %v3503_v2 = vadd.f32 %v8656_v43, %v8655_v15  ;;  %v8658_v15 = vld [vmem:[#allocation29_spill] sm:$0xff] }
 0x4b8   :  { %v7539_v58 = vpop.f32.mrf.mxu0 }
 0x4b9   :  { %8653 = vst [vmem:[#allocation13_spill] sm:$0xff] %v7539_v58  ;;  %v7543_v14 = vadd.f32 %v4126_v30, %v3918_v53  ;;  %v3712_v11 = vadd.f32 %v7289_v35, %v3503_v2  ;;  %v1877_v58 = vld [vmem:[#allocation2 + $0x1af] sm:$0xff]  ;;  %v1878_v2 = vld [vmem:[#allocation2 + $0x1c7] sm:$0xff] }
 0x4ba   :  { %v7541_v23 = vpop.f32.mrf.mxu1  ;;  %v1989_v30 = vld [vmem:[#allocation2 + $0xb0] sm:$0xff] }
 0x4bb   :  { %4298 = vmatmul.f32.gmra.mxu0 %v1876_v20  ;;  %8654 = vst [vmem:[#allocation48_spill] sm:$0xff] %v7543_v14  ;;  %3967 = vmatmul.f32.gmra.mxu2 %v1648_v38  ;;  %v4132_v53 = vpop.f32.mrf.mxu3  ;;  %v1782_v14 = vld [vmem:[#allocation2 + $0x3f1] sm:$0xff] }
 0x4bd   :  { %4459 = vmatmul.f32.gmra.mxu1 %v1988_v8  ;;  %v1649_v8 = vld [vmem:[#allocation2 + $0x3a8] sm:$0xff] }
 0x4be   :  { %v3920_v60 = vpop.f32.mrf.mxu2 }
 0x4bf   :  { %4191 = vmatmul.f32.gmra.mxu3 %v1781_v13  ;;  %v3921_v32 = vadd.f32 %v3920_v60, %v3712_v11  ;;  %v3506_v13 = vadd.f32 %v7049_v29, %v8658_v15 }
 0x4c0   :  { %v7550_v9 = vpop.f32.mrf.mxu0 }
 0x4c1   :  { %v7552_v20 = vadd.f32 %v4129_v39, %v3921_v32  ;;  %v3715_v35 = vadd.f32 %v7302_v61, %v3506_v13  ;;  %v1650_v32 = vld [vmem:[#allocation2 + $0x3b0] sm:$0xff] }
 0x4c2   :  { %v7548_v1 = vpop.f32.mrf.mxu1  ;;  %v1879_v13 = vld [vmem:[#allocation2 + $0x1cf] sm:$0xff] }
 0x4c3   :  { %4301 = vmatmul.f32.gmra.mxu0 %v1877_v58  ;;  %8657 = vst [vmem:[#allocation70_spill] sm:$0xff] %v7552_v20  ;;  %3970 = vmatmul.f32.gmra.mxu2 %v1649_v8  ;;  %v1990_v58 = vld [vmem:[#allocation2 + $0xc8] sm:$0xff] }
 0x4c4   :  { %v8659_v20 = vld [vmem:[#allocation30_spill] sm:$0xff] }
 0x4c5   :  { %4462 = vmatmul.f32.gmra.mxu1 %v1989_v30  ;;  %v1783_v30 = vld [vmem:[#allocation2 + $0x409] sm:$0xff]  ;;  %v3509_v29 = vadd.f32 %v7063_v10, %v8659_v20 }
 0x4c6   :  { %v3923_v38 = vpop.f32.mrf.mxu2 }
 0x4c7   :  { %4194 = vmatmul.f32.gmra.mxu3 %v1782_v14  ;;  %v3924_v11 = vadd.f32 %v3923_v38, %v3715_v35  ;;  %v4135_v14 = vpop.f32.mrf.mxu3  ;;  %v3718_v61 = vadd.f32 %v7315_v59, %v3509_v29 }
 0x4c8   :  { %v7561_v60 = vpop.f32.mrf.mxu0 }
 0x4c9   :  { %v7559_v39 = vadd.f32 %v4132_v53, %v3924_v11  ;;  %v1991_v53 = vld [vmem:[#allocation2 + $0xd0] sm:$0xff] }
 0x4ca   :  { %v7557_v43 = vpop.f32.mrf.mxu1  ;;  %v1784_v11 = vld [vmem:[#allocation2 + $0x411] sm:$0xff] }
 0x4cb   :  { %4304 = vmatmul.f32.gmra.mxu0 %v1878_v2  ;;  %3973 = vmatmul.f32.gmra.mxu2 %v1650_v32  ;;  %v1651_v2 = vld [vmem:[#allocation2 + $0x3c8] sm:$0xff] }
 0x4cd   :  { %4465 = vmatmul.f32.gmra.mxu1 %v1990_v58  ;;  %v8660_v58 = vld [vmem:[#allocation31_spill] sm:$0xff] }
 0x4ce   :  { %v3926_v8 = vpop.f32.mrf.mxu2  ;;  %v3512_v10 = vadd.f32 %v7075_v55, %v8660_v58  ;;  %v8662_v55 = vld [vmem:[#allocation32_spill] sm:$0xff] }
 0x4cf   :  { %4197 = vmatmul.f32.gmra.mxu3 %v1783_v30  ;;  %v3927_v35 = vadd.f32 %v3926_v8, %v3718_v61  ;;  %v4138_v32 = vpop.f32.mrf.mxu3  ;;  %v1880_v61 = vld [vmem:[#allocation2 + $0x1e7] sm:$0xff] }
 0x4d0   :  { %v7572_v20 = vpop.f32.mrf.mxu0  ;;  %v3721_v59 = vadd.f32 %v7328_v50, %v3512_v10 }
 0x4d1   :  { %v7568_v38 = vadd.f32 %v4135_v14, %v3927_v35  ;;  %v1992_v14 = vld [vmem:[#allocation2 + $0xe8] sm:$0xff]  ;;  %v1652_v35 = vld [vmem:[#allocation2 + $0x3d0] sm:$0xff] }
 0x4d2   :  { %v7566_v15 = vpop.f32.mrf.mxu1 }
 0x4d3   :  { %4307 = vmatmul.f32.gmra.mxu0 %v1879_v13  ;;  %3976 = vmatmul.f32.gmra.mxu2 %v1651_v2  ;;  %v3515_v2 = vadd.f32 %v7087_v26, %v8662_v55  ;;  %v2957_v26 = vld [vmem:[%s8434_s5 + $0x478] sm:$0xff] }
 0x4d4   :  { %4634 = vmatpush.msra.mxu2 %v2957_v26  ;;  %v1654_v26 = vld [vmem:[#allocation2 + $0x3f0] sm:$0xff] }
 0x4d5   :  { %4468 = vmatmul.f32.gmra.mxu1 %v1991_v53  ;;  %v1785_v53 = vld [vmem:[#allocation2 + $0x429] sm:$0xff]  ;;  %v3724_v50 = vadd.f32 %v7339_v47, %v3515_v2  ;;  %v1786_v47 = vld [vmem:[#allocation2 + $0x431] sm:$0xff] }
 0x4d6   :  { %v3929_v30 = vpop.f32.mrf.mxu2  ;;  %v2956_v2 = vld [vmem:[%s8434_s5 + $0x470] sm:$0xff] }
 0x4d7   :  { %4200 = vmatmul.f32.gmra.mxu3 %v1784_v11  ;;  %v3930_v8 = vadd.f32 %v3929_v30, %v3721_v59  ;;  %v1881_v59 = vld [vmem:[#allocation2 + $0x1ef] sm:$0xff]  ;;  %4635 = vmatpush.msra.mxu2 %v2956_v2 }
 0x4d8   :  { %v7582_v11 = vpop.f32.mrf.mxu0  ;;  %v2952_v2 = vld [vmem:[%s8434_s5 + $0x450] sm:$0xff] }
 0x4d9   :  { %v7577_v13 = vadd.f32 %v4138_v32, %v3930_v8  ;;  %v4141_v32 = vpop.f32.mrf.mxu3 }
 0x4da   :  { %v7575_v29 = vpop.f32.mrf.mxu1 }
 0x4db   :  { %4310 = vmatmul.f32.gmra.mxu0 %v1880_v61  ;;  %8661 = vst [vmem:[#allocation14_spill] sm:$0xff] %v7577_v13  ;;  %3979 = vmatmul.f32.gmra.mxu2 %v1652_v35  ;;  %v1993_v61 = vld [vmem:[#allocation2 + $0xf0] sm:$0xff]  ;;  %v8664_v35 = vld [vmem:[#allocation33_spill] sm:$0xff] }
 0x4dd   :  { %4471 = vmatmul.f32.gmra.mxu1 %v1992_v14  ;;  %v1653_v14 = vld [vmem:[#allocation2 + $0x3e8] sm:$0xff] }
 0x4de   :  { %v3932_v58 = vpop.f32.mrf.mxu2 }
 0x4df   :  { %4203 = vmatmul.f32.gmra.mxu3 %v1785_v53  ;;  %v3933_v30 = vadd.f32 %v3932_v58, %v3724_v50  ;;  %v3518_v53 = vadd.f32 %v7099_v31, %v8664_v35  ;;  %v2955_v31 = vld [vmem:[%s8434_s5 + $0x468] sm:$0xff] }
 0x4e0   :  { %4636 = vmatpush.msra.mxu2 %v2955_v31  ;;  %v1883_v31 = vld [vmem:[#allocation2 + $0x20f] sm:$0xff] }
 0x4e1   :  { %v7586_v8 = vadd.f32 %v4141_v32, %v3933_v30  ;;  %v3727_v55 = vadd.f32 %v7350_v48, %v3518_v53  ;;  %v7601_v32 = vpop.f32.mrf.mxu0  ;;  %v1994_v48 = vld [vmem:[#allocation2 + $0x108] sm:$0xff]  ;;  %v2953_v53 = vld [vmem:[%s8434_s5 + $0x458] sm:$0xff] }
 0x4e2   :  { %v7584_v10 = vpop.f32.mrf.mxu1 }
 0x4e3   :  { %4313 = vmatmul.f32.gmra.mxu0 %v1881_v59  ;;  %8663 = vst [vmem:[#allocation51_spill] sm:$0xff] %v7586_v8  ;;  %3982 = vmatmul.f32.gmra.mxu2 %v1653_v14  ;;  %v1882_v59 = vld [vmem:[#allocation2 + $0x207] sm:$0xff] }
 0x4e4   :  { %v1787_v14 = vld [vmem:[#allocation2 + $0x449] sm:$0xff] }
 0x4e5   :  { %4474 = vmatmul.f32.gmra.mxu1 %v1993_v61  ;;  %v2954_v61 = vld [vmem:[%s8434_s5 + $0x460] sm:$0xff] }
 0x4e6   :  { %v3935_v50 = vpop.f32.mrf.mxu2  ;;  %4637 = vmatpush.msra.mxu2 %v2954_v61  ;;  %v1995_v61 = vld [vmem:[#allocation2 + $0x110] sm:$0xff] }
 0x4e7   :  { %4206 = vmatmul.f32.gmra.mxu3 %v1786_v47  ;;  %v7599_v30 = vadd.f32 %v3935_v50, %v3727_v55  ;;  %v8666_v47 = vld [vmem:[#allocation35_spill] sm:$0xff] }
 0x4e8   :  { %v3521_v35 = vadd.f32 %v7111_v12, %v8666_v47  ;;  %4638 = vmatpush.msra.mxu2 %v2953_v53  ;;  %v2951_v12 = vld [vmem:[%s8434_s5 + $0x448] sm:$0xff]  ;;  %v1788_v47 = vld [vmem:[#allocation2 + $0x451] sm:$0xff] }
 0x4e9   :  { %8665 = vst [vmem:[#allocation73_spill] sm:$0xff] %v7599_v30 }
 0x4ea   :  { %v7597_v58 = vpop.f32.mrf.mxu1  ;;  %v3730_v55 = vadd.f32 %v7361_v46, %v3521_v35  ;;  %4639 = vmatpush.msra.mxu2 %v2952_v2  ;;  %v2950_v46 = vld [vmem:[%s8434_s5 + $0x440] sm:$0xff] }
 0x4eb   :  { %4316 = vmatmul.f32.gmra.mxu0 %v1882_v59  ;;  %3985 = vmatmul.f32.gmra.mxu2 %v1654_v26  ;;  %v7625_v26 = vpop.f32.mrf.mxu0  ;;  %v8668_v35 = vld [vmem:[#allocation37_spill] sm:$0xff] }
 0x4ec   :  { %4640 = vmatpush.msra.mxu2 %v2951_v12  ;;  %v3524_v53 = vadd.f32 %v7123_v33, %v8668_v35  ;;  %v2947_v33 = vld [vmem:[%s8434_s5 + $0x428] sm:$0xff] }
 0x4ed   :  { %4477 = vmatmul.f32.gmra.mxu1 %v1994_v48  ;;  %v8670_v35 = vld [vmem:[#allocation39_spill] sm:$0xff] }
 0x4ee   :  { %v3938_v50 = vpop.f32.mrf.mxu2  ;;  %4641 = vmatpush.msra.mxu2 %v2950_v46  ;;  %v3733_v2 = vadd.f32 %v7372_v17, %v3524_v53  ;;  %v2946_v17 = vld [vmem:[%s8434_s5 + $0x420] sm:$0xff]  ;;  %v3527_v53 = vadd.f32 %v7136_v44, %v8670_v35  ;;  %v1657_v35 = vld [vmem:[#allocation2 + $0x428] sm:$0xff] }
 0x4ef   :  { %4209 = vmatmul.f32.gmra.mxu3 %v1787_v14  ;;  %v7620_v48 = vadd.f32 %v3938_v50, %v3730_v55  ;;  %v1655_v14 = vld [vmem:[#allocation2 + $0x408] sm:$0xff]  ;;  %v2949_v55 = vld [vmem:[%s8434_s5 + $0x438] sm:$0xff]  ;;  %v2948_v50 = vld [vmem:[%s8434_s5 + $0x430] sm:$0xff] }
 0x4f0   :  { %4642 = vmatpush.msra.mxu2 %v2949_v55 }
 0x4f1   :  { %8667 = vst [vmem:[#allocation15_spill] sm:$0xff] %v7620_v48  ;;  %v8674_v48 = vld [vmem:[#allocation43_spill] sm:$0xff] }
 0x4f2   :  { %v7618_v59 = vpop.f32.mrf.mxu1  ;;  %4643 = vmatpush.msra.mxu2 %v2948_v50  ;;  %v3736_v50 = vadd.f32 %v7385_v3, %v3527_v53  ;;  %v2942_v3 = vld [vmem:[%s8434_s5 + $0x400] sm:$0xff] }
 0x4f3   :  { %4319 = vmatmul.f32.gmra.mxu0 %v1883_v31  ;;  %3988 = vmatmul.f32.gmra.mxu2 %v1655_v14  ;;  %v1996_v14 = vld [vmem:[#allocation2 + $0x128] sm:$0xff]  ;;  %v7651_v55 = vpop.f32.mrf.mxu0  ;;  %v8672_v53 = vld [vmem:[#allocation41_spill] sm:$0xff] }
 0x4f4   :  { %4644 = vmatpush.msra.mxu2 %v2947_v33 }
 0x4f5   :  { %4480 = vmatmul.f32.gmra.mxu1 %v1995_v61  ;;  %v1884_v61 = vld [vmem:[#allocation2 + $0x227] sm:$0xff] }
 0x4f6   :  { %v3941_v31 = vpop.f32.mrf.mxu2  ;;  %4645 = vmatpush.msra.mxu2 %v2946_v17  ;;  %v2943_v17 = vld [vmem:[%s8434_s5 + $0x408] sm:$0xff] }
 0x4f7   :  { %4212 = vmatmul.f32.gmra.mxu3 %v1788_v47  ;;  %v7641_v46 = vadd.f32 %v3941_v31, %v3733_v2  ;;  %v1656_v47 = vld [vmem:[#allocation2 + $0x410] sm:$0xff]  ;;  %v2945_v2 = vld [vmem:[%s8434_s5 + $0x418] sm:$0xff] }
 0x4f8   :  { %4646 = vmatpush.msra.mxu2 %v2945_v2  ;;  %v2944_v31 = vld [vmem:[%s8434_s5 + $0x410] sm:$0xff]  ;;  %v3530_v2 = vadd.f32 %v7149_v7, %v8672_v53 }
 0x4f9   :  { %8669 = vst [vmem:[#allocation54_spill] sm:$0xff] %v7641_v46  ;;  %v1658_v46 = vld [vmem:[#allocation2 + $0x430] sm:$0xff] }
 0x4fa   :  { %v7639_v12 = vpop.f32.mrf.mxu1  ;;  %4647 = vmatpush.msra.mxu2 %v2944_v31  ;;  %v1887_v53 = vld [vmem:[#allocation2 + $0x28f] sm:$0xff] }
 0x4fb   :  { %4322 = vmatmul.f32.gmra.mxu0 %v1884_v61  ;;  %3991 = vmatmul.f32.gmra.mxu2 %v1656_v47  ;;  %v1997_v47 = vld [vmem:[#allocation2 + $0x130] sm:$0xff]  ;;  %v7673_v31 = vpop.f32.mrf.mxu0 }
 0x4fc   :  { %4648 = vmatpush.msra.mxu2 %v2943_v17  ;;  %v1886_v17 = vld [vmem:[#allocation2 + $0x287] sm:$0xff] }
 0x4fd   :  { %4483 = vmatmul.f32.gmra.mxu1 %v1996_v14  ;;  %v1885_v14 = vld [vmem:[#allocation2 + $0x22f] sm:$0xff] }
 0x4fe   :  { %v3944_v61 = vpop.f32.mrf.mxu2  ;;  %4649 = vmatpush.msra.mxu2 %v2942_v3  ;;  %v3533_v3 = vadd.f32 %v7170_v57, %v8674_v48 }
 0x4ff   :  { %v7662_v44 = vadd.f32 %v3944_v61, %v3736_v50  ;;  %v3739_v50 = vadd.f32 %v7395_v28, %v3530_v2 }
 0x500   :  { %v3742_v7 = vadd.f32 %v7416_v24, %v3533_v3 }
 0x501   :  { %8671 = vst [vmem:[#allocation77_spill] sm:$0xff] %v7662_v44 }
 0x502   :  { %v7660_v33 = vpop.f32.mrf.mxu1 }
 0x503   :  { %4325 = vmatmul.f32.gmra.mxu0 %v1885_v14  ;;  %3994 = vmatmul.f32.gmra.mxu2 %v1657_v35  ;;  %v7686_v30 = vpop.f32.mrf.mxu0 }
 0x505   :  { %4486 = vmatmul.f32.gmra.mxu1 %v1997_v47  ;;  %v1998_v47 = vld [vmem:[#allocation2 + $0x148] sm:$0xff] }
 0x506   :  { %v3947_v61 = vpop.f32.mrf.mxu2 }
 0x507   :  { %v7677_v44 = vadd.f32 %v3947_v61, %v3739_v50  ;;  %v1999_v50 = vld [vmem:[#allocation2 + $0x150] sm:$0xff]  ;;  %v1659_v61 = vld [vmem:[#allocation2 + $0x448] sm:$0xff] }
 0x509   :  { %8673 = vst [vmem:[#allocation16_spill] sm:$0xff] %v7677_v44 }
 0x50a   :  { %v7675_v14 = vpop.f32.mrf.mxu1 }
 0x50b   :  { %4328 = vmatmul.f32.gmra.mxu0 %v1886_v17  ;;  %3997 = vmatmul.f32.gmra.mxu2 %v1658_v46  ;;  %v8676_v17 = vld [vmem:[#allocation45_spill] sm:$0xff]  ;;  %v1888_v46 = vld [vmem:[#allocation2 + $0x2a7] sm:$0xff] }
 0x50d   :  { %4489 = vmatmul.f32.gmra.mxu1 %v1998_v47  ;;  %v3536_v47 = vadd.f32 %v7194_v40, %v8676_v17  ;;  %v1889_v17 = vld [vmem:[#allocation2 + $0x2af] sm:$0xff] }
 0x50e   :  { %v3950_v35 = vpop.f32.mrf.mxu2 }
 0x50f   :  { %v7684_v2 = vadd.f32 %v3950_v35, %v3742_v7  ;;  %v3745_v57 = vadd.f32 %v7439_v19, %v3536_v47  ;;  %v2000_v7 = vld [vmem:[#allocation2 + $0x168] sm:$0xff]  ;;  %v7695_v35 = vpop.f32.mrf.mxu0 }
 0x511   :  { %8675 = vst [vmem:[#allocation57_spill] sm:$0xff] %v7684_v2 }
 0x512   :  { %v7682_v28 = vpop.f32.mrf.mxu1 }
 0x513   :  { %4331 = vmatmul.f32.gmra.mxu0 %v1887_v53  ;;  %4000 = vmatmul.f32.gmra.mxu2 %v1659_v61  ;;  %v1660_v53 = vld [vmem:[#allocation2 + $0x450] sm:$0xff] }
 0x515   :  { %4492 = vmatmul.f32.gmra.mxu1 %v1999_v50  ;;  %v8678_v50 = vld [vmem:[#allocation47_spill] sm:$0xff] }
 0x516   :  { %v3953_v48 = vpop.f32.mrf.mxu2  ;;  %v3539_v2 = vadd.f32 %v7219_v5, %v8678_v50 }
 0x517   :  { %v7693_v3 = vadd.f32 %v3953_v48, %v3745_v57  ;;  %v2001_v57 = vld [vmem:[#allocation2 + $0x170] sm:$0xff] }
 0x518   :  { %v3748_v40 = vadd.f32 %v7461_v54, %v3539_v2  ;;  %v2110_v48 = vld [vmem:[#allocation2 + $0x49] sm:$0xff] }
 0x519   :  { %8677 = vst [vmem:[#allocation81_spill] sm:$0xff] %v7693_v3  ;;  %v7706_v3 = vpop.f32.mrf.mxu0  ;;  %v1890_v2 = vld [vmem:[#allocation2 + $0x2c7] sm:$0xff] }
 0x51a   :  { %v7691_v24 = vpop.f32.mrf.mxu1 }
 0x51b   :  { %4334 = vmatmul.f32.gmra.mxu0 %v1888_v46  ;;  %4003 = vmatmul.f32.gmra.mxu2 %v1660_v53  ;;  %v8680_v46 = vld [vmem:[#allocation50_spill] sm:$0xff] }
 0x51d   :  { %4495 = vmatmul.f32.gmra.mxu1 %v2000_v7  ;;  %v3542_v7 = vadd.f32 %v7244_v42, %v8680_v46 }
 0x51e   :  { %v3956_v61 = vpop.f32.mrf.mxu2 }
 0x51f   :  { %v7702_v47 = vadd.f32 %v3956_v61, %v3748_v40  ;;  %v3751_v5 = vadd.f32 %v7483_v63, %v3542_v7  ;;  %v2002_v40 = vld [vmem:[#allocation2 + $0x188] sm:$0xff]  ;;  %v2111_v61 = vld [vmem:[#allocation2 + $0x51] sm:$0xff] }
 0x520   :  { %v1891_v7 = vld [vmem:[#allocation2 + $0x2cf] sm:$0xff] }
 0x521   :  { %8679 = vst [vmem:[#allocation17_spill] sm:$0xff] %v7702_v47 }
 0x522   :  { %v7700_v19 = vpop.f32.mrf.mxu1 }
 0x523   :  { %4337 = vmatmul.f32.gmra.mxu0 %v1889_v17  ;;  %4650 = vmatmul.f32.vlgmr.msra.gmra.mxu2 %v2110_v48  ;;  %v8682_v17 = vld [vmem:[#allocation53_spill] sm:$0xff]  ;;  %v7716_v48 = vpop.f32.mrf.mxu0 }
 0x525   :  { %4498 = vmatmul.f32.gmra.mxu1 %v2001_v57  ;;  %v3545_v57 = vadd.f32 %v7260_v16, %v8682_v17 }
 0x526   :  { %v3959_v53 = vpop.f32.mrf.mxu2 }
 0x527   :  { %v7711_v50 = vadd.f32 %v3959_v53, %v3751_v5  ;;  %v3754_v42 = vadd.f32 %v7496_v49, %v3545_v57  ;;  %v2003_v5 = vld [vmem:[#allocation2 + $0x190] sm:$0xff]  ;;  %v1892_v49 = vld [vmem:[#allocation2 + $0x2e7] sm:$0xff] }
 0x528   :  { %v2112_v53 = vld [vmem:[#allocation2 + $0x69] sm:$0xff] }
 0x529   :  { %8681 = vst [vmem:[#allocation60_spill] sm:$0xff] %v7711_v50 }
 0x52a   :  { %v7709_v54 = vpop.f32.mrf.mxu1 }
 0x52b   :  { %4340 = vmatmul.f32.gmra.mxu0 %v1890_v2  ;;  %4653 = vmatmul.f32.gmra.mxu2 %v2111_v61  ;;  %v8684_v2 = vld [vmem:[#allocation56_spill] sm:$0xff]  ;;  %v7727_v57 = vpop.f32.mrf.mxu0 }
 0x52d   :  { %4501 = vmatmul.f32.gmra.mxu1 %v2002_v40  ;;  %v3548_v40 = vadd.f32 %v7273_v21, %v8684_v2 }
 0x52e   :  { %v3962_v46 = vpop.f32.mrf.mxu2 }
 0x52f   :  { %v7720_v47 = vadd.f32 %v3962_v46, %v3754_v42  ;;  %v3757_v16 = vadd.f32 %v7505_v0, %v3548_v40  ;;  %v2004_v42 = vld [vmem:[#allocation2 + $0x1a8] sm:$0xff]  ;;  %v2113_v46 = vld [vmem:[#allocation2 + $0x71] sm:$0xff]  ;;  %v7736_v40 = vpop.f32.mrf.mxu3 }
 0x530   :  { %v1893_v0 = vld [vmem:[#allocation2 + $0x2ef] sm:$0xff]  ;;  %8688 = vst [vmem:[#allocation89_spill] sm:$0xff] %v7736_v40 }
 0x531   :  { %8683 = vst [vmem:[#allocation85_spill] sm:$0xff] %v7720_v47  ;;  %v8733_v40 = vld [vmem:[#allocation103_spill] sm:$0xff] }
 0x532   :  { %v7718_v63 = vpop.f32.mrf.mxu1 }
 0x533   :  { %4343 = vmatmul.f32.gmra.mxu0 %v1891_v7  ;;  %4656 = vmatmul.f32.gmra.mxu2 %v2112_v53  ;;  %v8686_v7 = vld [vmem:[#allocation59_spill] sm:$0xff] }
 0x535   :  { %4504 = vmatmul.f32.gmra.mxu1 %v2003_v5  ;;  %v3551_v5 = vadd.f32 %v7286_v41, %v8686_v7  ;;  %v1894_v7 = vld [vmem:[#allocation2 + $0x307] sm:$0xff] }
 0x536   :  { %v3965_v61 = vpop.f32.mrf.mxu2 }
 0x537   :  { %v7725_v17 = vadd.f32 %v3965_v61, %v3757_v16  ;;  %v3760_v21 = vadd.f32 %v7514_v18, %v3551_v5  ;;  %v2005_v16 = vld [vmem:[#allocation2 + $0x1b0] sm:$0xff]  ;;  %v7738_v61 = vpop.f32.mrf.mxu0 }
 0x539   :  { %8685 = vst [vmem:[#allocation18_spill] sm:$0xff] %v7725_v17  ;;  %v8689_v17 = vld [vmem:[#allocation62_spill] sm:$0xff] }
 0x53a   :  { %v7729_v50 = vpop.f32.mrf.mxu1  ;;  %v3554_v41 = vadd.f32 %v7299_v25, %v8689_v17 }
 0x53b   :  { %4346 = vmatmul.f32.gmra.mxu0 %v1892_v49  ;;  %4659 = vmatmul.f32.gmra.mxu2 %v2113_v46 }
 0x53c   :  { %v3763_v18 = vadd.f32 %v7523_v62, %v3554_v41 }
 0x53d   :  { %4507 = vmatmul.f32.gmra.mxu1 %v2004_v42  ;;  %v2114_v42 = vld [vmem:[#allocation2 + $0x89] sm:$0xff] }
 0x53e   :  { %v3968_v53 = vpop.f32.mrf.mxu2 }
 0x53f   :  { %v7734_v2 = vadd.f32 %v3968_v53, %v3760_v21  ;;  %v2006_v21 = vld [vmem:[#allocation2 + $0x1c8] sm:$0xff]  ;;  %v7747_v53 = vpop.f32.mrf.mxu3  ;;  %v7751_v47 = vpop.f32.mrf.mxu0 }
 0x540   :  { %8691 = vst [vmem:[#allocation66_spill] sm:$0xff] %v7747_v53 }
 0x541   :  { %8687 = vst [vmem:[#allocation63_spill] sm:$0xff] %v7734_v2  ;;  %v8692_v2 = vld [vmem:[#allocation65_spill] sm:$0xff] }
 0x542   :  { %v7740_v49 = vpop.f32.mrf.mxu1 }
 0x543   :  { %4349 = vmatmul.f32.gmra.mxu0 %v1893_v0  ;;  %4662 = vmatmul.f32.gmra.mxu2 %v2114_v42  ;;  %v2115_v0 = vld [vmem:[#allocation2 + $0x91] sm:$0xff] }
 0x544   :  { %v1895_v42 = vld [vmem:[#allocation2 + $0x30f] sm:$0xff] }
 0x545   :  { %4510 = vmatmul.f32.gmra.mxu1 %v2005_v16  ;;  %v3557_v16 = vadd.f32 %v7312_v4, %v8692_v2 }
 0x546   :  { %v3971_v46 = vpop.f32.mrf.mxu2 }
 0x547   :  { %v7745_v5 = vadd.f32 %v3971_v46, %v3763_v18  ;;  %v3766_v62 = vadd.f32 %v7532_v36, %v3557_v16  ;;  %v2007_v18 = vld [vmem:[#allocation2 + $0x1d0] sm:$0xff]  ;;  %v7760_v4 = vpop.f32.mrf.mxu3  ;;  %v1896_v16 = vld [vmem:[#allocation2 + $0x327] sm:$0xff] }
 0x548   :  { %v2116_v46 = vld [vmem:[#allocation2 + $0xa9] sm:$0xff]  ;;  %8695 = vst [vmem:[#allocation69_spill] sm:$0xff] %v7760_v4  ;;  %v8728_v4 = vld [vmem:[#allocation92_spill] sm:$0xff] }
 0x549   :  { %8690 = vst [vmem:[#allocation19_spill] sm:$0xff] %v7745_v5 }
 0x54a   :  { %v7753_v25 = vpop.f32.mrf.mxu1 }
 0x54b   :  { %4352 = vmatmul.f32.gmra.mxu0 %v1894_v7  ;;  %4665 = vmatmul.f32.gmra.mxu2 %v2115_v0  ;;  %v8694_v7 = vld [vmem:[#allocation68_spill] sm:$0xff]  ;;  %v7763_v0 = vpop.f32.mrf.mxu0 }
 0x54d   :  { %4513 = vmatmul.f32.gmra.mxu1 %v2006_v21  ;;  %v3560_v21 = vadd.f32 %v7323_v51, %v8694_v7 }
 0x54e   :  { %v3974_v17 = vpop.f32.mrf.mxu2 }
 0x54f   :  { %v7756_v41 = vadd.f32 %v3974_v17, %v3766_v62  ;;  %v3769_v2 = vadd.f32 %v7541_v23, %v3560_v21  ;;  %v2008_v17 = vld [vmem:[#allocation2 + $0x1e8] sm:$0xff]  ;;  %v7772_v7 = vpop.f32.mrf.mxu3 }
 0x550   :  { %8698 = vst [vmem:[#allocation72_spill] sm:$0xff] %v7772_v7  ;;  %v1897_v21 = vld [vmem:[#allocation2 + $0x32f] sm:$0xff] }
 0x551   :  { %8693 = vst [vmem:[#allocation20_spill] sm:$0xff] %v7756_v41 }
 0x552   :  { %v7765_v5 = vpop.f32.mrf.mxu1 }
 0x553   :  { %4355 = vmatmul.f32.gmra.mxu0 %v1895_v42  ;;  %4668 = vmatmul.f32.gmra.mxu2 %v2116_v46  ;;  %v2117_v42 = vld [vmem:[#allocation2 + $0xb1] sm:$0xff]  ;;  %v7774_v41 = vpop.f32.mrf.mxu0 }
 0x555   :  { %4516 = vmatmul.f32.gmra.mxu1 %v2007_v18  ;;  %v8697_v18 = vld [vmem:[#allocation71_spill] sm:$0xff] }
 0x556   :  { %v3977_v36 = vpop.f32.mrf.mxu2  ;;  %v3563_v51 = vadd.f32 %v7336_v34, %v8697_v18  ;;  %v1898_v18 = vld [vmem:[#allocation2 + $0x347] sm:$0xff] }
 0x557   :  { %v7767_v62 = vadd.f32 %v3977_v36, %v3769_v2  ;;  %v2009_v36 = vld [vmem:[#allocation2 + $0x1f0] sm:$0xff] }
 0x558   :  { %v3772_v46 = vadd.f32 %v7548_v1, %v3563_v51 }
 0x559   :  { %8696 = vst [vmem:[#allocation21_spill] sm:$0xff] %v7767_v62  ;;  %v7785_v62 = vpop.f32.mrf.mxu3 }
 0x55a   :  { %v7778_v2 = vpop.f32.mrf.mxu1  ;;  %8702 = vst [vmem:[#allocation23_spill] sm:$0xff] %v7785_v62  ;;  %v8718_v62 = vld [vmem:[#allocation40_spill] sm:$0xff] }
 0x55b   :  { %4358 = vmatmul.f32.gmra.mxu0 %v1896_v16  ;;  %4671 = vmatmul.f32.gmra.mxu2 %v2117_v42  ;;  %v2118_v16 = vld [vmem:[#allocation2 + $0xc9] sm:$0xff] }
 0x55d   :  { %4519 = vmatmul.f32.gmra.mxu1 %v2008_v17  ;;  %v8700_v17 = vld [vmem:[#allocation74_spill] sm:$0xff] }
 0x55e   :  { %v3980_v23 = vpop.f32.mrf.mxu2  ;;  %v3566_v34 = vadd.f32 %v7347_v37, %v8700_v17  ;;  %v4922_v37 = vld [vmem:[%s8436_s7 + $0x78] sm:$0xff] }
 0x55f   :  { %v7776_v44 = vadd.f32 %v3980_v23, %v3772_v46  ;;  %v2010_v46 = vld [vmem:[#allocation2 + $0x208] sm:$0xff]  ;;  %v7787_v23 = vpop.f32.mrf.mxu0  ;;  %4927 = vmatpush.msra.mxu3 %v4922_v37  ;;  %v2011_v37 = vld [vmem:[#allocation2 + $0x210] sm:$0xff] }
 0x560   :  { %v3775_v1 = vadd.f32 %v7557_v43, %v3566_v34  ;;  %v8703_v43 = vld [vmem:[#allocation78_spill] sm:$0xff]  ;;  %v4921_v34 = vld [vmem:[%s8436_s7 + $0x70] sm:$0xff] }
 0x561   :  { %8699 = vst [vmem:[#allocation22_spill] sm:$0xff] %v7776_v44  ;;  %4928 = vmatpush.msra.mxu3 %v4921_v34 }
 0x563   :  { %4361 = vmatmul.f32.gmra.mxu0 %v1897_v21  ;;  %4674 = vmatmul.f32.gmra.mxu2 %v2118_v16  ;;  %v7789_v21 = vpop.f32.mrf.mxu1  ;;  %v3569_v16 = vadd.f32 %v7358_v27, %v8703_v43  ;;  %v4919_v27 = vld [vmem:[%s8436_s7 + $0x60] sm:$0xff] }
 0x564   :  { %v8706_v43 = vld [vmem:[#allocation82_spill] sm:$0xff] }
 0x565   :  { %4522 = vmatmul.f32.gmra.mxu1 %v2009_v36  ;;  %v2119_v36 = vld [vmem:[#allocation2 + $0xd1] sm:$0xff]  ;;  %v3778_v17 = vadd.f32 %v7566_v15, %v3569_v16  ;;  %v7808_v15 = vpop.f32.mrf.mxu3  ;;  %v3572_v16 = vadd.f32 %v7369_v22, %v8706_v43  ;;  %v7828_v43 = vld [vmem:[#allocation2] sm:$0xff] }
 0x566   :  { %v3983_v42 = vpop.f32.mrf.mxu2  ;;  %8705 = vst [vmem:[#allocation24_spill] sm:$0xff] %v7808_v15  ;;  %v8717_v15 = vld [vmem:[#allocation96_spill] sm:$0xff] }
 0x567   :  { %v7783_v51 = vadd.f32 %v3983_v42, %v3775_v1  ;;  %v1899_v42 = vld [vmem:[#allocation2 + $0x34f] sm:$0xff] }
 0x569   :  { %8701 = vst [vmem:[#allocation75_spill] sm:$0xff] %v7783_v51 }
 0x56b   :  { %4364 = vmatmul.f32.gmra.mxu0 %v1898_v18  ;;  %4677 = vmatmul.f32.gmra.mxu2 %v2119_v36  ;;  %v2120_v36 = vld [vmem:[#allocation2 + $0xe9] sm:$0xff]  ;;  %v7814_v34 = vpop.f32.mrf.mxu1 }
 0x56d   :  { %4525 = vmatmul.f32.gmra.mxu1 %v2010_v46  ;;  %v4920_v46 = vld [vmem:[%s8436_s7 + $0x68] sm:$0xff] }
 0x56e   :  { %v3986_v1 = vpop.f32.mrf.mxu2  ;;  %4929 = vmatpush.msra.mxu3 %v4920_v46  ;;  %v4917_v46 = vld [vmem:[%s8436_s7 + $0x50] sm:$0xff] }
 0x56f   :  { %v7800_v18 = vadd.f32 %v3986_v1, %v3778_v17  ;;  %v7812_v17 = vpop.f32.mrf.mxu0  ;;  %v4918_v1 = vld [vmem:[%s8436_s7 + $0x58] sm:$0xff] }
 0x570   :  { %4930 = vmatpush.msra.mxu3 %v4919_v27  ;;  %v1900_v27 = vld [vmem:[#allocation2 + $0x367] sm:$0xff] }
 0x571   :  { %8704 = vst [vmem:[#allocation79_spill] sm:$0xff] %v7800_v18 }
 0x572   :  { %4931 = vmatpush.msra.mxu3 %v4918_v1  ;;  %v8708_v1 = vld [vmem:[#allocation86_spill] sm:$0xff] }
 0x573   :  { %4367 = vmatmul.f32.gmra.mxu0 %v1899_v42  ;;  %4680 = vmatmul.f32.gmra.mxu2 %v2120_v36  ;;  %v3781_v42 = vadd.f32 %v7575_v29, %v3572_v16  ;;  %v4916_v36 = vld [vmem:[%s8436_s7 + $0x48] sm:$0xff]  ;;  %v4915_v29 = vld [vmem:[%s8436_s7 + $0x40] sm:$0xff]  ;;  %v2121_v16 = vld [vmem:[#allocation2 + $0xf1] sm:$0xff] }
 0x574   :  { %4932 = vmatpush.msra.mxu3 %v4917_v46  ;;  %v4914_v46 = vld [vmem:[%s8436_s7 + $0x38] sm:$0xff] }
 0x575   :  { %4528 = vmatmul.f32.gmra.mxu1 %v2011_v37 }
 0x576   :  { %v3989_v37 = vpop.f32.mrf.mxu2  ;;  %4933 = vmatpush.msra.mxu3 %v4916_v36 }
 0x577   :  { %v7823_v22 = vadd.f32 %v3989_v37, %v3781_v42  ;;  %v3575_v42 = vadd.f32 %v7380_v52, %v8708_v1  ;;  %v7839_v37 = vpop.f32.mrf.mxu3  ;;  %v7842_v36 = vpop.f32.mrf.mxu0  ;;  %v1901_v52 = vld [vmem:[#allocation2 + $0x36f] sm:$0xff] }
 0x578   :  { %4934 = vmatpush.msra.mxu3 %v4915_v29  ;;  %8709 = vst [vmem:[#allocation25_spill] sm:$0xff] %v7839_v37  ;;  %v4913_v29 = vld [vmem:[%s8436_s7 + $0x30] sm:$0xff]  ;;  %v4912_v1 = vld [vmem:[%s8436_s7 + $0x28] sm:$0xff] }
 0x579   :  { %8707 = vst [vmem:[#allocation83_spill] sm:$0xff] %v7823_v22  ;;  %v7844_v22 = vpop.f32.mrf.mxu1 }
 0x57a   :  { %4935 = vmatpush.msra.mxu3 %v4914_v46  ;;  %v8711_v46 = vld [vmem:[#allocation90_spill] sm:$0xff] }
 0x57b   :  { %4370 = vmatmul.f32.gmra.mxu0 %v1900_v27  ;;  %4683 = vmatmul.f32.gmra.mxu2 %v2121_v16  ;;  %v3784_v27 = vadd.f32 %v7584_v10, %v3575_v42  ;;  %v4911_v10 = vld [vmem:[%s8436_s7 + $0x20] sm:$0xff]  ;;  %v2122_v42 = vld [vmem:[#allocation2 + $0x109] sm:$0xff] }
 0x57c   :  { %4936 = vmatpush.msra.mxu3 %v4913_v29  ;;  %v3578_v29 = vadd.f32 %v7392_v6, %v8711_v46  ;;  %v2014_v46 = vld [vmem:[#allocation2 + $0x288] sm:$0xff] }
 0x57d   :  { %4531 = vmatmul.f32.gmra.mxu1 %v7828_v43 }
 0x57e   :  { %v3992_v18 = vpop.f32.mrf.mxu2  ;;  %4937 = vmatpush.msra.mxu3 %v4912_v1 }
 0x57f   :  { %v7849_v16 = vadd.f32 %v3992_v18, %v3784_v27  ;;  %v4910_v18 = vld [vmem:[%s8436_s7 + $0x18] sm:$0xff]  ;;  %v3787_v27 = vadd.f32 %v7597_v58, %v3578_v29  ;;  %v7867_v1 = vpop.f32.mrf.mxu3  ;;  %v7869_v51 = vpop.f32.mrf.mxu0  ;;  %v4908_v58 = vld [vmem:[%s8436_s7 + $0x8] sm:$0xff]  ;;  %v4907_v29 = vld [vmem:[%s8436_s7] sm:$0xff] }
 0x580   :  { %4938 = vmatpush.msra.mxu3 %v4911_v10  ;;  %8712 = vst [vmem:[#allocation26_spill] sm:$0xff] %v7867_v1  ;;  %v1902_v10 = vld [vmem:[#allocation2 + $0x387] sm:$0xff] }
 0x581   :  { %8710 = vst [vmem:[#allocation87_spill] sm:$0xff] %v7849_v16 }
 0x582   :  { %4939 = vmatpush.msra.mxu3 %v4910_v18  ;;  %v2123_v18 = vld [vmem:[#allocation2 + $0x111] sm:$0xff] }
 0x583   :  { %4373 = vmatmul.f32.gmra.mxu0 %v1901_v52  ;;  %4686 = vmatmul.f32.gmra.mxu2 %v2122_v42  ;;  %v4909_v52 = vld [vmem:[%s8436_s7 + $0x10] sm:$0xff]  ;;  %v7873_v42 = vpop.f32.mrf.mxu1 }
 0x584   :  { %4940 = vmatpush.msra.mxu3 %v4909_v52  ;;  %v8714_v52 = vld [vmem:[#allocation93_spill] sm:$0xff] }
 0x585   :  { %4534 = vmatmul.f32.gmra.mxu1 %v7828_v43 }
 0x586   :  { %v3995_v16 = vpop.f32.mrf.mxu2  ;;  %4941 = vmatpush.msra.mxu3 %v4908_v58 }
 0x587   :  { %v7871_v6 = vadd.f32 %v3995_v16, %v3787_v27  ;;  %v3581_v16 = vadd.f32 %v7410_v45, %v8714_v52  ;;  %v7886_v58 = vpop.f32.mrf.mxu3  ;;  %v7888_v1 = vpop.f32.mrf.mxu0  ;;  %v3584_v45 = vadd.f32 %v8718_v62, %v8717_v15  ;;  %v1904_v52 = vld [vmem:[#allocation2 + $0x3a7] sm:$0xff] }
 0x588   :  { %4942 = vmatpush.msra.mxu3 %v4907_v29  ;;  %8716 = vst [vmem:[#allocation94_spill] sm:$0xff] %v7886_v58  ;;  %v2124_v29 = vld [vmem:[#allocation2 + $0x129] sm:$0xff]  ;;  %v8722_v58 = vld [vmem:[#allocation88_spill] sm:$0xff] }
 0x589   :  { %8713 = vst [vmem:[#allocation91_spill] sm:$0xff] %v7871_v6  ;;  %v3790_v27 = vadd.f32 %v7618_v59, %v3581_v16  ;;  %v1903_v6 = vld [vmem:[#allocation2 + $0x38f] sm:$0xff]  ;;  %v3793_v59 = vadd.f32 %v7639_v12, %v3584_v45 }
 0x58b   :  { %4376 = vmatmul.f32.gmra.mxu0 %v1902_v10  ;;  %4689 = vmatmul.f32.gmra.mxu2 %v2123_v18  ;;  %v7890_v37 = vpop.f32.mrf.mxu1 }
 0x58d   :  { %4537 = vmatmul.f32.gmra.mxu1 %v2014_v46  ;;  %v2015_v46 = vld [vmem:[#allocation2 + $0x290] sm:$0xff] }
 0x58e   :  { %v3998_v10 = vpop.f32.mrf.mxu2 }
 0x58f   :  { %v7884_v44 = vadd.f32 %v3998_v10, %v3790_v27  ;;  %v7897_v27 = vpop.f32.mrf.mxu3  ;;  %v2125_v10 = vld [vmem:[#allocation2 + $0x131] sm:$0xff]  ;;  %v7901_v7 = vpop.f32.mrf.mxu0 }
 0x590   :  { %8720 = vst [vmem:[#allocation97_spill] sm:$0xff] %v7897_v27 }
 0x591   :  { %8715 = vst [vmem:[#allocation27_spill] sm:$0xff] %v7884_v44  ;;  %v8721_v44 = vld [vmem:[#allocation99_spill] sm:$0xff] }
 0x593   :  { %4379 = vmatmul.f32.gmra.mxu0 %v1903_v6  ;;  %4692 = vmatmul.f32.gmra.mxu2 %v2124_v29  ;;  %v2016_v6 = vld [vmem:[#allocation2 + $0x2a8] sm:$0xff]  ;;  %v7903_v62 = vpop.f32.mrf.mxu1 }
 0x594   :  { %v1905_v29 = vld [vmem:[#allocation2 + $0x3af] sm:$0xff] }
 0x595   :  { %4540 = vmatmul.f32.gmra.mxu1 %v2015_v46  ;;  %v3587_v46 = vadd.f32 %v8722_v58, %v8721_v44 }
 0x596   :  { %v4001_v18 = vpop.f32.mrf.mxu2 }
 0x597   :  { %v7895_v16 = vadd.f32 %v4001_v18, %v3793_v59  ;;  %v3796_v12 = vadd.f32 %v7660_v33, %v3587_v46  ;;  %v2017_v59 = vld [vmem:[#allocation2 + $0x2b0] sm:$0xff]  ;;  %v7910_v44 = vpop.f32.mrf.mxu3  ;;  %v1906_v46 = vld [vmem:[#allocation2 + $0x3c7] sm:$0xff] }
 0x598   :  { %v2126_v18 = vld [vmem:[#allocation2 + $0x149] sm:$0xff]  ;;  %8726 = vst [vmem:[#allocation30_spill] sm:$0xff] %v7910_v44 }
 0x599   :  { %8719 = vst [vmem:[#allocation28_spill] sm:$0xff] %v7895_v16 }
 0x59b   :  { %4382 = vmatmul.f32.gmra.mxu0 %v1904_v52  ;;  %4695 = vmatmul.f32.gmra.mxu2 %v2125_v10  ;;  %v8724_v52 = vld [vmem:[#allocation100_spill] sm:$0xff]  ;;  %v7913_v10 = vpop.f32.mrf.mxu0  ;;  %v7915_v27 = vpop.f32.mrf.mxu1 }
 0x59d   :  { %4543 = vmatmul.f32.gmra.mxu1 %v2016_v6  ;;  %v8725_v6 = vld [vmem:[#allocation42_spill] sm:$0xff] }
 0x59e   :  { %v4004_v15 = vpop.f32.mrf.mxu2  ;;  %v4234_v16 = vadd.f32 %v8725_v6, %v8724_v52  ;;  %v1907_v6 = vld [vmem:[#allocation2 + $0x3cf] sm:$0xff] }
 0x59f   :  { %v7906_v45 = vadd.f32 %v4004_v15, %v3796_v12  ;;  %v2018_v15 = vld [vmem:[#allocation2 + $0x2c8] sm:$0xff] }
 0x5a0   :  { %v4443_v58 = vadd.f32 %v7675_v14, %v4234_v16  ;;  %v7920_v14 = vpop.f32.mrf.mxu3 }
 0x5a1   :  { %8723 = vst [vmem:[#allocation29_spill] sm:$0xff] %v7906_v45  ;;  %v8727_v45 = vld [vmem:[#allocation101_spill] sm:$0xff] }
 0x5a2   :  { %v4237_v52 = vadd.f32 %v8728_v4, %v8727_v45  ;;  %8729 = vst [vmem:[#allocation31_spill] sm:$0xff] %v7920_v14  ;;  %v8731_v4 = vld [vmem:[#allocation44_spill] sm:$0xff] }
 0x5a3   :  { %4385 = vmatmul.f32.gmra.mxu0 %v1905_v29  ;;  %4698 = vmatmul.f32.gmra.mxu2 %v2126_v18  ;;  %v7922_v44 = vpop.f32.mrf.mxu0 }
 0x5a4   :  { %v4446_v18 = vadd.f32 %v7682_v28, %v4237_v52 }
 0x5a5   :  { %4546 = vmatmul.f32.gmra.mxu1 %v2017_v59  ;;  %v2127_v59 = vld [vmem:[#allocation2 + $0x151] sm:$0xff] }
 0x5a6   :  { %v4651_v33 = vpop.f32.mrf.mxu2 }
 0x5a7   :  { %v4652_v12 = vadd.f32 %v4651_v33, %v4443_v58  ;;  %v7924_v58 = vpop.f32.mrf.mxu1  ;;  %v2019_v33 = vld [vmem:[#allocation2 + $0x2d0] sm:$0xff] }
 0x5a8   :  { %v7929_v14 = vpop.f32.mrf.mxu3 }
 0x5a9   :  { %v4843_v29 = vmax.f32 %v4652_v12, 0.0  ;;  %v2128_v12 = vld [vmem:[#allocation2 + $0x169] sm:$0xff]  ;;  %8732 = vst [vmem:[#allocation32_spill] sm:$0xff] %v7929_v14  ;;  %v8735_v14 = vld [vmem:[#allocation104_spill] sm:$0xff] }
 0x5ab   :  { %4388 = vmatmul.f32.gmra.mxu0 %v1906_v46  ;;  %4701 = vmatmul.f32.gmra.mxu2 %v2127_v59  ;;  %v1908_v59 = vld [vmem:[#allocation2 + $0x3e7] sm:$0xff] }
 0x5ac   :  { %4943 = vmatmul.f32.vlgmr.msra.gmra.mxu3 %v4843_v29 }
 0x5ad   :  { %4549 = vmatmul.f32.gmra.mxu1 %v2018_v15  ;;  %v8730_v15 = vld [vmem:[#allocation102_spill] sm:$0xff] }
 0x5ae   :  { %v4654_v16 = vpop.f32.mrf.mxu2  ;;  %v4240_v45 = vadd.f32 %v8731_v4, %v8730_v15  ;;  %v8734_v15 = vld [vmem:[#allocation95_spill] sm:$0xff] }
 0x5af   :  { %v4655_v53 = vadd.f32 %v4654_v16, %v4446_v18  ;;  %v2020_v18 = vld [vmem:[#allocation2 + $0x2e8] sm:$0xff]  ;;  %v7931_v16 = vpop.f32.mrf.mxu0 }
 0x5b0   :  { %v4449_v28 = vadd.f32 %v7691_v24, %v4240_v45  ;;  %v1909_v4 = vld [vmem:[#allocation2 + $0x3ef] sm:$0xff] }
 0x5b1   :  { %v4844_v46 = vmax.f32 %v4655_v53, 0.0  ;;  %v7933_v53 = vpop.f32.mrf.mxu1 }
 0x5b3   :  { %4391 = vmatmul.f32.gmra.mxu0 %v1907_v6  ;;  %4704 = vmatmul.f32.gmra.mxu2 %v2128_v12  ;;  %v4243_v12 = vadd.f32 %v8734_v15, %v8733_v40 }
 0x5b4   :  { %4946 = vmatmul.f32.gmra.mxu3 %v4844_v46 }
 0x5b5   :  { %4552 = vmatmul.f32.gmra.mxu1 %v2019_v33  ;;  %v2129_v33 = vld [vmem:[#allocation2 + $0x171] sm:$0xff]  ;;  %v4452_v24 = vadd.f32 %v7700_v19, %v4243_v12  ;;  %v2022_v12 = vld [vmem:[#allocation2 + $0x308] sm:$0xff] }
 0x5b6   :  { %v4657_v29 = vpop.f32.mrf.mxu2 }
 0x5b7   :  { %v4658_v52 = vadd.f32 %v4657_v29, %v4449_v28  ;;  %v2021_v28 = vld [vmem:[#allocation2 + $0x2f0] sm:$0xff]  ;;  %v7942_v13 = vpop.f32.mrf.mxu0 }
 0x5b9   :  { %v4845_v6 = vmax.f32 %v4658_v52, 0.0  ;;  %v2130_v52 = vld [vmem:[#allocation2 + $0x189] sm:$0xff]  ;;  %v7944_v40 = vpop.f32.mrf.mxu1 }
 0x5bb   :  { %4394 = vmatmul.f32.gmra.mxu0 %v1908_v59  ;;  %4707 = vmatmul.f32.gmra.mxu2 %v2129_v33  ;;  %v7938_v59 = vpop.f32.mrf.mxu3  ;;  %v1910_v33 = vld [vmem:[#allocation2 + $0x407] sm:$0xff] }
 0x5bc   :  { %4949 = vmatmul.f32.gmra.mxu3 %v4845_v6 }
 0x5bd   :  { %4555 = vmatmul.f32.gmra.mxu1 %v2020_v18  ;;  %v8736_v18 = vld [vmem:[#allocation46_spill] sm:$0xff] }
 0x5be   :  { %v4660_v46 = vpop.f32.mrf.mxu2  ;;  %v4246_v8 = vadd.f32 %v8736_v18, %v8735_v14 }
 0x5bf   :  { %v4661_v45 = vadd.f32 %v4660_v46, %v4452_v24  ;;  %v2131_v46 = vld [vmem:[#allocation2 + $0x191] sm:$0xff] }
 0x5c0   :  { %v4455_v19 = vadd.f32 %v7709_v54, %v4246_v8 }
 0x5c1   :  { %v4846_v29 = vmax.f32 %v4661_v45, 0.0  ;;  %v7954_v8 = vpop.f32.mrf.mxu1 }
 0x5c3   :  { %4397 = vmatmul.f32.gmra.mxu0 %v1909_v4  ;;  %4710 = vmatmul.f32.gmra.mxu2 %v2130_v52  ;;  %v8737_v4 = vld [vmem:[#allocation105_spill] sm:$0xff]  ;;  %v7949_v14 = vpop.f32.mrf.mxu3  ;;  %v1911_v52 = vld [vmem:[#allocation2 + $0x40f] sm:$0xff] }
 0x5c4   :  { %4952 = vmatmul.f32.gmra.mxu3 %v4846_v29  ;;  %v4249_v45 = vadd.f32 %v7529_v56, %v8737_v4  ;;  %8738 = vst [vmem:[#allocation33_spill] sm:$0xff] %v7949_v14  ;;  %v7952_v29 = vpop.f32.mrf.mxu0  ;;  %v8740_v56 = vld [vmem:[#allocation13_spill] sm:$0xff]  ;;  %v1912_v4 = vld [vmem:[#allocation2 + $0x427] sm:$0xff] }
 0x5c5   :  { %4558 = vmatmul.f32.gmra.mxu1 %v2021_v28 }
 0x5c6   :  { %v4663_v6 = vpop.f32.mrf.mxu2  ;;  %v4458_v28 = vadd.f32 %v7718_v63, %v4249_v45 }
 0x5c7   :  { %v4664_v15 = vadd.f32 %v4663_v6, %v4455_v19  ;;  %v2023_v19 = vld [vmem:[#allocation2 + $0x310] sm:$0xff] }
 0x5c9   :  { %v4847_v24 = vmax.f32 %v4664_v15, 0.0  ;;  %v8739_v15 = vld [vmem:[#allocation106_spill] sm:$0xff]  ;;  %v7963_v14 = vpop.f32.mrf.mxu1 }
 0x5cb   :  { %4400 = vmatmul.f32.gmra.mxu0 %v1910_v33  ;;  %4713 = vmatmul.f32.gmra.mxu2 %v2131_v46  ;;  %v2132_v33 = vld [vmem:[#allocation2 + $0x1a9] sm:$0xff]  ;;  %v7959_v63 = vpop.f32.mrf.mxu3 }
 0x5cc   :  { %4955 = vmatmul.f32.gmra.mxu3 %v4847_v24  ;;  %8741 = vst [vmem:[#allocation35_spill] sm:$0xff] %v7959_v63  ;;  %v7961_v45 = vpop.f32.mrf.mxu0  ;;  %v2025_v63 = vld [vmem:[#allocation2 + $0x330] sm:$0xff] }
 0x5cd   :  { %4561 = vmatmul.f32.gmra.mxu1 %v2022_v12  ;;  %v4252_v12 = vadd.f32 %v8740_v56, %v8739_v15  ;;  %v1913_v15 = vld [vmem:[#allocation2 + $0x42f] sm:$0xff] }
 0x5ce   :  { %v4666_v54 = vpop.f32.mrf.mxu2 }
 0x5cf   :  { %v4667_v18 = vadd.f32 %v4666_v54, %v4458_v28  ;;  %v4461_v24 = vadd.f32 %v7729_v50, %v4252_v12  ;;  %v2024_v54 = vld [vmem:[#allocation2 + $0x328] sm:$0xff] }
 0x5d1   :  { %v4848_v6 = vmax.f32 %v4667_v18, 0.0  ;;  %v2133_v18 = vld [vmem:[#allocation2 + $0x1b1] sm:$0xff] }
 0x5d3   :  { %4403 = vmatmul.f32.gmra.mxu0 %v1911_v52  ;;  %4716 = vmatmul.f32.gmra.mxu2 %v2132_v33  ;;  %v7968_v12 = vpop.f32.mrf.mxu3 }
 0x5d4   :  { %4958 = vmatmul.f32.gmra.mxu3 %v4848_v6  ;;  %8743 = vst [vmem:[#allocation37_spill] sm:$0xff] %v7968_v12 }
 0x5d5   :  { %4564 = vmatmul.f32.gmra.mxu1 %v2023_v19  ;;  %v8742_v19 = vld [vmem:[#allocation107_spill] sm:$0xff] }
 0x5d6   :  { %v4669_v46 = vpop.f32.mrf.mxu2  ;;  %v4255_v33 = vadd.f32 %v7550_v9, %v8742_v19 }
 0x5d7   :  { %v4670_v28 = vadd.f32 %v4669_v46, %v4461_v24  ;;  %v7970_v24 = vpop.f32.mrf.mxu0  ;;  %v7972_v46 = vpop.f32.mrf.mxu1 }
 0x5d8   :  { %v4464_v50 = vadd.f32 %v7740_v49, %v4255_v33  ;;  %v2026_v33 = vld [vmem:[#allocation2 + $0x348] sm:$0xff] }
 0x5d9   :  { %v4849_v52 = vmax.f32 %v4670_v28, 0.0  ;;  %v2134_v28 = vld [vmem:[#allocation2 + $0x1c9] sm:$0xff] }
 0x5db   :  { %4406 = vmatmul.f32.gmra.mxu0 %v1912_v4  ;;  %4719 = vmatmul.f32.gmra.mxu2 %v2133_v18  ;;  %v1914_v18 = vld [vmem:[#allocation2 + $0x447] sm:$0xff] }
 0x5dc   :  { %4961 = vmatmul.f32.gmra.mxu3 %v4849_v52 }
 0x5dd   :  { %4567 = vmatmul.f32.gmra.mxu1 %v2024_v54  ;;  %v8744_v54 = vld [vmem:[#allocation108_spill] sm:$0xff] }
 0x5de   :  { %v4672_v6 = vpop.f32.mrf.mxu2  ;;  %v4258_v9 = vadd.f32 %v7561_v60, %v8744_v54 }
 0x5df   :  { %v4673_v56 = vadd.f32 %v4672_v6, %v4464_v50  ;;  %v7977_v6 = vpop.f32.mrf.mxu3  ;;  %v7981_v12 = vpop.f32.mrf.mxu0 }
 0x5e0   :  { %v4467_v49 = vadd.f32 %v7753_v25, %v4258_v9  ;;  %v7983_v60 = vpop.f32.mrf.mxu1  ;;  %v2027_v9 = vld [vmem:[#allocation2 + $0x350] sm:$0xff] }
 0x5e1   :  { %v4850_v4 = vmax.f32 %v4673_v56, 0.0  ;;  %v8745_v56 = vld [vmem:[#allocation109_spill] sm:$0xff] }
 0x5e3   :  { %4409 = vmatmul.f32.gmra.mxu0 %v1913_v15  ;;  %4722 = vmatmul.f32.gmra.mxu2 %v2134_v28  ;;  %v2135_v15 = vld [vmem:[#allocation2 + $0x1d1] sm:$0xff] }
 0x5e4   :  { %4964 = vmatmul.f32.gmra.mxu3 %v4850_v4  ;;  %v1915_v28 = vld [vmem:[#allocation2 + $0x44f] sm:$0xff] }
 0x5e5   :  { %4570 = vmatmul.f32.gmra.mxu1 %v2025_v63  ;;  %v4261_v63 = vadd.f32 %v7572_v20, %v8745_v56  ;;  %v1916_v56 = vld [vmem:[#allocation2 + $0x467] sm:$0xff] }
 0x5e6   :  { %v4675_v52 = vpop.f32.mrf.mxu2 }
 0x5e7   :  { %v4676_v19 = vadd.f32 %v4675_v52, %v4467_v49  ;;  %v4470_v25 = vadd.f32 %v7765_v5, %v4261_v63  ;;  %v2136_v52 = vld [vmem:[#allocation2 + $0x1e9] sm:$0xff]  ;;  %v7988_v20 = vpop.f32.mrf.mxu3 }
 0x5e8   :  { %v7993_v5 = vpop.f32.mrf.mxu1 }
 0x5e9   :  { %v4851_v50 = vmax.f32 %v4676_v19, 0.0 }
 0x5eb   :  { %4412 = vmatmul.f32.gmra.mxu0 %v1914_v18  ;;  %4725 = vmatmul.f32.gmra.mxu2 %v2135_v15  ;;  %v8746_v18 = vld [vmem:[#allocation110_spill] sm:$0xff] }
 0x5ec   :  { %4967 = vmatmul.f32.gmra.mxu3 %v4851_v50  ;;  %v4264_v19 = vadd.f32 %v7582_v11, %v8746_v18  ;;  %v7991_v50 = vpop.f32.mrf.mxu0 }
 0x5ed   :  { %4573 = vmatmul.f32.gmra.mxu1 %v2026_v33 }
 0x5ee   :  { %v4678_v4 = vpop.f32.mrf.mxu2  ;;  %v4473_v33 = vadd.f32 %v7778_v2, %v4264_v19 }
 0x5ef   :  { %v4679_v54 = vadd.f32 %v4678_v4, %v4470_v25  ;;  %v2028_v25 = vld [vmem:[#allocation2 + $0x368] sm:$0xff]  ;;  %v7998_v2 = vpop.f32.mrf.mxu3 }
 0x5f0   :  { %v8002_v19 = vpop.f32.mrf.mxu1 }
 0x5f1   :  { %v4852_v49 = vmax.f32 %v4679_v54, 0.0  ;;  %v8747_v54 = vld [vmem:[#allocation111_spill] sm:$0xff] }
 0x5f2   :  { %v4267_v11 = vadd.f32 %v7601_v32, %v8747_v54 }
 0x5f3   :  { %4415 = vmatmul.f32.gmra.mxu0 %v1915_v28  ;;  %4728 = vmatmul.f32.gmra.mxu2 %v2136_v52  ;;  %v2137_v28 = vld [vmem:[#allocation2 + $0x1f1] sm:$0xff] }
 0x5f4   :  { %4970 = vmatmul.f32.gmra.mxu3 %v4852_v49  ;;  %v1917_v52 = vld [vmem:[#allocation2 + $0x46f] sm:$0xff]  ;;  %v8000_v18 = vpop.f32.mrf.mxu0 }
 0x5f5   :  { %4576 = vmatmul.f32.gmra.mxu1 %v2027_v9  ;;  %v4476_v9 = vadd.f32 %v7789_v21, %v4267_v11 }
 0x5f6   :  { %v4681_v15 = vpop.f32.mrf.mxu2 }
 0x5f7   :  { %v4682_v63 = vadd.f32 %v4681_v15, %v4473_v33  ;;  %v2029_v15 = vld [vmem:[#allocation2 + $0x370] sm:$0xff]  ;;  %v8010_v11 = vpop.f32.mrf.mxu3 }
 0x5f9   :  { %v4853_v4 = vmax.f32 %v4682_v63, 0.0  ;;  %v2138_v63 = vld [vmem:[#allocation2 + $0x209] sm:$0xff] }
 0x5fb   :  { %4418 = vmatmul.f32.gmra.mxu0 %v1916_v56  ;;  %4731 = vmatmul.f32.gmra.mxu2 %v2137_v28 }
 0x5fc   :  { %4973 = vmatmul.f32.gmra.mxu3 %v4853_v4  ;;  %v16_v4 = vstv %s8437_s8  ;;  %s5563_s8 = smov 1  }
 0x5fd   :  { %4579 = vmatmul.f32.gmra.mxu1 %v2028_v25  ;;  %v8748_v25 = vld [vmem:[#allocation112_spill] sm:$0xff]  ;;  %17 = vst [vmem:[#allocation5] sm:$0x1] %v16_v4 }
 0x5fe   :  { %v4684_v49 = vpop.f32.mrf.mxu2  ;;  %v4270_v32 = vadd.f32 %v7625_v26, %v8748_v25  ;;  %v8749_v26 = vld [vmem:[#allocation6_spill] sm:$0xff]  ;;  %v2140_v25 = vld [vmem:[#allocation2 + $0x229] sm:$0xff] }
 0x5ff   :  { %v4685_v33 = vadd.f32 %v4684_v49, %v4476_v9  ;;  %v2030_v9 = vld [vmem:[#allocation2 + $0x388] sm:$0xff]  ;;  %v8012_v49 = vpop.f32.mrf.mxu1  ;;  %v8017_v4 = vpop.f32.mrf.mxu3 }
 0x600   :  { %v4479_v21 = vadd.f32 %v7814_v34, %v4270_v32  ;;  %v2031_v32 = vld [vmem:[#allocation2 + $0x390] sm:$0xff] }
 0x601   :  { %v4854_v56 = vmax.f32 %v4685_v33, 0.0  ;;  %v2139_v33 = vld [vmem:[#allocation2 + $0x211] sm:$0xff] }
 0x603   :  { %4421 = vmatmul.f32.gmra.mxu0 %v1917_v52  ;;  %4734 = vmatmul.f32.gmra.mxu2 %v2138_v63 }
 0x604   :  { %4976 = vmatmul.f32.gmra.mxu3 %v4854_v56 }
 0x605   :  { %4582 = vmatmul.f32.gmra.mxu1 %v2029_v15  ;;  %v4273_v15 = vadd.f32 %v7651_v55, %v8749_v26  ;;  %v2032_v26 = vld [vmem:[#allocation2 + $0x3a8] sm:$0xff] }
 0x606   :  { %v4687_v28 = vpop.f32.mrf.mxu2 }
 0x607   :  { %v4688_v54 = vadd.f32 %v4687_v28, %v4479_v21  ;;  %v4482_v34 = vadd.f32 %v7844_v22, %v4273_v15  ;;  %v8750_v28 = vld [vmem:[#allocation34_spill] sm:$0xff]  ;;  %v2141_v22 = vld [vmem:[#allocation2 + $0x231] sm:$0xff] }
 0x609   :  { %v4855_v52 = vmax.f32 %v4688_v54, 0.0  ;;  %v4276_v54 = vadd.f32 %v7673_v31, %v8750_v28 }
 0x60b   :  { %4737 = vmatmul.f32.gmra.mxu2 %v2139_v33  ;;  %v4485_v55 = vadd.f32 %v7873_v42, %v4276_v54  ;;  %v2033_v42 = vld [vmem:[#allocation2 + $0x3b0] sm:$0xff] }
 0x60c   :  { %4979 = vmatmul.f32.gmra.mxu3 %v4855_v52  ;;  %v2142_v54 = vld [vmem:[#allocation2 + $0x289] sm:$0xff] }
 0x60d   :  { %4585 = vmatmul.f32.gmra.mxu1 %v2030_v9  ;;  %v8021_v9 = vpop.f32.mrf.mxu1 }
 0x60e   :  { %v4690_v56 = vpop.f32.mrf.mxu2 }
 0x60f   :  { %v4691_v63 = vadd.f32 %v4690_v56, %v4482_v34  ;;  %v8751_v34 = vld [vmem:[#allocation49_spill] sm:$0xff] }
 0x610   :  { %v4279_v56 = vadd.f32 %v7686_v30, %v8751_v34 }
 0x611   :  { %v4856_v21 = vmax.f32 %v4691_v63, 0.0  ;;  %v8026_v63 = vpop.f32.mrf.mxu3 }
 0x612   :  { %v4488_v31 = vadd.f32 %v7890_v37, %v4279_v56  ;;  %v2143_v56 = vld [vmem:[#allocation2 + $0x291] sm:$0xff] }
 0x613   :  { %4740 = vmatmul.f32.gmra.mxu2 %v2140_v25 }
 0x614   :  { %4982 = vmatmul.f32.gmra.mxu3 %v4856_v21 }
 0x615   :  { %4588 = vmatmul.f32.gmra.mxu1 %v2031_v32  ;;  %v8029_v32 = vpop.f32.mrf.mxu1 }
 0x616   :  { %v4693_v52 = vpop.f32.mrf.mxu2 }
 0x617   :  { %v4694_v33 = vadd.f32 %v4693_v52, %v4485_v55  ;;  %v8752_v55 = vld [vmem:[#allocation76_spill] sm:$0xff] }
 0x618   :  { %v4282_v52 = vadd.f32 %v7695_v35, %v8752_v55  ;;  %v8040_v35 = vld [vmem:[#allocation5] ss:$0 sm:$0xff]  ;;  %v2035_v55 = vld [vmem:[#allocation2 + $0x3d0] sm:$0xff] }
 0x619   :  { %v4857_v15 = vmax.f32 %v4694_v33, 0.0  ;;  %v8034_v33 = vpop.f32.mrf.mxu3 }
 0x61a   :  { %v4491_v30 = vadd.f32 %v7903_v62, %v4282_v52 }
 0x61b   :  { %4743 = vmatmul.f32.gmra.mxu2 %v2141_v22 }
 0x61c   :  { %4985 = vmatmul.f32.gmra.mxu3 %v4857_v15  ;;  %v2034_v15 = vld [vmem:[#allocation2 + $0x3c8] sm:$0xff] }
 0x61d   :  { %4591 = vmatmul.f32.gmra.mxu1 %v2032_v26  ;;  %v8036_v26 = vpop.f32.mrf.mxu1 }
 0x61e   :  { %v4696_v25 = vpop.f32.mrf.mxu2 }
 0x61f   :  { %v4697_v21 = vadd.f32 %v4696_v25, %v4488_v31  ;;  %v8753_v31 = vld [vmem:[#allocation7_spill] sm:$0xff] }
 0x620   :  { %v4285_v25 = vadd.f32 %v7706_v3, %v8753_v31  ;;  %v8754_v3 = vld [vmem:[#allocation36_spill] sm:$0xff] }
 0x621   :  { %v4858_v28 = vmax.f32 %v4697_v21, 0.0 }
 0x622   :  { %v4494_v21 = vadd.f32 %v7915_v27, %v4285_v25 }
 0x623   :  { %4746 = vmatmul.f32.gmra.mxu2 %v2142_v54 }
 0x624   :  { %4988 = vmatmul.f32.gmra.mxu3 %v4858_v28 }
 0x625   :  { %4594 = vmatmul.f32.gmra.mxu1 %v2033_v42  ;;  %v8044_v52 = vpop.f32.mrf.mxu1 }
 0x626   :  { %v4699_v22 = vpop.f32.mrf.mxu2 }
 0x627   :  { %v4700_v37 = vadd.f32 %v4699_v22, %v4491_v30 }
 0x629   :  { %v4859_v34 = vmax.f32 %v4700_v37, 0.0  ;;  %v2144_v37 = vld [vmem:[#allocation2 + $0x2a9] sm:$0xff] }
 0x62b   :  { %4749 = vmatmul.f32.gmra.mxu2 %v2143_v56 }
 0x62c   :  { %4991 = vmatmul.f32.gmra.mxu3 %v4859_v34 }
 0x62d   :  { %4597 = vmatmul.f32.gmra.mxu1 %v2034_v15  ;;  %v4288_v15 = vadd.f32 %v7716_v48, %v8754_v3  ;;  %v8053_v48 = vpop.f32.mrf.mxu1 }
 0x62e   :  { %v4702_v62 = vpop.f32.mrf.mxu2 }
 0x62f   :  { %v4944_v42 = vpop.f32.mrf.mxu3  ;;  %v4703_v28 = vadd.f32 %v4702_v62, %v4494_v21  ;;  %v4497_v27 = vadd.f32 %v7924_v58, %v4288_v15  ;;  %v2036_v21 = vld [vmem:[#allocation2 + $0x3e8] sm:$0xff]  ;;  %v2037_v15 = vld [vmem:[#allocation2 + $0x3f0] sm:$0xff] }
 0x630   :  { %v4945_v54 = vadd.f32 %v8040_v35, %v4944_v42 }
 0x631   :  { %v4860_v30 = vmax.f32 %v4703_v28, 0.0  ;;  %v2145_v28 = vld [vmem:[#allocation2 + $0x2b1] sm:$0xff] }
 0x632   :  { %v5136_v22 = vmax.f32 %v4945_v54, 0.0  ;;  %v8755_v54 = vld [vmem:[#allocation52_spill] sm:$0xff] }
 0x633   :  { %4752 = vmatmul.f32.gmra.mxu2 %v2144_v37 }
 0x634   :  { %4994 = vmatmul.f32.gmra.mxu3 %v4860_v30  ;;  %5201 = vst.msk [vmem:[#allocation4] sm:$0xff] %vm5200_vm2, %v5136_v22 }
 0x635   :  { %4600 = vmatmul.f32.gmra.mxu1 %v2035_v55  ;;  %v4291_v55 = vadd.f32 %v7727_v57, %v8755_v54  ;;  %v2038_v54 = vld [vmem:[#allocation2 + $0x408] sm:$0xff] }
 0x636   :  { %v4705_v34 = vpop.f32.mrf.mxu2 }
 0x637   :  { %v4947_v56 = vpop.f32.mrf.mxu3  ;;  %v4706_v31 = vadd.f32 %v4705_v34, %v4497_v27  ;;  %v4500_v58 = vadd.f32 %v7933_v53, %v4291_v55  ;;  %v8062_v53 = vpop.f32.mrf.mxu1 }
 0x638   :  { %v4948_v25 = vadd.f32 %v8040_v35, %v4947_v56  ;;  %v2146_v56 = vld [vmem:[#allocation2 + $0x2c9] sm:$0xff] }
 0x639   :  { %v4861_v62 = vmax.f32 %v4706_v31, 0.0  ;;  %v8756_v31 = vld [vmem:[#allocation80_spill] sm:$0xff] }
 0x63a   :  { %v5137_v42 = vmax.f32 %v4948_v25, 0.0  ;;  %v4294_v57 = vadd.f32 %v7738_v61, %v8756_v31 }
 0x63b   :  { %4755 = vmatmul.f32.gmra.mxu2 %v2145_v28 }
 0x63c   :  { %4997 = vmatmul.f32.gmra.mxu3 %v4861_v62  ;;  %5202 = vst.msk [vmem:[#allocation4 + $0x8] sm:$0xff] %vm5200_vm2, %v5137_v42  ;;  %v4503_v25 = vadd.f32 %v7944_v40, %v4294_v57 }
 0x63d   :  { %4603 = vmatmul.f32.gmra.mxu1 %v2036_v21 }
 0x63e   :  { %v4708_v30 = vpop.f32.mrf.mxu2 }
 0x63f   :  { %v4950_v22 = vpop.f32.mrf.mxu3  ;;  %v4709_v37 = vadd.f32 %v4708_v30, %v4500_v58  ;;  %v2147_v30 = vld [vmem:[#allocation2 + $0x2d1] sm:$0xff] }
 0x640   :  { %v4951_v3 = vadd.f32 %v8040_v35, %v4950_v22  ;;  %v8757_v22 = vld [vmem:[#allocation8_spill] sm:$0xff] }
 0x641   :  { %v4862_v27 = vmax.f32 %v4709_v37, 0.0  ;;  %v4297_v61 = vadd.f32 %v7751_v47, %v8757_v22 }
 0x642   :  { %v5138_v34 = vmax.f32 %v4951_v3, 0.0 }
 0x643   :  { %4758 = vmatmul.f32.gmra.mxu2 %v2146_v56  ;;  %v4506_v40 = vadd.f32 %v7954_v8, %v4297_v61  ;;  %v2039_v56 = vld [vmem:[#allocation2 + $0x410] sm:$0xff] }
 0x644   :  { %5000 = vmatmul.f32.gmra.mxu3 %v4862_v27  ;;  %5203 = vst.msk [vmem:[#allocation4 + $0x10] sm:$0xff] %vm5200_vm2, %v5138_v34  ;;  %v2149_v61 = vld [vmem:[#allocation2 + $0x2f1] sm:$0xff] }
 0x645   :  { %4606 = vmatmul.f32.gmra.mxu1 %v2037_v15  ;;  %v8069_v15 = vpop.f32.mrf.mxu1 }
 0x646   :  { %v4711_v21 = vpop.f32.mrf.mxu2 }
 0x647   :  { %v4953_v62 = vpop.f32.mrf.mxu3  ;;  %v4712_v42 = vadd.f32 %v4711_v21, %v4503_v25  ;;  %v2148_v25 = vld [vmem:[#allocation2 + $0x2e9] sm:$0xff]  ;;  %v8758_v21 = vld [vmem:[#allocation38_spill] sm:$0xff] }
 0x648   :  { %v4954_v28 = vadd.f32 %v8040_v35, %v4953_v62  ;;  %v4300_v47 = vadd.f32 %v7763_v0, %v8758_v21  ;;  %v8760_v21 = vld [vmem:[#allocation84_spill] sm:$0xff] }
 0x649   :  { %v4863_v55 = vmax.f32 %v4712_v42, 0.0 }
 0x64a   :  { %v5139_v58 = vmax.f32 %v4954_v28, 0.0  ;;  %v4509_v8 = vadd.f32 %v7963_v14, %v4300_v47  ;;  %v4306_v47 = vadd.f32 %v7787_v23, %v8760_v21 }
 0x64b   :  { %4761 = vmatmul.f32.gmra.mxu2 %v2147_v30 }
 0x64c   :  { %5003 = vmatmul.f32.gmra.mxu3 %v4863_v55  ;;  %5204 = vst.msk [vmem:[#allocation4 + $0x18] sm:$0xff] %vm5200_vm2, %v5139_v58  ;;  %v2040_v55 = vld [vmem:[#allocation2 + $0x428] sm:$0xff] }
 0x64d   :  { %4609 = vmatmul.f32.gmra.mxu1 %v2038_v54  ;;  %v8077_v58 = vpop.f32.mrf.mxu1 }
 0x64e   :  { %v4714_v37 = vpop.f32.mrf.mxu2 }
 0x64f   :  { %v4956_v3 = vpop.f32.mrf.mxu3  ;;  %v4715_v27 = vadd.f32 %v4714_v37, %v4506_v40  ;;  %v8759_v40 = vld [vmem:[#allocation55_spill] sm:$0xff] }
 0x650   :  { %v4957_v34 = vadd.f32 %v8040_v35, %v4956_v3  ;;  %v4303_v0 = vadd.f32 %v7774_v41, %v8759_v40 }
 0x651   :  { %v4864_v31 = vmax.f32 %v4715_v27, 0.0 }
 0x652   :  { %v5140_v57 = vmax.f32 %v4957_v34, 0.0  ;;  %v4512_v14 = vadd.f32 %v7972_v46, %v4303_v0  ;;  %v4515_v46 = vadd.f32 %v7983_v60, %v4306_v47 }
 0x653   :  { %4764 = vmatmul.f32.gmra.mxu2 %v2148_v25  ;;  %v2150_v25 = vld [vmem:[#allocation2 + $0x309] sm:$0xff] }
 0x654   :  { %5006 = vmatmul.f32.gmra.mxu3 %v4864_v31  ;;  %5205 = vst.msk [vmem:[#allocation4 + $0x20] sm:$0xff] %vm5200_vm2, %v5140_v57 }
 0x655   :  { %4612 = vmatmul.f32.gmra.mxu1 %v2039_v56  ;;  %v2041_v56 = vld [vmem:[#allocation2 + $0x430] sm:$0xff]  ;;  %v8086_v41 = vpop.f32.mrf.mxu1 }
 0x656   :  { %v4717_v62 = vpop.f32.mrf.mxu2 }
 0x657   :  { %v4959_v42 = vpop.f32.mrf.mxu3  ;;  %v4718_v28 = vadd.f32 %v4717_v62, %v4509_v8 }
 0x658   :  { %v4960_v54 = vadd.f32 %v8040_v35, %v4959_v42 }
 0x659   :  { %v4865_v30 = vmax.f32 %v4718_v28, 0.0 }
 0x65a   :  { %v5141_v22 = vmax.f32 %v4960_v54, 0.0  ;;  %v2042_v54 = vld [vmem:[#allocation2 + $0x448] sm:$0xff] }
 0x65b   :  { %4767 = vmatmul.f32.gmra.mxu2 %v2149_v61  ;;  %v8761_v61 = vld [vmem:[#allocation9_spill] sm:$0xff] }
 0x65c   :  { %5009 = vmatmul.f32.gmra.mxu3 %v4865_v30  ;;  %5206 = vst.msk [vmem:[#allocation4 + $0x28] sm:$0xff] %vm5200_vm2, %v5141_v22  ;;  %v2151_v22 = vld [vmem:[#allocation2 + $0x311] sm:$0xff]  ;;  %v4309_v23 = vadd.f32 %v7812_v17, %v8761_v61 }
 0x65d   :  { %4615 = vmatmul.f32.gmra.mxu1 %v2040_v55  ;;  %v8095_v60 = vpop.f32.mrf.mxu1 }
 0x65e   :  { %v4720_v37 = vpop.f32.mrf.mxu2  ;;  %v4518_v40 = vadd.f32 %v7993_v5, %v4309_v23 }
 0x65f   :  { %v4962_v3 = vpop.f32.mrf.mxu3  ;;  %v4721_v27 = vadd.f32 %v4720_v37, %v4512_v14 }
 0x660   :  { %v4963_v34 = vadd.f32 %v8040_v35, %v4962_v3 }
 0x661   :  { %v4866_v31 = vmax.f32 %v4721_v27, 0.0  ;;  %v2043_v27 = vld [vmem:[#allocation2 + $0x450] sm:$0xff] }
 0x662   :  { %v5142_v57 = vmax.f32 %v4963_v34, 0.0 }
 0x663   :  { %4770 = vmatmul.f32.gmra.mxu2 %v2150_v25 }
 0x664   :  { %5012 = vmatmul.f32.gmra.mxu3 %v4866_v31  ;;  %5207 = vst.msk [vmem:[#allocation4 + $0x30] sm:$0xff] %vm5200_vm2, %v5142_v57  ;;  %v2152_v31 = vld [vmem:[#allocation2 + $0x329] sm:$0xff]  ;;  %v8762_v57 = vld [vmem:[#allocation58_spill] sm:$0xff] }
 0x665   :  { %4618 = vmatmul.f32.gmra.mxu1 %v2041_v56  ;;  %v4312_v17 = vadd.f32 %v7842_v36, %v8762_v57  ;;  %v8102_v47 = vpop.f32.mrf.mxu1 }
 0x666   :  { %v4723_v8 = vpop.f32.mrf.mxu2 }
 0x667   :  { %v4965_v62 = vpop.f32.mrf.mxu3  ;;  %v4724_v42 = vadd.f32 %v4723_v8, %v4515_v46  ;;  %v4521_v5 = vadd.f32 %v8002_v19, %v4312_v17  ;;  %v2155_v17 = vld [vmem:[#allocation2 + $0x351] sm:$0xff] }
 0x668   :  { %v4966_v28 = vadd.f32 %v8040_v35, %v4965_v62 }
 0x669   :  { %v4867_v55 = vmax.f32 %v4724_v42, 0.0 }
 0x66a   :  { %v5143_v30 = vmax.f32 %v4966_v28, 0.0  ;;  %v2153_v28 = vld [vmem:[#allocation2 + $0x331] sm:$0xff] }
 0x66b   :  { %4773 = vmatmul.f32.gmra.mxu2 %v2151_v22 }
 0x66c   :  { %5015 = vmatmul.f32.gmra.mxu3 %v4867_v55  ;;  %5208 = vst.msk [vmem:[#allocation4 + $0x38] sm:$0xff] %vm5200_vm2, %v5143_v30 }
 0x66d   :  { %4621 = vmatmul.f32.gmra.mxu1 %v2042_v54  ;;  %v8763_v54 = vld [vmem:[#allocation10_spill] sm:$0xff]  ;;  %v8111_v23 = vpop.f32.mrf.mxu1 }
 0x66e   :  { %v4726_v0 = vpop.f32.mrf.mxu2  ;;  %v4315_v36 = vadd.f32 %v7869_v51, %v8763_v54 }
 0x66f   :  { %v4968_v14 = vpop.f32.mrf.mxu3  ;;  %v4727_v37 = vadd.f32 %v4726_v0, %v4518_v40 }
 0x670   :  { %v4969_v3 = vadd.f32 %v8040_v35, %v4968_v14  ;;  %v4524_v19 = vadd.f32 %v8012_v49, %v4315_v36  ;;  %v2154_v14 = vld [vmem:[#allocation2 + $0x349] sm:$0xff] }
 0x671   :  { %v4868_v34 = vmax.f32 %v4727_v37, 0.0  ;;  %v8764_v37 = vld [vmem:[#allocation61_spill] sm:$0xff] }
 0x672   :  { %v5144_v56 = vmax.f32 %v4969_v3, 0.0  ;;  %v4318_v51 = vadd.f32 %v7888_v1, %v8764_v37 }
 0x673   :  { %4776 = vmatmul.f32.gmra.mxu2 %v2152_v31 }
 0x674   :  { %5018 = vmatmul.f32.gmra.mxu3 %v4868_v34  ;;  %5209 = vst.msk [vmem:[#allocation4 + $0x40] sm:$0xff] %vm5200_vm2, %v5144_v56  ;;  %v4527_v49 = vadd.f32 %v8021_v9, %v4318_v51 }
 0x675   :  { %4624 = vmatmul.f32.gmra.mxu1 %v2043_v27 }
 0x676   :  { %v4729_v25 = vpop.f32.mrf.mxu2 }
 0x677   :  { %v4971_v21 = vpop.f32.mrf.mxu3  ;;  %v4730_v46 = vadd.f32 %v4729_v25, %v4521_v5  ;;  %v8765_v5 = vld [vmem:[#allocation11_spill] sm:$0xff] }
 0x678   :  { %v4972_v8 = vadd.f32 %v8040_v35, %v4971_v21 }
 0x679   :  { %v4869_v62 = vmax.f32 %v4730_v46, 0.0 }
 0x67a   :  { %v5145_v42 = vmax.f32 %v4972_v8, 0.0 }
 0x67b   :  { %4779 = vmatmul.f32.gmra.mxu2 %v2153_v28  ;;  %v8766_v28 = vld [vmem:[#allocation64_spill] sm:$0xff] }
 0x67c   :  { %5021 = vmatmul.f32.gmra.mxu3 %v4869_v62  ;;  %5210 = vst.msk [vmem:[#allocation4 + $0x48] sm:$0xff] %vm5200_vm2, %v5145_v42  ;;  %v2156_v42 = vld [vmem:[#allocation2 + $0x369] sm:$0xff]  ;;  %v4324_v54 = vadd.f32 %v7913_v10, %v8766_v28 }
 0x67d   :  { %4627 = vmatmul.f32.gmra.mxu1 %v7828_v43 }
 0x67e   :  { %v4732_v55 = vpop.f32.mrf.mxu2 }
 0x67f   :  { %v4974_v30 = vpop.f32.mrf.mxu3  ;;  %v4733_v22 = vadd.f32 %v4732_v55, %v4524_v19 }
 0x680   :  { %v4975_v61 = vadd.f32 %v8040_v35, %v4974_v30 }
 0x681   :  { %v4870_v40 = vmax.f32 %v4733_v22, 0.0 }
 0x682   :  { %v5146_v0 = vmax.f32 %v4975_v61, 0.0  ;;  %v2157_v61 = vld [vmem:[#allocation2 + $0x371] sm:$0xff] }
 0x683   :  { %4782 = vmatmul.f32.gmra.mxu2 %v2154_v14 }
 0x684   :  { %5024 = vmatmul.f32.gmra.mxu3 %v4870_v40  ;;  %5211 = vst.msk [vmem:[#allocation4 + $0x50] sm:$0xff] %vm5200_vm2, %v5146_v0  ;;  %v8767_v40 = vld [vmem:[#allocation12_spill] sm:$0xff] }
 0x685   :  { %4630 = vmatmul.f32.gmra.mxu1 %v7828_v43  ;;  %v4321_v43 = vadd.f32 %v7901_v7, %v8765_v5  ;;  %v4533_v7 = vadd.f32 %v8036_v26, %v4324_v54  ;;  %v4327_v0 = vadd.f32 %v7922_v44, %v8767_v40  ;;  %v2160_v54 = vld [vmem:[#allocation2 + $0x3a9] sm:$0xff]  ;;  %v2161_v40 = vld [vmem:[#allocation2 + $0x3b1] sm:$0xff] }
 0x686   :  { %v4735_v3 = vpop.f32.mrf.mxu2 }
 0x687   :  { %v4977_v27 = vpop.f32.mrf.mxu3  ;;  %v4736_v34 = vadd.f32 %v4735_v3, %v4527_v49  ;;  %v4530_v1 = vadd.f32 %v8029_v32, %v4321_v43  ;;  %v4536_v10 = vadd.f32 %v8044_v52, %v4327_v0  ;;  %v8771_v0 = vld [vmem:[#allocation70_spill] sm:$0xff] }
 0x688   :  { %v4978_v56 = vadd.f32 %v8040_v35, %v4977_v27  ;;  %v2158_v27 = vld [vmem:[#allocation2 + $0x389] sm:$0xff] }
 0x689   :  { %v4871_v31 = vmax.f32 %v4736_v34, 0.0  ;;  %v8768_v34 = vld [vmem:[#allocation67_spill] sm:$0xff] }
 0x68a   :  { %v5147_v57 = vmax.f32 %v4978_v56, 0.0  ;;  %v4330_v56 = vadd.f32 %v7931_v16, %v8768_v34  ;;  %v2162_v34 = vld [vmem:[#allocation2 + $0x3c9] sm:$0xff] }
 0x68b   :  { %4785 = vmatmul.f32.gmra.mxu2 %v2155_v17 }
 0x68c   :  { %5027 = vmatmul.f32.gmra.mxu3 %v4871_v31  ;;  %5212 = vst.msk [vmem:[#allocation4 + $0x58] sm:$0xff] %vm5200_vm2, %v5147_v57  ;;  %v4539_v44 = vadd.f32 %v8053_v48, %v4330_v56 }
 0x68e   :  { %v4738_v25 = vpop.f32.mrf.mxu2 }
 0x68f   :  { %v4980_v21 = vpop.f32.mrf.mxu3  ;;  %v4739_v9 = vadd.f32 %v4738_v25, %v4530_v1  ;;  %v2159_v1 = vld [vmem:[#allocation2 + $0x391] sm:$0xff]  ;;  %v8769_v25 = vld [vmem:[#allocation98_spill] sm:$0xff] }
 0x690   :  { %v4981_v46 = vadd.f32 %v8040_v35, %v4980_v21  ;;  %v4333_v21 = vadd.f32 %v7942_v13, %v8769_v25  ;;  %v8148_v13 = vpop.f32.mrf.mxu1 }
 0x691   :  { %v4872_v8 = vmax.f32 %v4739_v9, 0.0 }
 0x692   :  { %v5148_v62 = vmax.f32 %v4981_v46, 0.0  ;;  %v4542_v16 = vadd.f32 %v8062_v53, %v4333_v21 }
 0x693   :  { %4788 = vmatmul.f32.gmra.mxu2 %v2156_v42 }
 0x694   :  { %5030 = vmatmul.f32.gmra.mxu3 %v4872_v8  ;;  %5213 = vst.msk [vmem:[#allocation4 + $0x60] sm:$0xff] %vm5200_vm2, %v5148_v62  ;;  %v8144_v62 = vpop.f32.mrf.mxu0 }
 0x696   :  { %v4741_v36 = vpop.f32.mrf.mxu2 }
 0x697   :  { %v4983_v19 = vpop.f32.mrf.mxu3  ;;  %v4742_v32 = vadd.f32 %v4741_v36, %v4533_v7  ;;  %v8770_v7 = vld [vmem:[#allocation48_spill] sm:$0xff] }
 0x698   :  { %v4984_v55 = vadd.f32 %v8040_v35, %v4983_v19  ;;  %v4336_v36 = vadd.f32 %v7952_v29, %v8770_v7 }
 0x699   :  { %v4873_v30 = vmax.f32 %v4742_v32, 0.0 }
 0x69a   :  { %v5149_v22 = vmax.f32 %v4984_v55, 0.0  ;;  %v4545_v53 = vadd.f32 %v8069_v15, %v4336_v36  ;;  %v8159_v15 = vpop.f32.mrf.mxu1 }
 0x69b   :  { %4791 = vmatmul.f32.gmra.mxu2 %v2157_v61 }
 0x69c   :  { %5033 = vmatmul.f32.gmra.mxu3 %v4873_v30  ;;  %5214 = vst.msk [vmem:[#allocation4 + $0x68] sm:$0xff] %vm5200_vm2, %v5149_v22  ;;  %v8155_v29 = vpop.f32.mrf.mxu0 }
 0x69e   :  { %v4744_v14 = vpop.f32.mrf.mxu2 }
 0x69f   :  { %v4986_v37 = vpop.f32.mrf.mxu3  ;;  %v4745_v26 = vadd.f32 %v4744_v14, %v4536_v10  ;;  %v4339_v10 = vadd.f32 %v7961_v45, %v8771_v0  ;;  %v4342_v45 = vadd.f32 %v7970_v24, %v7559_v39  ;;  %v4345_v39 = vadd.f32 %v7981_v12, %v7568_v38 }
 0x6a0   :  { %v4987_v51 = vadd.f32 %v8040_v35, %v4986_v37 }
 0x6a1   :  { %v4874_v49 = vmax.f32 %v4745_v26, 0.0  ;;  %v4548_v14 = vadd.f32 %v8077_v58, %v4339_v10  ;;  %v4551_v58 = vadd.f32 %v8086_v41, %v4342_v45  ;;  %v4554_v24 = vadd.f32 %v8095_v60, %v4345_v39 }
 0x6a2   :  { %v5150_v3 = vmax.f32 %v4987_v51, 0.0 }
 0x6a3   :  { %4794 = vmatmul.f32.gmra.mxu2 %v2158_v27 }
 0x6a4   :  { %5036 = vmatmul.f32.gmra.mxu3 %v4874_v49  ;;  %5215 = vst.msk [vmem:[#allocation4 + $0x70] sm:$0xff] %vm5200_vm2, %v5150_v3  ;;  %v8165_v56 = vpop.f32.mrf.mxu0 }
 0x6a6   :  { %v4747_v31 = vpop.f32.mrf.mxu2 }
 0x6a7   :  { %v4989_v57 = vpop.f32.mrf.mxu3  ;;  %v4748_v52 = vadd.f32 %v4747_v31, %v4539_v44 }
 0x6a8   :  { %v4990_v17 = vadd.f32 %v8040_v35, %v4989_v57  ;;  %v8168_v57 = vpop.f32.mrf.mxu1 }
 0x6a9   :  { %v4875_v5 = vmax.f32 %v4748_v52, 0.0 }
 0x6aa   :  { %v5151_v43 = vmax.f32 %v4990_v17, 0.0 }
 0x6ab   :  { %4797 = vmatmul.f32.gmra.mxu2 %v2159_v1  ;;  %v2163_v1 = vld [vmem:[#allocation2 + $0x3d1] sm:$0xff] }
 0x6ac   :  { %5039 = vmatmul.f32.gmra.mxu3 %v4875_v5  ;;  %5216 = vst.msk [vmem:[#allocation4 + $0x78] sm:$0xff] %vm5200_vm2, %v5151_v43  ;;  %v8175_v21 = vpop.f32.mrf.mxu0 }
 0x6ae   :  { %v4750_v9 = vpop.f32.mrf.mxu2 }
 0x6af   :  { %v4992_v46 = vpop.f32.mrf.mxu3  ;;  %v4751_v48 = vadd.f32 %v4750_v9, %v4542_v16 }
 0x6b0   :  { %v4993_v8 = vadd.f32 %v8040_v35, %v4992_v46  ;;  %v8178_v46 = vpop.f32.mrf.mxu1 }
 0x6b1   :  { %v4876_v42 = vmax.f32 %v4751_v48, 0.0 }
 0x6b2   :  { %v5152_v28 = vmax.f32 %v4993_v8, 0.0 }
 0x6b3   :  { %4800 = vmatmul.f32.gmra.mxu2 %v2160_v54 }
 0x6b4   :  { %5042 = vmatmul.f32.gmra.mxu3 %v4876_v42  ;;  %5217 = vst.msk [vmem:[#allocation4 + $0x80] sm:$0xff] %vm5200_vm2, %v5152_v28  ;;  %v2164_v42 = vld [vmem:[#allocation2 + $0x3e9] sm:$0xff]  ;;  %v8772_v28 = vld [vmem:[#allocation14_spill] sm:$0xff] }
 0x6b5   :  { %v4348_v38 = vadd.f32 %v7991_v50, %v8772_v28 }
 0x6b6   :  { %v4753_v19 = vpop.f32.mrf.mxu2 }
 0x6b7   :  { %v4995_v32 = vpop.f32.mrf.mxu3  ;;  %v4754_v55 = vadd.f32 %v4753_v19, %v4545_v53  ;;  %v4557_v12 = vadd.f32 %v8102_v47, %v4348_v38  ;;  %v8185_v53 = vpop.f32.mrf.mxu0 }
 0x6b8   :  { %v4996_v30 = vadd.f32 %v8040_v35, %v4995_v32  ;;  %v8189_v50 = vpop.f32.mrf.mxu1 }
 0x6b9   :  { %v4877_v22 = vmax.f32 %v4754_v55, 0.0  ;;  %v2165_v55 = vld [vmem:[#allocation2 + $0x3f1] sm:$0xff] }
 0x6ba   :  { %v5153_v61 = vmax.f32 %v4996_v30, 0.0  ;;  %v8773_v30 = vld [vmem:[#allocation51_spill] sm:$0xff] }
 0x6bb   :  { %4803 = vmatmul.f32.gmra.mxu2 %v2161_v40 }
 0x6bc   :  { %5045 = vmatmul.f32.gmra.mxu3 %v4877_v22  ;;  %5218 = vst.msk [vmem:[#allocation4 + $0x88] sm:$0xff] %vm5200_vm2, %v5153_v61  ;;  %v4351_v22 = vadd.f32 %v8000_v18, %v8773_v30  ;;  %v8781_v30 = vld [vmem:[#allocation72_spill] sm:$0xff] }
 0x6be   :  { %v4756_v37 = vpop.f32.mrf.mxu2  ;;  %v4560_v47 = vadd.f32 %v8111_v23, %v4351_v22 }
 0x6bf   :  { %v4998_v26 = vpop.f32.mrf.mxu3  ;;  %v4757_v51 = vadd.f32 %v4756_v37, %v4548_v14  ;;  %v8774_v14 = vld [vmem:[#allocation73_spill] sm:$0xff] }
 0x6c0   :  { %v4999_v49 = vadd.f32 %v8040_v35, %v4998_v26  ;;  %v8775_v37 = vld [vmem:[#allocation89_spill] sm:$0xff] }
 0x6c1   :  { %v4878_v3 = vmax.f32 %v4757_v51, 0.0  ;;  %v4145_v26 = vadd.f32 %v8775_v37, %v8774_v14 }
 0x6c2   :  { %v5154_v27 = vmax.f32 %v4999_v49, 0.0 }
 0x6c3   :  { %4806 = vmatmul.f32.gmra.mxu2 %v2162_v34  ;;  %v4354_v18 = vadd.f32 %v8144_v62, %v4145_v26  ;;  %v8201_v34 = vpop.f32.mrf.mxu1 }
 0x6c4   :  { %5048 = vmatmul.f32.gmra.mxu3 %v4878_v3  ;;  %5219 = vst.msk [vmem:[#allocation4 + $0x90] sm:$0xff] %vm5200_vm2, %v5154_v27  ;;  %v2166_v3 = vld [vmem:[#allocation2 + $0x409] sm:$0xff]  ;;  %v8197_v27 = vpop.f32.mrf.mxu0 }
 0x6c5   :  { %v4563_v23 = vadd.f32 %v8148_v13, %v4354_v18 }
 0x6c6   :  { %v4759_v44 = vpop.f32.mrf.mxu2 }
 0x6c7   :  { %v5001_v31 = vpop.f32.mrf.mxu3  ;;  %v4760_v52 = vadd.f32 %v4759_v44, %v4551_v58 }
 0x6c8   :  { %v5002_v17 = vadd.f32 %v8040_v35, %v5001_v31 }
 0x6c9   :  { %v4879_v5 = vmax.f32 %v4760_v52, 0.0  ;;  %v8776_v52 = vld [vmem:[#allocation15_spill] sm:$0xff] }
 0x6ca   :  { %v5155_v43 = vmax.f32 %v5002_v17, 0.0  ;;  %v8777_v17 = vld [vmem:[#allocation66_spill] sm:$0xff] }
 0x6cb   :  { %4809 = vmatmul.f32.gmra.mxu2 %v2163_v1  ;;  %v2167_v1 = vld [vmem:[#allocation2 + $0x411] sm:$0xff] }
 0x6cc   :  { %5051 = vmatmul.f32.gmra.mxu3 %v4879_v5  ;;  %5220 = vst.msk [vmem:[#allocation4 + $0x98] sm:$0xff] %vm5200_vm2, %v5155_v43  ;;  %v4148_v5 = vadd.f32 %v8777_v17, %v8776_v52  ;;  %v8208_v13 = vpop.f32.mrf.mxu0 }
 0x6ce   :  { %v4762_v41 = vpop.f32.mrf.mxu2  ;;  %v4357_v39 = vadd.f32 %v8155_v29, %v4148_v5 }
 0x6cf   :  { %v5004_v25 = vpop.f32.mrf.mxu3  ;;  %v4763_v16 = vadd.f32 %v4762_v41, %v4554_v24 }
 0x6d0   :  { %v5005_v9 = vadd.f32 %v8040_v35, %v5004_v25  ;;  %v4566_v24 = vadd.f32 %v8159_v15, %v4357_v39 }
 0x6d1   :  { %v4880_v48 = vmax.f32 %v4763_v16, 0.0  ;;  %v8211_v16 = vpop.f32.mrf.mxu1 }
 0x6d2   :  { %v5156_v8 = vmax.f32 %v5005_v9, 0.0 }
 0x6d3   :  { %4812 = vmatmul.f32.gmra.mxu2 %v2164_v42  ;;  %v8779_v42 = vld [vmem:[#allocation69_spill] sm:$0xff] }
 0x6d4   :  { %5054 = vmatmul.f32.gmra.mxu3 %v4880_v48  ;;  %5221 = vst.msk [vmem:[#allocation4 + $0xa0] sm:$0xff] %vm5200_vm2, %v5156_v8  ;;  %v8778_v8 = vld [vmem:[#allocation54_spill] sm:$0xff] }
 0x6d5   :  { %v4151_v28 = vadd.f32 %v8779_v42, %v8778_v8 }
 0x6d6   :  { %v4765_v60 = vpop.f32.mrf.mxu2 }
 0x6d7   :  { %v5007_v54 = vpop.f32.mrf.mxu3  ;;  %v4766_v7 = vadd.f32 %v4765_v60, %v4557_v12  ;;  %v2168_v12 = vld [vmem:[#allocation2 + $0x429] sm:$0xff]  ;;  %v4360_v60 = vadd.f32 %v8165_v56, %v4151_v28 }
 0x6d8   :  { %v5008_v36 = vadd.f32 %v8040_v35, %v5007_v54 }
 0x6d9   :  { %v4881_v19 = vmax.f32 %v4766_v7, 0.0  ;;  %v4569_v15 = vadd.f32 %v8168_v57, %v4360_v60 }
 0x6da   :  { %v5157_v32 = vmax.f32 %v5008_v36, 0.0  ;;  %v8219_v36 = vpop.f32.mrf.mxu0 }
 0x6db   :  { %4815 = vmatmul.f32.gmra.mxu2 %v2165_v55  ;;  %v8780_v55 = vld [vmem:[#allocation77_spill] sm:$0xff] }
 0x6dc   :  { %5057 = vmatmul.f32.gmra.mxu3 %v4881_v19  ;;  %5222 = vst.msk [vmem:[#allocation4 + $0xa8] sm:$0xff] %vm5200_vm2, %v5157_v32  ;;  %v4154_v22 = vadd.f32 %v8781_v30, %v8780_v55 }
 0x6de   :  { %v4768_v61 = vpop.f32.mrf.mxu2 }
 0x6df   :  { %v5010_v40 = vpop.f32.mrf.mxu3  ;;  %v4769_v0 = vadd.f32 %v4768_v61, %v4560_v47  ;;  %v8224_v47 = vpop.f32.mrf.mxu1 }
 0x6e0   :  { %v5011_v10 = vadd.f32 %v8040_v35, %v5010_v40  ;;  %v2169_v40 = vld [vmem:[#allocation2 + $0x431] sm:$0xff] }
 0x6e1   :  { %v4882_v51 = vmax.f32 %v4769_v0, 0.0  ;;  %v4363_v0 = vadd.f32 %v8175_v21, %v4154_v22 }
 0x6e2   :  { %v5158_v49 = vmax.f32 %v5011_v10, 0.0  ;;  %v4377_v18 = vpop.f32.mrf.mxu0 }
 0x6e3   :  { %4818 = vmatmul.f32.gmra.mxu2 %v2166_v3  ;;  %v4572_v57 = vadd.f32 %v8178_v46, %v4363_v0 }
 0x6e4   :  { %5060 = vmatmul.f32.gmra.mxu3 %v4882_v51  ;;  %5223 = vst.msk [vmem:[#allocation4 + $0xb0] sm:$0xff] %vm5200_vm2, %v5158_v49  ;;  %v8782_v51 = vld [vmem:[#allocation16_spill] sm:$0xff]  ;;  %v8783_v49 = vld [vmem:[#allocation23_spill] sm:$0xff] }
 0x6e5   :  { %v4157_v3 = vadd.f32 %v8783_v49, %v8782_v51 }
 0x6e6   :  { %v4771_v45 = vpop.f32.mrf.mxu2 }
 0x6e7   :  { %v5013_v58 = vpop.f32.mrf.mxu3  ;;  %v4772_v44 = vadd.f32 %v4771_v45, %v4563_v23  ;;  %v4366_v21 = vadd.f32 %v8185_v53, %v4157_v3  ;;  %v8790_v3 = vld [vmem:[#allocation60_spill] sm:$0xff] }
 0x6e8   :  { %v5014_v31 = vadd.f32 %v8040_v35, %v5013_v58  ;;  %v2170_v58 = vld [vmem:[#allocation2 + $0x449] sm:$0xff] }
 0x6e9   :  { %v4883_v43 = vmax.f32 %v4772_v44, 0.0  ;;  %v4586_v44 = vpop.f32.mrf.mxu1  ;;  %v4575_v46 = vadd.f32 %v8189_v50, %v4366_v21 }
 0x6ea   :  { %v5159_v62 = vmax.f32 %v5014_v31, 0.0 }
 0x6eb   :  { %4821 = vmatmul.f32.gmra.mxu2 %v2167_v1 }
 0x6ec   :  { %5063 = vmatmul.f32.gmra.mxu3 %v4883_v43  ;;  %5224 = vst.msk [vmem:[#allocation4 + $0xb8] sm:$0xff] %vm5200_vm2, %v5159_v62  ;;  %v8784_v43 = vld [vmem:[#allocation57_spill] sm:$0xff]  ;;  %v8785_v62 = vld [vmem:[#allocation24_spill] sm:$0xff] }
 0x6ed   :  { %v4160_v1 = vadd.f32 %v8785_v62, %v8784_v43  ;;  %v8792_v43 = vld [vmem:[#allocation85_spill] sm:$0xff] }
 0x6ee   :  { %v4774_v41 = vpop.f32.mrf.mxu2  ;;  %v8793_v62 = vld [vmem:[#allocation97_spill] sm:$0xff] }
 0x6ef   :  { %v5016_v25 = vpop.f32.mrf.mxu3  ;;  %v4775_v9 = vadd.f32 %v4774_v41, %v4566_v24  ;;  %v2171_v41 = vld [vmem:[#allocation2 + $0x451] sm:$0xff]  ;;  %v4369_v53 = vadd.f32 %v8197_v27, %v4160_v1  ;;  %v4172_v1 = vadd.f32 %v8793_v62, %v8792_v43 }
 0x6f0   :  { %v5017_v48 = vadd.f32 %v8040_v35, %v5016_v25  ;;  %v4380_v25 = vpop.f32.mrf.mxu0 }
 0x6f1   :  { %v4884_v38 = vmax.f32 %v4775_v9, 0.0  ;;  %v4578_v50 = vadd.f32 %v8201_v34, %v4369_v53  ;;  %v4589_v9 = vpop.f32.mrf.mxu1  ;;  %v4381_v53 = vadd.f32 %v4380_v25, %v4172_v1 }
 0x6f2   :  { %v5160_v29 = vmax.f32 %v5017_v48, 0.0 }
 0x6f3   :  { %4824 = vmatmul.f32.gmra.mxu2 %v2168_v12  ;;  %v8787_v12 = vld [vmem:[#allocation25_spill] sm:$0xff] }
 0x6f4   :  { %5066 = vmatmul.f32.gmra.mxu3 %v4884_v38  ;;  %5225 = vst.msk [vmem:[#allocation4 + $0xc0] sm:$0xff] %vm5200_vm2, %v5160_v29  ;;  %v2172_v38 = vld [vmem:[#allocation2 + $0x469] sm:$0xff]  ;;  %v8786_v29 = vld [vmem:[#allocation81_spill] sm:$0xff] }
 0x6f5   :  { %v4163_v60 = vadd.f32 %v8787_v12, %v8786_v29 }
 0x6f6   :  { %v4777_v54 = vpop.f32.mrf.mxu2 }
 0x6f7   :  { %v5019_v7 = vpop.f32.mrf.mxu3  ;;  %v4778_v19 = vadd.f32 %v4777_v54, %v4569_v15  ;;  %v4372_v27 = vadd.f32 %v8208_v13, %v4163_v60 }
 0x6f8   :  { %v5020_v32 = vadd.f32 %v8040_v35, %v5019_v7  ;;  %v4383_v7 = vpop.f32.mrf.mxu0 }
 0x6f9   :  { %v4885_v61 = vmax.f32 %v4778_v19, 0.0  ;;  %v4581_v34 = vadd.f32 %v8211_v16, %v4372_v27  ;;  %v4592_v55 = vpop.f32.mrf.mxu1 }
 0x6fa   :  { %v5161_v56 = vmax.f32 %v5020_v32, 0.0 }
 0x6fb   :  { %4827 = vmatmul.f32.gmra.mxu2 %v2169_v40  ;;  %v8789_v40 = vld [vmem:[#allocation26_spill] sm:$0xff] }
 0x6fc   :  { %5069 = vmatmul.f32.gmra.mxu3 %v4885_v61  ;;  %5226 = vst.msk [vmem:[#allocation4 + $0xc8] sm:$0xff] %vm5200_vm2, %v5161_v56  ;;  %v2173_v61 = vld [vmem:[#allocation2 + $0x471] sm:$0xff]  ;;  %v8788_v56 = vld [vmem:[#allocation17_spill] sm:$0xff] }
 0x6fd   :  { %v4166_v0 = vadd.f32 %v8789_v40, %v8788_v56 }
 0x6fe   :  { %v4780_v10 = vpop.f32.mrf.mxu2 }
 0x6ff   :  { %v5022_v14 = vpop.f32.mrf.mxu3  ;;  %v4781_v37 = vadd.f32 %v4780_v10, %v4572_v57  ;;  %v4375_v13 = vadd.f32 %v8219_v36, %v4166_v0 }
 0x700   :  { %v5023_v26 = vadd.f32 %v8040_v35, %v5022_v14 }
 0x701   :  { %v4886_v23 = vmax.f32 %v4781_v37, 0.0  ;;  %v4584_v16 = vadd.f32 %v8224_v47, %v4375_v13 }
 0x702   :  { %v5162_v45 = vmax.f32 %v5023_v26, 0.0  ;;  %v4386_v26 = vpop.f32.mrf.mxu0 }
 0x703   :  { %4830 = vmatmul.f32.gmra.mxu2 %v2170_v58  ;;  %v4595_v58 = vpop.f32.mrf.mxu1 }
 0x704   :  { %5072 = vmatmul.f32.gmra.mxu3 %v4886_v23  ;;  %5227 = vst.msk [vmem:[#allocation4 + $0xd0] sm:$0xff] %vm5200_vm2, %v5162_v45  ;;  %v8791_v23 = vld [vmem:[#allocation94_spill] sm:$0xff] }
 0x705   :  { %v4169_v45 = vadd.f32 %v8791_v23, %v8790_v3  ;;  %v8800_v23 = vld [vmem:[#allocation20_spill] sm:$0xff] }
 0x706   :  { %v4783_v31 = vpop.f32.mrf.mxu2 }
 0x707   :  { %v5025_v52 = vpop.f32.mrf.mxu3  ;;  %v4784_v17 = vadd.f32 %v4783_v31, %v4575_v46  ;;  %v4378_v31 = vadd.f32 %v4377_v18, %v4169_v45  ;;  %v4590_v18 = vadd.f32 %v4589_v9, %v4381_v53  ;;  %v4184_v45 = vadd.f32 %v7938_v59, %v8800_v23 }
 0x708   :  { %v5026_v5 = vadd.f32 %v8040_v35, %v5025_v52 }
 0x709   :  { %v4887_v39 = vmax.f32 %v4784_v17, 0.0  ;;  %v4587_v36 = vadd.f32 %v4586_v44, %v4378_v31 }
 0x70a   :  { %v5163_v24 = vmax.f32 %v5026_v5, 0.0 }
 0x70b   :  { %4833 = vmatmul.f32.gmra.mxu2 %v2171_v41 }
 0x70c   :  { %5075 = vmatmul.f32.gmra.mxu3 %v4887_v39  ;;  %5228 = vst.msk [vmem:[#allocation4 + $0xd8] sm:$0xff] %vm5200_vm2, %v5163_v24  ;;  %v4389_v39 = vpop.f32.mrf.mxu0 }
 0x70e   :  { %v4786_v48 = vpop.f32.mrf.mxu2 }
 0x70f   :  { %v5028_v8 = vpop.f32.mrf.mxu3  ;;  %v4787_v42 = vadd.f32 %v4786_v48, %v4578_v50  ;;  %v4598_v50 = vpop.f32.mrf.mxu1 }
 0x710   :  { %v5029_v28 = vadd.f32 %v8040_v35, %v5028_v8 }
 0x711   :  { %v4888_v15 = vmax.f32 %v4787_v42, 0.0  ;;  %v8794_v42 = vld [vmem:[#allocation18_spill] sm:$0xff] }
 0x712   :  { %v5164_v54 = vmax.f32 %v5029_v28, 0.0  ;;  %v8795_v28 = vld [vmem:[#allocation30_spill] sm:$0xff] }
 0x713   :  { %4836 = vmatmul.f32.gmra.mxu2 %v2172_v38  ;;  %v4175_v38 = vadd.f32 %v8795_v28, %v8794_v42 }
 0x714   :  { %5078 = vmatmul.f32.gmra.mxu3 %v4888_v15  ;;  %5229 = vst.msk [vmem:[#allocation4 + $0xe0] sm:$0xff] %vm5200_vm2, %v5164_v54  ;;  %v4392_v60 = vpop.f32.mrf.mxu0 }
 0x715   :  { %v4384_v12 = vadd.f32 %v4383_v7, %v4175_v38 }
 0x716   :  { %v4789_v19 = vpop.f32.mrf.mxu2 }
 0x717   :  { %v5031_v32 = vpop.f32.mrf.mxu3  ;;  %v4790_v30 = vadd.f32 %v4789_v19, %v4581_v34  ;;  %v4593_v15 = vadd.f32 %v4592_v55, %v4384_v12  ;;  %v4601_v54 = vpop.f32.mrf.mxu1  ;;  %v8796_v19 = vld [vmem:[#allocation63_spill] sm:$0xff]  ;;  %v8799_v55 = vld [vmem:[#allocation32_spill] sm:$0xff] }
 0x718   :  { %v5032_v22 = vadd.f32 %v8040_v35, %v5031_v32  ;;  %v8797_v32 = vld [vmem:[#allocation31_spill] sm:$0xff] }
 0x719   :  { %v4889_v57 = vmax.f32 %v4790_v30, 0.0  ;;  %v4178_v9 = vadd.f32 %v8797_v32, %v8796_v19  ;;  %v8285_v19 = vld [vmem:[#allocation5] ss:$0 sm:$0xff]  ;;  %v8805_v32 = vld [vmem:[#allocation75_spill] sm:$0xff] }
 0x71a   :  { %v5165_v10 = vmax.f32 %v5032_v22, 0.0 }
 0x71b   :  { %4839 = vmatmul.f32.gmra.mxu2 %v2173_v61  ;;  %v4387_v22 = vadd.f32 %v4386_v26, %v4178_v9  ;;  %v8806_v9 = vld [vmem:[#allocation37_spill] sm:$0xff] }
 0x71c   :  { %5081 = vmatmul.f32.gmra.mxu3 %v4889_v57  ;;  %5230 = vst.msk [vmem:[#allocation4 + $0xe8] sm:$0xff] %vm5200_vm2, %v5165_v10  ;;  %v4395_v61 = vpop.f32.mrf.mxu0  ;;  %v8798_v10 = vld [vmem:[#allocation19_spill] sm:$0xff] }
 0x71d   :  { %v4596_v56 = vadd.f32 %v4595_v58, %v4387_v22  ;;  %v4181_v13 = vadd.f32 %v8799_v55, %v8798_v10 }
 0x71e   :  { %v4792_v14 = vpop.f32.mrf.mxu2 }
 0x71f   :  { %v5034_v37 = vpop.f32.mrf.mxu3  ;;  %v4793_v51 = vadd.f32 %v4792_v14, %v4584_v16  ;;  %v4604_v7 = vpop.f32.mrf.mxu1  ;;  %v4390_v14 = vadd.f32 %v4389_v39, %v4181_v13 }
 0x720   :  { %v5035_v49 = vadd.f32 %v8040_v35, %v5034_v37 }
 0x721   :  { %v4890_v21 = vmax.f32 %v4793_v51, 0.0  ;;  %v4599_v37 = vadd.f32 %v4598_v50, %v4390_v14  ;;  %v8807_v14 = vld [vmem:[#allocation79_spill] sm:$0xff] }
 0x722   :  { %v5166_v46 = vmax.f32 %v5035_v49, 0.0 }
 0x724   :  { %5084 = vmatmul.f32.gmra.mxu3 %v4890_v21  ;;  %5231 = vst.msk [vmem:[#allocation4 + $0xf0] sm:$0xff] %vm5200_vm2, %v5166_v46  ;;  %v4398_v3 = vpop.f32.mrf.mxu0  ;;  %v4393_v46 = vadd.f32 %v4392_v60, %v4184_v45 }
 0x726   :  { %v4795_v52 = vpop.f32.mrf.mxu2  ;;  %v4602_v31 = vadd.f32 %v4601_v54, %v4393_v46 }
 0x727   :  { %v5037_v17 = vpop.f32.mrf.mxu3  ;;  %v4796_v47 = vadd.f32 %v4795_v52, %v4587_v36  ;;  %v4607_v58 = vpop.f32.mrf.mxu1 }
 0x728   :  { %v5038_v5 = vadd.f32 %v8040_v35, %v5037_v17 }
 0x729   :  { %v4891_v24 = vmax.f32 %v4796_v47, 0.0  ;;  %v8801_v47 = vld [vmem:[#allocation21_spill] sm:$0xff] }
 0x72a   :  { %v5167_v41 = vmax.f32 %v5038_v5, 0.0  ;;  %v8802_v5 = vld [vmem:[#allocation33_spill] sm:$0xff] }
 0x72b   :  { %v4187_v43 = vadd.f32 %v8802_v5, %v8801_v47 }
 0x72c   :  { %5087 = vmatmul.f32.gmra.mxu3 %v4891_v24  ;;  %5232 = vst.msk [vmem:[#allocation4 + $0xf8] sm:$0xff] %vm5200_vm2, %v5167_v41  ;;  %v4401_v62 = vpop.f32.mrf.mxu0 }
 0x72d   :  { %v4396_v39 = vadd.f32 %v4395_v61, %v4187_v43 }
 0x72e   :  { %v4798_v48 = vpop.f32.mrf.mxu2 }
 0x72f   :  { %v8261_v8 = vpop.f32.mrf.mxu3  ;;  %v4799_v44 = vadd.f32 %v4798_v48, %v4590_v18  ;;  %v4610_v24 = vpop.f32.mrf.mxu1  ;;  %v4605_v41 = vadd.f32 %v4604_v7, %v4396_v39  ;;  %v8803_v48 = vld [vmem:[#allocation22_spill] sm:$0xff] }
 0x731   :  { %v4892_v29 = vmax.f32 %v4799_v44, 0.0  ;;  %v8804_v44 = vld [vmem:[#allocation35_spill] sm:$0xff] }
 0x732   :  { %v4190_v42 = vadd.f32 %v8804_v44, %v8803_v48 }
 0x734   :  { %5090 = vmatmul.f32.gmra.mxu3 %v4892_v29  ;;  %v4399_v29 = vadd.f32 %v4398_v3, %v4190_v42  ;;  %v4404_v12 = vpop.f32.mrf.mxu0 }
 0x736   :  { %v4801_v27 = vpop.f32.mrf.mxu2  ;;  %v4608_v60 = vadd.f32 %v4607_v58, %v4399_v29 }
 0x737   :  { %v8265_v25 = vpop.f32.mrf.mxu3  ;;  %v4802_v34 = vadd.f32 %v4801_v27, %v4593_v15  ;;  %v4613_v15 = vpop.f32.mrf.mxu1 }
 0x739   :  { %v4893_v30 = vmax.f32 %v4802_v34, 0.0 }
 0x73c   :  { %5093 = vmatmul.f32.gmra.mxu3 %v4893_v30  ;;  %v4193_v30 = vadd.f32 %v8806_v9, %v8805_v32 }
 0x73e   :  { %v4804_v40 = vpop.f32.mrf.mxu2 }
 0x73f   :  { %v8269_v0 = vpop.f32.mrf.mxu3  ;;  %v4805_v57 = vadd.f32 %v4804_v40, %v4596_v56  ;;  %v4402_v56 = vadd.f32 %v4401_v62, %v4193_v30  ;;  %v4407_v40 = vpop.f32.mrf.mxu0 }
 0x740   :  { %v4616_v55 = vpop.f32.mrf.mxu1 }
 0x741   :  { %v4894_v16 = vmax.f32 %v4805_v57, 0.0  ;;  %v4611_v7 = vadd.f32 %v4610_v24, %v4402_v56  ;;  %v8811_v56 = vld [vmem:[#allocation27_spill] sm:$0xff] }
 0x744   :  { %5096 = vmatmul.f32.gmra.mxu3 %v4894_v16 }
 0x746   :  { %v4807_v51 = vpop.f32.mrf.mxu2 }
 0x747   :  { %v8273_v49 = vpop.f32.mrf.mxu3  ;;  %v4808_v26 = vadd.f32 %v4807_v51, %v4599_v37  ;;  %v4196_v37 = vadd.f32 %v7977_v6, %v8807_v14 }
 0x748   :  { %v4619_v47 = vpop.f32.mrf.mxu1 }
 0x749   :  { %v4895_v21 = vmax.f32 %v4808_v26, 0.0  ;;  %v4405_v26 = vadd.f32 %v4404_v12, %v4196_v37 }
 0x74b   :  { %v4614_v23 = vadd.f32 %v4613_v15, %v4405_v26 }
 0x74c   :  { %5099 = vmatmul.f32.gmra.mxu3 %v4895_v21  ;;  %v4410_v21 = vpop.f32.mrf.mxu0 }
 0x74e   :  { %v4810_v36 = vpop.f32.mrf.mxu2 }
 0x74f   :  { %v8277_v52 = vpop.f32.mrf.mxu3  ;;  %v4811_v17 = vadd.f32 %v4810_v36, %v4602_v31  ;;  %v8808_v36 = vld [vmem:[#allocation83_spill] sm:$0xff] }
 0x750   :  { %v4622_v44 = vpop.f32.mrf.mxu1 }
 0x751   :  { %v4896_v1 = vmax.f32 %v4811_v17, 0.0  ;;  %v4199_v17 = vadd.f32 %v7988_v20, %v8808_v36 }
 0x753   :  { %v4408_v6 = vadd.f32 %v4407_v40, %v4199_v17  ;;  %v4208_v40 = vadd.f32 %v8017_v4, %v8811_v56 }
 0x754   :  { %5102 = vmatmul.f32.gmra.mxu3 %v4896_v1 }
 0x755   :  { %v4617_v62 = vadd.f32 %v4616_v55, %v4408_v6 }
 0x756   :  { %v4813_v53 = vpop.f32.mrf.mxu2 }
 0x757   :  { %v5055_v59 = vpop.f32.mrf.mxu3  ;;  %v4814_v50 = vadd.f32 %v4813_v53, %v4605_v41  ;;  %v8809_v53 = vld [vmem:[#allocation87_spill] sm:$0xff] }
 0x758   :  { %v5056_v18 = vadd.f32 %v8040_v35, %v5055_v59  ;;  %v4202_v59 = vadd.f32 %v7998_v2, %v8809_v53  ;;  %v4625_v32 = vpop.f32.mrf.mxu1 }
 0x759   :  { %v4897_v28 = vmax.f32 %v4814_v50, 0.0  ;;  %v4413_v50 = vpop.f32.mrf.mxu0 }
 0x75a   :  { %v5173_v38 = vmax.f32 %v5056_v18, 0.0  ;;  %v4411_v20 = vadd.f32 %v4410_v21, %v4202_v59 }
 0x75c   :  { %5105 = vmatmul.f32.gmra.mxu3 %v4897_v28  ;;  %5275 = vrot.lane.b32.xlu1 %v5173_v38, %s5563_s8  ;;  %v4620_v42 = vadd.f32 %v4619_v47, %v4411_v20  ;;  %v8813_v47 = vld [vmem:[#allocation29_spill] sm:$0xff] }
 0x75e   :  { %v4816_v54 = vpop.f32.mrf.mxu2 }
 0x75f   :  { %v5058_v27 = vpop.f32.mrf.mxu3  ;;  %v4817_v34 = vadd.f32 %v4816_v54, %v4608_v60  ;;  %v8810_v60 = vld [vmem:[#allocation91_spill] sm:$0xff] }
 0x760   :  { %v5059_v35 = vadd.f32 %v8285_v19, %v5058_v27  ;;  %v4205_v15 = vadd.f32 %v8010_v11, %v8810_v60 }
 0x761   :  { %v4898_v22 = vmax.f32 %v4817_v34, 0.0  ;;  %v4416_v34 = vpop.f32.mrf.mxu0 }
 0x762   :  { %v5174_v61 = vmax.f32 %v5059_v35, 0.0  ;;  %v4414_v2 = vadd.f32 %v4413_v50, %v4205_v15  ;;  %v4417_v11 = vadd.f32 %v4416_v34, %v4208_v40 }
 0x764   :  { %5108 = vmatmul.f32.gmra.mxu3 %v4898_v22  ;;  %5277 = vrot.lane.b32.xlu2 %v5174_v61, %s5563_s8  ;;  %v4623_v35 = vadd.f32 %v4622_v44, %v4414_v2  ;;  %v4626_v55 = vadd.f32 %v4625_v32, %v4417_v11 }
 0x766   :  { %v4819_v57 = vpop.f32.mrf.mxu2 }
 0x767   :  { %v5061_v10 = vpop.f32.mrf.mxu3  ;;  %v4820_v13 = vadd.f32 %v4819_v57, %v4611_v7 }
 0x768   :  { %v5062_v16 = vadd.f32 %v8285_v19, %v5061_v10 }
 0x769   :  { %v4899_v51 = vmax.f32 %v4820_v13, 0.0  ;;  %v4419_v10 = vpop.f32.mrf.mxu0 }
 0x76a   :  { %v5175_v3 = vmax.f32 %v5062_v16, 0.0 }
 0x76c   :  { %5111 = vmatmul.f32.gmra.mxu3 %v4899_v51  ;;  %5279 = vrot.lane.b32.xlu0 %v5175_v3, %s5563_s8  ;;  %v4628_v51 = vpop.f32.mrf.mxu1  ;;  %v8812_v3 = vld [vmem:[#allocation28_spill] sm:$0xff] }
 0x76d   :  { %v4211_v26 = vadd.f32 %v8026_v63, %v8812_v3 }
 0x76e   :  { %v4822_v45 = vpop.f32.mrf.mxu2 }
 0x76f   :  { %v5064_v58 = vpop.f32.mrf.mxu3  ;;  %v4823_v46 = vadd.f32 %v4822_v45, %v4614_v23  ;;  %v4420_v4 = vadd.f32 %v4419_v10, %v4211_v26 }
 0x770   :  { %v5065_v31 = vadd.f32 %v8285_v19, %v5064_v58 }
 0x771   :  { %v4900_v5 = vmax.f32 %v4823_v46, 0.0  ;;  %v4629_v58 = vadd.f32 %v4628_v51, %v4420_v4  ;;  %v4422_v17 = vpop.f32.mrf.mxu0 }
 0x772   :  { %v5176_v43 = vmax.f32 %v5065_v31, 0.0 }
 0x774   :  { %5114 = vmatmul.f32.gmra.mxu3 %v4900_v5  ;;  %5281 = vrot.lane.b32.xlu1 %v5176_v43, %s5563_s8  ;;  %v4214_v5 = vadd.f32 %v8034_v33, %v8813_v47 }
 0x776   :  { %v4825_v1 = vpop.f32.mrf.mxu2  ;;  %v4423_v63 = vadd.f32 %v4422_v17, %v4214_v5 }
 0x777   :  { %v5067_v39 = vpop.f32.mrf.mxu3  ;;  %v4826_v24 = vadd.f32 %v4825_v1, %v4617_v62  ;;  %v4631_v62 = vpop.f32.mrf.mxu1 }
 0x778   :  { %v5068_v41 = vadd.f32 %v8285_v19, %v5067_v39  ;;  %v4632_v1 = vadd.f32 %v4631_v62, %v4423_v63 }
 0x779   :  { %v4901_v18 = vmax.f32 %v4826_v24, 0.0 }
 0x77a   :  { %v5177_v48 = vmax.f32 %v5068_v41, 0.0 }
 0x77c   :  { %5117 = vmatmul.f32.gmra.mxu3 %v4901_v18  ;;  %5283 = vrot.lane.b32.xlu2 %v5177_v48, %s5563_s8 }
 0x77e   :  { %v4828_v28 = vpop.f32.mrf.mxu2 }
 0x77f   :  { %v5070_v38 = vpop.f32.mrf.mxu3  ;;  %v4829_v29 = vadd.f32 %v4828_v28, %v4620_v42 }
 0x780   :  { %v5071_v12 = vadd.f32 %v8285_v19, %v5070_v38 }
 0x781   :  { %v4902_v54 = vmax.f32 %v4829_v29, 0.0 }
 0x782   :  { %v5178_v27 = vmax.f32 %v5071_v12, 0.0 }
 0x784   :  { %5120 = vmatmul.f32.gmra.mxu3 %v4902_v54  ;;  %5285 = vrot.lane.b32.xlu0 %v5178_v27, %s5563_s8 }
 0x786   :  { %v4831_v9 = vpop.f32.mrf.mxu2 }
 0x787   :  { %v5073_v30 = vpop.f32.mrf.mxu3  ;;  %v4832_v22 = vadd.f32 %v4831_v9, %v4623_v35 }
 0x788   :  { %v5074_v61 = vadd.f32 %v8285_v19, %v5073_v30 }
 0x789   :  { %v4903_v7 = vmax.f32 %v4832_v22, 0.0 }
 0x78a   :  { %v5179_v57 = vmax.f32 %v5074_v61, 0.0 }
 0x78c   :  { %5123 = vmatmul.f32.gmra.mxu3 %v4903_v7  ;;  %5287 = vrot.lane.b32.xlu1 %v5179_v57, %s5563_s8 }
 0x78e   :  { %v4834_v13 = vpop.f32.mrf.mxu2 }
 0x78f   :  { %v5076_v16 = vpop.f32.mrf.mxu3  ;;  %v4835_v14 = vadd.f32 %v4834_v13, %v4626_v55 }
 0x790   :  { %v5077_v37 = vadd.f32 %v8285_v19, %v5076_v16 }
 0x791   :  { %v4904_v23 = vmax.f32 %v4835_v14, 0.0 }
 0x792   :  { %v5180_v45 = vmax.f32 %v5077_v37, 0.0 }
 0x794   :  { %5126 = vmatmul.f32.gmra.mxu3 %v4904_v23  ;;  %5289 = vrot.lane.b32.xlu2 %v5180_v45, %s5563_s8 }
 0x796   :  { %v4837_v21 = vpop.f32.mrf.mxu2 }
 0x797   :  { %v5079_v46 = vpop.f32.mrf.mxu3  ;;  %v4838_v31 = vadd.f32 %v4837_v21, %v4629_v58 }
 0x798   :  { %v5080_v36 = vadd.f32 %v8285_v19, %v5079_v46  ;;  %v5053_v46 = vadd.f32 %v8285_v19, %v8277_v52 }
 0x799   :  { %v4905_v43 = vmax.f32 %v4838_v31, 0.0 }
 0x79a   :  { %v5181_v6 = vmax.f32 %v5080_v36, 0.0  ;;  %v5172_v47 = vmax.f32 %v5053_v46, 0.0  ;;  %v5564_v46 = vmov 0  }
 0x79b   :  { %5548 = vset.pattern.permute.xlu2 %v5564_v46  ;;  %5549 = vset.pattern.permute.xlu0 %v5564_v46 }
 0x79c   :  { %5129 = vmatmul.f32.gmra.mxu3 %v4905_v43  ;;  %5291 = vrot.lane.b32.xlu1 %v5181_v6, %s5563_s8 }
 0x79e   :  { %v4840_v39 = vpop.f32.mrf.mxu2 }
 0x79f   :  { %v5082_v24 = vpop.f32.mrf.mxu3  ;;  %v4841_v41 = vadd.f32 %v4840_v39, %v4632_v1 }
 0x7a0   :  { %v5083_v53 = vadd.f32 %v8285_v19, %v5082_v24 }
 0x7a1   :  { %v4906_v59 = vmax.f32 %v4841_v41, 0.0 }
 0x7a2   :  { %v5182_v50 = vmax.f32 %v5083_v53, 0.0 }
 0x7a4   :  { %5132 = vmatmul.f32.gmra.mxu3 %v4906_v59  ;;  %5293 = vrot.lane.b32.xlu0 %v5182_v50, %s5563_s8  ;;  %v5050_v50 = vadd.f32 %v8285_v19, %v8273_v49 }
 0x7a7   :  { %v5085_v18 = vpop.f32.mrf.mxu3 }
 0x7a8   :  { %v5086_v33 = vadd.f32 %v8285_v19, %v5085_v18 }
 0x7aa   :  { %v5183_v48 = vmax.f32 %v5086_v33, 0.0 }
 0x7ac   :  { %5295 = vrot.lane.b32.xlu0 %v5183_v48, %s5563_s8  ;;  %v5044_v48 = vadd.f32 %v8285_v19, %v8265_v25 }
 0x7af   :  { %v8323_v20 = vpop.f32.mrf.mxu3 }
 0x7b7   :  { %v8325_v44 = vpop.f32.mrf.mxu3 }
 0x7be   :  { %v5278_v42 = vpop.permute.xlu2 %5277 }
 0x7bf   :  { %5368 = vst.msk [vmem:[#allocation4 + $0x30] sm:$0xff] %vm5361_vm3, %v5278_v42  ;;  %v8328_v28 = vpop.f32.mrf.mxu3 }
 0x7c7   :  { %v8330_v38 = vpop.f32.mrf.mxu3 }
 0x7c8   :  { %v5098_v25 = vadd.f32 %v8285_v19, %v8330_v38 }
 0x7ce   :  { %v5276_v29 = vpop.permute.xlu1 %5275 }
 0x7cf   :  { %5367 = vst.msk [vmem:[#allocation4 + $0x28] sm:$0xff] %vm5361_vm3, %v5276_v29  ;;  %v5100_v12 = vpop.f32.mrf.mxu3  ;;  %v5171_v29 = vmax.f32 %v5050_v50, 0.0 }
 0x7d0   :  { %v5101_v62 = vadd.f32 %v8285_v19, %v5100_v12 }
 0x7d2   :  { %v5188_v53 = vmax.f32 %v5101_v62, 0.0 }
 0x7d6   :  { %v5284_v60 = vpop.permute.xlu2 %5283 }
 0x7d7   :  { %5371 = vst.msk [vmem:[#allocation4 + $0x48] sm:$0xff] %vm5361_vm3, %v5284_v60  ;;  %v8334_v15 = vpop.f32.mrf.mxu3 }
 0x7d8   :  { %v5104_v18 = vadd.f32 %v8285_v19, %v8334_v15  ;;  %v5047_v15 = vadd.f32 %v8285_v19, %v8269_v0  ;;  %v5041_v0 = vadd.f32 %v8285_v19, %v8261_v8 }
 0x7da   :  { %v5189_v12 = vmax.f32 %v5104_v18, 0.0  ;;  %v5168_v38 = vmax.f32 %v5041_v0, 0.0 }
 0x7de   :  { %v5280_v54 = vpop.permute.xlu0 %5279  ;;  %v5405_v60 = vld [vmem:[#allocation4 + $0x48] sm:$0xff] }
 0x7df   :  { %5369 = vst.msk [vmem:[#allocation4 + $0x38] sm:$0xff] %vm5361_vm3, %v5280_v54  ;;  %v5106_v27 = vpop.f32.mrf.mxu3  ;;  %v5169_v54 = vmax.f32 %v5044_v48, 0.0 }
 0x7e0   :  { %v5107_v43 = vadd.f32 %v8285_v19, %v5106_v27 }
 0x7e2   :  { %v5190_v39 = vmax.f32 %v5107_v43, 0.0 }
 0x7e6   :  { %v5282_v2 = vpop.permute.xlu1 %5281  ;;  %v5403_v27 = vld [vmem:[#allocation4 + $0x38] sm:$0xff] }
 0x7e7   :  { %5370 = vst.msk [vmem:[#allocation4 + $0x40] sm:$0xff] %vm5361_vm3, %v5282_v2  ;;  %v5109_v34 = vpop.f32.mrf.mxu3  ;;  %v5092_v2 = vadd.f32 %v8285_v19, %v8325_v44  ;;  %v5095_v44 = vadd.f32 %v8285_v19, %v8328_v28 }
 0x7e8   :  { %v5110_v35 = vadd.f32 %v8285_v19, %v5109_v34  ;;  %v5402_v34 = vld [vmem:[#allocation4 + $0x30] sm:$0xff] }
 0x7ea   :  { %v5191_v32 = vmax.f32 %v5110_v35, 0.0  ;;  %v5170_v35 = vmax.f32 %v5047_v15, 0.0 }
 0x7ec   :  { %5311 = vrot.lane.b32.xlu0 %v5191_v32, %s5563_s8  ;;  %v5187_v32 = vmax.f32 %v5098_v25, 0.0 }
 0x7ee   :  { %v5290_v9 = vpop.permute.xlu2 %5289  ;;  %v5404_v49 = vld [vmem:[#allocation4 + $0x40] sm:$0xff] }
 0x7ef   :  { %5374 = vst.msk [vmem:[#allocation4 + $0x60] sm:$0xff] %vm5361_vm3, %v5290_v9  ;;  %v5112_v30 = vpop.f32.mrf.mxu3  ;;  %v5401_v9 = vld [vmem:[#allocation4 + $0x28] sm:$0xff] }
 0x7f0   :  { %v5113_v22 = vadd.f32 %v8285_v19, %v5112_v30  ;;  %v5185_v30 = vmax.f32 %v5092_v2, 0.0 }
 0x7f2   :  { %v5192_v61 = vmax.f32 %v5113_v22, 0.0  ;;  %v5186_v22 = vmax.f32 %v5095_v44, 0.0 }
 0x7f4   :  { %5313 = vrot.lane.b32.xlu1 %v5192_v61, %s5563_s8  ;;  %v5089_v61 = vadd.f32 %v8285_v19, %v8323_v20 }
 0x7f6   :  { %v5286_v56 = vpop.permute.xlu0 %5285  ;;  %v5408_v59 = vld [vmem:[#allocation4 + $0x60] sm:$0xff] }
 0x7f7   :  { %5372 = vst.msk [vmem:[#allocation4 + $0x50] sm:$0xff] %vm5361_vm3, %v5286_v56  ;;  %v5115_v40 = vpop.f32.mrf.mxu3  ;;  %v5184_v56 = vmax.f32 %v5089_v61, 0.0 }
 0x7f8   :  { %v5116_v7 = vadd.f32 %v8285_v19, %v5115_v40 }
 0x7fa   :  { %v5193_v57 = vmax.f32 %v5116_v7, 0.0 }
 0x7fc   :  { %5315 = vrot.lane.b32.xlu2 %v5193_v57, %s5563_s8 }
 0x7fe   :  { %v5288_v11 = vpop.permute.xlu1 %5287  ;;  %v5406_v42 = vld [vmem:[#allocation4 + $0x50] sm:$0xff] }
 0x7ff   :  { %5373 = vst.msk [vmem:[#allocation4 + $0x58] sm:$0xff] %vm5361_vm3, %v5288_v11  ;;  %v5118_v10 = vpop.f32.mrf.mxu3 }
 0x800   :  { %v5119_v55 = vadd.f32 %v8285_v19, %v5118_v10 }
 0x802   :  { %v5194_v13 = vmax.f32 %v5119_v55, 0.0 }
 0x804   :  { %5317 = vrot.lane.b32.xlu0 %v5194_v13, %s5563_s8 }
 0x806   :  { %v5407_v33 = vld [vmem:[#allocation4 + $0x58] sm:$0xff] }
 0x807   :  { %v5121_v16 = vpop.f32.mrf.mxu3 }
 0x808   :  { %v5122_v14 = vadd.f32 %v8285_v19, %v5121_v16 }
 0x80a   :  { %v5195_v37 = vmax.f32 %v5122_v14, 0.0 }
 0x80c   :  { %5319 = vrot.lane.b32.xlu1 %v5195_v37, %s5563_s8 }
 0x80e   :  { %v5292_v51 = vpop.permute.xlu1 %5291 }
 0x80f   :  { %5375 = vst.msk [vmem:[#allocation4 + $0x68] sm:$0xff] %vm5361_vm3, %v5292_v51  ;;  %v5124_v3 = vpop.f32.mrf.mxu3 }
 0x810   :  { %v5125_v26 = vadd.f32 %v8285_v19, %v5124_v3 }
 0x812   :  { %v5196_v23 = vmax.f32 %v5125_v26, 0.0 }
 0x814   :  { %5321 = vrot.lane.b32.xlu2 %v5196_v23, %s5563_s8 }
 0x816   :  { %v5294_v45 = vpop.permute.xlu0 %5293  ;;  %v5409_v41 = vld [vmem:[#allocation4 + $0x68] sm:$0xff] }
 0x817   :  { %5376 = vst.msk [vmem:[#allocation4 + $0x70] sm:$0xff] %vm5361_vm3, %v5294_v45  ;;  %v5127_v4 = vpop.f32.mrf.mxu3 }
 0x818   :  { %v5128_v58 = vadd.f32 %v8285_v19, %v5127_v4 }
 0x81a   :  { %v5197_v21 = vmax.f32 %v5128_v58, 0.0 }
 0x81c   :  { %5323 = vrot.lane.b32.xlu0 %v5197_v21, %s5563_s8  ;;  %v5428_v21 = vld [vmem:[%s8438_s10] sm:$0xff] }
 0x81e   :  { %v5296_v31 = vpop.permute.xlu0 %5295  ;;  %v5410_v1 = vld [vmem:[#allocation4 + $0x70] sm:$0xff] }
 0x81f   :  { %5377 = vst.msk [vmem:[#allocation4 + $0x78] sm:$0xff] %vm5361_vm3, %v5296_v31  ;;  %v5130_v36 = vpop.f32.mrf.mxu3 }
 0x820   :  { %v5131_v17 = vadd.f32 %v8285_v19, %v5130_v36 }
 0x822   :  { %v5198_v5 = vmax.f32 %v5131_v17, 0.0 }
 0x824   :  { %5325 = vrot.lane.b32.xlu2 %v5198_v5, %s5563_s8  ;;  %5273 = vrot.lane.b32.xlu0 %v5172_v47, %s5563_s8 }
 0x826   :  { %v5411_v6 = vld [vmem:[#allocation4 + $0x78] sm:$0xff] }
 0x827   :  { %v5133_v63 = vpop.f32.mrf.mxu3  ;;  %5434 = vmatpush.msrb.mxu0 %v5411_v6 }
 0x828   :  { %v5134_v52 = vadd.f32 %v8285_v19, %v5133_v63 }
 0x829   :  { %5435 = vmatpush.msrb.mxu0 %v5410_v1 }
 0x82a   :  { %v5199_v24 = vmax.f32 %v5134_v52, 0.0 }
 0x82b   :  { %5436 = vmatpush.msrb.mxu0 %v5409_v41  ;;  %v5394_v41 = vld [vmem:[%s8439_s9] sm:$0xff] }
 0x82c   :  { %5309 = vrot.lane.b32.xlu2 %v5190_v39, %s5563_s8  ;;  %5327 = vrot.lane.b32.xlu1 %v5199_v24, %s5563_s8 }
 0x82d   :  { %5305 = vrot.lane.b32.xlu0 %v5188_v53, %s5563_s8  ;;  %5437 = vmatpush.msrb.mxu0 %v5408_v59 }
 0x82f   :  { %5438 = vmatpush.msrb.mxu0 %v5407_v33 }
 0x831   :  { %5439 = vmatpush.msrb.mxu0 %v5406_v42 }
 0x833   :  { %5440 = vmatpush.msrb.mxu0 %v5405_v60 }
 0x834   :  { %5307 = vrot.lane.b32.xlu1 %v5189_v12, %s5563_s8  ;;  %5271 = vrot.lane.b32.xlu2 %v5171_v29, %s5563_s8  ;;  %v5395_v29 = vld [vmem:[%s8439_s9 + $0x8] sm:$0xff] }
 0x835   :  { %5267 = vrot.lane.b32.xlu0 %v5169_v54, %s5563_s8  ;;  %5441 = vmatpush.msrb.mxu0 %v5404_v49 }
 0x837   :  { %5442 = vmatpush.msrb.mxu0 %v5403_v27 }
 0x839   :  { %5443 = vmatpush.msrb.mxu0 %v5402_v34 }
 0x83b   :  { %5444 = vmatpush.msrb.mxu0 %v5401_v9 }
 0x83c   :  { %5303 = vrot.lane.b32.xlu2 %v5187_v32, %s5563_s8  ;;  %5269 = vrot.lane.b32.xlu1 %v5170_v35, %s5563_s8 }
 0x83d   :  { %5299 = vrot.lane.b32.xlu0 %v5185_v30, %s5563_s8 }
 0x844   :  { %5301 = vrot.lane.b32.xlu1 %v5186_v22, %s5563_s8  ;;  %5265 = vrot.lane.b32.xlu2 %v5168_v38, %s5563_s8 }
 0x84c   :  { %5297 = vrot.lane.b32.xlu1 %v5184_v56, %s5563_s8  ;;  %5431 = vperm.xlu2 %5548, %v5428_v21  }
 0x856   :  { %v5316_v40 = vpop.permute.xlu2 %5315 }
 0x857   :  { %5387 = vst.msk [vmem:[#allocation4 + $0xc8] sm:$0xff] %vm5361_vm3, %v5316_v40 }
 0x85e   :  { %v5312_v7 = vpop.permute.xlu0 %5311  ;;  %v5421_v6 = vld [vmem:[#allocation4 + $0xc8] sm:$0xff] }
 0x85f   :  { %5385 = vst.msk [vmem:[#allocation4 + $0xb8] sm:$0xff] %vm5361_vm3, %v5312_v7 }
 0x866   :  { %v5314_v8 = vpop.permute.xlu1 %5313  ;;  %v5419_v1 = vld [vmem:[#allocation4 + $0xb8] sm:$0xff] }
 0x867   :  { %5386 = vst.msk [vmem:[#allocation4 + $0xc0] sm:$0xff] %vm5361_vm3, %v5314_v8 }
 0x86e   :  { %v5322_v28 = vpop.permute.xlu2 %5321  ;;  %v5420_v62 = vld [vmem:[#allocation4 + $0xc0] sm:$0xff] }
 0x86f   :  { %5390 = vst.msk [vmem:[#allocation4 + $0xe0] sm:$0xff] %vm5361_vm3, %v5322_v28 }
 0x876   :  { %v5318_v57 = vpop.permute.xlu0 %5317  ;;  %v5424_v36 = vld [vmem:[#allocation4 + $0xe0] sm:$0xff] }
 0x877   :  { %5388 = vst.msk [vmem:[#allocation4 + $0xd0] sm:$0xff] %vm5361_vm3, %v5318_v57 }
 0x87e   :  { %v5326_v11 = vpop.permute.xlu2 %5325  ;;  %v5320_v19 = vpop.permute.xlu1 %5319  ;;  %v5422_v43 = vld [vmem:[#allocation4 + $0xd0] sm:$0xff] }
 0x87f   :  { %5392 = vst.msk [vmem:[#allocation4 + $0xf0] sm:$0xff] %vm5361_vm3, %v5326_v11 }
 0x880   :  { %5389 = vst.msk [vmem:[#allocation4 + $0xd8] sm:$0xff] %vm5361_vm3, %v5320_v19 }
 0x886   :  { %v5310_v20 = vpop.permute.xlu2 %5309  ;;  %v5426_v58 = vld [vmem:[#allocation4 + $0xf0] sm:$0xff] }
 0x887   :  { %5384 = vst.msk [vmem:[#allocation4 + $0xb0] sm:$0xff] %vm5361_vm3, %v5310_v20  ;;  %v5423_v47 = vld [vmem:[#allocation4 + $0xd8] sm:$0xff] }
 0x88e   :  { %v5324_v10 = vpop.permute.xlu0 %5323  ;;  %v5272_v55 = vpop.permute.xlu2 %5271  ;;  %v5418_v24 = vld [vmem:[#allocation4 + $0xb0] sm:$0xff] }
 0x88f   :  { %5391 = vst.msk [vmem:[#allocation4 + $0xe8] sm:$0xff] %vm5361_vm3, %v5324_v10 }
 0x890   :  { %5365 = vst.msk [vmem:[#allocation4 + $0x18] sm:$0xff] %vm5361_vm3, %v5272_v55 }
 0x896   :  { %v5274_v13 = vpop.permute.xlu0 %5273  ;;  %v5304_v16 = vpop.permute.xlu2 %5303  ;;  %v5425_v31 = vld [vmem:[#allocation4 + $0xe8] sm:$0xff] }
 0x897   :  { %5366 = vst.msk [vmem:[#allocation4 + $0x20] sm:$0xff] %vm5361_vm3, %v5274_v13  ;;  %v5399_v26 = vld [vmem:[#allocation4 + $0x18] sm:$0xff] }
 0x898   :  { %5381 = vst.msk [vmem:[#allocation4 + $0x98] sm:$0xff] %vm5361_vm3, %v5304_v16 }
 0x89e   :  { %v5328_v14 = vpop.permute.xlu1 %5327  ;;  %v5266_v37 = vpop.permute.xlu2 %5265  ;;  %v5400_v51 = vld [vmem:[#allocation4 + $0x20] sm:$0xff] }
 0x89f   :  { %5393 = vst.msk [vmem:[#allocation4 + $0xf8] sm:$0xff] %vm5361_vm3, %v5328_v14  ;;  %v5306_v3 = vpop.permute.xlu0 %5305  ;;  %5445 = vmatpush.msrb.mxu0 %v5400_v51  ;;  %v5415_v33 = vld [vmem:[#allocation4 + $0x98] sm:$0xff] }
 0x8a0   :  { %5382 = vst.msk [vmem:[#allocation4 + $0xa0] sm:$0xff] %vm5361_vm3, %v5306_v3 }
 0x8a1   :  { %5362 = vst.msk [vmem:[#allocation4] sm:$0xff] %vm5361_vm3, %v5266_v37  ;;  %5446 = vmatpush.msrb.mxu0 %v5399_v26 }
 0x8a6   :  { %v5308_v23 = vpop.permute.xlu1 %5307  ;;  %v5427_v45 = vld [vmem:[#allocation4 + $0xf8] sm:$0xff]  ;;  %v5432_v60 = vpop.permute.xlu2 %5431 }
 0x8a7   :  { %5383 = vst.msk [vmem:[#allocation4 + $0xa8] sm:$0xff] %vm5361_vm3, %v5308_v23  ;;  %v5268_v4 = vpop.permute.xlu0 %5267  ;;  %5454 = vmatpush.msrb.mxu1 %v5427_v45  ;;  %v5416_v50 = vld [vmem:[#allocation4 + $0xa0] sm:$0xff] }
 0x8a8   :  { %5363 = vst.msk [vmem:[#allocation4 + $0x8] sm:$0xff] %vm5361_vm3, %v5268_v4  ;;  %v5396_v53 = vld [vmem:[#allocation4] sm:$0xff] }
 0x8a9   :  { %5455 = vmatpush.msrb.mxu1 %v5426_v58 }
 0x8ab   :  { %5456 = vmatpush.msrb.mxu1 %v5425_v31 }
 0x8ad   :  { %5457 = vmatpush.msrb.mxu1 %v5424_v36 }
 0x8ae   :  { %v5270_v17 = vpop.permute.xlu1 %5269  ;;  %v5417_v59 = vld [vmem:[#allocation4 + $0xa8] sm:$0xff] }
 0x8af   :  { %5364 = vst.msk [vmem:[#allocation4 + $0x10] sm:$0xff] %vm5361_vm3, %v5270_v17  ;;  %v5300_v5 = vpop.permute.xlu0 %5299  ;;  %5458 = vmatpush.msrb.mxu1 %v5423_v47  ;;  %v5397_v39 = vld [vmem:[#allocation4 + $0x8] sm:$0xff] }
 0x8b0   :  { %5379 = vst.msk [vmem:[#allocation4 + $0x88] sm:$0xff] %vm5361_vm3, %v5300_v5 }
 0x8b1   :  { %5459 = vmatpush.msrb.mxu1 %v5422_v43 }
 0x8b3   :  { %5460 = vmatpush.msrb.mxu1 %v5421_v6 }
 0x8b5   :  { %5461 = vmatpush.msrb.mxu1 %v5420_v62 }
 0x8b6   :  { %v5302_v63 = vpop.permute.xlu1 %5301  ;;  %v5398_v52 = vld [vmem:[#allocation4 + $0x10] sm:$0xff] }
 0x8b7   :  { %5380 = vst.msk [vmem:[#allocation4 + $0x90] sm:$0xff] %vm5361_vm3, %v5302_v63  ;;  %5447 = vmatpush.msrb.mxu0 %v5398_v52  ;;  %5462 = vmatpush.msrb.mxu1 %v5419_v1  ;;  %v5413_v42 = vld [vmem:[#allocation4 + $0x88] sm:$0xff] }
 0x8b9   :  { %5448 = vmatpush.msrb.mxu0 %v5397_v39  ;;  %5463 = vmatpush.msrb.mxu1 %v5418_v24 }
 0x8bb   :  { %5449 = vmatpush.msrb.mxu0 %v5396_v53  ;;  %5464 = vmatpush.msrb.mxu1 %v5417_v59 }
 0x8bc   :  { %5450 = vmatmul.f32.vlgmr.msrb.gmra.mxu0 %v5394_v41 }
 0x8bd   :  { %5465 = vmatpush.msrb.mxu1 %v5416_v50 }
 0x8be   :  { %v5298_v18 = vpop.permute.xlu1 %5297  ;;  %v5414_v48 = vld [vmem:[#allocation4 + $0x90] sm:$0xff] }
 0x8bf   :  { %5378 = vst.msk [vmem:[#allocation4 + $0x80] sm:$0xff] %vm5361_vm3, %v5298_v18  ;;  %5466 = vmatpush.msrb.mxu1 %v5415_v33 }
 0x8c1   :  { %5467 = vmatpush.msrb.mxu1 %v5414_v48 }
 0x8c3   :  { %5468 = vmatpush.msrb.mxu1 %v5413_v42 }
 0x8c6   :  { %v5412_v12 = vld [vmem:[#allocation4 + $0x80] sm:$0xff] }
 0x8c7   :  { %5469 = vmatpush.msrb.mxu1 %v5412_v12 }
 0x8c8   :  { %5470 = vmatmul.f32.vlgmr.msrb.gmra.mxu1 %v5395_v29 }
 0x939   :  { %v5451_v54 = vpop.f32.mrf.mxu0 }
 0x93a   :  { %v5452_v49 = vadd.f32 %v5451_v54, %v5432_v60 }
 0x945   :  { %v5471_v15 = vpop.f32.mrf.mxu1 }
 0x946   :  { %v5472_v25 = vadd.f32 %v5471_v15, %v5452_v49 }
 0x948   :  { %5475 = vst.msk [vmem:[%s8440_s11] sm:$0xff] %vm5474_vm4, %v5472_v25 }

</bundles_post_ra>
